<compile_context>
chip_gen: v5e
topology: v5e:2x2
jax: 0.10.0
libtpu: 0.0.40
codegen_flags: <defaults>
</compile_context>

<pallas_src>
import math

import jax
import jax.numpy as jnp
from jax import lax
from jax.experimental import pallas as pl
from jax.experimental.pallas import tpu as pltpu

_ECA_OFF = 128   # lane-aligned offset of the pooled vector inside the ECA pad scratch


def eca_bottleneck_kernel(x_ref,                    # VMEM (1,HW,Cin) f32 input block
                          w1_ref, w2_ref, w3_ref,   # bf16 weights: (Cin,P), (3,3P,P), (P,C4)
                          sb12_ref,                 # f32 (4,P): rows = s1,b1,s2,b2
                          sb3_ref,                  # f32 (2,C4): rows = s3,b3
                          wk_ref,                   # SMEM (k,) f32 ECA conv taps
                          out_ref,                  # VMEM (1,HW,C4) bf16
                          pad_ref,                  # scratch (H+2, Wpad, P) bf16
                          ypad_ref):                # scratch (1, Cpad) f32 for the ECA taps
    P = w1_ref.shape[1]
    C4 = w3_ref.shape[1]
    HW = x_ref.shape[1]
    H = pad_ref.shape[0] - 2
    W = HW // H
    k = wk_ref.shape[0]
    kpad = (k - 1) // 2

    x = x_ref[0]                                                    # (HW, Cin) f32 residual
    xb = x.astype(jnp.bfloat16)                                     # in-kernel cast for the MXU

    # ---- conv1 (1x1) + bn1 + relu (bf16 operands, f32 accumulate/epilogue) ----
    o1 = jnp.dot(xb, w1_ref[...], preferred_element_type=jnp.float32)
    o1 = jnp.maximum(o1 * sb12_ref[pl.ds(0, 1), :] + sb12_ref[pl.ds(1, 1), :], 0.0)

    # ---- conv2 (3x3, stride 1, pad 1) + bn2 + relu ----
    # Only the 1-pixel border + interior are written each step (megacore-safe, no full sweep).
    zr = jnp.zeros((1, W + 2, P), pad_ref.dtype)
    zc = jnp.zeros((H, 1, P), pad_ref.dtype)
    pad_ref[pl.ds(0, 1), pl.ds(0, W + 2), :] = zr                   # top border row
    pad_ref[pl.ds(H + 1, 1), pl.ds(0, W + 2), :] = zr               # bottom border row
    pad_ref[pl.ds(1, H), pl.ds(0, 1), :] = zc                       # left border col
    pad_ref[pl.ds(1, H), pl.ds(W + 1, 1), :] = zc                   # right border col
    pad_ref[pl.ds(1, H), pl.ds(1, W), :] = o1.reshape(H, W, P).astype(pad_ref.dtype)

    # kw folded into the contraction: per kh one (HW, 3P) x (3P, P) matmul, f32 accumulator
    # initialised from the kh=0 result (no zeros+add).
    acc = None
    for kh in range(3):
        parts = [pad_ref[pl.ds(kh, H), pl.ds(kw, W), :] for kw in range(3)]
        patch = jnp.concatenate(parts, axis=-1).reshape(HW, 3 * P)  # (HW, 3P) bf16
        contrib = jnp.dot(patch, w2_ref[kh], preferred_element_type=jnp.float32)
        acc = contrib if acc is None else acc + contrib
    o2 = jnp.maximum(acc * sb12_ref[pl.ds(2, 1), :] + sb12_ref[pl.ds(3, 1), :], 0.0)

    # ---- conv3 (1x1) + bn3 ----
    o3 = jnp.dot(o2.astype(jnp.bfloat16), w3_ref[...],
                 preferred_element_type=jnp.float32)
    o3 = o3 * sb3_ref[pl.ds(0, 1), :] + sb3_ref[pl.ds(1, 1), :]     # (HW, C4) f32

    # ---- ECA: global average pool -> k lane-shifted FMAs (1D channel conv) -> sigmoid ----
    y = jnp.mean(o3, axis=0, keepdims=True)                         # (1, C4) f32
    ypad_ref[...] = jnp.zeros(ypad_ref.shape, ypad_ref.dtype)       # tiny (1, Cpad) zero fill
    ypad_ref[:, pl.ds(_ECA_OFF, C4)] = y                            # lane-aligned placement
    yc = wk_ref[0] * ypad_ref[:, pl.ds(_ECA_OFF - kpad, C4)]
    for j in range(1, k):
        yc = yc + wk_ref[j] * ypad_ref[:, pl.ds(_ECA_OFF - kpad + j, C4)]
    attn = jax.nn.sigmoid(yc)                                       # (1, C4) f32

    # ---- gate, identity residual (f32), relu, bf16 store ----
    out_ref[0] = jnp.maximum(o3 * attn + x, 0.0).astype(out_ref.dtype)


def eca_bottleneck(x_nhwc, p):
    """x_nhwc: (N, H, W, Cin) float32.  Returns (N, H, W, C4) bfloat16."""
    N, H, W, Cin = x_nhwc.shape
    P = p["w1"].shape[1]
    C4 = p["w3"].shape[1]
    k = p["wk"].shape[0]
    kpad = (k - 1) // 2
    assert Cin == C4, "identity residual requires inplanes == planes * expansion"
    assert W % 8 == 0, "W must be a multiple of 8 (copy-free reshapes)"
    assert P % 128 == 0 and C4 % 128 == 0, "lane-dense channel widths required (review item 5)"
    HW = H * W
    Wpad = ((W + 2 + 7) // 8) * 8                        # sublane-aligned scratch width
    Cpad = ((_ECA_OFF + C4 + 128 + 127) // 128) * 128    # ECA pad row (zeros around y)

    # Input stays f32 (no host-side cast pass); weights are bf16 MXU operands.
    x_flat = x_nhwc.reshape(N, HW, Cin)
    w1 = p["w1"].astype(jnp.bfloat16)
    w2 = p["w2"].reshape(3, 3 * P, P).astype(jnp.bfloat16)          # (kh, kw*Cin, Cout)
    w3 = p["w3"].astype(jnp.bfloat16)
    sb12 = jnp.concatenate([p["s1"], p["b1"], p["s2"], p["b2"]], axis=0).astype(jnp.float32)
    sb3 = jnp.concatenate([p["s3"], p["b3"]], axis=0).astype(jnp.float32)
    wk = p["wk"].astype(jnp.float32)                                # (k,) taps -> SMEM

    # Generation-aware VMEM limit (~65% of physical; safe on v7x's 64 MiB parts).
    try:
        vmem_cap = int(pltpu.get_tpu_info().vmem_capacity_bytes)
    except Exception:
        vmem_cap = 64 * 1024 * 1024
    if vmem_cap <= 0:
        vmem_cap = 64 * 1024 * 1024
    vmem_limit = int(0.65 * vmem_cap)

    out = pl.pallas_call(
        eca_bottleneck_kernel,
        out_shape=jax.ShapeDtypeStruct((N, HW, C4), jnp.bfloat16),
        grid=(N,),
        in_specs=[
            pl.BlockSpec((1, HW, Cin), lambda n: (n, 0, 0)),        # x (f32)
            pl.BlockSpec((Cin, P), lambda n: (0, 0)),               # w1
            pl.BlockSpec((3, 3 * P, P), lambda n: (0, 0, 0)),       # w2 (kh, 3P, P)
            pl.BlockSpec((P, C4), lambda n: (0, 0)),                # w3
            pl.BlockSpec((4, P), lambda n: (0, 0)),                 # packed s1,b1,s2,b2
            pl.BlockSpec((2, C4), lambda n: (0, 0)),                # packed s3,b3
            pl.BlockSpec(memory_space=pltpu.MemorySpace.SMEM),      # wk scalars
        ],
        out_specs=pl.BlockSpec((1, HW, C4), lambda n: (n, 0, 0)),
        scratch_shapes=[
            pltpu.VMEM((H + 2, Wpad, P), jnp.bfloat16),             # conv2 padded plane
            pltpu.VMEM((1, Cpad), jnp.float32),                     # ECA zero-padded pooled row
        ],
        compiler_params=pltpu.CompilerParams(
            dimension_semantics=("parallel",),
            vmem_limit_bytes=vmem_limit),
    )(x_flat, w1, w2, w3, sb12, sb3, wk)

    return out.reshape(N, H, W, C4)


def make_params(key, inplanes, planes, gamma=2, b=1, eps=1e-5):
    """Deterministic synthetic parameters; BN folded into (scale, bias) for eval mode."""
    expansion = 4
    C4 = planes * expansion
    t = int(abs((math.log(C4, 2) + b) / gamma))
    k = t if t % 2 else t + 1
    keys = jax.random.split(key, 16)

    def folded_bn(k1, k2, k3, k4, c):
        g = jax.random.uniform(k1, (c,), minval=0.5, maxval=1.5)
        beta = 0.1 * jax.random.normal(k2, (c,))
        mean = 0.1 * jax.random.normal(k3, (c,))
        var = jax.random.uniform(k4, (c,), minval=0.5, maxval=1.5)
        scale = g * lax.rsqrt(var + eps)
        bias = beta - mean * scale
        return (scale.reshape(1, c).astype(jnp.float32),
                bias.reshape(1, c).astype(jnp.float32))

    w1 = (0.1 * jax.random.normal(keys[0], (inplanes, planes))).astype(jnp.float32)
    w2 = (0.1 * jax.random.normal(keys[1], (3, 3, planes, planes))).astype(jnp.float32)  # HWIO
    w3 = (0.1 * jax.random.normal(keys[2], (planes, C4))).astype(jnp.float32)
    wk = (0.5 * jax.random.normal(keys[3], (k,))).astype(jnp.float32)
    s1, b1 = folded_bn(keys[4], keys[5], keys[6], keys[7], planes)
    s2, b2 = folded_bn(keys[8], keys[9], keys[10], keys[11], planes)
    s3, b3 = folded_bn(keys[12], keys[13], keys[14], keys[15], C4)
    return dict(w1=w1, s1=s1, b1=b1, w2=w2, s2=s2, b2=b2,
                w3=w3, s3=s3, b3=b3, wk=wk)


def reference(x_nhwc, p):
    """Pure-JAX (XLA) reference mirroring the kernel's bf16-operand / f32-accumulate precision."""
    bq = lambda a: a.astype(jnp.bfloat16).astype(jnp.float32)
    N, H, W, Cin = x_nhwc.shape
    P = p["w1"].shape[1]
    C4 = p["w3"].shape[1]
    k = p["wk"].shape[0]
    kpad = (k - 1) // 2
    dn = ("NHWC", "HWIO", "NHWC")

    o = lax.conv_general_dilated(bq(x_nhwc), bq(p["w1"]).reshape(1, 1, Cin, P),
                                 (1, 1), "VALID", dimension_numbers=dn)
    o = jnp.maximum(o * p["s1"] + p["b1"], 0.0)
    o = lax.conv_general_dilated(bq(o), bq(p["w2"]), (1, 1), "SAME",
                                 dimension_numbers=dn)
    o = jnp.maximum(o * p["s2"] + p["b2"], 0.0)
    o = lax.conv_general_dilated(bq(o), bq(p["w3"]).reshape(1, 1, P, C4),
                                 (1, 1), "VALID", dimension_numbers=dn)
    o = o * p["s3"] + p["b3"]

    y = jnp.mean(o, axis=(1, 2))                                    # (N, C4) f32
    ypad = jnp.pad(y, ((0, 0), (kpad, kpad)))
    yc = sum(p["wk"][j] * ypad[:, j:j + C4] for j in range(k))
    attn = jax.nn.sigmoid(yc)[:, None, None, :]
    return jnp.maximum(o * attn + x_nhwc, 0.0)                      # residual in f32


if __name__ == "__main__":
    N, H, W = 2, 16, 16
    planes = 128                     # lane-dense widths: P=128, 3P=384, C4=512 (review item 5)
    inplanes = planes * 4            # identity residual path (downsample=None, stride=1)

    key = jax.random.PRNGKey(0)
    kx, kp = jax.random.split(key)
    x = jax.random.normal(kx, (N, H, W, inplanes), dtype=jnp.float32)
    params = make_params(kp, inplanes, planes)

    out = jax.block_until_ready(eca_bottleneck(x, params))
    ref = jax.block_until_ready(reference(x, params))

    assert out.shape == (N, H, W, planes * 4)
    err = float(jnp.max(jnp.abs(out.astype(jnp.float32) - ref) / (1.0 + jnp.abs(ref))))
    if err > 1.5e-2:   # bf16 output rounding (~2^-9 rel) + bf16-operand matmul order noise
        raise AssertionError(f"mismatch vs reference: max rel err {err}")

    print("KERNEL_OK")
</pallas_src>

<mosaic_0001>
module attributes {stable_mosaic.version = 11 : i64} {
  func.func @eca_bottleneck_kernel(%arg0: i32, %arg1: memref<1x256x512xf32, #tpu.memory_space<vmem>>, %arg2: memref<512x128xbf16, #tpu.memory_space<vmem>>, %arg3: memref<3x384x128xbf16, #tpu.memory_space<vmem>>, %arg4: memref<128x512xbf16, #tpu.memory_space<vmem>>, %arg5: memref<4x128xf32, #tpu.memory_space<vmem>>, %arg6: memref<2x512xf32, #tpu.memory_space<vmem>>, %arg7: memref<5xf32, #tpu.memory_space<smem>>, %arg8: memref<1x256x512xbf16, #tpu.memory_space<vmem>>, %arg9: memref<18x24x128xbf16, #tpu.memory_space<vmem>>, %arg10: memref<1x768xf32, #tpu.memory_space<vmem>>) attributes {dimension_semantics = [#tpu.dimension_semantics<parallel>], iteration_bounds = array<i64: 2>, scalar_prefetch = 0 : i64, scratch_operands = 2 : i64, tpu.core_type = #tpu.core_type<tc>, window_params = [{transform_indices = @transform_0, window_bounds = array<i64: 1, 256, 512>}, {pipeline_mode = #tpu.pipeline_mode<synchronous>, transform_indices = @transform_1, window_bounds = array<i64: 512, 128>}, {pipeline_mode = #tpu.pipeline_mode<synchronous>, transform_indices = @transform_2, window_bounds = array<i64: 3, 384, 128>}, {pipeline_mode = #tpu.pipeline_mode<synchronous>, transform_indices = @transform_3, window_bounds = array<i64: 128, 512>}, {pipeline_mode = #tpu.pipeline_mode<synchronous>, transform_indices = @transform_4, window_bounds = array<i64: 4, 128>}, {pipeline_mode = #tpu.pipeline_mode<synchronous>, transform_indices = @transform_5, window_bounds = array<i64: 2, 512>}, {transform_indices = @transform_6, window_bounds = array<i64: 5>}, {transform_indices = @transform_7, window_bounds = array<i64: 1, 256, 512>}]} {
    %c0 = arith.constant 0 : index
    %c0_0 = arith.constant 0 : index
    %c0_1 = arith.constant 0 : index
    %0 = vector.load %arg1[%c0, %c0_0, %c0_1] : memref<1x256x512xf32, #tpu.memory_space<vmem>>, vector<1x256x512xf32>
    %1 = vector.shape_cast %0 : vector<1x256x512xf32> to vector<256x512xf32>
    %2 = arith.truncf %1 : vector<256x512xf32> to vector<256x512xbf16>
    %c0_2 = arith.constant 0 : index
    %c0_3 = arith.constant 0 : index
    %3 = vector.load %arg2[%c0_2, %c0_3] : memref<512x128xbf16, #tpu.memory_space<vmem>>, vector<512x128xbf16>
    %cst = arith.constant dense<0.000000e+00> : vector<256x128xf32>
    %4 = tpu.matmul %2, %3, %cst {dimension_numbers = #tpu.dot_dimension_numbers<[1], [0], [0], [1], [0, 0, 1, 1], [], []>} : vector<256x512xbf16>, vector<512x128xbf16>, vector<256x128xf32> -> vector<256x128xf32>
    %c0_4 = arith.constant 0 : index
    %c0_5 = arith.constant 0 : index
    %5 = vector.load %arg5[%c0_4, %c0_5] : memref<4x128xf32, #tpu.memory_space<vmem>>, vector<1x128xf32>
    %6 = vector.broadcast %5 : vector<1x128xf32> to vector<256x128xf32>
    %7 = arith.mulf %4, %6 : vector<256x128xf32>
    %c1 = arith.constant 1 : index
    %c0_6 = arith.constant 0 : index
    %8 = vector.load %arg5[%c1, %c0_6] : memref<4x128xf32, #tpu.memory_space<vmem>>, vector<1x128xf32>
    %9 = vector.broadcast %8 : vector<1x128xf32> to vector<256x128xf32>
    %10 = arith.addf %7, %9 : vector<256x128xf32>
    %cst_7 = arith.constant 0.000000e+00 : f32
    %11 = vector.broadcast %cst_7 : f32 to vector<256x128xf32>
    %12 = arith.maximumf %10, %11 : vector<256x128xf32>
    %cst_8 = arith.constant 0.000000e+00 : bf16
    %13 = vector.broadcast %cst_8 : bf16 to vector<1x18x128xbf16>
    %cst_9 = arith.constant 0.000000e+00 : bf16
    %14 = vector.broadcast %cst_9 : bf16 to vector<16x1x128xbf16>
    %c0_10 = arith.constant 0 : index
    %c0_11 = arith.constant 0 : index
    %c0_12 = arith.constant 0 : index
    %15 = vector.load %arg9[%c0_10, %c0_11, %c0_12] : memref<18x24x128xbf16, #tpu.memory_space<vmem>>, vector<1x18x128xbf16>
    tpu.vector_store %arg9[%c0_10, %c0_11, %c0_12], %13 {strides = array<i32>} : memref<18x24x128xbf16, #tpu.memory_space<vmem>>, vector<1x18x128xbf16>,
    %c17 = arith.constant 17 : index
    %c0_13 = arith.constant 0 : index
    %c0_14 = arith.constant 0 : index
    %16 = vector.load %arg9[%c17, %c0_13, %c0_14] : memref<18x24x128xbf16, #tpu.memory_space<vmem>>, vector<1x18x128xbf16>
    tpu.vector_store %arg9[%c17, %c0_13, %c0_14], %13 {strides = array<i32>} : memref<18x24x128xbf16, #tpu.memory_space<vmem>>, vector<1x18x128xbf16>,
    %c1_15 = arith.constant 1 : index
    %c0_16 = arith.constant 0 : index
    %c0_17 = arith.constant 0 : index
    %17 = vector.load %arg9[%c1_15, %c0_16, %c0_17] : memref<18x24x128xbf16, #tpu.memory_space<vmem>>, vector<16x1x128xbf16>
    tpu.vector_store %arg9[%c1_15, %c0_16, %c0_17], %14 {strides = array<i32>} : memref<18x24x128xbf16, #tpu.memory_space<vmem>>, vector<16x1x128xbf16>,
    %c1_18 = arith.constant 1 : index
    %c17_19 = arith.constant 17 : index
    %c0_20 = arith.constant 0 : index
    %18 = vector.load %arg9[%c1_18, %c17_19, %c0_20] : memref<18x24x128xbf16, #tpu.memory_space<vmem>>, vector<16x1x128xbf16>
    tpu.vector_store %arg9[%c1_18, %c17_19, %c0_20], %14 {strides = array<i32>} : memref<18x24x128xbf16, #tpu.memory_space<vmem>>, vector<16x1x128xbf16>,
    %19 = vector.shape_cast %12 : vector<256x128xf32> to vector<16x16x128xf32>
    %20 = arith.truncf %19 : vector<16x16x128xf32> to vector<16x16x128xbf16>
    %c1_21 = arith.constant 1 : index
    %c1_22 = arith.constant 1 : index
    %c0_23 = arith.constant 0 : index
    %21 = vector.load %arg9[%c1_21, %c1_22, %c0_23] : memref<18x24x128xbf16, #tpu.memory_space<vmem>>, vector<16x16x128xbf16>
    tpu.vector_store %arg9[%c1_21, %c1_22, %c0_23], %20 {strides = array<i32>} : memref<18x24x128xbf16, #tpu.memory_space<vmem>>, vector<16x16x128xbf16>,
    %c0_24 = arith.constant 0 : index
    %c0_25 = arith.constant 0 : index
    %c0_26 = arith.constant 0 : index
    %22 = vector.load %arg9[%c0_24, %c0_25, %c0_26] : memref<18x24x128xbf16, #tpu.memory_space<vmem>>, vector<16x16x128xbf16>
    %c0_27 = arith.constant 0 : index
    %c1_28 = arith.constant 1 : index
    %c0_29 = arith.constant 0 : index
    %23 = vector.load %arg9[%c0_27, %c1_28, %c0_29] : memref<18x24x128xbf16, #tpu.memory_space<vmem>>, vector<16x16x128xbf16>
    %c0_30 = arith.constant 0 : index
    %c2 = arith.constant 2 : index
    %c0_31 = arith.constant 0 : index
    %24 = vector.load %arg9[%c0_30, %c2, %c0_31] : memref<18x24x128xbf16, #tpu.memory_space<vmem>>, vector<16x16x128xbf16>
    %25 = tpu.concatenate %22, %23, %24 in 2 : vector<16x16x128xbf16>, vector<16x16x128xbf16>, vector<16x16x128xbf16> -> vector<16x16x384xbf16>
    %26 = vector.shape_cast %25 : vector<16x16x384xbf16> to vector<256x384xbf16>
    %c0_32 = arith.constant 0 : index
    %c0_33 = arith.constant 0 : index
    %c0_34 = arith.constant 0 : index
    %27 = vector.load %arg3[%c0_32, %c0_33, %c0_34] : memref<3x384x128xbf16, #tpu.memory_space<vmem>>, vector<1x384x128xbf16>
    %28 = vector.shape_cast %27 : vector<1x384x128xbf16> to vector<384x128xbf16>
    %cst_35 = arith.constant dense<0.000000e+00> : vector<256x128xf32>
    %29 = tpu.matmul %26, %28, %cst_35 {dimension_numbers = #tpu.dot_dimension_numbers<[1], [0], [0], [1], [0, 0, 1, 1], [], []>} : vector<256x384xbf16>, vector<384x128xbf16>, vector<256x128xf32> -> vector<256x128xf32>
    %c1_36 = arith.constant 1 : index
    %c0_37 = arith.constant 0 : index
    %c0_38 = arith.constant 0 : index
    %30 = vector.load %arg9[%c1_36, %c0_37, %c0_38] : memref<18x24x128xbf16, #tpu.memory_space<vmem>>, vector<16x16x128xbf16>
    %c1_39 = arith.constant 1 : index
    %c1_40 = arith.constant 1 : index
    %c0_41 = arith.constant 0 : index
    %31 = vector.load %arg9[%c1_39, %c1_40, %c0_41] : memref<18x24x128xbf16, #tpu.memory_space<vmem>>, vector<16x16x128xbf16>
    %c1_42 = arith.constant 1 : index
    %c2_43 = arith.constant 2 : index
    %c0_44 = arith.constant 0 : index
    %32 = vector.load %arg9[%c1_42, %c2_43, %c0_44] : memref<18x24x128xbf16, #tpu.memory_space<vmem>>, vector<16x16x128xbf16>
    %33 = tpu.concatenate %30, %31, %32 in 2 : vector<16x16x128xbf16>, vector<16x16x128xbf16>, vector<16x16x128xbf16> -> vector<16x16x384xbf16>
    %34 = vector.shape_cast %33 : vector<16x16x384xbf16> to vector<256x384xbf16>
    %c1_45 = arith.constant 1 : index
    %c0_46 = arith.constant 0 : index
    %c0_47 = arith.constant 0 : index
    %35 = vector.load %arg3[%c1_45, %c0_46, %c0_47] : memref<3x384x128xbf16, #tpu.memory_space<vmem>>, vector<1x384x128xbf16>
    %36 = vector.shape_cast %35 : vector<1x384x128xbf16> to vector<384x128xbf16>
    %cst_48 = arith.constant dense<0.000000e+00> : vector<256x128xf32>
    %37 = tpu.matmul %34, %36, %cst_48 {dimension_numbers = #tpu.dot_dimension_numbers<[1], [0], [0], [1], [0, 0, 1, 1], [], []>} : vector<256x384xbf16>, vector<384x128xbf16>, vector<256x128xf32> -> vector<256x128xf32>
    %38 = arith.addf %29, %37 : vector<256x128xf32>
    %c2_49 = arith.constant 2 : index
    %c0_50 = arith.constant 0 : index
    %c0_51 = arith.constant 0 : index
    %39 = vector.load %arg9[%c2_49, %c0_50, %c0_51] : memref<18x24x128xbf16, #tpu.memory_space<vmem>>, vector<16x16x128xbf16>
    %c2_52 = arith.constant 2 : index
    %c1_53 = arith.constant 1 : index
    %c0_54 = arith.constant 0 : index
    %40 = vector.load %arg9[%c2_52, %c1_53, %c0_54] : memref<18x24x128xbf16, #tpu.memory_space<vmem>>, vector<16x16x128xbf16>
    %c2_55 = arith.constant 2 : index
    %c2_56 = arith.constant 2 : index
    %c0_57 = arith.constant 0 : index
    %41 = vector.load %arg9[%c2_55, %c2_56, %c0_57] : memref<18x24x128xbf16, #tpu.memory_space<vmem>>, vector<16x16x128xbf16>
    %42 = tpu.concatenate %39, %40, %41 in 2 : vector<16x16x128xbf16>, vector<16x16x128xbf16>, vector<16x16x128xbf16> -> vector<16x16x384xbf16>
    %43 = vector.shape_cast %42 : vector<16x16x384xbf16> to vector<256x384xbf16>
    %c2_58 = arith.constant 2 : index
    %c0_59 = arith.constant 0 : index
    %c0_60 = arith.constant 0 : index
    %44 = vector.load %arg3[%c2_58, %c0_59, %c0_60] : memref<3x384x128xbf16, #tpu.memory_space<vmem>>, vector<1x384x128xbf16>
    %45 = vector.shape_cast %44 : vector<1x384x128xbf16> to vector<384x128xbf16>
    %cst_61 = arith.constant dense<0.000000e+00> : vector<256x128xf32>
    %46 = tpu.matmul %43, %45, %cst_61 {dimension_numbers = #tpu.dot_dimension_numbers<[1], [0], [0], [1], [0, 0, 1, 1], [], []>} : vector<256x384xbf16>, vector<384x128xbf16>, vector<256x128xf32> -> vector<256x128xf32>
    %47 = arith.addf %38, %46 : vector<256x128xf32>
    %c2_62 = arith.constant 2 : index
    %c0_63 = arith.constant 0 : index
    %48 = vector.load %arg5[%c2_62, %c0_63] : memref<4x128xf32, #tpu.memory_space<vmem>>, vector<1x128xf32>
    %49 = vector.broadcast %48 : vector<1x128xf32> to vector<256x128xf32>
    %50 = arith.mulf %47, %49 : vector<256x128xf32>
    %c3 = arith.constant 3 : index
    %c0_64 = arith.constant 0 : index
    %51 = vector.load %arg5[%c3, %c0_64] : memref<4x128xf32, #tpu.memory_space<vmem>>, vector<1x128xf32>
    %52 = vector.broadcast %51 : vector<1x128xf32> to vector<256x128xf32>
    %53 = arith.addf %50, %52 : vector<256x128xf32>
    %cst_65 = arith.constant 0.000000e+00 : f32
    %54 = vector.broadcast %cst_65 : f32 to vector<256x128xf32>
    %55 = arith.maximumf %53, %54 : vector<256x128xf32>
    %56 = arith.truncf %55 : vector<256x128xf32> to vector<256x128xbf16>
    %c0_66 = arith.constant 0 : index
    %c0_67 = arith.constant 0 : index
    %57 = vector.load %arg4[%c0_66, %c0_67] : memref<128x512xbf16, #tpu.memory_space<vmem>>, vector<128x512xbf16>
    %cst_68 = arith.constant dense<0.000000e+00> : vector<256x512xf32>
    %58 = tpu.matmul %56, %57, %cst_68 {dimension_numbers = #tpu.dot_dimension_numbers<[1], [0], [0], [1], [0, 0, 1, 1], [], []>} : vector<256x128xbf16>, vector<128x512xbf16>, vector<256x512xf32> -> vector<256x512xf32>
    %c0_69 = arith.constant 0 : index
    %c0_70 = arith.constant 0 : index
    %59 = vector.load %arg6[%c0_69, %c0_70] : memref<2x512xf32, #tpu.memory_space<vmem>>, vector<1x512xf32>
    %60 = vector.broadcast %59 : vector<1x512xf32> to vector<256x512xf32>
    %61 = arith.mulf %58, %60 : vector<256x512xf32>
    %c1_71 = arith.constant 1 : index
    %c0_72 = arith.constant 0 : index
    %62 = vector.load %arg6[%c1_71, %c0_72] : memref<2x512xf32, #tpu.memory_space<vmem>>, vector<1x512xf32>
    %63 = vector.broadcast %62 : vector<1x512xf32> to vector<256x512xf32>
    %64 = arith.addf %61, %63 : vector<256x512xf32>
    %cst_73 = arith.constant dense<0.000000e+00> : vector<512xf32>
    %65 = vector.multi_reduction <add>, %64, %cst_73 [0] : vector<256x512xf32> to vector<512xf32>
    %66 = vector.shape_cast %65 : vector<512xf32> to vector<1x512xf32>
    %cst_74 = arith.constant 2.560000e+02 : f32
    %67 = vector.broadcast %cst_74 : f32 to vector<1x512xf32>
    %68 = arith.divf %66, %67 : vector<1x512xf32>
    %cst_75 = arith.constant 0.000000e+00 : f32
    %69 = vector.broadcast %cst_75 : f32 to vector<1x768xf32>
    %c0_76 = arith.constant 0 : index
    %c0_77 = arith.constant 0 : index
    %70 = vector.load %arg10[%c0_76, %c0_77] : memref<1x768xf32, #tpu.memory_space<vmem>>, vector<1x768xf32>
    tpu.vector_store %arg10[%c0_76, %c0_77], %69 {strides = array<i32>} : memref<1x768xf32, #tpu.memory_space<vmem>>, vector<1x768xf32>,
    %c0_78 = arith.constant 0 : index
    %c128 = arith.constant 128 : index
    %71 = vector.load %arg10[%c0_78, %c128] : memref<1x768xf32, #tpu.memory_space<vmem>>, vector<1x512xf32>
    tpu.vector_store %arg10[%c0_78, %c128], %68 {strides = array<i32>} : memref<1x768xf32, #tpu.memory_space<vmem>>, vector<1x512xf32>,
    %c0_79 = arith.constant 0 : index
    %72 = memref.load %arg7[%c0_79] : memref<5xf32, #tpu.memory_space<smem>>
    %c0_80 = arith.constant 0 : index
    %c126 = arith.constant 126 : index
    %73 = vector.load %arg10[%c0_80, %c126] : memref<1x768xf32, #tpu.memory_space<vmem>>, vector<1x512xf32>
    %74 = vector.broadcast %72 : f32 to vector<1x512xf32>
    %75 = arith.mulf %74, %73 : vector<1x512xf32>
    %c1_81 = arith.constant 1 : index
    %76 = memref.load %arg7[%c1_81] : memref<5xf32, #tpu.memory_space<smem>>
    %c0_82 = arith.constant 0 : index
    %c127 = arith.constant 127 : index
    %77 = vector.load %arg10[%c0_82, %c127] : memref<1x768xf32, #tpu.memory_space<vmem>>, vector<1x512xf32>
    %78 = vector.broadcast %76 : f32 to vector<1x512xf32>
    %79 = arith.mulf %78, %77 : vector<1x512xf32>
    %80 = arith.addf %75, %79 : vector<1x512xf32>
    %c2_83 = arith.constant 2 : index
    %81 = memref.load %arg7[%c2_83] : memref<5xf32, #tpu.memory_space<smem>>
    %c0_84 = arith.constant 0 : index
    %c128_85 = arith.constant 128 : index
    %82 = vector.load %arg10[%c0_84, %c128_85] : memref<1x768xf32, #tpu.memory_space<vmem>>, vector<1x512xf32>
    %83 = vector.broadcast %81 : f32 to vector<1x512xf32>
    %84 = arith.mulf %83, %82 : vector<1x512xf32>
    %85 = arith.addf %80, %84 : vector<1x512xf32>
    %c3_86 = arith.constant 3 : index
    %86 = memref.load %arg7[%c3_86] : memref<5xf32, #tpu.memory_space<smem>>
    %c0_87 = arith.constant 0 : index
    %c129 = arith.constant 129 : index
    %87 = vector.load %arg10[%c0_87, %c129] : memref<1x768xf32, #tpu.memory_space<vmem>>, vector<1x512xf32>
    %88 = vector.broadcast %86 : f32 to vector<1x512xf32>
    %89 = arith.mulf %88, %87 : vector<1x512xf32>
    %90 = arith.addf %85, %89 : vector<1x512xf32>
    %c4 = arith.constant 4 : index
    %91 = memref.load %arg7[%c4] : memref<5xf32, #tpu.memory_space<smem>>
    %c0_88 = arith.constant 0 : index
    %c130 = arith.constant 130 : index
    %92 = vector.load %arg10[%c0_88, %c130] : memref<1x768xf32, #tpu.memory_space<vmem>>, vector<1x512xf32>
    %93 = vector.broadcast %91 : f32 to vector<1x512xf32>
    %94 = arith.mulf %93, %92 : vector<1x512xf32>
    %95 = arith.addf %90, %94 : vector<1x512xf32>
    %96 = arith.negf %95 : vector<1x512xf32>
    %97 = math.exp %96 : vector<1x512xf32>
    %cst_89 = arith.constant 1.000000e+00 : f32
    %98 = vector.broadcast %cst_89 : f32 to vector<1x512xf32>
    %99 = arith.addf %98, %97 : vector<1x512xf32>
    %100 = arith.divf %98, %99 : vector<1x512xf32>
    %101 = vector.broadcast %100 : vector<1x512xf32> to vector<256x512xf32>
    %102 = arith.mulf %64, %101 : vector<256x512xf32>
    %103 = arith.addf %102, %1 : vector<256x512xf32>
    %cst_90 = arith.constant 0.000000e+00 : f32
    %104 = vector.broadcast %cst_90 : f32 to vector<256x512xf32>
    %105 = arith.maximumf %103, %104 : vector<256x512xf32>
    %106 = arith.truncf %105 : vector<256x512xf32> to vector<256x512xbf16>
    %c0_91 = arith.constant 0 : index
    %c0_92 = arith.constant 0 : index
    %c0_93 = arith.constant 0 : index
    %107 = vector.load %arg8[%c0_91, %c0_92, %c0_93] : memref<1x256x512xbf16, #tpu.memory_space<vmem>>, vector<1x256x512xbf16>
    %108 = vector.shape_cast %107 : vector<1x256x512xbf16> to vector<256x512xbf16>
    %109 = vector.shape_cast %106 : vector<256x512xbf16> to vector<1x256x512xbf16>
    tpu.vector_store %arg8[%c0_91, %c0_92, %c0_93], %109 {strides = array<i32>} : memref<1x256x512xbf16, #tpu.memory_space<vmem>>, vector<1x256x512xbf16>,
    return
  }
  func.func @transform_0(%arg0: i32) -> (i32, i32, i32) {
    %c0_i32 = arith.constant 0 : i32
    %c0_i32_0 = arith.constant 0 : i32
    %c0_i32_1 = arith.constant 0 : i32
    return %arg0, %c0_i32, %c0_i32_0 : i32, i32, i32
  }
  func.func @transform_1(%arg0: i32) -> (i32, i32) {
    %c0_i32 = arith.constant 0 : i32
    %c0_i32_0 = arith.constant 0 : i32
    %c0_i32_1 = arith.constant 0 : i32
    return %c0_i32, %c0_i32_0 : i32, i32
  }
  func.func @transform_2(%arg0: i32) -> (i32, i32, i32) {
    %c0_i32 = arith.constant 0 : i32
    %c0_i32_0 = arith.constant 0 : i32
    %c0_i32_1 = arith.constant 0 : i32
    %c0_i32_2 = arith.constant 0 : i32
    return %c0_i32, %c0_i32_0, %c0_i32_1 : i32, i32, i32
  }
  func.func @transform_3(%arg0: i32) -> (i32, i32) {
    %c0_i32 = arith.constant 0 : i32
    %c0_i32_0 = arith.constant 0 : i32
    %c0_i32_1 = arith.constant 0 : i32
    return %c0_i32, %c0_i32_0 : i32, i32
  }
  func.func @transform_4(%arg0: i32) -> (i32, i32) {
    %c0_i32 = arith.constant 0 : i32
    %c0_i32_0 = arith.constant 0 : i32
    %c0_i32_1 = arith.constant 0 : i32
    return %c0_i32, %c0_i32_0 : i32, i32
  }
  func.func @transform_5(%arg0: i32) -> (i32, i32) {
    %c0_i32 = arith.constant 0 : i32
    %c0_i32_0 = arith.constant 0 : i32
    %c0_i32_1 = arith.constant 0 : i32
    return %c0_i32, %c0_i32_0 : i32, i32
  }
  func.func @transform_6(%arg0: i32) -> i32 {
    %c0_i32 = arith.constant 0 : i32
    %c0_i32_0 = arith.constant 0 : i32
    return %c0_i32 : i32
  }
  func.func @transform_7(%arg0: i32) -> (i32, i32, i32) {
    %c0_i32 = arith.constant 0 : i32
    %c0_i32_0 = arith.constant 0 : i32
    %c0_i32_1 = arith.constant 0 : i32
    return %arg0, %c0_i32, %c0_i32_0 : i32, i32, i32
  }
}

</mosaic_0001>

<bundles_post_ra>
// kernel: tpu_custom_call.1
= control target key start
LH: loop header
LB: loop body
LE: loop exit
PB: predicated region body
PF: predicated region fallthrough
CT: control target
= control target key end

     0   :  { %s12137_s0 = inlined_call_operand.hbm [shape: f32[2,256,512], index: 0, kind: input, shape index: {}]   ;;  %s12138_s1 = inlined_call_operand.hbm [shape: bf16[512,128], index: 1, kind: input, shape index: {}]   ;;  %s12139_s2 = inlined_call_operand.hbm [shape: bf16[3,384,128], index: 2, kind: input, shape index: {}]   ;;  %s12140_s3 = inlined_call_operand.hbm [shape: bf16[128,512], index: 3, kind: input, shape index: {}]   ;;  %s12141_s4 = inlined_call_operand.hbm [shape: f32[4,128], index: 4, kind: input, shape index: {}]   ;;  %s12142_s5 = inlined_call_operand.hbm [shape: f32[2,512], index: 5, kind: input, shape index: {}]   ;;  %s12143_s6 = inlined_call_operand.vmem [shape: f32[5], index: 6, kind: input, shape index: {}]   ;;  %s12144_s7 = inlined_call_operand.hbm [shape: bf16[2,256,512], index: 7, kind: output, shape index: {}]  }
   0x1   :  { %12265 = sst [smem:[#allocation132_spill]] %s12138_s1 }
   0x2   :  { %12266 = sst [smem:[#allocation133_spill]] %s12139_s2 }
   0x3   :  { %12 = vsyncpa [#allocation5], 0 }
   0x4   :  { %14 = vsyncpa [#allocation5 + $0x1], 0 }
   0x5   :  { %15 = vsyncpa [#allocation9], 0 }
   0x6   :  { %16 = vsyncpa [#allocation12], 0 }
   0x7   :  { %17 = vsyncpa [#allocation15], 0 }
   0x8   :  { %18 = vsyncpa [#allocation7], 0 }
   0x9   :  { %19 = vsyncpa [#allocation6], 0 }
   0xa   :  { %21 = vsyncpa [#allocation6 + $0x1], 0  ;;  %s8357_s24 = smov 0   ;;  %s8359_s25 = smov 0  }
   0xb   :  { %s8361_s26 = smov 0   ;;  %s8363_s27 = smov 0  }
   0xc LB: > { %s12267_s1 = sld [smem:[#allocation132_spill]]  ;;  %s8381_s8 = sadd.s32 4294967295, %s8293_s27   ;;  %s8293_s27 = sphi %s8363_s27, %s12848_s27   ;;  %s8289_s26 = sphi %s8361_s26, %s12847_s26   ;;  %s8285_s25 = sphi %s8359_s25, %s12846_s25   ;;  %s8281_s24 = sphi %s8357_s24, %s12845_s24  }
   0xd   : > { %p6750_p0 = scmp.ge.s32.totalorder %s8293_s27, 1  ;;  %p48_p1 = scmp.eq.s32.totalorder %s8381_s8, 0 }
   0xe   : > { %p210_p2 = scmp.lt.s32.totalorder %s8293_s27, 3  ;;  %s8295_s10 = smov [#allocation8]  }
   0xf   : > { %s223_s11 = sshll.u32 %s8295_s10, 4  ;;  %s249_s14 = sshll.u32 %s12140_s3, 4  ;;  %s224_s11 = int_to_ptr.vmem [resolvable:$true] %s223_s11  ;;  %s250_s14 = int_to_ptr.hbm [resolvable:$true] %s249_s14 }
  0x10   : > { %p8386_p3 = pnand %p6750_p0, %p210_p2  ;;  %s8296_s16 = smov [#allocation11]  }
  0x11   : > { %s251_s17 = sshll.u32 %s8296_s16, 4  ;;  %s8297_s18 = smov 64   ;;  %s252_s17 = int_to_ptr.vmem [resolvable:$true] %s251_s17 }
  0x12   : > { %s221_s30 = sshll.u32 %s12267_s1, 4  ;;  %p7704_p4 = pneg %p8386_p3  ;;  %s222_s30 = int_to_ptr.hbm [resolvable:$true] %s221_s30 }
  0x13   : > { %s8298_s19 = smov 4   ;;  %s8299_s20 = smov 256  }
  0x14   : > { %p8398_p6 = pnand %p7704_p4, %p48_p1  ;;  %s8300_s21 = smov 16  }
  0x15   : > { %s12270_s2 = sld [smem:[#allocation133_spill]]  ;;  %s8301_s29 = smov [#allocation10]  }
  0x16   : > { %7707 = dma.hbm_to_vmem [thread:$0]  (!%p8398_p6), %s222_s30, 4096, %s224_s11, [#allocation9], %s8297_s18, %s8297_s18, %s8298_s19  }
  0x17   : > { %7713 = dma.hbm_to_vmem [thread:$0]  (!%p8398_p6), %s250_s14, 4096, %s252_s17, [#allocation12], %s8299_s20, %s8299_s20, %s8300_s21  }
  0x18   : > { %s237_s10 = sshll.u32 %s8301_s29, 4  ;;  %s264_s16 = sshll.u32 %s12141_s4, 4  ;;  %s238_s10 = int_to_ptr.vmem [resolvable:$true] %s237_s10  ;;  %s265_s16 = int_to_ptr.hbm [resolvable:$true] %s264_s16 }
  0x19   : > { %s8302_s30 = smov [#allocation13]   ;;  %s276_s20 = sshll.u32 %s12142_s5, 4  ;;  %s277_s20 = int_to_ptr.hbm [resolvable:$true] %s276_s20 }
  0x1a   : > { %s266_s11 = sshll.u32 %s8302_s30, 4  ;;  %s8303_s22 = smov [#allocation14]   ;;  %s267_s11 = int_to_ptr.vmem [resolvable:$true] %s266_s11 }
  0x1b   : > { %s235_s28 = sshll.u32 %s12270_s2, 4  ;;  %s278_s23 = sshll.u32 %s8303_s22, 4  ;;  %s236_s28 = int_to_ptr.hbm [resolvable:$true] %s235_s28  ;;  %s279_s23 = int_to_ptr.vmem [resolvable:$true] %s278_s23 }
  0x1c   : > { %7710 = dma.hbm_to_vmem [thread:$0]  (!%p8398_p6), %s236_s28, 9216, %s238_s10, [#allocation9], %s8297_s18, %s8297_s18, %s8298_s19  }
  0x1d   : > { %7716 = dma.hbm_to_vmem [thread:$0]  (!%p8398_p6), %s265_s16, 64, %s267_s11, [#allocation12]  }
  0x1e   : > { %s288_s19 = sshll.u32 %s12143_s6, 4  ;;  %s8304_s28 = smov [#allocation16]   ;;  %s289_s19 = int_to_ptr.vmem [resolvable:$true] %s288_s19 }
  0x1f   : > { %7719 = dma.hbm_to_vmem [thread:$0]  (!%p8398_p6), %s277_s20, 128, %s279_s23, [#allocation15]  }
  0x20   : > { %7722 = dma.vmem_to_smem (!%p8398_p6), %s289_s19, 16, %s8304_s28, [#allocation7]  }
  0x21   : > { %s6749_s29 = sadd.s32 4294967294, %s8293_s27   ;;  %s8428_s10 = sadd.s32 1, %s8293_s27  }
  0x22   : > { %s31_s12 = ssub.s32 %s8293_s27, %s8428_s10  ;;  %s34_s13 = sadd.s32 1, %s8289_s26 }
  0x23   : > { %p32_p7 = scmp.eq.s32.totalorder %s31_s12, 0  ;;  %p41_p8 = scmp.ne.s32.totalorder %s8289_s26, %s8285_s25 }
  0x24   : > { %p42_p9 = scmp.eq.s32.totalorder %s8293_s27, 0  ;;  %p47_p10 = scmp.ne.s32.totalorder %s8285_s25, %s8281_s24 }
  0x25   : > { %s8439_s16 = scalar_select %p32_p7, %s8289_s26, %s34_s13  }
  0x26   : > { %p8441_p11 = por %p42_p9, %p41_p8  ;;  %p8447_p12 = por %p48_p1, %p47_p10 }
  0x27   : > { %p197_p13 = scmp.eq.s32.totalorder %s8381_s8, 1  ;;  %p203_p0 = scmp.eq.s32.totalorder %s6749_s29, 1 }
  0x28   : > { %p7737_p2 = scmp.lt.s32.totalorder %s8293_s27, 2  ;;  %s299_s11 = sand.u32 1, %s8289_s26  }
  0x29   : > { %p8454_p4 = por %p197_p13, %p41_p8  ;;  %p8458_p6 = por %p203_p0, %p47_p10 }
  0x2a   : > { %s6758_s20 = sshll.u32 %s299_s11, 10  ;;  %s7324_s21 = sshll.u32 %s8293_s27, 10 }
  0x2b   : > { %s308_s22 = scalar_lea.hbm %s12137_s0, %s7324_s21  ;;  %s303_s23 = scalar_lea.vmem [#allocation4], %s6758_s20 }
  0x2c   : > { %s311_s28 = sshll.u32 %s303_s23, 4  ;;  %s309_s12 = sshll.u32 %s308_s22, 4  ;;  %s312_s28 = int_to_ptr.vmem [resolvable:$true] %s311_s28  ;;  %s310_s12 = int_to_ptr.hbm [resolvable:$true] %s309_s12 }
  0x2d   : > { %p8468_p7 = pnand %p7737_p2, %p8441_p11  ;;  %s300_s13 = scalar_lea.sflag [#allocation5], %s299_s11 }
  0x2e   : > { %s8160_s1 = sshra.s32 %s310_s12, 4  ;;  %s8167_s18 = scalar_lea.hbm %s12137_s0, 2048  ;;  %s8161_s1 = int_to_ptr.hbm [resolvable:$true] %s8160_s1 }
  0x2f   : > { %s8162_s2 = scalar_lea.hbm %s8161_s1, 1024  ;;  %p8164_p9 = pneg %p8468_p7 }
  0x30   : > { %p8163_p8 = scmp.ne.s32.totalorder %s8161_s1, %s8162_s2  ;;  %p8168_p11 = scmp.lt.s32.totalorder %s8161_s1, %s12137_s0 }
  0x31   : > { %p8169_p0 = scmp.lt.s32.totalorder %s8167_s18, %s8162_s2 }
  0x32   : > { %p8165_p10 = pnand %p8164_p9, %p8163_p8 }
  0x33   : > { %p8170_p2 = por %p8169_p0, %p8168_p11 }
  0x34   : > { %p8166_p13 = pneg %p8165_p10 }
  0x36   : > { %p8171_p5 = pnand %p8170_p2, %p8166_p13 }
  0x38   : > { %8174 = shalt.err (!%p8171_p5)
}
  0x39   : > { %s8305_s11 = smov 512   ;;  %s8306_s22 = smov 32  }
  0x3a   : > { %7726 = dma.hbm_to_vmem [thread:$0]  (!%p8468_p7), %s310_s12, 16384, %s312_s28, %s300_s13, %s8305_s11, %s8305_s11, %s8306_s22  }
  0x3b   : > { %323 = sbr.rel (%p8386_p3) target bundleno = 1954 (0x7a2), region = 48 }
  0x40   : > { %s8485_s23 = sand.u32 1, %s8285_s25  }
  0x41   : > { %s6762_s20 = sshll.u32 %s8485_s23, 10  ;;  %s326_s1 = scalar_lea.sflag [#allocation5], %s8485_s23 }
  0x42   : > { %s8489_s2 = scalar_lea.vmem [#allocation4], %s6762_s20 }
  0x43   : > { %8235 = dma.done.wait (%p8447_p12), %s326_s1, 16384  }
  0x44   : > { %8237 = vsyncadd (%p8447_p12), %s326_s1, 4294950912 }
  0x45   : > { %8239 = dma.done.wait (%p48_p1), [#allocation9], 13312  }
  0x46   : > { %8241 = vsyncadd (%p48_p1), [#allocation9], 4294953984 }
  0x47   : > { %8243 = dma.done.wait (%p48_p1), [#allocation12], 4160  }
  0x48   : > { %8245 = vsyncadd (%p48_p1), [#allocation12], 4294963136 }
  0x49   : > { %8247 = dma.done.wait (%p48_p1), [#allocation15], 128  }
  0x4a   : > { %8249 = vsyncadd (%p48_p1), [#allocation15], 4294967168 }
  0x4b   : > { %8251 = dma.done.wait (%p48_p1), [#allocation7], 16  }
  0x4c   : > { %8253 = vsyncadd (%p48_p1), [#allocation7], 4294967280 }
  0x4d   : > { %365 = sfence }
  0x4e   : > { %v7332_v0 = vld [vmem:[#allocation8 + $0x38] sm:$0xff]  ;;  %v7331_v1 = vld [vmem:[#allocation8 + $0x30] sm:$0xff]  ;;  %v7330_v2 = vld [vmem:[#allocation8 + $0x28] sm:$0xff]  ;;  %vm1305_vm0 = vcmask 1040384   ;;  %vm1306_vm1 = vsmask.f32 256 }
  0x4f   : > { %7652 = vmatpush.bf16.msra.mxu1 %v7332_v0  ;;  %7653 = vmatpush.bf16.msra.mxu2 %v7332_v0  ;;  %v7329_v3 = vld [vmem:[#allocation8 + $0x20] sm:$0xff]  ;;  %v7328_v4 = vld [vmem:[#allocation8 + $0x18] sm:$0xff]  ;;  %v7327_v5 = vld [vmem:[#allocation8 + $0x10] sm:$0xff]  ;;  %vm1356_vm3 = vsmask.f32 7938  ;;  %vm1760_vm5 = vcmask 1043456  }
  0x50   : > { %7654 = vmatpush.bf16.msra.mxu3 %v7332_v0  ;;  %841 = vmatpush.bf16.msra.mxu0 %v7332_v0  ;;  %v7326_v6 = vld [vmem:[#allocation8 + $0x8] sm:$0xff]  ;;  %v7325_v7 = vld [vmem:[#allocation8] sm:$0xff]  ;;  %v7348_v14 = vld [vmem:[#allocation8 + $0xb8] sm:$0xff]  ;;  %vm1438_vm7 = vsmask.f32 4368  ;;  %vm2339_vm9 = vcmask 1046528  }
  0x51   : > { %v425_v8 = vld [vmem:[%s8489_s2 + $0x100] sm:$0xff]  ;;  %v7356_v15 = vld [vmem:[#allocation8 + $0xf8] sm:$0xff]  ;;  %v7347_v20 = vld [vmem:[#allocation8 + $0xb0] sm:$0xff]  ;;  %vm2082_vm10 = vsmask.f32 7424  ;;  %vm5986_vm13 = vcmask 1042434  }
  0x52   : > { %v429_v9 = vld [vmem:[%s8489_s2 + $0x120] sm:$0xff]  ;;  %v7340_v16 = vld [vmem:[#allocation8 + $0x78] sm:$0xff]  ;;  %v7355_v21 = vld [vmem:[#allocation8 + $0xf0] sm:$0xff]  ;;  %vm5988_vm14 = vcmask 1041408   ;;  %s7316_s9 = sld [smem:[#allocation16 + $0x3]]  ;;  %s8310_s29 = smov 125  }
  0x53   : > { %7655 = vmatpush.bf16.msra.mxu1 %v7331_v1  ;;  %7656 = vmatpush.bf16.msra.mxu2 %v7331_v1  ;;  %v457_v10 = vld [vmem:[%s8489_s2 + $0x200] sm:$0xff]  ;;  %v537_v17 = vpack.c.bf16 %v429_v9, %v425_v8  ;;  %v7339_v22 = vld [vmem:[#allocation8 + $0x70] sm:$0xff]  ;;  %v7346_v23 = vld [vmem:[#allocation8 + $0xa8] sm:$0xff]  ;;  %s7314_s15 = sld [smem:[#allocation16 + $0x1]]  ;;  %s8311_s13 = smov 127  }
  0x54   : > { %7657 = vmatpush.bf16.msra.mxu3 %v7331_v1  ;;  %842 = vmatpush.bf16.msra.mxu0 %v7331_v1  ;;  %v461_v11 = vld [vmem:[%s8489_s2 + $0x220] sm:$0xff]  ;;  %v7354_v24 = vld [vmem:[#allocation8 + $0xe8] sm:$0xff]  ;;  %v7344_v35 = vld [vmem:[#allocation8 + $0x98] sm:$0xff]  ;;  %s7317_s28 = sld [smem:[#allocation16 + $0x4]]  ;;  %s8312_s21 = smov 124  }
  0x55   : > { %v489_v12 = vld [vmem:[%s8489_s2 + $0x300] sm:$0xff]  ;;  %v553_v18 = vpack.c.bf16 %v461_v11, %v457_v10  ;;  %v7338_v25 = vld [vmem:[#allocation8 + $0x68] sm:$0xff]  ;;  %v7352_v36 = vld [vmem:[#allocation8 + $0xd8] sm:$0xff]  ;;  %s7315_s12 = sld [smem:[#allocation16 + $0x2]]  ;;  %s8313_s18 = smov 126  }
  0x56   : > { %v493_v13 = vld [vmem:[%s8489_s2 + $0x320] sm:$0xff]  ;;  %v7336_v37 = vld [vmem:[#allocation8 + $0x58] sm:$0xff]  ;;  %v7343_v41 = vld [vmem:[#allocation8 + $0x90] sm:$0xff]  ;;  %s5994_s19 = sld [smem:[#allocation16]]  ;;  %s8314_s30 = smov 2  }
  0x57   : > { %7658 = vmatpush.bf16.msra.mxu1 %v7330_v2  ;;  %7659 = vmatpush.bf16.msra.mxu2 %v7330_v2  ;;  %v569_v19 = vpack.c.bf16 %v493_v13, %v489_v12  ;;  %v7345_v26 = vld [vmem:[#allocation8 + $0xa0] sm:$0xff]  ;;  %v7351_v42 = vld [vmem:[#allocation8 + $0xd0] sm:$0xff]  ;;  %v7342_v44 = vld [vmem:[#allocation8 + $0x88] sm:$0xff]  ;;  %s6769_s11 = sshll.u32 %s8485_s23, 9  ;;  %s7461_s20 = sshll.u32 %s8381_s8, 9 }
  0x58   : > { %7660 = vmatpush.bf16.msra.mxu3 %v7330_v2  ;;  %843 = vmatpush.bf16.msra.mxu0 %v7330_v2  ;;  %v7353_v27 = vld [vmem:[#allocation8 + $0xe0] sm:$0xff]  ;;  %v7335_v43 = vld [vmem:[#allocation8 + $0x50] sm:$0xff]  ;;  %v7350_v46 = vld [vmem:[#allocation8 + $0xc8] sm:$0xff]  ;;  %s11764_s22 = scalar_lea.vmem [#allocation17], %s6769_s11 }
  0x59   : > { %v7337_v28 = vld [vmem:[#allocation8 + $0x60] sm:$0xff]  ;;  %v7334_v47 = vld [vmem:[#allocation8 + $0x48] sm:$0xff]  ;;  %vm8631_vm2 = vmand %vm1305_vm0, %vm1306_vm1 }
  0x5a   : > { %v433_v29 = vld [vmem:[%s8489_s2 + $0x140] sm:$0xff]  ;;  %v394_v13 = vld [vmem:[%s8489_s2 + $0x8] sm:$0xff]  ;;  %vm8641_vm4 = vmand %vm1305_vm0, %vm1356_vm3 }
  0x5b   : > { %7661 = vmatpush.bf16.msra.mxu1 %v7329_v3  ;;  %7662 = vmatpush.bf16.msra.mxu2 %v7329_v3  ;;  %v437_v30 = vld [vmem:[%s8489_s2 + $0x160] sm:$0xff]  ;;  %vm8682_vm6 = vmand %vm1760_vm5, %vm1356_vm3  ;;  %vm6040_vm3 = vcmask 1014784  }
  0x5c   : > { %7663 = vmatpush.bf16.msra.mxu3 %v7329_v3  ;;  %844 = vmatpush.bf16.msra.mxu0 %v7329_v3  ;;  %v465_v31 = vld [vmem:[%s8489_s2 + $0x240] sm:$0xff]  ;;  %v541_v38 = vpack.c.bf16 %v437_v30, %v433_v29  ;;  %v404_v29 = vld [vmem:[%s8489_s2 + $0x58] sm:$0xff]  ;;  %vm8700_vm8 = vmor %vm1306_vm1, %vm1438_vm7  ;;  %vm6017_vm1 = vcmask 1031168  }
  0x5d   : > { %v469_v32 = vld [vmem:[%s8489_s2 + $0x260] sm:$0xff]  ;;  %v408_v30 = vld [vmem:[%s8489_s2 + $0x78] sm:$0xff] }
  0x5e   : > { %v497_v33 = vld [vmem:[%s8489_s2 + $0x340] sm:$0xff]  ;;  %v557_v39 = vpack.c.bf16 %v469_v32, %v465_v31 }
  0x5f   : > { %7664 = vmatpush.bf16.msra.mxu1 %v7328_v4  ;;  %7665 = vmatpush.bf16.msra.mxu2 %v7328_v4  ;;  %v501_v34 = vld [vmem:[%s8489_s2 + $0x360] sm:$0xff] }
  0x60   : > { %7666 = vmatpush.bf16.msra.mxu3 %v7328_v4  ;;  %845 = vmatpush.bf16.msra.mxu0 %v7328_v4  ;;  %v573_v40 = vpack.c.bf16 %v501_v34, %v497_v33  ;;  %v393_v45 = vld [vmem:[%s8489_s2] sm:$0xff]  ;;  %v528_v33 = vpack.c.bf16 %v408_v30, %v404_v29  ;;  %v410_v34 = vld [vmem:[%s8489_s2 + $0x88] sm:$0xff] }
  0x61   : > { %v397_v48 = vld [vmem:[%s8489_s2 + $0x20] sm:$0xff] }
  0x62   : > { %v521_v49 = vpack.c.bf16 %v397_v48, %v393_v45  ;;  %v7341_v50 = vld [vmem:[#allocation8 + $0x80] sm:$0xff]  ;;  %v419_v45 = vld [vmem:[%s8489_s2 + $0xd0] sm:$0xff]  ;;  %v424_v48 = vld [vmem:[%s8489_s2 + $0xf8] sm:$0xff] }
  0x63   : > { %7667 = vmatpush.bf16.msra.mxu1 %v7327_v5  ;;  %7668 = vmatpush.bf16.msra.mxu2 %v7327_v5  ;;  %v7349_v51 = vld [vmem:[#allocation8 + $0xc0] sm:$0xff] }
  0x64   : > { %7669 = vmatpush.bf16.msra.mxu3 %v7327_v5  ;;  %846 = vmatpush.bf16.msra.mxu0 %v7327_v5  ;;  %v7333_v52 = vld [vmem:[#allocation8 + $0x40] sm:$0xff] }
  0x65   : > { %v441_v53 = vld [vmem:[%s8489_s2 + $0x180] sm:$0xff] }
  0x66   : > { %v445_v54 = vld [vmem:[%s8489_s2 + $0x1a0] sm:$0xff] }
  0x67   : > { %7670 = vmatpush.bf16.msra.mxu1 %v7326_v6  ;;  %7671 = vmatpush.bf16.msra.mxu2 %v7326_v6  ;;  %v473_v55 = vld [vmem:[%s8489_s2 + $0x280] sm:$0xff]  ;;  %v545_v59 = vpack.c.bf16 %v445_v54, %v441_v53  ;;  %v430_v53 = vld [vmem:[%s8489_s2 + $0x128] sm:$0xff]  ;;  %v427_v54 = vld [vmem:[%s8489_s2 + $0x110] sm:$0xff] }
  0x68   : > { %7672 = vmatpush.bf16.msra.mxu3 %v7326_v6  ;;  %847 = vmatpush.bf16.msra.mxu0 %v7326_v6  ;;  %v477_v56 = vld [vmem:[%s8489_s2 + $0x2a0] sm:$0xff] }
  0x69   : > { %v505_v57 = vld [vmem:[%s8489_s2 + $0x380] sm:$0xff]  ;;  %v561_v60 = vpack.c.bf16 %v477_v56, %v473_v55  ;;  %v431_v55 = vld [vmem:[%s8489_s2 + $0x130] sm:$0xff]  ;;  %v428_v56 = vld [vmem:[%s8489_s2 + $0x118] sm:$0xff] }
  0x6a   : > { %v509_v58 = vld [vmem:[%s8489_s2 + $0x3a0] sm:$0xff] }
  0x6b   : > { %7673 = vmatpush.bf16.msra.mxu1 %v7325_v7  ;;  %7674 = vmatpush.bf16.msra.mxu2 %v7325_v7  ;;  %v577_v61 = vpack.c.bf16 %v509_v58, %v505_v57  ;;  %v401_v62 = vld [vmem:[%s8489_s2 + $0x40] sm:$0xff]  ;;  %v432_v57 = vld [vmem:[%s8489_s2 + $0x138] sm:$0xff] }
  0x6c   : > { %7675 = vmatpush.bf16.msra.mxu3 %v7325_v7  ;;  %848 = vmatpush.bf16.msra.mxu0 %v7325_v7  ;;  %v405_v63 = vld [vmem:[%s8489_s2 + $0x60] sm:$0xff] }
  0x6d   : > { %v525_v0 = vpack.c.bf16 %v405_v63, %v401_v62  ;;  %v449_v1 = vld [vmem:[%s8489_s2 + $0x1c0] sm:$0xff] }
  0x6e   : > { %869 = vmatmul.bf16.vlgmr.msra.gmra.mxu1 %v537_v17  ;;  %889 = vmatmul.bf16.vlgmr.msra.gmra.mxu2 %v553_v18  ;;  %v453_v2 = vld [vmem:[%s8489_s2 + $0x1e0] sm:$0xff]  ;;  %v396_v17 = vld [vmem:[%s8489_s2 + $0x18] sm:$0xff] }
  0x6f   : > { %1019 = vmatpush.bf16.msrb.mxu2 %v7348_v14  ;;  %930 = vmatpush.bf16.msrb.mxu1 %v7340_v16  ;;  %v481_v3 = vld [vmem:[%s8489_s2 + $0x2c0] sm:$0xff]  ;;  %v549_v7 = vpack.c.bf16 %v453_v2, %v449_v1  ;;  %v398_v14 = vld [vmem:[%s8489_s2 + $0x28] sm:$0xff]  ;;  %v399_v16 = vld [vmem:[%s8489_s2 + $0x30] sm:$0xff] }
  0x70   : > { %1108 = vmatpush.bf16.msrb.mxu3 %v7356_v15  ;;  %849 = vmatmul.bf16.vlgmr.msra.gmra.mxu0 %v521_v49  ;;  %v485_v4 = vld [vmem:[%s8489_s2 + $0x2e0] sm:$0xff]  ;;  %v395_v15 = vld [vmem:[%s8489_s2 + $0x10] sm:$0xff]  ;;  %v400_v18 = vld [vmem:[%s8489_s2 + $0x38] sm:$0xff] }
  0x71   : > { %909 = vmatmul.bf16.vlgmr.msra.gmra.mxu3 %v569_v19  ;;  %v513_v5 = vld [vmem:[%s8489_s2 + $0x3c0] sm:$0xff]  ;;  %v565_v8 = vpack.c.bf16 %v485_v4, %v481_v3  ;;  %v522_v19 = vpack.c.bf16 %v398_v14, %v394_v13  ;;  %v434_v1 = vld [vmem:[%s8489_s2 + $0x148] sm:$0xff]  ;;  %v435_v3 = vld [vmem:[%s8489_s2 + $0x150] sm:$0xff] }
  0x72   : > { %v517_v6 = vld [vmem:[%s8489_s2 + $0x3e0] sm:$0xff]  ;;  %v438_v2 = vld [vmem:[%s8489_s2 + $0x168] sm:$0xff]  ;;  %v439_v4 = vld [vmem:[%s8489_s2 + $0x170] sm:$0xff] }
  0x73   : > { %1020 = vmatpush.bf16.msrb.mxu2 %v7347_v20  ;;  %931 = vmatpush.bf16.msrb.mxu1 %v7339_v22  ;;  %v581_v9 = vpack.c.bf16 %v517_v6, %v513_v5  ;;  %v409_v10 = vld [vmem:[%s8489_s2 + $0x80] sm:$0xff]  ;;  %v523_v20 = vpack.c.bf16 %v399_v16, %v395_v15  ;;  %v436_v5 = vld [vmem:[%s8489_s2 + $0x158] sm:$0xff]  ;;  %v7387_v16 = vld [vmem:[#allocation10 + $0xf0] sm:$0xff] }
  0x74   : > { %1109 = vmatpush.bf16.msrb.mxu3 %v7355_v21  ;;  %v413_v11 = vld [vmem:[%s8489_s2 + $0xa0] sm:$0xff]  ;;  %v524_v21 = vpack.c.bf16 %v400_v18, %v396_v17  ;;  %v440_v6 = vld [vmem:[%s8489_s2 + $0x178] sm:$0xff]  ;;  %v442_v18 = vld [vmem:[%s8489_s2 + $0x188] sm:$0xff] }
  0x75   : > { %v529_v12 = vpack.c.bf16 %v413_v11, %v409_v10  ;;  %v417_v22 = vld [vmem:[%s8489_s2 + $0xc0] sm:$0xff]  ;;  %v543_v10 = vpack.c.bf16 %v439_v4, %v435_v3  ;;  %v7388_v11 = vld [vmem:[#allocation10 + $0xf8] sm:$0xff]  ;;  %v544_v13 = vpack.c.bf16 %v440_v6, %v436_v5 }
  0x76   : > { %3173 = vmatpush.bf16.msrb.mxu0 %v7388_v11  ;;  %v7384_v4 = vld [vmem:[#allocation10 + $0xd8] sm:$0xff] }
  0x77   : > { %1021 = vmatpush.bf16.msrb.mxu2 %v7346_v23  ;;  %932 = vmatpush.bf16.msrb.mxu1 %v7338_v25  ;;  %v421_v23 = vld [vmem:[%s8489_s2 + $0xe0] sm:$0xff]  ;;  %v402_v25 = vld [vmem:[%s8489_s2 + $0x48] sm:$0xff] }
  0x78   : > { %1110 = vmatpush.bf16.msrb.mxu3 %v7354_v24  ;;  %v533_v24 = vpack.c.bf16 %v421_v23, %v417_v22  ;;  %v444_v22 = vld [vmem:[%s8489_s2 + $0x198] sm:$0xff] }
  0x79   : > { %v448_v23 = vld [vmem:[%s8489_s2 + $0x1b8] sm:$0xff] }
  0x7a   : > { %3174 = vmatpush.bf16.msrb.mxu0 %v7387_v16  ;;  %v548_v30 = vpack.c.bf16 %v448_v23, %v444_v22  ;;  %v1311_v16 = vld [vmem:[#allocation2 + $0x18] sm:$0x1]  ;;  %v7382_v22 = vld [vmem:[#allocation10 + $0xc8] sm:$0xff] }
  0x7b   : > { %1022 = vmatpush.bf16.msrb.mxu2 %v7345_v26  ;;  %933 = vmatpush.bf16.msrb.mxu1 %v7337_v28  ;;  %v406_v26 = vld [vmem:[%s8489_s2 + $0x68] sm:$0xff]  ;;  %v407_v28 = vld [vmem:[%s8489_s2 + $0x70] sm:$0xff] }
  0x7c   : > { %1111 = vmatpush.bf16.msrb.mxu3 %v7353_v27  ;;  %v403_v27 = vld [vmem:[%s8489_s2 + $0x50] sm:$0xff]  ;;  %v526_v31 = vpack.c.bf16 %v406_v26, %v402_v25 }
  0x7d   : > { %v527_v32 = vpack.c.bf16 %v407_v28, %v403_v27  ;;  %v7386_v28 = vld [vmem:[#allocation10 + $0xe8] sm:$0xff] }
  0x7e   : > { %874 = vmatmul.bf16.gmra.mxu1 %v541_v38  ;;  %894 = vmatmul.bf16.gmra.mxu2 %v557_v39  ;;  %v412_v38 = vld [vmem:[%s8489_s2 + $0x98] sm:$0xff] }
  0x7f   : > { %1023 = vmatpush.bf16.msrb.mxu2 %v7344_v35  ;;  %934 = vmatpush.bf16.msrb.mxu1 %v7336_v37  ;;  %v414_v35 = vld [vmem:[%s8489_s2 + $0xa8] sm:$0xff]  ;;  %v415_v37 = vld [vmem:[%s8489_s2 + $0xb0] sm:$0xff]  ;;  %v416_v39 = vld [vmem:[%s8489_s2 + $0xb8] sm:$0xff] }
  0x80   : > { %1112 = vmatpush.bf16.msrb.mxu3 %v7352_v36  ;;  %854 = vmatmul.bf16.gmra.mxu0 %v525_v0  ;;  %v411_v36 = vld [vmem:[%s8489_s2 + $0x90] sm:$0xff] }
  0x81   : > { %914 = vmatmul.bf16.gmra.mxu3 %v573_v40  ;;  %v530_v40 = vpack.c.bf16 %v414_v35, %v410_v34  ;;  %3175 = vmatpush.bf16.msrb.mxu0 %v7386_v28  ;;  %v450_v34 = vld [vmem:[%s8489_s2 + $0x1c8] sm:$0xff] }
  0x82   : > { %v454_v35 = vld [vmem:[%s8489_s2 + $0x1e8] sm:$0xff] }
  0x83   : > { %1024 = vmatpush.bf16.msrb.mxu2 %v7343_v41  ;;  %935 = vmatpush.bf16.msrb.mxu1 %v7335_v43  ;;  %v531_v41 = vpack.c.bf16 %v415_v37, %v411_v36  ;;  %v418_v43 = vld [vmem:[%s8489_s2 + $0xc8] sm:$0xff]  ;;  %v451_v36 = vld [vmem:[%s8489_s2 + $0x1d0] sm:$0xff] }
  0x84   : > { %1113 = vmatpush.bf16.msrb.mxu3 %v7351_v42  ;;  %v532_v42 = vpack.c.bf16 %v416_v39, %v412_v38  ;;  %v455_v37 = vld [vmem:[%s8489_s2 + $0x1f0] sm:$0xff]  ;;  %v452_v38 = vld [vmem:[%s8489_s2 + $0x1d8] sm:$0xff] }
  0x85   : > { %v456_v39 = vld [vmem:[%s8489_s2 + $0x1f8] sm:$0xff] }
  0x87   : > { %1025 = vmatpush.bf16.msrb.mxu2 %v7342_v44  ;;  %936 = vmatpush.bf16.msrb.mxu1 %v7334_v47  ;;  %v422_v44 = vld [vmem:[%s8489_s2 + $0xe8] sm:$0xff]  ;;  %v420_v47 = vld [vmem:[%s8489_s2 + $0xd8] sm:$0xff] }
  0x88   : > { %1114 = vmatpush.bf16.msrb.mxu3 %v7350_v46  ;;  %v423_v46 = vld [vmem:[%s8489_s2 + $0xf0] sm:$0xff]  ;;  %v534_v49 = vpack.c.bf16 %v422_v44, %v418_v43  ;;  %v551_v43 = vpack.c.bf16 %v455_v37, %v451_v36  ;;  %v1308_v44 = vld [vmem:[#allocation2 + $0xc] sm:$0x1] }
  0x8b   : > { %1026 = vmatpush.bf16.msrb.mxu2 %v7341_v50  ;;  %937 = vmatpush.bf16.msrb.mxu1 %v7333_v52  ;;  %v535_v50 = vpack.c.bf16 %v423_v46, %v419_v45  ;;  %v426_v52 = vld [vmem:[%s8489_s2 + $0x108] sm:$0xff]  ;;  %v552_v46 = vpack.c.bf16 %v456_v39, %v452_v38  ;;  %v7381_v38 = vld [vmem:[#allocation10 + $0xc0] sm:$0xff] }
  0x8c   : > { %1115 = vmatpush.bf16.msrb.mxu3 %v7349_v51  ;;  %v536_v51 = vpack.c.bf16 %v424_v48, %v420_v47  ;;  %v538_v58 = vpack.c.bf16 %v430_v53, %v426_v52  ;;  %v1309_v48 = vsel %vm8631_vm2, 0, %v1308_v44  ;;  %v467_v44 = vld [vmem:[%s8489_s2 + $0x250] sm:$0xff] }
  0x8d   : > { %1310 = vst [vmem:[#allocation2 + $0xc] sm:$0x1] %v1309_v48 }
  0x8e   : > { %879 = vmatmul.bf16.gmra.mxu1 %v545_v59  ;;  %899 = vmatmul.bf16.gmra.mxu2 %v561_v60  ;;  %v539_v59 = vpack.c.bf16 %v431_v55, %v427_v54  ;;  %v1358_v54 = vld [vmem:[#allocation2 + $0x14] sm:$0x1] }
  0x8f   : > { %v1359_v55 = vsel %vm8641_vm4, 0, %v1358_v54  ;;  %v468_v54 = vld [vmem:[%s8489_s2 + $0x258] sm:$0xff] }
  0x90   : > { %859 = vmatmul.bf16.gmra.mxu0 %v529_v12  ;;  %1360 = vst [vmem:[#allocation2 + $0x14] sm:$0x1] %v1359_v55  ;;  %v472_v55 = vld [vmem:[%s8489_s2 + $0x278] sm:$0xff] }
  0x91   : > { %919 = vmatmul.bf16.gmra.mxu3 %v577_v61  ;;  %v540_v61 = vpack.c.bf16 %v432_v57, %v428_v56  ;;  %v7385_v56 = vld [vmem:[#allocation10 + $0xe0] sm:$0xff]  ;;  %v458_v57 = vld [vmem:[%s8489_s2 + $0x208] sm:$0xff] }
  0x92   : > { %3176 = vmatpush.bf16.msrb.mxu0 %v7385_v56 }
  0x96   : > { %3177 = vmatpush.bf16.msrb.mxu0 %v7384_v4  ;;  %v560_v4 = vpack.c.bf16 %v472_v55, %v468_v54 }
  0x9e   : > { %884 = vmatmul.bf16.gmra.mxu1 %v549_v7  ;;  %904 = vmatmul.bf16.gmra.mxu2 %v565_v8 }
  0xa0   : > { %864 = vmatmul.bf16.gmra.mxu0 %v533_v24 }
  0xa1   : > { %924 = vmatmul.bf16.gmra.mxu3 %v581_v9  ;;  %v542_v9 = vpack.c.bf16 %v438_v2, %v434_v1  ;;  %v460_v1 = vld [vmem:[%s8489_s2 + $0x218] sm:$0xff] }
  0xa2   : > { %v464_v2 = vld [vmem:[%s8489_s2 + $0x238] sm:$0xff] }
  0xa3   : > { %v556_v11 = vpack.c.bf16 %v464_v2, %v460_v1 }
  0xae   : > { %938 = vmatmul.bf16.vlgmr.msrb.gmra.mxu1 %v522_v19  ;;  %1027 = vmatmul.bf16.vlgmr.msrb.gmra.mxu2 %v523_v20  ;;  %v446_v19 = vld [vmem:[%s8489_s2 + $0x1a8] sm:$0xff]  ;;  %v443_v20 = vld [vmem:[%s8489_s2 + $0x190] sm:$0xff] }
  0xaf   : > { %v546_v26 = vpack.c.bf16 %v446_v19, %v442_v18  ;;  %v1312_v18 = vsel %vm8631_vm2, 0, %v1311_v16  ;;  %v7383_v19 = vld [vmem:[#allocation10 + $0xd0] sm:$0xff] }
  0xb0   : > { %1313 = vst [vmem:[#allocation2 + $0x18] sm:$0x1] %v1312_v18  ;;  %3178 = vmatpush.bf16.msrb.mxu0 %v7383_v19 }
  0xb1   : > { %1116 = vmatmul.bf16.vlgmr.msrb.gmra.mxu3 %v524_v21  ;;  %v447_v21 = vld [vmem:[%s8489_s2 + $0x1b0] sm:$0xff] }
  0xb2   : > { %v547_v27 = vpack.c.bf16 %v447_v21, %v443_v20 }
  0xb4   : > { %3179 = vmatpush.bf16.msrb.mxu0 %v7382_v22 }
  0xb8   : > { %3180 = vmatpush.bf16.msrb.mxu0 %v7381_v38 }
  0xbe   : > { %943 = vmatmul.bf16.gmra.mxu1 %v526_v31  ;;  %1032 = vmatmul.bf16.gmra.mxu2 %v527_v32 }
  0xc1   : > { %1121 = vmatmul.bf16.gmra.mxu3 %v528_v33 }
  0xce   : > { %948 = vmatmul.bf16.gmra.mxu1 %v530_v40  ;;  %1037 = vmatmul.bf16.gmra.mxu2 %v531_v41 }
  0xd1   : > { %1126 = vmatmul.bf16.gmra.mxu3 %v532_v42  ;;  %v550_v42 = vpack.c.bf16 %v454_v35, %v450_v34  ;;  %v8665_v35 = vld [vmem:[#allocation13 + $0x1] ss:$0 sm:$0xff] }
  0xde   : > { %953 = vmatmul.bf16.gmra.mxu1 %v534_v49  ;;  %1042 = vmatmul.bf16.gmra.mxu2 %v535_v50 }
  0xe1   : > { %1131 = vmatmul.bf16.gmra.mxu3 %v536_v51 }
  0xeb   : > { %v8573_v60 = vpop.f32.mrf.mxu1 }
  0xed   : > { %v850_v50 = vpop.f32.mrf.mxu0 }
  0xee   : > { %958 = vmatmul.bf16.gmra.mxu1 %v538_v58  ;;  %1047 = vmatmul.bf16.gmra.mxu2 %v539_v59  ;;  %v462_v58 = vld [vmem:[%s8489_s2 + $0x228] sm:$0xff]  ;;  %v459_v59 = vld [vmem:[%s8489_s2 + $0x210] sm:$0xff] }
  0xef   : > { %v554_v6 = vpack.c.bf16 %v462_v58, %v458_v57 }
  0xf1   : > { %1136 = vmatmul.bf16.gmra.mxu3 %v540_v61  ;;  %v8575_v62 = vpop.f32.mrf.mxu2  ;;  %v463_v61 = vld [vmem:[%s8489_s2 + $0x230] sm:$0xff] }
  0xf3   : > { %v8579_v0 = vpop.f32.mrf.mxu1 }
  0xf4   : > { %v8577_v63 = vpop.f32.mrf.mxu3 }
  0xf9   : > { %v8587_v7 = vpop.f32.mrf.mxu2 }
  0xfb   : > { %v8591_v12 = vpop.f32.mrf.mxu1 }
  0xfc   : > { %v8589_v8 = vpop.f32.mrf.mxu3 }
  0xfe   : > { %963 = vmatmul.bf16.gmra.mxu1 %v542_v9  ;;  %1052 = vmatmul.bf16.gmra.mxu2 %v543_v10  ;;  %v555_v9 = vpack.c.bf16 %v463_v61, %v459_v59 }
 0x101   : > { %1141 = vmatmul.bf16.gmra.mxu3 %v544_v13  ;;  %v8593_v14 = vpop.f32.mrf.mxu2  ;;  %v852_v13 = vpop.f32.mrf.mxu0 }
 0x103   : > { %v8597_v17 = vpop.f32.mrf.mxu1 }
 0x104   : > { %v8595_v15 = vpop.f32.mrf.mxu3 }
 0x109   : > { %v8605_v24 = vpop.f32.mrf.mxu2  ;;  %v855_v37 = vpop.f32.mrf.mxu0 }
 0x10b   : > { %v8609_v29 = vpop.f32.mrf.mxu1 }
 0x10c   : > { %v8607_v25 = vpop.f32.mrf.mxu3 }
 0x10e   : > { %968 = vmatmul.bf16.gmra.mxu1 %v546_v26  ;;  %1057 = vmatmul.bf16.gmra.mxu2 %v547_v27  ;;  %v8663_v27 = vld [vmem:[#allocation13] ss:$0 sm:$0xff] }
 0x111   : > { %1146 = vmatmul.bf16.gmra.mxu3 %v548_v30  ;;  %v8611_v31 = vpop.f32.mrf.mxu2  ;;  %v1361_v30 = vld [vmem:[#allocation2 + $0x20] sm:$0x1]  ;;  %v857_v19 = vpop.f32.mrf.mxu0 }
 0x112   : > { %v1362_v36 = vsel %vm8641_vm4, 0, %v1361_v30 }
 0x113   : > { %v8615_v33 = vpop.f32.mrf.mxu1  ;;  %1363 = vst [vmem:[#allocation2 + $0x20] sm:$0x1] %v1362_v36 }
 0x114   : > { %v8613_v32 = vpop.f32.mrf.mxu3 }
 0x119   : > { %v8623_v40 = vpop.f32.mrf.mxu2 }
 0x11b   : > { %v8627_v45 = vpop.f32.mrf.mxu1 }
 0x11c   : > { %v8625_v41 = vpop.f32.mrf.mxu3 }
 0x11e   : > { %973 = vmatmul.bf16.gmra.mxu1 %v550_v42  ;;  %1062 = vmatmul.bf16.gmra.mxu2 %v551_v43  ;;  %v466_v42 = vld [vmem:[%s8489_s2 + $0x248] sm:$0xff] }
 0x11f   : > { %v470_v43 = vld [vmem:[%s8489_s2 + $0x268] sm:$0xff] }
 0x120   : > { %v558_v61 = vpack.c.bf16 %v470_v43, %v466_v42 }
 0x121   : > { %1151 = vmatmul.bf16.gmra.mxu3 %v552_v46  ;;  %v8637_v49 = vpop.f32.mrf.mxu2  ;;  %v471_v46 = vld [vmem:[%s8489_s2 + $0x270] sm:$0xff] }
 0x122   : > { %v559_v1 = vpack.c.bf16 %v471_v46, %v467_v44  ;;  %v474_v46 = vld [vmem:[%s8489_s2 + $0x288] sm:$0xff] }
 0x123   : > { %v8647_v53 = vpop.f32.mrf.mxu1 }
 0x124   : > { %v8645_v52 = vpop.f32.mrf.mxu3 }
 0x129   : > { %v8657_v3 = vpop.f32.mrf.mxu2 }
 0x12b   : > { %v939_v10 = vpop.f32.mrf.mxu1 }
 0x12c   : > { %v8659_v5 = vpop.f32.mrf.mxu3  ;;  %v940_v20 = vadd.f32 %v939_v10, %v850_v50 }
 0x12e   : > { %978 = vmatmul.bf16.gmra.mxu1 %v554_v6  ;;  %1067 = vmatmul.bf16.gmra.mxu2 %v555_v9  ;;  %v1314_v6 = vld [vmem:[#allocation2 + $0x24] sm:$0x1] }
 0x131   : > { %1156 = vmatmul.bf16.gmra.mxu3 %v556_v11  ;;  %v1028_v21 = vpop.f32.mrf.mxu2  ;;  %v1315_v11 = vsel %vm8631_vm2, 0, %v1314_v6  ;;  %v476_v6 = vld [vmem:[%s8489_s2 + $0x298] sm:$0xff] }
 0x132   : > { %v1029_v23 = vadd.f32 %v1028_v21, %v940_v20  ;;  %1316 = vst [vmem:[#allocation2 + $0x24] sm:$0x1] %v1315_v11 }
 0x133   : > { %v941_v28 = vpop.f32.mrf.mxu1 }
 0x134   : > { %v1117_v26 = vpop.f32.mrf.mxu3  ;;  %v942_v50 = vadd.f32 %v941_v28, %v852_v13 }
 0x135   : > { %v1118_v34 = vadd.f32 %v1117_v26, %v1029_v23  ;;  %v1762_v26 = vld [vmem:[#allocation2 + $0xc] sm:$0xf] }
 0x137   : > { %v1199_v39 = vmul.f32 %v8663_v27, %v1118_v34 }
 0x139   : > { %v1233_v48 = vadd.f32 %v8665_v35, %v1199_v39  ;;  %v1030_v56 = vpop.f32.mrf.mxu2  ;;  %v1364_v39 = vld [vmem:[#allocation2 + $0x2c] sm:$0x1] }
 0x13a   : > { %v1031_v58 = vadd.f32 %v1030_v56, %v942_v50  ;;  %v7364_v50 = vld [vmem:[#allocation10 + $0x38] sm:$0xff]  ;;  %v1365_v54 = vsel %vm8641_vm4, 0, %v1364_v39 }
 0x13b   : > { %v1265_v57 = vmax.f32 %v1233_v48, 0.0  ;;  %v944_v2 = vpop.f32.mrf.mxu1  ;;  %v7404_v48 = vld [vmem:[#allocation10 + $0x178] sm:$0xff]  ;;  %1366 = vst [vmem:[#allocation2 + $0x2c] sm:$0x1] %v1365_v54  ;;  %3584 = vmatpush.bf16.msra.mxu3 %v7364_v50 }
 0x13c   : > { %v1119_v59 = vpop.f32.mrf.mxu3  ;;  %v945_v18 = vadd.f32 %v944_v2, %v855_v37  ;;  %3351 = vmatpush.bf16.msra.mxu2 %v7404_v48  ;;  %v7372_v54 = vld [vmem:[#allocation10 + $0x78] sm:$0xff] }
 0x13d   : > { %v1406_v9 = vpack.c.bf16 %v1265_v57, %v1265_v57  ;;  %v1120_v10 = vadd.f32 %v1119_v59, %v1031_v58  ;;  %v478_v57 = vld [vmem:[%s8489_s2 + $0x2a8] sm:$0xff]  ;;  %v475_v58 = vld [vmem:[%s8489_s2 + $0x290] sm:$0xff]  ;;  %3673 = vmatpush.bf16.msra.mxu0 %v7372_v54  ;;  %v1773_v54 = vld [vmem:[#allocation2 + $0x20] sm:$0x1] }
 0x13e   : > { %983 = vmatmul.bf16.gmra.mxu1 %v558_v61  ;;  %1072 = vmatmul.bf16.gmra.mxu2 %v559_v1  ;;  %v479_v59 = vld [vmem:[%s8489_s2 + $0x2b0] sm:$0xff] }
 0x13f   : > { %v1441_v16 = vshrl.u32 %v1406_v9, 16  ;;  %v1200_v13 = vmul.f32 %v8663_v27, %v1120_v10  ;;  %v1444_v21 = vshll.u32 %v1406_v9, 16  ;;  %v480_v9 = vld [vmem:[%s8489_s2 + $0x2b8] sm:$0xff] }
 0x141   : > { %1161 = vmatmul.bf16.gmra.mxu3 %v560_v4  ;;  %v1443_v20 = vrot.slane %v1441_v16, 7  ;;  %v1234_v22 = vadd.f32 %v8665_v35, %v1200_v13  ;;  %v1033_v28 = vpop.f32.mrf.mxu2  ;;  %v1766_v16 = vld [vmem:[#allocation2 + $0x14] sm:$0x1]  ;;  %v860_v13 = vpop.f32.mrf.mxu0 }
 0x142   : > { %v1034_v36 = vadd.f32 %v1033_v28, %v945_v18 }
 0x143   : > { %v1446_v30 = vor.u32 %v1444_v21, %v1443_v20  ;;  %v1266_v34 = vmax.f32 %v1234_v22, 0.0  ;;  %v946_v38 = vpop.f32.mrf.mxu1  ;;  %v1447_v10 = vrot.slane %v1443_v20, 4  ;;  %v562_v21 = vpack.c.bf16 %v478_v57, %v474_v46 }
 0x144   : > { %v1122_v37 = vpop.f32.mrf.mxu3  ;;  %v947_v4 = vadd.f32 %v946_v38, %v857_v19  ;;  %v563_v22 = vpack.c.bf16 %v479_v59, %v475_v58  ;;  %v1317_v38 = vld [vmem:[#allocation2 + $0x30] sm:$0x1]  ;;  %v1769_v59 = vld [vmem:[#allocation2 + $0x18] sm:$0xf] }
 0x145   : > { %v1763_v42 = vsel %vm8682_vm6, %v1446_v30, %v1762_v26  ;;  %v1407_v43 = vpack.c.bf16 %v1266_v34, %v1266_v34  ;;  %v1123_v44 = vadd.f32 %v1122_v37, %v1034_v36  ;;  %v564_v37 = vpack.c.bf16 %v480_v9, %v476_v6 }
 0x146   : > { %1764 = vst [vmem:[#allocation2 + $0xc] sm:$0xf] %v1763_v42 }
 0x147   : > { %v1449_v55 = vshrl.u32 %v1407_v43, 16  ;;  %v1201_v56 = vmul.f32 %v8663_v27, %v1123_v44  ;;  %v1452_v1 = vshll.u32 %v1407_v43, 16  ;;  %v1318_v44 = vsel %vm8631_vm2, 0, %v1317_v38  ;;  %v487_v38 = vld [vmem:[%s8489_s2 + $0x2f0] sm:$0xff] }
 0x148   : > { %1319 = vst [vmem:[#allocation2 + $0x30] sm:$0x1] %v1318_v44  ;;  %v484_v44 = vld [vmem:[%s8489_s2 + $0x2d8] sm:$0xff] }
 0x149   : > { %v1451_v61 = vrot.slane %v1449_v55, 7  ;;  %v1235_v2 = vadd.f32 %v8665_v35, %v1201_v56  ;;  %v1035_v18 = vpop.f32.mrf.mxu2  ;;  %v7396_v55 = vld [vmem:[#allocation10 + $0x138] sm:$0xff]  ;;  %v862_v9 = vpop.f32.mrf.mxu0 }
 0x14a   : > { %v1036_v34 = vadd.f32 %v1035_v18, %v947_v4  ;;  %3262 = vmatpush.bf16.msra.mxu1 %v7396_v55 }
 0x14b   : > { %v1454_v26 = vor.u32 %v1452_v1, %v1451_v61  ;;  %v1456_v28 = vrot.slane %v1451_v61, 4  ;;  %v1267_v30 = vmax.f32 %v1235_v2, 0.0  ;;  %v949_v19 = vpop.f32.mrf.mxu1 }
 0x14c   : > { %v1124_v36 = vpop.f32.mrf.mxu3  ;;  %v950_v50 = vadd.f32 %v949_v19, %v860_v13  ;;  %v486_v19 = vld [vmem:[%s8489_s2 + $0x2e8] sm:$0xff] }
 0x14d   : > { %v1455_v20 = vsel %vm8700_vm8, %v1447_v10, %v1454_v26  ;;  %v1767_v39 = vsel %vm8631_vm2, %v1456_v28, %v1766_v16  ;;  %v1408_v42 = vpack.c.bf16 %v1267_v30, %v1267_v30  ;;  %v1125_v43 = vadd.f32 %v1124_v36, %v1036_v34  ;;  %v1367_v16 = vld [vmem:[#allocation2 + $0x38] sm:$0x1]  ;;  %v482_v28 = vld [vmem:[%s8489_s2 + $0x2c8] sm:$0xff] }
 0x14e   : > { %1765 = vst [vmem:[#allocation2 + $0x10] sm:$0xf] %v1455_v20  ;;  %988 = vmatmul.bf16.gmra.mxu1 %v562_v21  ;;  %1077 = vmatmul.bf16.gmra.mxu2 %v563_v22  ;;  %v1368_v30 = vsel %vm8641_vm4, 0, %v1367_v16 }
 0x14f   : > { %1768 = vst [vmem:[#allocation2 + $0x14] sm:$0x1] %v1767_v39  ;;  %v1458_v46 = vshrl.u32 %v1408_v42, 16  ;;  %v1202_v48 = vmul.f32 %v8663_v27, %v1125_v43  ;;  %v1461_v57 = vshll.u32 %v1408_v42, 16 }
 0x150   : > { %1369 = vst [vmem:[#allocation2 + $0x38] sm:$0x1] %v1368_v30 }
 0x151   : > { %1166 = vmatmul.bf16.gmra.mxu3 %v564_v37  ;;  %v1460_v56 = vrot.slane %v1458_v46, 7  ;;  %v1236_v58 = vadd.f32 %v8665_v35, %v1202_v48  ;;  %v1038_v61 = vpop.f32.mrf.mxu2  ;;  %v483_v37 = vld [vmem:[%s8489_s2 + $0x2d0] sm:$0xff]  ;;  %v488_v46 = vld [vmem:[%s8489_s2 + $0x2f8] sm:$0xff] }
 0x152   : > { %v1039_v4 = vadd.f32 %v1038_v61, %v950_v50 }
 0x153   : > { %v1463_v1 = vor.u32 %v1461_v57, %v1460_v56  ;;  %v1268_v2 = vmax.f32 %v1236_v58, 0.0  ;;  %v951_v10 = vpop.f32.mrf.mxu1  ;;  %v1464_v50 = vrot.slane %v1460_v56, 4  ;;  %v566_v57 = vpack.c.bf16 %v486_v19, %v482_v28 }
 0x154   : > { %v1127_v6 = vpop.f32.mrf.mxu3  ;;  %v952_v43 = vadd.f32 %v951_v10, %v862_v9  ;;  %v567_v58 = vpack.c.bf16 %v487_v38, %v483_v37  ;;  %v568_v10 = vpack.c.bf16 %v488_v46, %v484_v44  ;;  %v1776_v46 = vld [vmem:[#allocation2 + $0x24] sm:$0xf] }
 0x155   : > { %v1770_v13 = vsel %vm8682_vm6, %v1463_v1, %v1769_v59  ;;  %v1409_v18 = vpack.c.bf16 %v1268_v2, %v1268_v2  ;;  %v1128_v21 = vadd.f32 %v1127_v6, %v1039_v4  ;;  %v8714_v22 = vld [vmem:[#allocation2 + $0xc] sm:$0xff]  }
 0x156   : > { %v8716_v26 = vld [vmem:[#allocation2 + $0xc] sm:$0xf0]  ;;  %1771 = vst [vmem:[#allocation2 + $0x18] sm:$0xf] %v1770_v13  ;;  %v1907_v48 = vld [vmem:[#allocation2 + $0x14] sm:$0x1]  ;;  %3181 = vmatmul.bf16.vlgmr.msrb.gmra.mxu0 %v8714_v22  ;;  %v865_v13 = vpop.f32.mrf.mxu0 }
 0x157   : > { %v1466_v34 = vshrl.u32 %v1409_v18, 16  ;;  %v1203_v36 = vmul.f32 %v8663_v27, %v1128_v21  ;;  %v1469_v39 = vshll.u32 %v1409_v18, 16  ;;  %v8729_v6 = vld [vmem:[#allocation2 + $0xc] sm:$0xff]   ;;  %v1320_v18 = vld [vmem:[#allocation2 + $0x3c] sm:$0x1]  ;;  %v2051_v21 = vunpack.c.l.b16 %v1907_v48 }
 0x158   : > { %v8258_v16 = vld [vmem:[#allocation2 + $0xc] sm:$0xf0]  ;;  %v1321_v19 = vsel %vm8631_vm2, 0, %v1320_v18 }
 0x159   : > { %v1468_v20 = vrot.slane %v1466_v34, 7  ;;  %v1237_v42 = vadd.f32 %v8665_v35, %v1203_v36  ;;  %v1040_v55 = vpop.f32.mrf.mxu2  ;;  %v8259_v36 = vld [vmem:[#allocation2 + $0xc] sm:$0xe]  ;;  %1322 = vst [vmem:[#allocation2 + $0x3c] sm:$0x1] %v1321_v19 }
 0x15a   : > { %v1041_v2 = vadd.f32 %v1040_v55, %v952_v43  ;;  %v7403_v18 = vld [vmem:[#allocation10 + $0x170] sm:$0xff] }
 0x15b   : > { %v1471_v59 = vor.u32 %v1469_v39, %v1468_v20  ;;  %v1473_v61 = vrot.slane %v1468_v20, 4  ;;  %v1269_v1 = vmax.f32 %v1237_v42, 0.0  ;;  %v954_v9 = vpop.f32.mrf.mxu1  ;;  %v8738_v39 = vpack.c.b16 %v2051_v21, %v2051_v21  ;;  %v7363_v21 = vld [vmem:[#allocation10 + $0x30] sm:$0xff]  ;;  %3352 = vmatpush.bf16.msra.mxu2 %v7403_v18 }
 0x15c   : > { %v1129_v4 = vpop.f32.mrf.mxu3  ;;  %v955_v20 = vadd.f32 %v954_v9, %v865_v13  ;;  %3585 = vmatpush.bf16.msra.mxu3 %v7363_v21 }
 0x15d   : > { %v1472_v56 = vsel %vm8700_vm8, %v1464_v50, %v1471_v59  ;;  %v1774_v28 = vsel %vm8631_vm2, %v1473_v61, %v1773_v54  ;;  %v1410_v30 = vpack.c.bf16 %v1269_v1, %v1269_v1  ;;  %v1130_v34 = vadd.f32 %v1129_v4, %v1041_v2 }
 0x15e   : > { %1772 = vst [vmem:[#allocation2 + $0x1c] sm:$0xf] %v1472_v56  ;;  %993 = vmatmul.bf16.gmra.mxu1 %v566_v57  ;;  %1082 = vmatmul.bf16.gmra.mxu2 %v567_v58  ;;  %v8260_v50 = vor.u32 %v8259_v36, %v8258_v16  ;;  %v1370_v57 = vld [vmem:[#allocation2 + $0x44] sm:$0x1]  ;;  %v2344_v2 = vrot.slane %v8738_v39, 1  ;;  %v867_v16 = vpop.f32.mrf.mxu0  ;;  %v495_v36 = vld [vmem:[%s8489_s2 + $0x330] sm:$0xff] }
 0x15f   : > { %1775 = vst [vmem:[#allocation2 + $0x20] sm:$0x1] %v1774_v28  ;;  %v1475_v37 = vshrl.u32 %v1410_v30, 16  ;;  %v1204_v38 = vmul.f32 %v8663_v27, %v1130_v34  ;;  %v1478_v43 = vshll.u32 %v1410_v30, 16  ;;  %v494_v30 = vld [vmem:[%s8489_s2 + $0x328] sm:$0xff]  ;;  %v491_v34 = vld [vmem:[%s8489_s2 + $0x310] sm:$0xff] }
 0x160   : > { %v2343_v58 = vrot.slane %v8260_v50, 1  ;;  %v1371_v19 = vsel %vm8641_vm4, 0, %v1370_v57  ;;  %v496_v50 = vld [vmem:[%s8489_s2 + $0x338] sm:$0xff]  ;;  %v571_v57 = vpack.c.bf16 %v495_v36, %v491_v34  ;;  %v7371_v36 = vld [vmem:[#allocation10 + $0x70] sm:$0xff] }
 0x161   : > { %1171 = vmatmul.bf16.gmra.mxu3 %v568_v10  ;;  %v1477_v42 = vrot.slane %v1475_v37, 7  ;;  %v1238_v44 = vadd.f32 %v8665_v35, %v1204_v38  ;;  %v1043_v48 = vpop.f32.mrf.mxu2  ;;  %v490_v10 = vld [vmem:[%s8489_s2 + $0x308] sm:$0xff]  ;;  %1372 = vst [vmem:[#allocation2 + $0x44] sm:$0x1] %v1371_v19  ;;  %v7395_v19 = vld [vmem:[#allocation10 + $0x130] sm:$0xff]  ;;  %3674 = vmatpush.bf16.msra.mxu0 %v7371_v36 }
 0x162   : > { %v1044_v59 = vadd.f32 %v1043_v48, %v955_v20  ;;  %v8752_v37 = vsel %vm2339_vm9, %v2343_v58, %v2344_v2  ;;  %v492_v48 = vld [vmem:[%s8489_s2 + $0x318] sm:$0xff]  ;;  %3263 = vmatpush.bf16.msra.mxu1 %v7395_v19 }
 0x163   : > { %v1480_v54 = vor.u32 %v1478_v43, %v1477_v42  ;;  %v1270_v55 = vmax.f32 %v1238_v44, 0.0  ;;  %v956_v1 = vpop.f32.mrf.mxu1  ;;  %12284 = vst [vmem:[#allocation24_spill] sm:$0xff] %v8752_v37  ;;  %v572_v21 = vpack.c.bf16 %v496_v50, %v492_v48  ;;  %v1783_v48 = vld [vmem:[#allocation2 + $0x30] sm:$0xf]  ;;  %v7393_v37 = vld [vmem:[#allocation10 + $0x120] sm:$0xff] }
 0x164   : > { %v1132_v61 = vpop.f32.mrf.mxu3  ;;  %v957_v44 = vadd.f32 %v956_v1, %v867_v16 }
 0x165   : > { %v1777_v4 = vsel %vm8682_vm6, %v1480_v54, %v1776_v46  ;;  %v1411_v13 = vpack.c.bf16 %v1270_v55, %v1270_v55  ;;  %v1133_v9 = vadd.f32 %v1132_v61, %v1044_v59  ;;  %v8755_v46 = vld [vmem:[#allocation2 + $0x18] sm:$0xff]   ;;  %v1481_v54 = vrot.slane %v1477_v42, 4  ;;  %v1780_v55 = vld [vmem:[#allocation2 + $0x2c] sm:$0x1] }
 0x166   : > { %1778 = vst [vmem:[#allocation2 + $0x24] sm:$0xf] %v1777_v4  ;;  %3186 = vmatmul.bf16.gmra.mxu0 %v8755_v46  ;;  %v570_v61 = vpack.c.bf16 %v494_v30, %v490_v10 }
 0x167   : > { %v1483_v56 = vshrl.u32 %v1411_v13, 16  ;;  %v1205_v28 = vmul.f32 %v8663_v27, %v1133_v9  ;;  %v1486_v20 = vshll.u32 %v1411_v13, 16 }
 0x169   : > { %v1485_v38 = vrot.slane %v1483_v56, 7  ;;  %v1239_v43 = vadd.f32 %v8665_v35, %v1205_v28  ;;  %v1045_v59 = vpop.f32.mrf.mxu2  ;;  %v1323_v56 = vld [vmem:[#allocation2 + $0x48] sm:$0x1] }
 0x16a   : > { %v1046_v2 = vadd.f32 %v1045_v59, %v957_v44  ;;  %v1324_v10 = vsel %vm8631_vm2, 0, %v1323_v56 }
 0x16b   : > { %v1488_v4 = vor.u32 %v1486_v20, %v1485_v38  ;;  %v1490_v9 = vrot.slane %v1485_v38, 4  ;;  %v1271_v58 = vmax.f32 %v1239_v43, 0.0  ;;  %v959_v13 = vpop.f32.mrf.mxu1  ;;  %1325 = vst [vmem:[#allocation2 + $0x48] sm:$0x1] %v1324_v10  ;;  %v7402_v10 = vld [vmem:[#allocation10 + $0x168] sm:$0xff] }
 0x16c   : > { %v1134_v18 = vpop.f32.mrf.mxu3  ;;  %v960_v44 = vadd.f32 %v959_v13, %v8573_v60  ;;  %v498_v13 = vld [vmem:[%s8489_s2 + $0x348] sm:$0xff]  ;;  %3353 = vmatpush.bf16.msra.mxu2 %v7402_v10 }
 0x16d   : > { %v1489_v1 = vsel %vm8700_vm8, %v1481_v54, %v1488_v4  ;;  %v1781_v42 = vsel %vm8631_vm2, %v1490_v9, %v1780_v55  ;;  %v1412_v16 = vpack.c.bf16 %v1271_v58, %v1271_v58  ;;  %v1135_v28 = vadd.f32 %v1134_v18, %v1046_v2  ;;  %v1373_v4 = vld [vmem:[#allocation2 + $0x50] sm:$0x1] }
 0x16e   : > { %1779 = vst [vmem:[#allocation2 + $0x28] sm:$0xf] %v1489_v1  ;;  %998 = vmatmul.bf16.gmra.mxu1 %v570_v61  ;;  %1087 = vmatmul.bf16.gmra.mxu2 %v571_v57 }
 0x16f   : > { %1782 = vst [vmem:[#allocation2 + $0x2c] sm:$0x1] %v1781_v42  ;;  %v1492_v30 = vshrl.u32 %v1412_v16, 16  ;;  %v1206_v34 = vmul.f32 %v8663_v27, %v1135_v28  ;;  %v1495_v20 = vshll.u32 %v1412_v16, 16  ;;  %v502_v42 = vld [vmem:[%s8489_s2 + $0x368] sm:$0xff]  ;;  %v499_v16 = vld [vmem:[%s8489_s2 + $0x350] sm:$0xff] }
 0x170   : > { %v503_v28 = vld [vmem:[%s8489_s2 + $0x370] sm:$0xff] }
 0x171   : > { %1176 = vmatmul.bf16.gmra.mxu3 %v572_v21  ;;  %v1494_v38 = vrot.slane %v1492_v30, 7  ;;  %v1240_v43 = vadd.f32 %v8665_v35, %v1206_v34  ;;  %v1048_v50 = vpop.f32.mrf.mxu2  ;;  %v1374_v21 = vsel %vm8641_vm4, 0, %v1373_v4  ;;  %v7362_v30 = vld [vmem:[#allocation10 + $0x28] sm:$0xff] }
 0x172   : > { %v1049_v59 = vadd.f32 %v1048_v50, %v960_v44  ;;  %1375 = vst [vmem:[#allocation2 + $0x50] sm:$0x1] %v1374_v21  ;;  %v7394_v34 = vld [vmem:[#allocation10 + $0x128] sm:$0xff]  ;;  %v500_v44 = vld [vmem:[%s8489_s2 + $0x358] sm:$0xff]  ;;  %3586 = vmatpush.bf16.msra.mxu3 %v7362_v30 }
 0x173   : > { %v1497_v54 = vor.u32 %v1495_v20, %v1494_v38  ;;  %v1272_v55 = vmax.f32 %v1240_v43, 0.0  ;;  %v961_v57 = vpop.f32.mrf.mxu1  ;;  %v1498_v50 = vrot.slane %v1494_v38, 4  ;;  %3264 = vmatpush.bf16.msra.mxu1 %v7394_v34 }
 0x174   : > { %v1137_v61 = vpop.f32.mrf.mxu3  ;;  %v962_v43 = vadd.f32 %v961_v57, %v8579_v0  ;;  %v1326_v57 = vld [vmem:[#allocation2 + $0x54] sm:$0x1] }
 0x175   : > { %v1784_v9 = vsel %vm8682_vm6, %v1497_v54, %v1783_v48  ;;  %v1413_v58 = vpack.c.bf16 %v1272_v55, %v1272_v55  ;;  %v1138_v2 = vadd.f32 %v1137_v61, %v1049_v59  ;;  %v8771_v60 = vld [vmem:[#allocation2 + $0x24] sm:$0xff]   ;;  %v504_v48 = vld [vmem:[%s8489_s2 + $0x378] sm:$0xff]  ;;  %v574_v59 = vpack.c.bf16 %v502_v42, %v498_v13 }
 0x176   : > { %v8773_v18 = vld [vmem:[#allocation2 + $0x24] sm:$0xf0]  ;;  %1785 = vst [vmem:[#allocation2 + $0x30] sm:$0xf] %v1784_v9  ;;  %v1787_v54 = vld [vmem:[#allocation2 + $0x38] sm:$0x1]  ;;  %3191 = vmatmul.bf16.gmra.mxu0 %v8771_v60  ;;  %v575_v61 = vpack.c.bf16 %v503_v28, %v499_v16  ;;  %v576_v0 = vpack.c.bf16 %v504_v48, %v500_v44 }
 0x177   : > { %v1500_v56 = vshrl.u32 %v1413_v58, 16  ;;  %v1207_v1 = vmul.f32 %v8663_v27, %v1138_v2  ;;  %v1503_v19 = vshll.u32 %v1413_v58, 16  ;;  %v7401_v58 = vld [vmem:[#allocation10 + $0x160] sm:$0xff]  ;;  %v1327_v10 = vsel %vm8631_vm2, 0, %v1326_v57  ;;  %3265 = vmatpush.bf16.msra.mxu1 %v7393_v37  ;;  %v506_v57 = vld [vmem:[%s8489_s2 + $0x388] sm:$0xff] }
 0x178   : > { %v7361_v28 = vld [vmem:[#allocation10 + $0x20] sm:$0xff]  ;;  %3354 = vmatpush.bf16.msra.mxu2 %v7401_v58  ;;  %1328 = vst [vmem:[#allocation2 + $0x54] sm:$0x1] %v1327_v10  ;;  %v511_v10 = vld [vmem:[%s8489_s2 + $0x3b0] sm:$0xff] }
 0x179   : > { %v1502_v36 = vrot.slane %v1500_v56, 7  ;;  %v1241_v20 = vadd.f32 %v8665_v35, %v1207_v1  ;;  %v1050_v55 = vpop.f32.mrf.mxu2  ;;  %3587 = vmatpush.bf16.msra.mxu3 %v7361_v28  ;;  %v507_v28 = vld [vmem:[%s8489_s2 + $0x390] sm:$0xff] }
 0x17a   : > { %v1051_v21 = vadd.f32 %v1050_v55, %v962_v43 }
 0x17b   : > { %v1505_v4 = vor.u32 %v1503_v19, %v1502_v36  ;;  %v1507_v9 = vrot.slane %v1502_v36, 4  ;;  %v1273_v2 = vmax.f32 %v1241_v20, 0.0  ;;  %v964_v1 = vpop.f32.mrf.mxu1  ;;  %v7392_v36 = vld [vmem:[#allocation10 + $0x118] sm:$0xff] }
 0x17c   : > { %v1139_v56 = vpop.f32.mrf.mxu3  ;;  %v7400_v19 = vld [vmem:[#allocation10 + $0x158] sm:$0xff]  ;;  %v965_v48 = vadd.f32 %v964_v1, %v8591_v12  ;;  %3266 = vmatpush.bf16.msra.mxu1 %v7392_v36  ;;  %v7398_v36 = vld [vmem:[#allocation10 + $0x148] sm:$0xff] }
 0x17d   : > { %v1506_v38 = vsel %vm8700_vm8, %v1498_v50, %v1505_v4  ;;  %v1788_v13 = vsel %vm8631_vm2, %v1507_v9, %v1787_v54  ;;  %v1414_v42 = vpack.c.bf16 %v1273_v2, %v1273_v2  ;;  %v1140_v16 = vadd.f32 %v1139_v56, %v1051_v21  ;;  %v7360_v50 = vld [vmem:[#allocation10 + $0x18] sm:$0xff]  ;;  %3355 = vmatpush.bf16.msra.mxu2 %v7400_v19  ;;  %v7399_v9 = vld [vmem:[#allocation10 + $0x150] sm:$0xff] }
 0x17e   : > { %1786 = vst [vmem:[#allocation2 + $0x34] sm:$0xf] %v1506_v38  ;;  %1003 = vmatmul.bf16.gmra.mxu1 %v574_v59  ;;  %1092 = vmatmul.bf16.gmra.mxu2 %v575_v61  ;;  %v1790_v54 = vld [vmem:[#allocation2 + $0x3c] sm:$0xf]  ;;  %v7391_v56 = vld [vmem:[#allocation10 + $0x110] sm:$0xff] }
 0x17f   : > { %1789 = vst [vmem:[#allocation2 + $0x38] sm:$0x1] %v1788_v13  ;;  %v1509_v30 = vshrl.u32 %v1414_v42, 16  ;;  %v1208_v34 = vmul.f32 %v8663_v27, %v1140_v16  ;;  %v1512_v43 = vshll.u32 %v1414_v42, 16  ;;  %v1376_v21 = vld [vmem:[#allocation2 + $0x5c] sm:$0x1]  ;;  %3588 = vmatpush.bf16.msra.mxu3 %v7360_v50 }
 0x180   : > { %v1377_v38 = vsel %vm8641_vm4, 0, %v1376_v21  ;;  %v510_v16 = vld [vmem:[%s8489_s2 + $0x3a8] sm:$0xff]  ;;  %3267 = vmatpush.bf16.msra.mxu1 %v7391_v56 }
 0x181   : > { %1181 = vmatmul.bf16.gmra.mxu3 %v576_v0  ;;  %v8794_v20 = vrot.slane %v1509_v30, 7  ;;  %v1242_v44 = vadd.f32 %v8665_v35, %v1208_v34  ;;  %v1053_v55 = vpop.f32.mrf.mxu2  ;;  %v7359_v0 = vld [vmem:[#allocation10 + $0x10] sm:$0xff]  ;;  %3356 = vmatpush.bf16.msra.mxu2 %v7399_v9  ;;  %1378 = vst [vmem:[#allocation2 + $0x5c] sm:$0x1] %v1377_v38  ;;  %v508_v30 = vld [vmem:[%s8489_s2 + $0x398] sm:$0xff]  ;;  %v7390_v34 = vld [vmem:[#allocation10 + $0x108] sm:$0xff]  ;;  %v579_v9 = vpack.c.bf16 %v511_v10, %v507_v28 }
 0x182   : > { %v1054_v4 = vadd.f32 %v1053_v55, %v965_v48  ;;  %v7358_v55 = vld [vmem:[#allocation10 + $0x8] sm:$0xff]  ;;  %v7357_v10 = vld [vmem:[#allocation10] sm:$0xff] }
 0x183   : > { %v1514_v59 = vor.u32 %v1512_v43, %v8794_v20  ;;  %v1274_v61 = vmax.f32 %v1242_v44, 0.0  ;;  %v966_v2 = vpop.f32.mrf.mxu1  ;;  %3589 = vmatpush.bf16.msra.mxu3 %v7359_v0  ;;  %v7389_v0 = vld [vmem:[#allocation10 + $0x100] sm:$0xff] }
 0x184   : > { %v1142_v37 = vpop.f32.mrf.mxu3  ;;  %v967_v48 = vadd.f32 %v966_v2, %v8597_v17  ;;  %v7397_v17 = vld [vmem:[#allocation10 + $0x140] sm:$0xff]  ;;  %3268 = vmatpush.bf16.msra.mxu1 %v7390_v34 }
 0x185   : > { %v1791_v12 = vsel %vm8682_vm6, %v1514_v59, %v1790_v54  ;;  %v1415_v58 = vpack.c.bf16 %v1274_v61, %v1274_v61  ;;  %v1143_v1 = vadd.f32 %v1142_v37, %v1054_v4  ;;  %v8811_v50 = vld [vmem:[#allocation2 + $0x30] sm:$0xff]   ;;  %v1515_v59 = vrot.slane %v8794_v20, 4  ;;  %v1794_v61 = vld [vmem:[#allocation2 + $0x44] sm:$0x1]  ;;  %3357 = vmatpush.bf16.msra.mxu2 %v7398_v36 }
 0x186   : > { %1792 = vst [vmem:[#allocation2 + $0x3c] sm:$0xf] %v1791_v12  ;;  %v512_v54 = vld [vmem:[%s8489_s2 + $0x3b8] sm:$0xff]  ;;  %3196 = vmatmul.bf16.gmra.mxu0 %v8811_v50  ;;  %v578_v37 = vpack.c.bf16 %v510_v16, %v506_v57 }
 0x187   : > { %v1517_v13 = vshrl.u32 %v1415_v58, 16  ;;  %v1209_v42 = vmul.f32 %v8663_v27, %v1143_v1  ;;  %v1520_v43 = vshll.u32 %v1415_v58, 16  ;;  %v580_v38 = vpack.c.bf16 %v512_v54, %v508_v30  ;;  %3590 = vmatpush.bf16.msra.mxu3 %v7358_v55  ;;  %v1797_v55 = vld [vmem:[#allocation2 + $0x48] sm:$0xf] }
 0x188   : > { %3269 = vmatpush.bf16.msra.mxu1 %v7389_v0 }
 0x189   : > { %v1519_v19 = vrot.slane %v1517_v13, 7  ;;  %v1243_v44 = vadd.f32 %v8665_v35, %v1209_v42  ;;  %v1055_v4 = vpop.f32.mrf.mxu2  ;;  %v1329_v13 = vld [vmem:[#allocation2 + $0x60] sm:$0x1]  ;;  %v8307_v42 = vmov 0   ;;  %3358 = vmatpush.bf16.msra.mxu2 %v7397_v17 }
 0x18a   : > { %v1056_v58 = vadd.f32 %v1055_v4, %v967_v48  ;;  %1297 = vst [vmem:[#allocation2] sm:$0xf] %v8307_v42  ;;  %v1330_v36 = vsel %vm8631_vm2, 0, %v1329_v13 }
 0x18b   : > { %v1522_v21 = vor.u32 %v1520_v43, %v1519_v19  ;;  %v1524_v56 = vrot.slane %v1519_v19, 4  ;;  %v1275_v12 = vmax.f32 %v1243_v44, 0.0  ;;  %v969_v2 = vpop.f32.mrf.mxu1  ;;  %v7370_v19 = vld [vmem:[#allocation10 + $0x68] sm:$0xff]  ;;  %1331 = vst [vmem:[#allocation2 + $0x60] sm:$0x1] %v1330_v36  ;;  %3591 = vmatpush.bf16.msra.mxu3 %v7357_v10 }
 0x18c   : > { %v1144_v1 = vpop.f32.mrf.mxu3  ;;  %v970_v54 = vadd.f32 %v969_v2, %v8609_v29  ;;  %3675 = vmatpush.bf16.msra.mxu0 %v7370_v19  ;;  %1298 = vst [vmem:[#allocation2 + $0x4] sm:$0xf] %v8307_v42  ;;  %v514_v2 = vld [vmem:[%s8489_s2 + $0x3c8] sm:$0xff] }
 0x18d   : > { %v1523_v20 = vsel %vm8700_vm8, %v1515_v59, %v1522_v21  ;;  %v1795_v57 = vsel %vm8631_vm2, %v1524_v56, %v1794_v61  ;;  %v1416_v16 = vpack.c.bf16 %v1275_v12, %v1275_v12  ;;  %v1145_v28 = vadd.f32 %v1144_v1, %v1056_v58  ;;  %1299 = vst [vmem:[#allocation2 + $0x8] sm:$0x1] %v8307_v42  ;;  %v1379_v56 = vld [vmem:[#allocation2 + $0x68] sm:$0x1] }
 0x18e   : > { %1793 = vst [vmem:[#allocation2 + $0x40] sm:$0xf] %v1523_v20  ;;  %1008 = vmatmul.bf16.gmra.mxu1 %v578_v37  ;;  %1097 = vmatmul.bf16.gmra.mxu2 %v579_v9  ;;  %v518_v20 = vld [vmem:[%s8489_s2 + $0x3e8] sm:$0xff] }
 0x18f   : > { %1796 = vst [vmem:[#allocation2 + $0x44] sm:$0x1] %v1795_v57  ;;  %v1526_v30 = vshrl.u32 %v1416_v16, 16  ;;  %v1210_v34 = vmul.f32 %v8663_v27, %v1145_v28  ;;  %v1529_v44 = vshll.u32 %v1416_v16, 16  ;;  %v515_v57 = vld [vmem:[%s8489_s2 + $0x3d0] sm:$0xff] }
 0x190   : > { %1301 = vst [vmem:[#allocation2 + $0xcc] sm:$0xf] %v8307_v42  ;;  %v519_v16 = vld [vmem:[%s8489_s2 + $0x3f0] sm:$0xff] }
 0x191   : > { %1186 = vmatmul.bf16.gmra.mxu3 %v580_v38  ;;  %v1528_v43 = vrot.slane %v1526_v30, 7  ;;  %v1244_v48 = vadd.f32 %v8665_v35, %v1210_v34  ;;  %v1058_v59 = vpop.f32.mrf.mxu2  ;;  %1302 = vst [vmem:[#allocation2 + $0xd0] sm:$0xf] %v8307_v42  ;;  %v1380_v38 = vsel %vm8641_vm4, 0, %v1379_v56  ;;  %v516_v34 = vld [vmem:[%s8489_s2 + $0x3d8] sm:$0xff] }
 0x192   : > { %v1059_v37 = vadd.f32 %v1058_v59, %v970_v54  ;;  %1303 = vst [vmem:[#allocation2 + $0xd4] sm:$0x1] %v8307_v42  ;;  %v520_v42 = vld [vmem:[%s8489_s2 + $0x3f8] sm:$0xff]  ;;  %v582_v54 = vpack.c.bf16 %v518_v20, %v514_v2  ;;  %v1332_v20 = vld [vmem:[#allocation2 + $0x6c] sm:$0x1] }
 0x193   : > { %v1531_v61 = vor.u32 %v1529_v44, %v1528_v43  ;;  %v1276_v4 = vmax.f32 %v1244_v48, 0.0  ;;  %v971_v21 = vpop.f32.mrf.mxu1  ;;  %1381 = vst [vmem:[#allocation2 + $0x68] sm:$0x1] %v1380_v38  ;;  %v1532_v19 = vrot.slane %v1528_v43, 4  ;;  %v1801_v44 = vld [vmem:[#allocation2 + $0x50] sm:$0x1] }
 0x194   : > { %v1147_v9 = vpop.f32.mrf.mxu3  ;;  %v972_v30 = vadd.f32 %v971_v21, %v8615_v33 }
 0x195   : > { %v1798_v29 = vsel %vm8682_vm6, %v1531_v61, %v1797_v55  ;;  %v1417_v12 = vpack.c.bf16 %v1276_v4, %v1276_v4  ;;  %v1148_v58 = vadd.f32 %v1147_v9, %v1059_v37  ;;  %v8827_v1 = vld [vmem:[#allocation2 + $0x3c] sm:$0xff]   ;;  %v583_v55 = vpack.c.bf16 %v519_v16, %v515_v57  ;;  %v7945_v57 = vld [vmem:[#allocation2 + $0xc] sm:$0xe] }
 0x196   : > { %v8829_v17 = vld [vmem:[#allocation2 + $0x3c] sm:$0xf0]  ;;  %1799 = vst [vmem:[#allocation2 + $0x48] sm:$0xf] %v1798_v29  ;;  %3201 = vmatmul.bf16.gmra.mxu0 %v8827_v1  ;;  %v584_v29 = vpack.c.bf16 %v520_v42, %v516_v34  ;;  %v1804_v34 = vld [vmem:[#allocation2 + $0x54] sm:$0xf] }
 0x197   : > { %v1534_v13 = vshrl.u32 %v1417_v12, 16  ;;  %v1211_v0 = vmul.f32 %v8663_v27, %v1148_v58  ;;  %v1537_v10 = vshll.u32 %v1417_v12, 16  ;;  %v2484_v58 = vld [vmem:[#allocation2 + $0x14] sm:$0x1] }
 0x199   : > { %v1536_v28 = vrot.slane %v1534_v13, 7  ;;  %v1245_v36 = vadd.f32 %v8665_v35, %v1211_v0  ;;  %v1060_v48 = vpop.f32.mrf.mxu2  ;;  %v2628_v0 = vunpack.c.l.b16 %v2484_v58 }
 0x19a   : > { %v1061_v37 = vadd.f32 %v1060_v48, %v972_v30  ;;  %v2663_v30 = vshll.u32 %v8714_v22, 16 }
 0x19b   : > { %v1539_v59 = vor.u32 %v1537_v10, %v1536_v28  ;;  %v1541_v61 = vrot.slane %v1536_v28, 4  ;;  %v1277_v4 = vmax.f32 %v1245_v36, 0.0  ;;  %v974_v56 = vpop.f32.mrf.mxu1  ;;  %v1333_v36 = vsel %vm8631_vm2, 0, %v1332_v20 }
 0x19c   : > { %v1149_v9 = vpop.f32.mrf.mxu3  ;;  %v975_v13 = vadd.f32 %v974_v56, %v8627_v45  ;;  %1334 = vst [vmem:[#allocation2 + $0x6c] sm:$0x1] %v1333_v36  ;;  %v7946_v56 = vor.u32 %v7945_v57, %v8716_v26  ;;  %v8864_v57 = vld [vmem:[#allocation2 + $0x24] sm:$0xff]   ;;  %v1808_v36 = vld [vmem:[#allocation2 + $0x5c] sm:$0x1] }
 0x19d   : > { %v1540_v12 = vsel %vm8700_vm8, %v1532_v19, %v1539_v59  ;;  %v1802_v33 = vsel %vm8631_vm2, %v1541_v61, %v1801_v44  ;;  %v1418_v43 = vpack.c.bf16 %v1277_v4, %v1277_v4  ;;  %v1150_v21 = vadd.f32 %v1149_v9, %v1061_v37  ;;  %v1909_v37 = vld [vmem:[#allocation2 + $0x2c] sm:$0x1] }
 0x19e   : > { %1800 = vst [vmem:[#allocation2 + $0x4c] sm:$0xf] %v1540_v12  ;;  %1013 = vmatmul.bf16.gmra.mxu1 %v582_v54  ;;  %1102 = vmatmul.bf16.gmra.mxu2 %v583_v55  ;;  %v2644_v55 = vpack.c.b16 %v2628_v0, %v2628_v0  ;;  %v2665_v9 = vrot.slane %v2663_v30, 1 }
 0x19f   : > { %1803 = vst [vmem:[#allocation2 + $0x50] sm:$0x1] %v1802_v33  ;;  %v1543_v2 = vshrl.u32 %v1418_v43, 16  ;;  %v1212_v38 = vmul.f32 %v8663_v27, %v1150_v21  ;;  %v1546_v28 = vshll.u32 %v1418_v43, 16  ;;  %v2661_v21 = vshrl.u32 %v8714_v22, 16 }
 0x1a0   : > { %v2668_v58 = vshll.u32 %v2644_v55, 16 }
 0x1a1   : > { %1191 = vmatmul.bf16.gmra.mxu3 %v584_v29  ;;  %v1545_v16 = vrot.slane %v1543_v2, 7  ;;  %v1246_v10 = vadd.f32 %v8665_v35, %v1212_v38  ;;  %v1063_v42 = vpop.f32.mrf.mxu2  ;;  %v1382_v29 = vld [vmem:[#allocation2 + $0x74] sm:$0x1]  ;;  %v2053_v2 = vunpack.c.l.b16 %v1909_v37  ;;  %v2666_v22 = vor.u32 %v2665_v9, %v2661_v21 }
 0x1a2   : > { %v1064_v48 = vadd.f32 %v1063_v42, %v975_v13  ;;  %v1383_v43 = vsel %vm8641_vm4, 0, %v1382_v29 }
 0x1a3   : > { %v1548_v19 = vor.u32 %v1546_v28, %v1545_v16  ;;  %v1278_v44 = vmax.f32 %v1246_v10, 0.0  ;;  %v976_v54 = vpop.f32.mrf.mxu1  ;;  %1384 = vst [vmem:[#allocation2 + $0x74] sm:$0x1] %v1383_v43  ;;  %v2916_v28 = vrot.slane %v7946_v56, 1  ;;  %v1549_v10 = vrot.slane %v1545_v16, 4 }
 0x1a4   : > { %v1152_v45 = vpop.f32.mrf.mxu3  ;;  %v977_v26 = vadd.f32 %v976_v54, %v8647_v53  ;;  %v8262_v53 = vld [vmem:[#allocation2 + $0x24] sm:$0xe]  ;;  %v8875_v43 = vld [vmem:[#allocation13] ss:$0 sm:$0xff] }
 0x1a5   : > { %v1805_v59 = vsel %vm8682_vm6, %v1548_v19, %v1804_v34  ;;  %v1419_v61 = vpack.c.bf16 %v1278_v44, %v1278_v44  ;;  %v1153_v4 = vadd.f32 %v1152_v45, %v1064_v48  ;;  %v8862_v20 = vld [vmem:[#allocation2 + $0x48] sm:$0xff]   ;;  %v2917_v34 = vrot.slane %v2644_v55, 1  ;;  %v2485_v45 = vld [vmem:[#allocation2 + $0x20] sm:$0x1] }
 0x1a6   : > { %1806 = vst [vmem:[#allocation2 + $0x54] sm:$0xf] %v1805_v59  ;;  %3206 = vmatmul.bf16.gmra.mxu0 %v8862_v20  ;;  %v2670_v59 = vrot.slane %v2668_v58, 1  ;;  %v7463_v55 = vld [vmem:[#allocation2] sm:$0xff]  }
 0x1a7   : > { %v1551_v12 = vshrl.u32 %v1419_v61, 16  ;;  %v1213_v33 = vmul.f32 %v8663_v27, %v1153_v4  ;;  %v1554_v13 = vshll.u32 %v1419_v61, 16  ;;  %v8261_v27 = vld [vmem:[#allocation2 + $0x24] sm:$0xf0]  ;;  %v8867_v61 = vpack.c.b16 %v2053_v2, %v2053_v2 }
 0x1a8   : > { %v2671_v56 = vsel %vm2082_vm10, %v2666_v22, %v2670_v59  ;;  %v2918_v29 = vsel %vm2339_vm9, %v2916_v28, %v2917_v34  ;;  %v1811_v22 = vld [vmem:[#allocation2 + $0x60] sm:$0xf] }
 0x1a9   : > { %v1553_v38 = vrot.slane %v1551_v12, 7  ;;  %v1247_v0 = vadd.f32 %v8665_v35, %v1213_v33  ;;  %v1065_v30 = vpop.f32.mrf.mxu2  ;;  %v2629_v12 = vunpack.c.l.b16 %v2485_v45 }
 0x1aa   : > { %v1066_v48 = vadd.f32 %v1065_v30, %v977_v26  ;;  %v2350_v30 = vrot.slane %v8867_v61, 1 }
 0x1ab   : > { %v1556_v42 = vor.u32 %v1554_v13, %v1553_v38  ;;  %v1558_v19 = vrot.slane %v1553_v38, 4  ;;  %v1279_v44 = vmax.f32 %v1247_v0, 0.0  ;;  %v979_v54 = vpop.f32.mrf.mxu1  ;;  %v7369_v38 = vld [vmem:[#allocation10 + $0x60] sm:$0xff]  ;;  %v1335_v13 = vld [vmem:[#allocation2 + $0x78] sm:$0x1]  ;;  %v8263_v0 = vor.u32 %v8262_v53, %v8261_v27 }
 0x1ac   : > { %v1154_v35 = vpop.f32.mrf.mxu3  ;;  %v980_v2 = vadd.f32 %v979_v54, %v8575_v62  ;;  %3676 = vmatpush.bf16.msra.mxu0 %v7369_v38 }
 0x1ad   : > { %v1557_v16 = vsel %vm8700_vm8, %v1549_v10, %v1556_v42  ;;  %v1809_v4 = vsel %vm8631_vm2, %v1558_v19, %v1808_v36  ;;  %v1420_v37 = vpack.c.bf16 %v1279_v44, %v1279_v44  ;;  %v1155_v9 = vadd.f32 %v1154_v35, %v1066_v48  ;;  %v8879_v10 = vld [vmem:[#allocation13 + $0x1] ss:$0 sm:$0xff] }
 0x1ae   : > { %1807 = vst [vmem:[#allocation2 + $0x58] sm:$0xf] %v1557_v16  ;;  %3270 = vmatmul.bf16.vlgmr.msra.gmra.mxu1 %v2671_v56  ;;  %3359 = vmatmul.bf16.vlgmr.msra.gmra.mxu2 %v2918_v29  ;;  %v1336_v36 = vsel %vm8631_vm2, 0, %v1335_v13  ;;  %v2645_v42 = vpack.c.b16 %v2629_v12, %v2629_v12  ;;  %v2349_v62 = vrot.slane %v8263_v0, 1  ;;  %v2675_v35 = vshll.u32 %v8755_v46, 16 }
 0x1af   : > { %1810 = vst [vmem:[#allocation2 + $0x5c] sm:$0x1] %v1809_v4  ;;  %v1560_v33 = vshrl.u32 %v1420_v37, 16  ;;  %v1214_v21 = vmul.f32 %v8875_v43, %v1155_v9  ;;  %v1563_v58 = vshll.u32 %v1420_v37, 16  ;;  %v7597_v9 = vld [vmem:[#allocation2 + $0x18] sm:$0xf0] }
 0x1b0   : > { %1337 = vst [vmem:[#allocation2 + $0x78] sm:$0x1] %v1336_v36  ;;  %v8887_v53 = vsel %vm2339_vm9, %v2349_v62, %v2350_v30  ;;  %v1385_v56 = vld [vmem:[#allocation2 + $0x80] sm:$0x1]  ;;  %v2673_v36 = vshrl.u32 %v8755_v46, 16 }
 0x1b1   : > { %3592 = vmatmul.bf16.vlgmr.msra.gmra.mxu3 %v7463_v55  ;;  %v1562_v26 = vrot.slane %v1560_v33, 7  ;;  %v1248_v28 = vadd.f32 %v8879_v10, %v1214_v21  ;;  %v1068_v34 = vpop.f32.mrf.mxu2  ;;  %12285 = vst [vmem:[#allocation25_spill] sm:$0xff] %v8887_v53  ;;  %v2680_v55 = vshll.u32 %v2645_v42, 16  ;;  %v7598_v33 = vld [vmem:[#allocation2 + $0x18] sm:$0xe]  ;;  %v1386_v21 = vsel %vm8641_vm4, 0, %v1385_v56 }
 0x1b2   : > { %v1069_v48 = vadd.f32 %v1068_v34, %v980_v2  ;;  %v7599_v2 = vor.u32 %v7598_v33, %v7597_v9  ;;  %1387 = vst [vmem:[#allocation2 + $0x80] sm:$0x1] %v1386_v21  ;;  %v2486_v56 = vld [vmem:[#allocation2 + $0x2c] sm:$0x1] }
 0x1b3   : > { %v1565_v19 = vor.u32 %v1563_v58, %v1562_v26  ;;  %v1280_v44 = vmax.f32 %v1248_v28, 0.0  ;;  %v981_v45 = vpop.f32.mrf.mxu1  ;;  %v2677_v58 = vrot.slane %v2675_v35, 1  ;;  %v1566_v30 = vrot.slane %v1562_v26, 4 }
 0x1b4   : > { %v1157_v27 = vpop.f32.mrf.mxu3  ;;  %v982_v28 = vadd.f32 %v981_v45, %v8587_v7  ;;  %v2682_v62 = vrot.slane %v2680_v55, 1  ;;  %v2919_v9 = vrot.slane %v7599_v2, 1  ;;  %v2630_v21 = vunpack.c.l.b16 %v2486_v56 }
 0x1b5   : > { %v1812_v54 = vsel %vm8682_vm6, %v1565_v19, %v1811_v22  ;;  %v1421_v59 = vpack.c.bf16 %v1280_v44, %v1280_v44  ;;  %v1158_v16 = vadd.f32 %v1157_v27, %v1069_v48  ;;  %v8891_v4 = vld [vmem:[#allocation2 + $0x54] sm:$0xff]   ;;  %v1815_v22 = vld [vmem:[#allocation2 + $0x68] sm:$0x1]  ;;  %v2920_v19 = vrot.slane %v2645_v42, 1 }
 0x1b6   : > { %v8893_v37 = vld [vmem:[#allocation2 + $0x54] sm:$0xf0]  ;;  %1813 = vst [vmem:[#allocation2 + $0x60] sm:$0xf] %v1812_v54  ;;  %3211 = vmatmul.bf16.gmra.mxu0 %v8891_v4 }
 0x1b7   : > { %v1568_v29 = vshrl.u32 %v1421_v59, 16  ;;  %v1215_v12 = vmul.f32 %v8875_v43, %v1158_v16  ;;  %v1571_v13 = vshll.u32 %v1421_v59, 16  ;;  %v2678_v16 = vor.u32 %v2677_v58, %v2673_v36  ;;  %v1338_v58 = vld [vmem:[#allocation2 + $0x84] sm:$0x1] }
 0x1b8   : > { %v2921_v55 = vsel %vm2339_vm9, %v2919_v9, %v2920_v19  ;;  %v2687_v36 = vshll.u32 %v8771_v60, 16  ;;  %v1388_v9 = vld [vmem:[#allocation2 + $0x8c] sm:$0x1] }
 0x1b9   : > { %v1570_v38 = vrot.slane %v1568_v29, 7  ;;  %v1249_v0 = vadd.f32 %v8879_v10, %v1215_v12  ;;  %v1070_v34 = vpop.f32.mrf.mxu2  ;;  %v2683_v42 = vsel %vm2082_vm10, %v2678_v16, %v2682_v62 }
 0x1ba   : > { %v1071_v35 = vadd.f32 %v1070_v34, %v982_v28  ;;  %v1339_v28 = vsel %vm8631_vm2, 0, %v1338_v58  ;;  %v2689_v16 = vrot.slane %v2687_v36, 1  ;;  %v1822_v58 = vld [vmem:[#allocation2 + $0x74] sm:$0x1] }
 0x1bb   : > { %v1573_v44 = vor.u32 %v1571_v13, %v1570_v38  ;;  %v1575_v48 = vrot.slane %v1570_v38, 4  ;;  %v1281_v27 = vmax.f32 %v1249_v0, 0.0  ;;  %v984_v59 = vpop.f32.mrf.mxu1  ;;  %v7948_v0 = vld [vmem:[#allocation2 + $0x24] sm:$0xe]  ;;  %1340 = vst [vmem:[#allocation2 + $0x84] sm:$0x1] %v1339_v28 }
 0x1bc   : > { %v1159_v54 = vpop.f32.mrf.mxu3  ;;  %v985_v33 = vadd.f32 %v984_v59, %v8593_v14  ;;  %v7949_v59 = vor.u32 %v7948_v0, %v8773_v18  ;;  %v1911_v18 = vld [vmem:[#allocation2 + $0x44] sm:$0x1] }
 0x1bd   : > { %v1574_v7 = vsel %vm8700_vm8, %v1566_v30, %v1573_v44  ;;  %v1816_v46 = vsel %vm8631_vm2, %v1575_v48, %v1815_v22  ;;  %v1422_v26 = vpack.c.bf16 %v1281_v27, %v1281_v27  ;;  %v1160_v45 = vadd.f32 %v1159_v54, %v1071_v35  ;;  %v1818_v30 = vld [vmem:[#allocation2 + $0x6c] sm:$0xf] }
 0x1be   : > { %1814 = vst [vmem:[#allocation2 + $0x64] sm:$0xf] %v1574_v7  ;;  %3275 = vmatmul.bf16.gmra.mxu1 %v2683_v42  ;;  %3364 = vmatmul.bf16.gmra.mxu2 %v2921_v55  ;;  %v2646_v48 = vpack.c.b16 %v2630_v21, %v2630_v21  ;;  %v2922_v0 = vrot.slane %v7949_v59, 1 }
 0x1bf   : > { %1817 = vst [vmem:[#allocation2 + $0x68] sm:$0x1] %v1816_v46  ;;  %v1577_v29 = vshrl.u32 %v1422_v26, 16  ;;  %v1216_v12 = vmul.f32 %v8875_v43, %v1160_v45  ;;  %v1580_v38 = vshll.u32 %v1422_v26, 16  ;;  %v1389_v26 = vsel %vm8641_vm4, 0, %v1388_v9 }
 0x1c0   : > { %v2685_v45 = vshrl.u32 %v8771_v60, 16  ;;  %v2692_v56 = vshll.u32 %v2646_v48, 16  ;;  %1390 = vst [vmem:[#allocation2 + $0x8c] sm:$0x1] %v1389_v26  ;;  %v2923_v28 = vrot.slane %v2646_v48, 1 }
 0x1c1   : > { %3597 = vmatmul.bf16.gmra.mxu3 %v8729_v6  ;;  %v1579_v2 = vrot.slane %v1577_v29, 7  ;;  %v1250_v13 = vadd.f32 %v8879_v10, %v1216_v12  ;;  %v1073_v22 = vpop.f32.mrf.mxu2 }
 0x1c2   : > { %v1074_v14 = vadd.f32 %v1073_v22, %v985_v33  ;;  %v2924_v9 = vsel %vm2339_vm9, %v2922_v0, %v2923_v28 }
 0x1c3   : > { %v1582_v34 = vor.u32 %v1580_v38, %v1579_v2  ;;  %v1282_v62 = vmax.f32 %v1250_v13, 0.0  ;;  %v986_v44 = vpop.f32.mrf.mxu1  ;;  %v1583_v21 = vrot.slane %v1579_v2, 4  ;;  %v2690_v13 = vor.u32 %v2689_v16, %v2685_v45  ;;  %v8265_v16 = vld [vmem:[#allocation2 + $0x3c] sm:$0xe] }
 0x1c4   : > { %v1162_v19 = vpop.f32.mrf.mxu3  ;;  %v987_v12 = vadd.f32 %v986_v44, %v8605_v24  ;;  %v8264_v24 = vld [vmem:[#allocation2 + $0x3c] sm:$0xf0]  ;;  %v2694_v44 = vrot.slane %v2692_v56, 1  ;;  %v7558_v45 = vld [vmem:[#allocation2 + $0x18] sm:$0xff]  }
 0x1c5   : > { %v1819_v27 = vsel %vm8682_vm6, %v1582_v34, %v1818_v30  ;;  %v1423_v35 = vpack.c.bf16 %v1282_v62, %v1282_v62  ;;  %v1163_v54 = vadd.f32 %v1162_v19, %v1074_v14  ;;  %v8924_v33 = vld [vmem:[#allocation2 + $0x60] sm:$0xff]   ;;  %v2487_v62 = vld [vmem:[#allocation2 + $0x38] sm:$0x1]  ;;  %v8266_v28 = vor.u32 %v8265_v16, %v8264_v24 }
 0x1c6   : > { %1820 = vst [vmem:[#allocation2 + $0x6c] sm:$0xf] %v1819_v27  ;;  %3216 = vmatmul.bf16.gmra.mxu0 %v8924_v33  ;;  %v8927_v14 = vld [vmem:[#allocation2 + $0x3c] sm:$0xff]   ;;  %v2055_v27 = vunpack.c.l.b16 %v1911_v18  ;;  %v2695_v59 = vsel %vm2082_vm10, %v2690_v13, %v2694_v44  ;;  %v1391_v16 = vld [vmem:[#allocation2 + $0x98] sm:$0x1] }
 0x1c7   : > { %v1585_v7 = vshrl.u32 %v1423_v35, 16  ;;  %v1217_v46 = vmul.f32 %v8875_v43, %v1163_v54  ;;  %v1588_v55 = vshll.u32 %v1423_v35, 16  ;;  %v2355_v24 = vrot.slane %v8266_v28, 1  ;;  %v1829_v28 = vld [vmem:[#allocation2 + $0x80] sm:$0x1] }
 0x1c9   : > { %v1587_v42 = vrot.slane %v1585_v7, 7  ;;  %v1251_v29 = vadd.f32 %v8879_v10, %v1217_v46  ;;  %v1075_v38 = vpop.f32.mrf.mxu2  ;;  %v2631_v7 = vunpack.c.l.b16 %v2487_v62 }
 0x1ca   : > { %v1076_v22 = vadd.f32 %v1075_v38, %v987_v12  ;;  %v1825_v38 = vld [vmem:[#allocation2 + $0x78] sm:$0xf] }
 0x1cb   : > { %v1590_v60 = vor.u32 %v1588_v55, %v1587_v42  ;;  %v1592_v36 = vrot.slane %v1587_v42, 4  ;;  %v1283_v30 = vmax.f32 %v1251_v29, 0.0  ;;  %v989_v19 = vpop.f32.mrf.mxu1  ;;  %v7368_v42 = vld [vmem:[#allocation10 + $0x58] sm:$0xff]  ;;  %v1341_v55 = vld [vmem:[#allocation2 + $0x90] sm:$0x1]  ;;  %v8937_v29 = vpack.c.b16 %v2055_v27, %v2055_v27 }
 0x1cc   : > { %v1164_v34 = vpop.f32.mrf.mxu3  ;;  %v990_v56 = vadd.f32 %v989_v19, %v8611_v31  ;;  %3677 = vmatpush.bf16.msra.mxu0 %v7368_v42  ;;  %v2647_v0 = vpack.c.b16 %v2631_v7, %v2631_v7 }
 0x1cd   : > { %v1591_v2 = vsel %vm8700_vm8, %v1583_v21, %v1590_v60  ;;  %v1823_v35 = vsel %vm8631_vm2, %v1592_v36, %v1822_v58  ;;  %v1424_v54 = vpack.c.bf16 %v1283_v30, %v1283_v30  ;;  %v1165_v48 = vadd.f32 %v1164_v34, %v1076_v22 }
 0x1ce   : > { %1821 = vst [vmem:[#allocation2 + $0x70] sm:$0xf] %v1591_v2  ;;  %3280 = vmatmul.bf16.gmra.mxu1 %v2695_v59  ;;  %3369 = vmatmul.bf16.gmra.mxu2 %v2924_v9  ;;  %v1342_v58 = vsel %vm8631_vm2, 0, %v1341_v55  ;;  %v2699_v22 = vshll.u32 %v8811_v50, 16  ;;  %v2356_v62 = vrot.slane %v8937_v29, 1 }
 0x1cf   : > { %1824 = vst [vmem:[#allocation2 + $0x74] sm:$0x1] %v1823_v35  ;;  %v1594_v46 = vshrl.u32 %v1424_v54, 16  ;;  %v1218_v26 = vmul.f32 %v8875_v43, %v1165_v48  ;;  %v1597_v18 = vshll.u32 %v1424_v54, 16  ;;  %v7600_v54 = vld [vmem:[#allocation2 + $0x30] sm:$0xf0] }
 0x1d0   : > { %1343 = vst [vmem:[#allocation2 + $0x90] sm:$0x1] %v1342_v58  ;;  %v2704_v48 = vshll.u32 %v2647_v0, 16  ;;  %v8958_v58 = vsel %vm2339_vm9, %v2355_v24, %v2356_v62 }
 0x1d1   : > { %3602 = vmatmul.bf16.gmra.mxu3 %v7558_v45  ;;  %v1596_v12 = vrot.slane %v1594_v46, 7  ;;  %v1252_v21 = vadd.f32 %v8879_v10, %v1218_v26  ;;  %v1078_v13 = vpop.f32.mrf.mxu2  ;;  %v7601_v46 = vld [vmem:[#allocation2 + $0x30] sm:$0xe]  ;;  %v1392_v26 = vsel %vm8641_vm4, 0, %v1391_v16  ;;  %v2701_v45 = vrot.slane %v2699_v22, 1  ;;  %12286 = vst [vmem:[#allocation26_spill] sm:$0xff] %v8958_v58 }
 0x1d2   : > { %v1079_v36 = vadd.f32 %v1078_v13, %v990_v56  ;;  %v7602_v42 = vor.u32 %v7601_v46, %v7600_v54  ;;  %1393 = vst [vmem:[#allocation2 + $0x98] sm:$0x1] %v1392_v26  ;;  %v2488_v16 = vld [vmem:[#allocation2 + $0x44] sm:$0x1] }
 0x1d3   : > { %v1599_v60 = vor.u32 %v1597_v18, %v1596_v12  ;;  %v1284_v31 = vmax.f32 %v1252_v21, 0.0  ;;  %v991_v34 = vpop.f32.mrf.mxu1  ;;  %v8951_v7 = vpop.f32.mrf.mxu0  ;;  %v1600_v13 = vrot.slane %v1596_v12, 4 }
 0x1d4   : > { %v1167_v30 = vpop.f32.mrf.mxu3  ;;  %v992_v56 = vadd.f32 %v991_v34, %v8623_v40  ;;  %v2925_v54 = vrot.slane %v7602_v42, 1 }
 0x1d5   : > { %v1826_v19 = vsel %vm8682_vm6, %v1599_v60, %v1825_v38  ;;  %v1425_v44 = vpack.c.bf16 %v1284_v31, %v1284_v31  ;;  %v1168_v27 = vadd.f32 %v1167_v30, %v1079_v36  ;;  %v8946_v2 = vld [vmem:[#allocation2 + $0x6c] sm:$0xff]   ;;  %v2697_v38 = vshrl.u32 %v8811_v50, 16 }
 0x1d6   : > { %v8948_v35 = vld [vmem:[#allocation2 + $0x6c] sm:$0xf0]  ;;  %1827 = vst [vmem:[#allocation2 + $0x78] sm:$0xf] %v1826_v19  ;;  %3221 = vmatmul.bf16.gmra.mxu0 %v8946_v2  ;;  %v2706_v31 = vrot.slane %v2704_v48, 1  ;;  %v2926_v36 = vrot.slane %v2647_v0, 1 }
 0x1d7   : > { %v1602_v59 = vshrl.u32 %v1425_v44, 16  ;;  %v1219_v9 = vmul.f32 %v8875_v43, %v1168_v27  ;;  %v1605_v18 = vshll.u32 %v1425_v44, 16  ;;  %v2702_v44 = vor.u32 %v2701_v45, %v2697_v38 }
 0x1d8   : > { %v2927_v48 = vsel %vm2339_vm9, %v2925_v54, %v2926_v36  ;;  %v2632_v45 = vunpack.c.l.b16 %v2488_v16 }
 0x1d9   : > { %v1604_v55 = vrot.slane %v1602_v59, 7  ;;  %v1253_v21 = vadd.f32 %v8879_v10, %v1219_v9  ;;  %v1080_v60 = vpop.f32.mrf.mxu2  ;;  %v2707_v0 = vsel %vm2082_vm10, %v2702_v44, %v2706_v31 }
 0x1da   : > { %v1081_v34 = vadd.f32 %v1080_v60, %v992_v56  ;;  %v1344_v56 = vld [vmem:[#allocation2 + $0x9c] sm:$0x1] }
 0x1db   : > { %v1607_v30 = vor.u32 %v1605_v18, %v1604_v55  ;;  %v1609_v40 = vrot.slane %v1604_v55, 4  ;;  %v1285_v22 = vmax.f32 %v1253_v21, 0.0  ;;  %v994_v27 = vpop.f32.mrf.mxu1  ;;  %v8969_v46 = vpop.f32.mrf.mxu0  ;;  %v7951_v21 = vld [vmem:[#allocation2 + $0x3c] sm:$0xe]  ;;  %v1345_v38 = vsel %vm8631_vm2, 0, %v1344_v56 }
 0x1dc   : > { %v1169_v19 = vpop.f32.mrf.mxu3  ;;  %v995_v26 = vadd.f32 %v994_v27, %v8637_v49  ;;  %1346 = vst [vmem:[#allocation2 + $0x9c] sm:$0x1] %v1345_v38  ;;  %v1913_v27 = vld [vmem:[#allocation2 + $0x5c] sm:$0x1] }
 0x1dd   : > { %v1608_v62 = vsel %vm8700_vm8, %v1600_v13, %v1607_v30  ;;  %v1830_v50 = vsel %vm8631_vm2, %v1609_v40, %v1829_v28  ;;  %v1426_v12 = vpack.c.bf16 %v1285_v22, %v1285_v22  ;;  %v1170_v24 = vadd.f32 %v1169_v19, %v1081_v34  ;;  %v1832_v28 = vld [vmem:[#allocation2 + $0x84] sm:$0xf] }
 0x1de   : > { %1828 = vst [vmem:[#allocation2 + $0x7c] sm:$0xf] %v1608_v62  ;;  %3285 = vmatmul.bf16.gmra.mxu1 %v2707_v0  ;;  %3374 = vmatmul.bf16.gmra.mxu2 %v2927_v48  ;;  %v2711_v13 = vshll.u32 %v8827_v1, 16  ;;  %v2648_v22 = vpack.c.b16 %v2632_v45, %v2632_v45  ;;  %v7952_v62 = vor.u32 %v7951_v21, %v8829_v17  ;;  %v2709_v48 = vshrl.u32 %v8827_v1, 16  ;;  %v8267_v21 = vld [vmem:[#allocation2 + $0x54] sm:$0xf0] }
 0x1df   : > { %1831 = vst [vmem:[#allocation2 + $0x80] sm:$0x1] %v1830_v50  ;;  %v1611_v59 = vshrl.u32 %v1426_v12, 16  ;;  %v1220_v9 = vmul.f32 %v8875_v43, %v1170_v24  ;;  %v1614_v55 = vshll.u32 %v1426_v12, 16  ;;  %v1394_v50 = vld [vmem:[#allocation2 + $0xa4] sm:$0x1] }
 0x1e0   : > { %v2713_v54 = vrot.slane %v2711_v13, 1  ;;  %v1395_v0 = vsel %vm8641_vm4, 0, %v1394_v50  ;;  %v1836_v13 = vld [vmem:[#allocation2 + $0x8c] sm:$0x1] }
 0x1e1   : > { %3607 = vmatmul.bf16.gmra.mxu3 %v8864_v57  ;;  %v1613_v42 = vrot.slane %v1611_v59, 7  ;;  %v1254_v18 = vadd.f32 %v8879_v10, %v1220_v9  ;;  %v1083_v60 = vpop.f32.mrf.mxu2  ;;  %v2716_v59 = vshll.u32 %v2648_v22, 16  ;;  %1396 = vst [vmem:[#allocation2 + $0xa4] sm:$0x1] %v1395_v0  ;;  %v2057_v9 = vunpack.c.l.b16 %v1913_v27 }
 0x1e2   : > { %v1084_v49 = vadd.f32 %v1083_v60, %v995_v26  ;;  %v2714_v1 = vor.u32 %v2713_v54, %v2709_v48  ;;  %v2928_v60 = vrot.slane %v7952_v62, 1 }
 0x1e3   : > { %v1616_v31 = vor.u32 %v1614_v55, %v1613_v42  ;;  %v1286_v36 = vmax.f32 %v1254_v18, 0.0  ;;  %v996_v40 = vpop.f32.mrf.mxu1  ;;  %v8981_v16 = vpop.f32.mrf.mxu0  ;;  %v8990_v18 = vld [vmem:[#allocation2 + $0x54] sm:$0xff]   ;;  %v1617_v38 = vrot.slane %v1613_v42, 4  ;;  %v2718_v27 = vrot.slane %v2716_v59, 1 }
 0x1e4   : > { %v1172_v30 = vpop.f32.mrf.mxu3  ;;  %v997_v17 = vadd.f32 %v996_v40, %v8657_v3  ;;  %v8268_v3 = vld [vmem:[#allocation2 + $0x54] sm:$0xe]  ;;  %v8993_v50 = vpack.c.b16 %v2057_v9, %v2057_v9 }
 0x1e5   : > { %v1833_v34 = vsel %vm8682_vm6, %v1616_v31, %v1832_v28  ;;  %v1427_v19 = vpack.c.bf16 %v1286_v36, %v1286_v36  ;;  %v1173_v44 = vadd.f32 %v1172_v30, %v1084_v49  ;;  %v8988_v55 = vld [vmem:[#allocation2 + $0x78] sm:$0xff]   ;;  %v2929_v31 = vrot.slane %v2648_v22, 1 }
 0x1e6   : > { %1834 = vst [vmem:[#allocation2 + $0x84] sm:$0xf] %v1833_v34  ;;  %3226 = vmatmul.bf16.gmra.mxu0 %v8988_v55  ;;  %v2719_v22 = vsel %vm2082_vm10, %v2714_v1, %v2718_v27 }
 0x1e7   : > { %v1619_v12 = vshrl.u32 %v1427_v19, 16  ;;  %v1221_v24 = vmul.f32 %v8875_v43, %v1173_v44  ;;  %v1622_v45 = vshll.u32 %v1427_v19, 16  ;;  %v2489_v44 = vld [vmem:[#allocation2 + $0x50] sm:$0x1] }
 0x1e8   : > { %v2633_v0 = vunpack.c.l.b16 %v2489_v44 }
 0x1e9   : > { %v1621_v26 = vrot.slane %v1619_v12, 7  ;;  %v1255_v56 = vadd.f32 %v8879_v10, %v1221_v24  ;;  %v1085_v28 = vpop.f32.mrf.mxu2  ;;  %v2930_v24 = vsel %vm2339_vm9, %v2928_v60, %v2929_v31  ;;  %v2362_v31 = vrot.slane %v8993_v50, 1 }
 0x1ea   : > { %v1086_v34 = vadd.f32 %v1085_v28, %v997_v17  ;;  %v7367_v17 = vld [vmem:[#allocation10 + $0x50] sm:$0xff] }
 0x1eb   : > { %v1624_v36 = vor.u32 %v1622_v45, %v1621_v26  ;;  %v1626_v49 = vrot.slane %v1621_v26, 4  ;;  %v1287_v30 = vmax.f32 %v1255_v56, 0.0  ;;  %v999_v40 = vpop.f32.mrf.mxu1  ;;  %v9002_v9 = vpop.f32.mrf.mxu0  ;;  %v7559_v26 = vld [vmem:[#allocation2 + $0x30] sm:$0xff]   ;;  %3678 = vmatpush.bf16.msra.mxu0 %v7367_v17 }
 0x1ec   : > { %v1174_v19 = vpop.f32.mrf.mxu3  ;;  %v1000_v56 = vadd.f32 %v999_v40, %v8577_v63 }
 0x1ed   : > { %v1625_v42 = vsel %vm8700_vm8, %v1617_v38, %v1624_v36  ;;  %v1837_v12 = vsel %vm8631_vm2, %v1626_v49, %v1836_v13  ;;  %v1428_v54 = vpack.c.bf16 %v1287_v30, %v1287_v30  ;;  %v1175_v62 = vadd.f32 %v1174_v19, %v1086_v34  ;;  %v1347_v38 = vld [vmem:[#allocation2 + $0xa8] sm:$0x1]  ;;  %v1839_v36 = vld [vmem:[#allocation2 + $0x90] sm:$0xf] }
 0x1ee   : > { %1835 = vst [vmem:[#allocation2 + $0x88] sm:$0xf] %v1625_v42  ;;  %3290 = vmatmul.bf16.gmra.mxu1 %v2719_v22  ;;  %3379 = vmatmul.bf16.gmra.mxu2 %v2930_v24  ;;  %v8269_v13 = vor.u32 %v8268_v3, %v8267_v21  ;;  %v1348_v60 = vsel %vm8631_vm2, 0, %v1347_v38  ;;  %v2649_v30 = vpack.c.b16 %v2633_v0, %v2633_v0  ;;  %v2723_v21 = vshll.u32 %v8862_v20, 16  ;;  %v7603_v24 = vld [vmem:[#allocation2 + $0x48] sm:$0xf0] }
 0x1ef   : > { %1838 = vst [vmem:[#allocation2 + $0x8c] sm:$0x1] %v1837_v12  ;;  %v1628_v48 = vshrl.u32 %v1428_v54, 16  ;;  %v1222_v59 = vmul.f32 %v8875_v43, %v1175_v62  ;;  %v1631_v45 = vshll.u32 %v1428_v54, 16 }
 0x1f0   : > { %1349 = vst [vmem:[#allocation2 + $0xa8] sm:$0x1] %v1348_v60  ;;  %v2361_v34 = vrot.slane %v8269_v13, 1  ;;  %v2728_v0 = vshll.u32 %v2649_v30, 16  ;;  %v2725_v38 = vrot.slane %v2723_v21, 1 }
 0x1f1   : > { %3612 = vmatmul.bf16.gmra.mxu3 %v7559_v26  ;;  %v1630_v28 = vrot.slane %v1628_v48, 7  ;;  %v1256_v1 = vadd.f32 %v8879_v10, %v1222_v59  ;;  %v1088_v49 = vpop.f32.mrf.mxu2  ;;  %v1397_v48 = vld [vmem:[#allocation2 + $0xb0] sm:$0x1] }
 0x1f2   : > { %v1089_v44 = vadd.f32 %v1088_v49, %v1000_v56  ;;  %v9011_v27 = vsel %vm2339_vm9, %v2361_v34, %v2362_v31  ;;  %v7604_v56 = vld [vmem:[#allocation2 + $0x48] sm:$0xe]  ;;  %v1398_v17 = vsel %vm8641_vm4, 0, %v1397_v48  ;;  %v2721_v49 = vshrl.u32 %v8862_v20, 16 }
 0x1f3   : > { %v1633_v19 = vor.u32 %v1631_v45, %v1630_v28  ;;  %v1288_v63 = vmax.f32 %v1256_v1, 0.0  ;;  %v1001_v3 = vpop.f32.mrf.mxu1  ;;  %12287 = vst [vmem:[#allocation27_spill] sm:$0xff] %v9011_v27  ;;  %v9020_v45 = vpop.f32.mrf.mxu0  ;;  %v7605_v13 = vor.u32 %v7604_v56, %v7603_v24  ;;  %v1634_v34 = vrot.slane %v1630_v28, 4 }
 0x1f4   : > { %v1177_v40 = vpop.f32.mrf.mxu3  ;;  %1399 = vst [vmem:[#allocation2 + $0xb0] sm:$0x1] %v1398_v17  ;;  %v2490_v17 = vld [vmem:[#allocation2 + $0x5c] sm:$0x1] }
 0x1f5   : > { %v1840_v42 = vsel %vm8682_vm6, %v1633_v19, %v1839_v36  ;;  %v1429_v12 = vpack.c.bf16 %v1288_v63, %v1288_v63  ;;  %v1178_v54 = vadd.f32 %v1177_v40, %v1089_v44  ;;  %v9015_v62 = vld [vmem:[#allocation2 + $0x84] sm:$0xff]   ;;  %v1002_v36 = vadd.f32 %v1001_v3, %v8589_v8  ;;  %v1843_v19 = vld [vmem:[#allocation2 + $0x98] sm:$0x1] }
 0x1f6   : > { %v9017_v22 = vld [vmem:[#allocation2 + $0x84] sm:$0xf0]  ;;  %1841 = vst [vmem:[#allocation2 + $0x90] sm:$0xf] %v1840_v42  ;;  %3231 = vmatmul.bf16.gmra.mxu0 %v9015_v62  ;;  %v2730_v44 = vrot.slane %v2728_v0, 1  ;;  %v2932_v40 = vrot.slane %v2649_v30, 1 }
 0x1f7   : > { %v1636_v59 = vshrl.u32 %v1429_v12, 16  ;;  %v1223_v26 = vmul.f32 %v8875_v43, %v1178_v54  ;;  %v1639_v60 = vshll.u32 %v1429_v12, 16 }
 0x1f9   : > { %v1638_v1 = vrot.slane %v1636_v59, 7  ;;  %v1257_v31 = vadd.f32 %v8879_v10, %v1223_v26  ;;  %v1090_v63 = vpop.f32.mrf.mxu2  ;;  %v9028_v59 = vor.u32 %v2725_v38, %v2721_v49  ;;  %v2931_v26 = vrot.slane %v7605_v13, 1 }
 0x1fa   : > { %v1091_v24 = vadd.f32 %v1090_v63, %v1002_v36  ;;  %v1350_v36 = vld [vmem:[#allocation2 + $0xb4] sm:$0x1]  ;;  %v7954_v63 = vld [vmem:[#allocation2 + $0x54] sm:$0xe] }
 0x1fb   : > { %v1641_v42 = vor.u32 %v1639_v60, %v1638_v1  ;;  %v1643_v54 = vrot.slane %v1638_v1, 4  ;;  %v1289_v21 = vmax.f32 %v1257_v31, 0.0  ;;  %v1004_v12 = vpop.f32.mrf.mxu1  ;;  %v2731_v30 = vsel %vm2082_vm10, %v9028_v59, %v2730_v44  ;;  %v9038_v13 = vpop.f32.mrf.mxu0  ;;  %v1857_v58 = vld [vmem:[#allocation2 + $0xb0] sm:$0x1] }
 0x1fc   : > { %v1179_v48 = vpop.f32.mrf.mxu3  ;;  %v2933_v0 = vsel %vm2339_vm9, %v2931_v26, %v2932_v40  ;;  %v1005_v60 = vadd.f32 %v1004_v12, %v8595_v15  ;;  %v2634_v31 = vunpack.c.l.b16 %v2490_v17  ;;  %v1351_v44 = vsel %vm8631_vm2, 0, %v1350_v36 }
 0x1fd   : > { %v1642_v8 = vsel %vm8700_vm8, %v1634_v34, %v1641_v42  ;;  %v1844_v28 = vsel %vm8631_vm2, %v1643_v54, %v1843_v19  ;;  %v1430_v3 = vpack.c.bf16 %v1289_v21, %v1289_v21  ;;  %v1180_v56 = vadd.f32 %v1179_v48, %v1091_v24  ;;  %v1846_v42 = vld [vmem:[#allocation2 + $0x9c] sm:$0xf]  ;;  %1352 = vst [vmem:[#allocation2 + $0xb4] sm:$0x1] %v1351_v44 }
 0x1fe   : > { %1842 = vst [vmem:[#allocation2 + $0x94] sm:$0xf] %v1642_v8  ;;  %3295 = vmatmul.bf16.gmra.mxu1 %v2731_v30  ;;  %3384 = vmatmul.bf16.gmra.mxu2 %v2933_v0  ;;  %v2735_v40 = vshll.u32 %v8891_v4, 16  ;;  %v2650_v26 = vpack.c.b16 %v2634_v31, %v2634_v31  ;;  %v7955_v17 = vor.u32 %v7954_v63, %v8893_v37  ;;  %v1400_v30 = vld [vmem:[#allocation2 + $0xbc] sm:$0x1]  ;;  %v2733_v31 = vshrl.u32 %v8891_v4, 16 }
 0x1ff   : > { %1845 = vst [vmem:[#allocation2 + $0x98] sm:$0x1] %v1844_v28  ;;  %v1645_v38 = vshrl.u32 %v1430_v3, 16  ;;  %v1224_v1 = vmul.f32 %v8875_v43, %v1180_v56  ;;  %v1648_v34 = vshll.u32 %v1430_v3, 16 }
 0x200   : > { %v2737_v56 = vrot.slane %v2735_v40, 1  ;;  %v2740_v36 = vshll.u32 %v2650_v26, 16 }
 0x201   : > { %3617 = vmatmul.bf16.gmra.mxu3 %v8927_v14  ;;  %v1647_v49 = vrot.slane %v1645_v38, 7  ;;  %v1258_v19 = vadd.f32 %v8879_v10, %v1224_v1  ;;  %v1093_v54 = vpop.f32.mrf.mxu2 }
 0x202   : > { %v1094_v15 = vadd.f32 %v1093_v54, %v1005_v60  ;;  %v1401_v60 = vsel %vm8641_vm4, 0, %v1400_v30 }
 0x203   : > { %v1650_v21 = vor.u32 %v1648_v34, %v1647_v49  ;;  %v1290_v24 = vmax.f32 %v1258_v19, 0.0  ;;  %v1006_v12 = vpop.f32.mrf.mxu1  ;;  %v9050_v1 = vpop.f32.mrf.mxu0  ;;  %1402 = vst [vmem:[#allocation2 + $0xbc] sm:$0x1] %v1401_v60  ;;  %v1651_v63 = vrot.slane %v1647_v49, 4 }
 0x204   : > { %v1182_v48 = vpop.f32.mrf.mxu3  ;;  %v1007_v40 = vadd.f32 %v1006_v12, %v8607_v25 }
 0x205   : > { %v1847_v8 = vsel %vm8682_vm6, %v1650_v21, %v1846_v42  ;;  %v1431_v28 = vpack.c.bf16 %v1290_v24, %v1290_v24  ;;  %v1183_v3 = vadd.f32 %v1182_v48, %v1094_v15  ;;  %v9057_v37 = vld [vmem:[#allocation2 + $0x90] sm:$0xff]   ;;  %v1850_v42 = vld [vmem:[#allocation2 + $0xa4] sm:$0x1]  ;;  %v2738_v21 = vor.u32 %v2737_v56, %v2733_v31 }
 0x206   : > { %1848 = vst [vmem:[#allocation2 + $0x9c] sm:$0xf] %v1847_v8  ;;  %3236 = vmatmul.bf16.gmra.mxu0 %v9057_v37  ;;  %v2934_v24 = vrot.slane %v7955_v17, 1  ;;  %v2935_v15 = vrot.slane %v2650_v26, 1 }
 0x207   : > { %v1653_v0 = vshrl.u32 %v1431_v28, 16  ;;  %v1225_v38 = vmul.f32 %v8875_v43, %v1183_v3  ;;  %v1656_v19 = vshll.u32 %v1431_v28, 16  ;;  %v2491_v28 = vld [vmem:[#allocation2 + $0x68] sm:$0x1] }
 0x208   : > { %v2936_v26 = vsel %vm2339_vm9, %v2934_v24, %v2935_v15  ;;  %v2635_v17 = vunpack.c.l.b16 %v2491_v28  ;;  %v1853_v24 = vld [vmem:[#allocation2 + $0xa8] sm:$0xf]  ;;  %v7606_v28 = vld [vmem:[#allocation2 + $0x60] sm:$0xf0] }
 0x209   : > { %v1655_v34 = vrot.slane %v1653_v0, 7  ;;  %v1259_v44 = vadd.f32 %v8879_v10, %v1225_v38  ;;  %v1095_v54 = vpop.f32.mrf.mxu2  ;;  %v2742_v38 = vrot.slane %v2740_v36, 1 }
 0x20a   : > { %v1096_v3 = vadd.f32 %v1095_v54, %v1007_v40  ;;  %v1353_v40 = vld [vmem:[#allocation2 + $0xc0] sm:$0x1] }
 0x20b   : > { %v1658_v48 = vor.u32 %v1656_v19, %v1655_v34  ;;  %v1660_v4 = vrot.slane %v1655_v34, 4  ;;  %v1291_v8 = vmax.f32 %v1259_v44, 0.0  ;;  %v1009_v0 = vpop.f32.mrf.mxu1  ;;  %v2743_v56 = vsel %vm2082_vm10, %v2738_v21, %v2742_v38  ;;  %v9067_v19 = vpop.f32.mrf.mxu0  ;;  %v7366_v44 = vld [vmem:[#allocation10 + $0x48] sm:$0xff] }
 0x20c   : > { %v1184_v30 = vpop.f32.mrf.mxu3  ;;  %v1010_v36 = vadd.f32 %v1009_v0, %v8613_v32  ;;  %v1354_v21 = vsel %vm8631_vm2, 0, %v1353_v40  ;;  %3679 = vmatpush.bf16.msra.mxu0 %v7366_v44  ;;  %v7607_v0 = vld [vmem:[#allocation2 + $0x60] sm:$0xe] }
 0x20d   : > { %v1659_v25 = vsel %vm8700_vm8, %v1651_v63, %v1658_v48  ;;  %v1851_v49 = vsel %vm8631_vm2, %v1660_v4, %v1850_v42  ;;  %v1432_v12 = vpack.c.bf16 %v1291_v8, %v1291_v8  ;;  %v1185_v60 = vadd.f32 %v1184_v30, %v1096_v3  ;;  %1355 = vst [vmem:[#allocation2 + $0xc0] sm:$0x1] %v1354_v21 }
 0x20e   : > { %1849 = vst [vmem:[#allocation2 + $0xa0] sm:$0xf] %v1659_v25  ;;  %3300 = vmatmul.bf16.gmra.mxu1 %v2743_v56  ;;  %3389 = vmatmul.bf16.gmra.mxu2 %v2936_v26  ;;  %v2651_v48 = vpack.c.b16 %v2635_v17, %v2635_v17  ;;  %v9081_v56 = vld [vmem:[#allocation2 + $0x6c] sm:$0xff]   ;;  %v1915_v17 = vld [vmem:[#allocation2 + $0x74] sm:$0x1] }
 0x20f   : > { %1852 = vst [vmem:[#allocation2 + $0xa4] sm:$0x1] %v1851_v49  ;;  %v1662_v31 = vshrl.u32 %v1432_v12, 16  ;;  %v1226_v34 = vmul.f32 %v8875_v43, %v1185_v60  ;;  %v1665_v42 = vshll.u32 %v1432_v12, 16  ;;  %v8270_v26 = vld [vmem:[#allocation2 + $0x6c] sm:$0xf0] }
 0x211   : > { %3622 = vmatmul.bf16.gmra.mxu3 %v8862_v20  ;;  %v1664_v63 = vrot.slane %v1662_v31, 7  ;;  %v1260_v54 = vadd.f32 %v8879_v10, %v1226_v34  ;;  %v1098_v15 = vpop.f32.mrf.mxu2  ;;  %v2747_v20 = vshll.u32 %v8924_v33, 16  ;;  %v2745_v31 = vshrl.u32 %v8924_v33, 16 }
 0x212   : > { %v1099_v3 = vadd.f32 %v1098_v15, %v1010_v36  ;;  %v2752_v34 = vshll.u32 %v2651_v48, 16  ;;  %v1403_v36 = vld [vmem:[#allocation2 + $0xc8] sm:$0x1] }
 0x213   : > { %v1667_v4 = vor.u32 %v1665_v42, %v1664_v63  ;;  %v1292_v8 = vmax.f32 %v1260_v54, 0.0  ;;  %v1011_v30 = vpop.f32.mrf.mxu1  ;;  %v9085_v42 = vpop.f32.mrf.mxu0  ;;  %v7608_v54 = vor.u32 %v7607_v0, %v7606_v28  ;;  %v1404_v21 = vsel %vm8641_vm4, 0, %v1403_v36 }
 0x214   : > { %v1187_v32 = vpop.f32.mrf.mxu3  ;;  %v2749_v15 = vrot.slane %v2747_v20, 1  ;;  %1405 = vst [vmem:[#allocation2 + $0xc8] sm:$0x1] %v1404_v21  ;;  %v1668_v27 = vrot.slane %v1664_v63, 4  ;;  %v2938_v28 = vrot.slane %v2651_v48, 1 }
 0x215   : > { %v1854_v38 = vsel %vm8682_vm6, %v1667_v4, %v1853_v24  ;;  %v1433_v25 = vpack.c.bf16 %v1292_v8, %v1292_v8  ;;  %v1188_v49 = vadd.f32 %v1187_v32, %v1099_v3  ;;  %v9077_v12 = vld [vmem:[#allocation2 + $0x9c] sm:$0xff]   ;;  %v8271_v24 = vld [vmem:[#allocation2 + $0x6c] sm:$0xe]  ;;  %v2059_v4 = vunpack.c.l.b16 %v1915_v17 }
 0x216   : > { %v9079_v60 = vld [vmem:[#allocation2 + $0x9c] sm:$0xf0]  ;;  %1855 = vst [vmem:[#allocation2 + $0xa8] sm:$0xf] %v1854_v38  ;;  %v1012_v38 = vadd.f32 %v1011_v30, %v8625_v41  ;;  %3241 = vmatmul.bf16.gmra.mxu0 %v9077_v12  ;;  %v9092_v21 = vor.u32 %v2749_v15, %v2745_v31 }
 0x217   : > { %v1670_v44 = vshrl.u32 %v1433_v25, 16  ;;  %v1227_v40 = vmul.f32 %v8875_v43, %v1188_v49  ;;  %v1673_v3 = vshll.u32 %v1433_v25, 16  ;;  %v2754_v43 = vrot.slane %v2752_v34, 1  ;;  %v2492_v34 = vld [vmem:[#allocation2 + $0x74] sm:$0x1]  ;;  %v7365_v15 = vld [vmem:[#allocation10 + $0x40] sm:$0xff] }
 0x218   : > { %v2937_v25 = vrot.slane %v7608_v54, 1  ;;  %v9103_v54 = vld [vmem:[#allocation13] ss:$0 sm:$0xff]  ;;  %3680 = vmatpush.bf16.msra.mxu0 %v7365_v15 }
 0x219   : > { %v1672_v8 = vrot.slane %v1670_v44, 7  ;;  %v1261_v32 = vadd.f32 %v8879_v10, %v1227_v40  ;;  %v1100_v53 = vpop.f32.mrf.mxu2  ;;  %v9094_v44 = vpack.c.b16 %v2059_v4, %v2059_v4  ;;  %v8272_v10 = vor.u32 %v8271_v24, %v8270_v26 }
 0x21a   : > { %v1101_v36 = vadd.f32 %v1100_v53, %v1012_v38  ;;  %v2755_v53 = vsel %vm2082_vm10, %v9092_v21, %v2754_v43  ;;  %v2939_v31 = vsel %vm2339_vm9, %v2937_v25, %v2938_v28  ;;  %v7957_v43 = vld [vmem:[#allocation2 + $0x6c] sm:$0xe] }
 0x21b   : > { %v1675_v0 = vor.u32 %v1673_v3, %v1672_v8  ;;  %v1677_v51 = vrot.slane %v1672_v8, 4  ;;  %v1293_v49 = vmax.f32 %v1261_v32, 0.0  ;;  %v1014_v17 = vpop.f32.mrf.mxu1  ;;  %v9106_v24 = vpop.f32.mrf.mxu0  ;;  %v2367_v4 = vrot.slane %v8272_v10, 1  ;;  %v9110_v32 = vld [vmem:[#allocation13 + $0x1] ss:$0 sm:$0xff] }
 0x21c   : > { %v1189_v20 = vpop.f32.mrf.mxu3  ;;  %v2368_v28 = vrot.slane %v9094_v44, 1 }
 0x21d   : > { %v1676_v41 = vsel %vm8700_vm8, %v1668_v27, %v1675_v0  ;;  %v1858_v63 = vsel %vm8631_vm2, %v1677_v51, %v1857_v58  ;;  %v1434_v30 = vpack.c.bf16 %v1293_v49, %v1293_v49  ;;  %v1190_v48 = vadd.f32 %v1189_v20, %v1101_v36  ;;  %v1860_v51 = vld [vmem:[#allocation2 + $0xb4] sm:$0xf] }
 0x21e   : > { %1856 = vst [vmem:[#allocation2 + $0xac] sm:$0xf] %v1676_v41  ;;  %3305 = vmatmul.bf16.gmra.mxu1 %v2755_v53  ;;  %3394 = vmatmul.bf16.gmra.mxu2 %v2939_v31  ;;  %v1015_v58 = vadd.f32 %v1014_v17, %v8645_v52  ;;  %v2636_v27 = vunpack.c.l.b16 %v2492_v34  ;;  %v2759_v0 = vshll.u32 %v8946_v2, 16  ;;  %v9116_v41 = vsel %vm2339_vm9, %v2367_v4, %v2368_v28 }
 0x21f   : > { %1859 = vst [vmem:[#allocation2 + $0xb0] sm:$0x1] %v1858_v63  ;;  %v1679_v40 = vshrl.u32 %v1434_v30, 16  ;;  %v1228_v26 = vmul.f32 %v9103_v54, %v1190_v48  ;;  %v1682_v3 = vshll.u32 %v1434_v30, 16  ;;  %v7958_v53 = vor.u32 %v7957_v43, %v8948_v35 }
 0x220   : > { %v2652_v10 = vpack.c.b16 %v2636_v27, %v2636_v27  ;;  %12288 = vst [vmem:[#allocation28_spill] sm:$0xff] %v9116_v41  ;;  %v2761_v34 = vrot.slane %v2759_v0, 1  ;;  %v1864_v0 = vld [vmem:[#allocation2 + $0xbc] sm:$0x1] }
 0x221   : > { %3627 = vmatmul.bf16.gmra.mxu3 %v8990_v18  ;;  %v1681_v8 = vrot.slane %v1679_v40, 7  ;;  %v1262_v38 = vadd.f32 %v9110_v32, %v1228_v26  ;;  %v1103_v49 = vpop.f32.mrf.mxu2  ;;  %v2940_v43 = vrot.slane %v7958_v53, 1 }
 0x222   : > { %v1104_v20 = vadd.f32 %v1103_v49, %v1015_v58  ;;  %v2757_v58 = vshrl.u32 %v8946_v2, 16  ;;  %v2764_v27 = vshll.u32 %v2652_v10, 16 }
 0x223   : > { %v1684_v52 = vor.u32 %v1682_v3, %v1681_v8  ;;  %v1294_v36 = vmax.f32 %v1262_v38, 0.0  ;;  %v1016_v25 = vpop.f32.mrf.mxu1  ;;  %v9122_v26 = vpop.f32.mrf.mxu0 }
 0x224   : > { %v1192_v17 = vpop.f32.mrf.mxu3  ;;  %v1017_v38 = vadd.f32 %v1016_v25, %v8659_v5  ;;  %v2762_v35 = vor.u32 %v2761_v34, %v2757_v58 }
 0x225   : > { %v1861_v63 = vsel %vm8682_vm6, %v1684_v52, %v1860_v51  ;;  %v1435_v30 = vpack.c.bf16 %v1294_v36, %v1294_v36  ;;  %v1193_v48 = vadd.f32 %v1192_v17, %v1104_v20  ;;  %v9127_v28 = vld [vmem:[#allocation2 + $0xa8] sm:$0xff]   ;;  %v1685_v51 = vrot.slane %v1681_v8, 4 }
 0x226   : > { %1862 = vst [vmem:[#allocation2 + $0xb4] sm:$0xf] %v1861_v63  ;;  %3246 = vmatmul.bf16.gmra.mxu0 %v9127_v28  ;;  %v2941_v52 = vrot.slane %v2652_v10, 1 }
 0x227   : > { %v1687_v31 = vshrl.u32 %v1435_v30, 16  ;;  %v1229_v40 = vmul.f32 %v9103_v54, %v1193_v48  ;;  %v1690_v4 = vshll.u32 %v1435_v30, 16  ;;  %v2493_v30 = vld [vmem:[#allocation2 + $0x80] sm:$0x1] }
 0x228   : > { %v2942_v10 = vsel %vm2339_vm9, %v2940_v43, %v2941_v52  ;;  %v2637_v53 = vunpack.c.l.b16 %v2493_v30 }
 0x229   : > { %v1689_v15 = vrot.slane %v1687_v31, 7  ;;  %v1263_v3 = vadd.f32 %v9110_v32, %v1229_v40  ;;  %v1105_v49 = vpop.f32.mrf.mxu2  ;;  %v2766_v31 = vrot.slane %v2764_v27, 1 }
 0x22a   : > { %v1106_v17 = vadd.f32 %v1105_v49, %v1017_v38 }
 0x22b   : > { %v1692_v36 = vor.u32 %v1690_v4, %v1689_v15  ;;  %v1694_v20 = vrot.slane %v1689_v15, 4  ;;  %v1295_v2 = vmax.f32 %v1263_v3, 0.0  ;;  %v3271_v48 = vpop.f32.mrf.mxu1  ;;  %v2767_v34 = vsel %vm2082_vm10, %v2762_v35, %v2766_v31  ;;  %v9137_v4 = vpop.f32.mrf.mxu0  ;;  %v7420_v31 = vld [vmem:[#allocation10 + $0x1f8] sm:$0xff] }
 0x22c   : > { %v1194_v63 = vpop.f32.mrf.mxu3  ;;  %v2653_v35 = vpack.c.b16 %v2637_v53, %v2637_v53  ;;  %4662 = vmatpush.bf16.msrb.mxu3 %v7420_v31  ;;  %v7428_v31 = vld [vmem:[#allocation10 + $0x238] sm:$0xff] }
 0x22d   : > { %v1693_v5 = vsel %vm8700_vm8, %v1685_v51, %v1692_v36  ;;  %v1865_v8 = vsel %vm8631_vm2, %v1694_v20, %v1864_v0  ;;  %v1436_v25 = vpack.c.bf16 %v1295_v2, %v1295_v2  ;;  %v1195_v40 = vadd.f32 %v1194_v63, %v1106_v17  ;;  %v1867_v0 = vld [vmem:[#allocation2 + $0xc0] sm:$0xf]  ;;  %v7609_v17 = vld [vmem:[#allocation2 + $0x78] sm:$0xf0]  ;;  %4751 = vmatpush.bf16.msrb.mxu0 %v7428_v31 }
 0x22e   : > { %1863 = vst [vmem:[#allocation2 + $0xb8] sm:$0xf] %v1693_v5  ;;  %3310 = vmatmul.bf16.gmra.mxu1 %v2767_v34  ;;  %3399 = vmatmul.bf16.gmra.mxu2 %v2942_v10  ;;  %v3272_v51 = vadd.f32 %v3271_v48, %v8951_v7  ;;  %v7412_v48 = vld [vmem:[#allocation10 + $0x1b8] sm:$0xff]  ;;  %v2776_v5 = vshll.u32 %v2653_v35, 16 }
 0x22f   : > { %1866 = vst [vmem:[#allocation2 + $0xbc] sm:$0x1] %v1865_v8  ;;  %v1696_v58 = vshrl.u32 %v1436_v25, 16  ;;  %v1230_v15 = vmul.f32 %v9103_v54, %v1195_v40  ;;  %v1699_v3 = vshll.u32 %v1436_v25, 16  ;;  %v2771_v54 = vshll.u32 %v8988_v55, 16  ;;  %4573 = vmatpush.bf16.msrb.mxu2 %v7412_v48 }
 0x230   : > { %v7610_v40 = vld [vmem:[#allocation2 + $0x78] sm:$0xe]  ;;  %v2494_v48 = vld [vmem:[#allocation2 + $0x8c] sm:$0x1] }
 0x231   : > { %3632 = vmatmul.bf16.gmra.mxu3 %v8924_v33  ;;  %v1698_v27 = vrot.slane %v1696_v58, 7  ;;  %v1264_v38 = vadd.f32 %v9110_v32, %v1230_v15  ;;  %v3360_v49 = vpop.f32.mrf.mxu2  ;;  %v2773_v34 = vrot.slane %v2771_v54, 1  ;;  %v7611_v23 = vor.u32 %v7610_v40, %v7609_v17  ;;  %v7960_v40 = vld [vmem:[#allocation2 + $0x84] sm:$0xe] }
 0x232   : > { %v3361_v36 = vadd.f32 %v3360_v49, %v3272_v51  ;;  %v2769_v15 = vshrl.u32 %v8988_v55, 16  ;;  %v2778_v51 = vrot.slane %v2776_v5, 1  ;;  %v2638_v47 = vunpack.c.l.b16 %v2494_v48  ;;  %v7813_v48 = vld [vmem:[#allocation2] sm:$0xff]  }
 0x233   : > { %v1701_v43 = vor.u32 %v1699_v3, %v1698_v27  ;;  %v1296_v52 = vmax.f32 %v1264_v38, 0.0  ;;  %v3273_v2 = vpop.f32.mrf.mxu1  ;;  %v9151_v25 = vpop.f32.mrf.mxu0  ;;  %v1871_v3 = vld [vmem:[#allocation2 + $0xc8] sm:$0x1]  ;;  %v1702_v49 = vrot.slane %v1698_v27, 4  ;;  %v2943_v17 = vrot.slane %v7611_v23, 1 }
 0x234   : > { %v3593_v20 = vpop.f32.mrf.mxu3  ;;  %v3274_v58 = vadd.f32 %v3273_v2, %v8969_v46  ;;  %v2086_v31 = vshll.u32 %v7813_v48, 16 }
 0x235   : > { %v1868_v33 = vsel %vm8682_vm6, %v1701_v43, %v1867_v0  ;;  %v1437_v63 = vpack.c.bf16 %v1296_v52, %v1296_v52  ;;  %v9145_v30 = vadd.f32 %v3593_v20, %v3361_v36  ;;  %v9147_v32 = vld [vmem:[#allocation2 + $0xb4] sm:$0xff]   ;;  %v2944_v0 = vrot.slane %v2653_v35, 1 }
 0x236   : > { %v9149_v7 = vld [vmem:[#allocation2 + $0xb4] sm:$0xf0]  ;;  %1869 = vst [vmem:[#allocation2 + $0xc0] sm:$0xf] %v1868_v33  ;;  %3251 = vmatmul.bf16.gmra.mxu0 %v9147_v32  ;;  %v9156_v33 = vor.u32 %v2773_v34, %v2769_v15  ;;  %v2783_v34 = vshll.u32 %v9015_v62, 16  ;;  %v2654_v15 = vpack.c.b16 %v2638_v47, %v2638_v47 }
 0x237   : > { %v1704_v8 = vshrl.u32 %v1437_v63, 16  ;;  %v1707_v53 = vshll.u32 %v1437_v63, 16  ;;  %v7380_v35 = vld [vmem:[#allocation10 + $0xb8] sm:$0xff]  ;;  %v2945_v5 = vsel %vm2339_vm9, %v2943_v17, %v2944_v0  ;;  %v7961_v0 = vor.u32 %v7960_v40, %v9017_v22 }
 0x238   : > { %v2779_v27 = vsel %vm2082_vm10, %v9156_v33, %v2778_v51  ;;  %3762 = vmatpush.bf16.msrb.mxu1 %v7380_v35  ;;  %v2785_v51 = vrot.slane %v2783_v34, 1  ;;  %v2498_v41 = vld [vmem:[#allocation2 + $0xbc] sm:$0x1] }
 0x239   : > { %v1706_v10 = vrot.slane %v1704_v8, 7  ;;  %v3362_v38 = vpop.f32.mrf.mxu2 }
 0x23a   : > { %v3363_v36 = vadd.f32 %v3362_v38, %v3274_v58 }
 0x23b   : > { %v1709_v43 = vor.u32 %v1707_v53, %v1706_v10  ;;  %v1711_v52 = vrot.slane %v1706_v10, 4  ;;  %v3276_v54 = vpop.f32.mrf.mxu1  ;;  %v9167_v8 = vpop.f32.mrf.mxu0 }
 0x23c   : > { %v3595_v20 = vpop.f32.mrf.mxu3  ;;  %v3277_v11 = vadd.f32 %v3276_v54, %v8981_v16  ;;  %v2781_v16 = vshrl.u32 %v9015_v62, 16 }
 0x23d   : > { %v1710_v46 = vsel %vm8700_vm8, %v1702_v49, %v1709_v43  ;;  %v1872_v2 = vsel %vm8631_vm2, %v1711_v52, %v1871_v3  ;;  %v9162_v63 = vadd.f32 %v3595_v20, %v3363_v36  ;;  %v1906_v3 = vld [vmem:[#allocation2 + $0x8] sm:$0x1]  ;;  %v2788_v52 = vshll.u32 %v2654_v15, 16 }
 0x23e   : > { %1870 = vst [vmem:[#allocation2 + $0xc4] sm:$0xf] %v1710_v46  ;;  %3315 = vmatmul.bf16.gmra.mxu1 %v2779_v27  ;;  %3404 = vmatmul.bf16.gmra.mxu2 %v2945_v5  ;;  %v2050_v43 = vunpack.c.l.b16 %v1906_v3  ;;  %v2786_v17 = vor.u32 %v2785_v51, %v2781_v16  ;;  %v2946_v46 = vrot.slane %v7961_v0, 1  ;;  %v2495_v5 = vld [vmem:[#allocation2 + $0x98] sm:$0x1]  ;;  %vm6029_vm2 = vcmask 1022976  }
 0x23f   : > { %1873 = vst [vmem:[#allocation2 + $0xc8] sm:$0x1] %v1872_v2  ;;  %v2947_v2 = vrot.slane %v2654_v15, 1  ;;  %v2790_v62 = vrot.slane %v2788_v52, 1  ;;  %v2639_v34 = vunpack.c.l.b16 %v2495_v5  ;;  %v7613_v5 = vld [vmem:[#allocation2 + $0x90] sm:$0xe] }
 0x240   : > { %v9182_v27 = vpack.c.b16 %v2050_v43, %v2050_v43  ;;  %vm6079_vm8 = vcmask 15360  }
 0x241   : > { %3637 = vmatmul.bf16.gmra.mxu3 %v9081_v56  ;;  %v3365_v23 = vpop.f32.mrf.mxu2  ;;  %v2948_v40 = vsel %vm2339_vm9, %v2946_v46, %v2947_v2  ;;  %v2655_v51 = vpack.c.b16 %v2639_v34, %v2639_v34  ;;  %v7612_v46 = vld [vmem:[#allocation2 + $0x90] sm:$0xf0] }
 0x242   : > { %v3366_v10 = vadd.f32 %v3365_v23, %v3277_v11  ;;  %v2084_v23 = vshrl.u32 %v7813_v48, 16  ;;  %v7411_v2 = vld [vmem:[#allocation10 + $0x1b0] sm:$0xff] }
 0x243   : > { %v3278_v58 = vpop.f32.mrf.mxu1  ;;  %v9175_v49 = vpop.f32.mrf.mxu0  ;;  %v7419_v48 = vld [vmem:[#allocation10 + $0x1f0] sm:$0xff]  ;;  %4574 = vmatpush.bf16.msrb.mxu2 %v7411_v2 }
 0x244   : > { %v3598_v53 = vpop.f32.mrf.mxu3  ;;  %v3279_v36 = vadd.f32 %v3278_v58, %v9002_v9  ;;  %v2791_v9 = vsel %vm2082_vm10, %v2786_v17, %v2790_v62  ;;  %v2091_v58 = vshll.u32 %v9182_v27, 16  ;;  %4663 = vmatpush.bf16.msrb.mxu3 %v7419_v48  ;;  %v7614_v62 = vor.u32 %v7613_v5, %v7612_v46  ;;  %v7427_v46 = vld [vmem:[#allocation10 + $0x230] sm:$0xff]  ;;  %v7963_v5 = vld [vmem:[#allocation2 + $0x9c] sm:$0xe] }
 0x245   : > { %v9172_v38 = vadd.f32 %v3598_v53, %v3366_v10  ;;  %v9179_v20 = vld [vmem:[#allocation2 + $0xc0] sm:$0xff]   ;;  %v2088_v10 = vrot.slane %v2086_v31, 1  ;;  %v2800_v31 = vshll.u32 %v2655_v51, 16  ;;  %v7379_v2 = vld [vmem:[#allocation10 + $0xb0] sm:$0xff]  ;;  %4752 = vmatpush.bf16.msrb.mxu0 %v7427_v46 }
 0x246   : > { %3256 = vmatmul.bf16.gmra.mxu0 %v9179_v20  ;;  %v2093_v52 = vrot.slane %v2091_v58, 1  ;;  %3763 = vmatpush.bf16.msrb.mxu1 %v7379_v2  ;;  %v2805_v2 = vshrl.u32 %v9077_v12, 16 }
 0x247   : > { %v2089_v0 = vor.u32 %v2088_v10, %v2084_v23  ;;  %v2802_v23 = vrot.slane %v2800_v31, 1  ;;  %v2950_v10 = vrot.slane %v2655_v51, 1 }
 0x249   : > { %v3367_v54 = vpop.f32.mrf.mxu2 }
 0x24a   : > { %v3368_v35 = vadd.f32 %v3367_v54, %v3279_v36  ;;  %v2795_v36 = vshll.u32 %v9057_v37, 16 }
 0x24b   : > { %v3281_v47 = vpop.f32.mrf.mxu1  ;;  %v9188_v53 = vpop.f32.mrf.mxu0 }
 0x24c   : > { %v3600_v22 = vpop.f32.mrf.mxu3  ;;  %v3282_v15 = vadd.f32 %v3281_v47, %v9020_v45  ;;  %v2797_v47 = vrot.slane %v2795_v36, 1  ;;  %v2496_v36 = vld [vmem:[#allocation2 + $0xa4] sm:$0x1] }
 0x24d   : > { %v9184_v11 = vadd.f32 %v3600_v22, %v3368_v35  ;;  %v9196_v35 = vld [vmem:[#allocation2 + $0x84] sm:$0xff]   ;;  %v2094_v22 = vsel %vm2082_vm10, %v2089_v0, %v2093_v52  ;;  %v2098_v0 = vshll.u32 %v8729_v6, 16  ;;  %v2640_v51 = vunpack.c.l.b16 %v2496_v36 }
 0x24e   : > { %3320 = vmatmul.bf16.gmra.mxu1 %v2791_v9  ;;  %3409 = vmatmul.bf16.gmra.mxu2 %v2948_v40  ;;  %v2793_v40 = vshrl.u32 %v9057_v37, 16 }
 0x251   : > { %3642 = vmatmul.bf16.gmra.mxu3 %v8988_v55  ;;  %v3370_v3 = vpop.f32.mrf.mxu2  ;;  %v9198_v55 = vld [vmem:[#allocation2 + $0x84] sm:$0xf0] }
 0x252   : > { %v3371_v43 = vadd.f32 %v3370_v3, %v3282_v15  ;;  %12289 = vst [vmem:[#allocation29_spill] sm:$0xff] %v9198_v55  ;;  %v9205_v3 = vor.u32 %v2797_v47, %v2793_v40  ;;  %v2807_v47 = vshll.u32 %v9077_v12, 16 }
 0x253   : > { %v3283_v54 = vpop.f32.mrf.mxu1  ;;  %v9200_v45 = vpop.f32.mrf.mxu0 }
 0x254   : > { %v3603_v16 = vpop.f32.mrf.mxu3  ;;  %v3284_v9 = vadd.f32 %v3283_v54, %v9038_v13  ;;  %v2803_v13 = vsel %vm2082_vm10, %v9205_v3, %v2802_v23  ;;  %v2103_v23 = vshll.u32 %v8738_v39, 16  ;;  %v2809_v36 = vrot.slane %v2807_v47, 1 }
 0x255   : > { %v9194_v17 = vadd.f32 %v3603_v16, %v3371_v43  ;;  %v2949_v16 = vrot.slane %v7614_v62, 1 }
 0x256   : > { %3681 = vmatmul.bf16.vlgmr.msra.gmra.mxu0 %v2094_v22  ;;  %v2100_v22 = vrot.slane %v2098_v0, 1  ;;  %v2105_v46 = vrot.slane %v2103_v23, 1 }
 0x257   : > { %v2951_v54 = vsel %vm2339_vm9, %v2949_v16, %v2950_v10 }
 0x259   : > { %v3372_v34 = vpop.f32.mrf.mxu2 }
 0x25a   : > { %v3373_v58 = vadd.f32 %v3372_v34, %v3284_v9  ;;  %v2096_v34 = vshrl.u32 %v8729_v6, 16 }
 0x25b   : > { %v3286_v43 = vpop.f32.mrf.mxu1  ;;  %v9213_v48 = vpop.f32.mrf.mxu0 }
 0x25c   : > { %v3605_v15 = vpop.f32.mrf.mxu3  ;;  %v3287_v31 = vadd.f32 %v3286_v43, %v9050_v1  ;;  %v2101_v16 = vor.u32 %v2100_v22, %v2096_v34  ;;  %v7964_v1 = vor.u32 %v7963_v5, %v9079_v60  ;;  %v1908_v43 = vld [vmem:[#allocation2 + $0x20] sm:$0x1]  ;;  %v2497_v60 = vld [vmem:[#allocation2 + $0xb0] sm:$0x1] }
 0x25d   : > { %v9208_v52 = vadd.f32 %v3605_v15, %v3373_v58  ;;  %v2656_v58 = vpack.c.b16 %v2640_v51, %v2640_v51  ;;  %v2052_v39 = vunpack.c.l.b16 %v1908_v43  ;;  %v2810_v51 = vor.u32 %v2809_v36, %v2805_v2 }
 0x25e   : > { %3325 = vmatmul.bf16.gmra.mxu1 %v2803_v13  ;;  %3414 = vmatmul.bf16.gmra.mxu2 %v2951_v54  ;;  %v2106_v6 = vsel %vm2082_vm10, %v2101_v16, %v2105_v46  ;;  %v7814_v16 = vld [vmem:[#allocation2 + $0x18] sm:$0xff]  }
 0x25f   : > { %v2812_v13 = vshll.u32 %v2656_v58, 16  ;;  %v2953_v22 = vrot.slane %v2656_v58, 1  ;;  %v9230_v23 = vpack.c.b16 %v2052_v39, %v2052_v39  ;;  %v2110_v43 = vshll.u32 %v7814_v16, 16 }
 0x260   : > { %v2819_v39 = vshll.u32 %v9127_v28, 16 }
 0x261   : > { %3647 = vmatmul.bf16.gmra.mxu3 %v9196_v35  ;;  %v3375_v62 = vpop.f32.mrf.mxu2  ;;  %v2115_v36 = vshll.u32 %v9230_v23, 16 }
 0x262   : > { %v3376_v9 = vadd.f32 %v3375_v62, %v3287_v31  ;;  %v2952_v62 = vrot.slane %v7964_v1, 1 }
 0x263   : > { %v3288_v10 = vpop.f32.mrf.mxu1  ;;  %v9223_v0 = vpop.f32.mrf.mxu0 }
 0x264   : > { %v3608_v40 = vpop.f32.mrf.mxu3  ;;  %v3289_v54 = vadd.f32 %v3288_v10, %v9067_v19  ;;  %v2954_v19 = vsel %vm2339_vm9, %v2952_v62, %v2953_v22  ;;  %v2641_v10 = vunpack.c.l.b16 %v2497_v60  ;;  %v2117_v22 = vrot.slane %v2115_v36, 1  ;;  %v7418_v60 = vld [vmem:[#allocation10 + $0x1e8] sm:$0xff] }
 0x265   : > { %v9220_v15 = vadd.f32 %v3608_v40, %v3376_v9  ;;  %v2814_v40 = vrot.slane %v2812_v13, 1  ;;  %v2112_v13 = vrot.slane %v2110_v43, 1  ;;  %4664 = vmatpush.bf16.msrb.mxu3 %v7418_v60  ;;  %v2821_v43 = vrot.slane %v2819_v39, 1 }
 0x266   : > { %3686 = vmatmul.bf16.gmra.mxu0 %v2106_v6  ;;  %v2657_v2 = vpack.c.b16 %v2641_v10, %v2641_v10  ;;  %v7378_v10 = vld [vmem:[#allocation10 + $0xa8] sm:$0xff]  ;;  %v2122_v39 = vshll.u32 %v8864_v57, 16 }
 0x267   : > { %v2815_v12 = vsel %vm2082_vm10, %v2810_v51, %v2814_v40  ;;  %v2108_v51 = vshrl.u32 %v7814_v16, 16  ;;  %v9242_v40 = vld [vmem:[#allocation2 + $0x9c] sm:$0xff]   ;;  %3764 = vmatpush.bf16.msrb.mxu1 %v7378_v10  ;;  %v2642_v10 = vunpack.c.l.b16 %v2498_v41  ;;  %v2127_v41 = vshll.u32 %v8867_v61, 16 }
 0x268   : > { %v2829_v61 = vshrl.u32 %v9147_v32, 16 }
 0x269   : > { %v3377_v31 = vpop.f32.mrf.mxu2 }
 0x26a   : > { %v3378_v47 = vadd.f32 %v3377_v31, %v3289_v54 }
 0x26b   : > { %v3291_v5 = vpop.f32.mrf.mxu1  ;;  %v9234_v46 = vpop.f32.mrf.mxu0 }
 0x26c   : > { %v3610_v9 = vpop.f32.mrf.mxu3  ;;  %v3292_v58 = vadd.f32 %v3291_v5, %v9085_v42  ;;  %v9244_v42 = vld [vmem:[#allocation2 + $0x9c] sm:$0xf0]  ;;  %v2113_v5 = vor.u32 %v2112_v13, %v2108_v51 }
 0x26d   : > { %v9228_v34 = vadd.f32 %v3610_v9, %v3378_v47  ;;  %v7615_v47 = vld [vmem:[#allocation2 + $0xa8] sm:$0xf0]  ;;  %12290 = vst [vmem:[#allocation30_spill] sm:$0xff] %v9244_v42  ;;  %v2956_v42 = vrot.slane %v2657_v2, 1 }
 0x26e   : > { %3330 = vmatmul.bf16.gmra.mxu1 %v2815_v12  ;;  %3419 = vmatmul.bf16.gmra.mxu2 %v2954_v19  ;;  %v7410_v9 = vld [vmem:[#allocation10 + $0x1a8] sm:$0xff]  ;;  %v2118_v36 = vsel %vm2082_vm10, %v2113_v5, %v2117_v22  ;;  %v7409_v22 = vld [vmem:[#allocation10 + $0x1a0] sm:$0xff] }
 0x26f   : > { %v7616_v19 = vld [vmem:[#allocation2 + $0xa8] sm:$0xe]  ;;  %4575 = vmatpush.bf16.msrb.mxu2 %v7410_v9 }
 0x270   : > { %v7617_v16 = vor.u32 %v7616_v19, %v7615_v47 }
 0x271   : > { %3652 = vmatmul.bf16.gmra.mxu3 %v9057_v37  ;;  %v3380_v1 = vpop.f32.mrf.mxu2  ;;  %v2824_v37 = vshll.u32 %v2657_v2, 16  ;;  %v7417_v2 = vld [vmem:[#allocation10 + $0x1e0] sm:$0xff] }
 0x272   : > { %v3381_v54 = vadd.f32 %v3380_v1, %v3292_v58  ;;  %v2817_v1 = vshrl.u32 %v9127_v28, 16  ;;  %v2955_v60 = vrot.slane %v7617_v16, 1  ;;  %v2124_v16 = vrot.slane %v2122_v39, 1  ;;  %4665 = vmatpush.bf16.msrb.mxu3 %v7417_v2  ;;  %v7375_v39 = vld [vmem:[#allocation10 + $0x90] sm:$0xff]  ;;  %v1910_v2 = vld [vmem:[#allocation2 + $0x38] sm:$0x1] }
 0x273   : > { %v3293_v31 = vpop.f32.mrf.mxu1  ;;  %v9246_v12 = vpop.f32.mrf.mxu0  ;;  %4576 = vmatpush.bf16.msrb.mxu2 %v7409_v22 }
 0x274   : > { %v3613_v6 = vpop.f32.mrf.mxu3  ;;  %v3294_v58 = vadd.f32 %v3293_v31, %v9106_v24  ;;  %v9251_v55 = vor.u32 %v2821_v43, %v2817_v1  ;;  %v7426_v24 = vld [vmem:[#allocation10 + $0x228] sm:$0xff]  ;;  %v7377_v31 = vld [vmem:[#allocation10 + $0xa0] sm:$0xff]  ;;  %v7408_v1 = vld [vmem:[#allocation10 + $0x198] sm:$0xff] }
 0x275   : > { %v9240_v62 = vadd.f32 %v3613_v6, %v3381_v54  ;;  %v2826_v6 = vrot.slane %v2824_v37, 1  ;;  %v2957_v37 = vsel %vm2339_vm9, %v2955_v60, %v2956_v42  ;;  %4753 = vmatpush.bf16.msrb.mxu0 %v7426_v24  ;;  %3765 = vmatpush.bf16.msrb.mxu1 %v7377_v31  ;;  %v2120_v60 = vshrl.u32 %v8864_v57, 16  ;;  %v7407_v31 = vld [vmem:[#allocation10 + $0x190] sm:$0xff] }
 0x276   : > { %3691 = vmatmul.bf16.gmra.mxu0 %v2118_v36  ;;  %12291 = vst [vmem:[#allocation31_spill] sm:$0xff] %v9251_v55  ;;  %v7376_v36 = vld [vmem:[#allocation10 + $0x98] sm:$0xff]  ;;  %v2129_v57 = vrot.slane %v2127_v41, 1 }
 0x277   : > { %v2827_v5 = vsel %vm2082_vm10, %v9251_v55, %v2826_v6  ;;  %v7416_v6 = vld [vmem:[#allocation10 + $0x1d8] sm:$0xff]  ;;  %4577 = vmatpush.bf16.msrb.mxu2 %v7408_v1  ;;  %v7374_v1 = vld [vmem:[#allocation10 + $0x88] sm:$0xff] }
 0x278   : > { %4666 = vmatpush.bf16.msrb.mxu3 %v7416_v6 }
 0x279   : > { %v3382_v54 = vpop.f32.mrf.mxu2  ;;  %3766 = vmatpush.bf16.msrb.mxu1 %v7376_v36  ;;  %v2054_v36 = vunpack.c.l.b16 %v1910_v2  ;;  %v7815_v2 = vld [vmem:[#allocation2 + $0x30] sm:$0xff]  }
 0x27a   : > { %v3383_v13 = vadd.f32 %v3382_v54, %v3294_v58  ;;  %v7966_v58 = vld [vmem:[#allocation2 + $0xb4] sm:$0xe]  ;;  %v2831_v54 = vshll.u32 %v9147_v32, 16  ;;  %v2499_v32 = vld [vmem:[#allocation2 + $0xc8] sm:$0x1] }
 0x27b   : > { %v3296_v9 = vpop.f32.mrf.mxu1  ;;  %v9259_v19 = vpop.f32.mrf.mxu0  ;;  %4578 = vmatpush.bf16.msrb.mxu2 %v7407_v31 }
 0x27c   : > { %v3615_v51 = vpop.f32.mrf.mxu3  ;;  %v3297_v43 = vadd.f32 %v3296_v9, %v9122_v26  ;;  %v2125_v9 = vor.u32 %v2124_v16, %v2120_v60  ;;  %v2833_v22 = vrot.slane %v2831_v54, 1  ;;  %v7406_v54 = vld [vmem:[#allocation10 + $0x188] sm:$0xff] }
 0x27d   : > { %v9254_v47 = vadd.f32 %v3615_v51, %v3383_v13  ;;  %3767 = vmatpush.bf16.msrb.mxu1 %v7375_v39  ;;  %v7405_v39 = vld [vmem:[#allocation10 + $0x180] sm:$0xff] }
 0x27e   : > { %3335 = vmatmul.bf16.gmra.mxu1 %v2827_v5  ;;  %3424 = vmatmul.bf16.gmra.mxu2 %v2957_v37  ;;  %v2658_v5 = vpack.c.b16 %v2642_v10, %v2642_v10  ;;  %v7967_v37 = vor.u32 %v7966_v58, %v9149_v7  ;;  %v2130_v16 = vsel %vm2082_vm10, %v2125_v9, %v2129_v57  ;;  %v7373_v9 = vld [vmem:[#allocation10 + $0x80] sm:$0xff] }
 0x27f   : > { %12292 = vst [vmem:[#allocation32_spill] sm:$0xff] %v9254_v47  ;;  %v2834_v7 = vor.u32 %v2833_v22, %v2829_v61  ;;  %4579 = vmatpush.bf16.msrb.mxu2 %v7406_v54  ;;  %v2843_v54 = vshll.u32 %v9179_v20, 16 }
 0x280   : > { %v2836_v55 = vshll.u32 %v2658_v5, 16  ;;  %v2958_v58 = vrot.slane %v7967_v37, 1  ;;  %v2959_v6 = vrot.slane %v2658_v5, 1  ;;  %v2643_v5 = vunpack.c.l.b16 %v2499_v32  ;;  %v7413_v37 = vld [vmem:[#allocation10 + $0x1c0] sm:$0xff] }
 0x281   : > { %3657 = vmatmul.bf16.gmra.mxu3 %v9242_v40  ;;  %v3385_v42 = vpop.f32.mrf.mxu2  ;;  %3768 = vmatpush.bf16.msrb.mxu1 %v7374_v1  ;;  %v7619_v32 = vld [vmem:[#allocation2 + $0xc0] sm:$0xe] }
 0x282   : > { %v3386_v13 = vadd.f32 %v3385_v42, %v3297_v43  ;;  %v7415_v43 = vld [vmem:[#allocation10 + $0x1d0] sm:$0xff]  ;;  %v2838_v47 = vrot.slane %v2836_v55, 1  ;;  %v2960_v22 = vsel %vm2339_vm9, %v2958_v58, %v2959_v6 }
 0x283   : > { %v3298_v24 = vpop.f32.mrf.mxu1  ;;  %v9269_v42 = vpop.f32.mrf.mxu0  ;;  %4667 = vmatpush.bf16.msrb.mxu3 %v7415_v43  ;;  %v2134_v43 = vshll.u32 %v7815_v2, 16  ;;  %4580 = vmatpush.bf16.msrb.mxu2 %v7405_v39 }
 0x284   : > { %v3618_v51 = vpop.f32.mrf.mxu3  ;;  %v3299_v10 = vadd.f32 %v3298_v24, %v9137_v4  ;;  %v9276_v24 = vpack.c.b16 %v2054_v36, %v2054_v36  ;;  %v2839_v31 = vsel %vm2082_vm10, %v2834_v7, %v2838_v47  ;;  %v2132_v7 = vshrl.u32 %v7815_v2, 16 }
 0x285   : > { %v9266_v26 = vadd.f32 %v3618_v51, %v3386_v13  ;;  %v7414_v51 = vld [vmem:[#allocation10 + $0x1c8] sm:$0xff]  ;;  %3769 = vmatpush.bf16.msrb.mxu1 %v7373_v9  ;;  %v2845_v9 = vrot.slane %v2843_v54, 1 }
 0x286   : > { %3696 = vmatmul.bf16.gmra.mxu0 %v2130_v16  ;;  %v2139_v61 = vshll.u32 %v9276_v24, 16  ;;  %v2136_v16 = vrot.slane %v2134_v43, 1 }
 0x287   : > { %12293 = vst [vmem:[#allocation33_spill] sm:$0xff] %v9266_v26  ;;  %4668 = vmatpush.bf16.msrb.mxu3 %v7414_v51 }
 0x288   : > { %v2141_v6 = vrot.slane %v2139_v61, 1 }
 0x289   : > { %v3387_v13 = vpop.f32.mrf.mxu2 }
 0x28a   : > { %v3388_v60 = vadd.f32 %v3387_v13, %v3299_v10  ;;  %v2659_v10 = vpack.c.b16 %v2643_v5, %v2643_v5  ;;  %v2841_v5 = vshrl.u32 %v9179_v20, 16 }
 0x28b   : > { %v3301_v26 = vpop.f32.mrf.mxu1  ;;  %v9280_v57 = vpop.f32.mrf.mxu0  ;;  %4669 = vmatpush.bf16.msrb.mxu3 %v7413_v37 }
 0x28c   : > { %v3620_v41 = vpop.f32.mrf.mxu3  ;;  %v3302_v55 = vadd.f32 %v3301_v26, %v9151_v25  ;;  %v2848_v51 = vshll.u32 %v2659_v10, 16  ;;  %v9288_v25 = vld [vmem:[#allocation2 + $0xb4] sm:$0xff]   ;;  %v2962_v43 = vrot.slane %v2659_v10, 1 }
 0x28d   : > { %v9274_v4 = vadd.f32 %v3620_v41, %v3388_v60  ;;  %v9290_v26 = vld [vmem:[#allocation2 + $0xb4] sm:$0xf0]  ;;  %v2137_v60 = vor.u32 %v2136_v16, %v2132_v7  ;;  %v2146_v7 = vshll.u32 %v8927_v14, 16 }
 0x28e   : > { %3340 = vmatmul.bf16.gmra.mxu1 %v2839_v31  ;;  %3429 = vmatmul.bf16.gmra.mxu2 %v2960_v22  ;;  %12294 = vst [vmem:[#allocation34_spill] sm:$0xff] %v9290_v26  ;;  %v2850_v2 = vrot.slane %v2848_v51, 1 }
 0x28f   : > { %v2142_v22 = vsel %vm2082_vm10, %v2137_v60, %v2141_v6  ;;  %v2148_v51 = vrot.slane %v2146_v7, 1  ;;  %v7565_v60 = vld [vmem:[#allocation2] sm:$0xf0] }
 0x291   : > { %3662 = vmatmul.bf16.gmra.mxu3 %v9127_v28  ;;  %v3390_v47 = vpop.f32.mrf.mxu2  ;;  %v7618_v28 = vld [vmem:[#allocation2 + $0xc0] sm:$0xf0] }
 0x292   : > { %v3391_v36 = vadd.f32 %v3390_v47, %v3302_v55  ;;  %v7620_v39 = vor.u32 %v7619_v32, %v7618_v28  ;;  %v2846_v47 = vor.u32 %v2845_v9, %v2841_v5  ;;  %v7425_v28 = vld [vmem:[#allocation10 + $0x220] sm:$0xff]  ;;  %v2144_v5 = vshrl.u32 %v8927_v14, 16 }
 0x293   : > { %v3303_v13 = vpop.f32.mrf.mxu1  ;;  %v9292_v41 = vpop.f32.mrf.mxu0  ;;  %4754 = vmatpush.bf16.msrb.mxu0 %v7425_v28  ;;  %v7566_v32 = vld [vmem:[#allocation2] sm:$0xe]  ;;  %v3854_v14 = vld [vmem:[#allocation2 + $0x24] sm:$0xff]  }
 0x294   : > { %v3623_v1 = vpop.f32.mrf.mxu3  ;;  %v3304_v31 = vadd.f32 %v3303_v13, %v9167_v8  ;;  %v2961_v16 = vrot.slane %v7620_v39, 1  ;;  %v2851_v8 = vsel %vm2082_vm10, %v2846_v47, %v2850_v2  ;;  %v7527_v39 = vld [vmem:[#allocation2 + $0x18] sm:$0xff]   ;;  %v2149_v47 = vor.u32 %v2148_v51, %v2144_v5 }
 0x295   : > { %v9286_v58 = vadd.f32 %v3623_v1, %v3391_v36  ;;  %v3884_v1 = vld [vmem:[#allocation2 + $0x20] sm:$0x1] }
 0x296   : > { %3701 = vmatmul.bf16.gmra.mxu0 %v2142_v22  ;;  %v2963_v13 = vsel %vm2339_vm9, %v2961_v16, %v2962_v43  ;;  %v4028_v10 = vunpack.c.l.b16 %v3884_v1  ;;  %v4063_v16 = vshll.u32 %v7527_v39, 16 }
 0x298   : > { %v9308_v2 = vpack.c.b16 %v4028_v10, %v4028_v10 }
 0x299   : > { %v3392_v37 = vpop.f32.mrf.mxu2 }
 0x29a   : > { %v3393_v55 = vadd.f32 %v3392_v37, %v3304_v31  ;;  %v2151_v37 = vshll.u32 %v8937_v29, 16  ;;  %v4068_v7 = vshll.u32 %v9308_v2, 16 }
 0x29b   : > { %v3306_v36 = vpop.f32.mrf.mxu1  ;;  %v9302_v20 = vpop.f32.mrf.mxu0 }
 0x29c   : > { %v3625_v61 = vpop.f32.mrf.mxu3  ;;  %v3307_v6 = vadd.f32 %v3306_v36, %v9175_v49  ;;  %v1912_v49 = vld [vmem:[#allocation2 + $0x50] sm:$0x1]  ;;  %v2153_v1 = vrot.slane %v2151_v37, 1 }
 0x29d   : > { %v9298_v54 = vadd.f32 %v3625_v61, %v3393_v55  ;;  %v7567_v55 = vor.u32 %v7566_v32, %v7565_v60  ;;  %v2056_v60 = vunpack.c.l.b16 %v1912_v49  ;;  %v4061_v32 = vshrl.u32 %v7527_v39, 16 }
 0x29e   : > { %3345 = vmatmul.bf16.gmra.mxu1 %v2851_v8  ;;  %3434 = vmatmul.bf16.gmra.mxu2 %v2963_v13  ;;  %v2341_v8 = vrot.slane %v9182_v27, 1  ;;  %v9316_v13 = vld [vmem:[#allocation2 + $0x24] sm:$0xf0]  ;;  %v2154_v10 = vsel %vm2082_vm10, %v2149_v47, %v2153_v1 }
 0x29f   : > { %v2340_v28 = vrot.slane %v7567_v55, 1  ;;  %12295 = vst [vmem:[#allocation35_spill] sm:$0xff] %v9316_v13  ;;  %v9323_v26 = vpack.c.b16 %v2056_v60, %v2056_v60  ;;  %v3885_v13 = vld [vmem:[#allocation2 + $0x2c] sm:$0x1] }
 0x2a0   : > { %v4029_v49 = vunpack.c.l.b16 %v3885_v13 }
 0x2a1   : > { %3667 = vmatmul.bf16.gmra.mxu3 %v9288_v25  ;;  %v3395_v9 = vpop.f32.mrf.mxu2  ;;  %v2342_v37 = vsel %vm2339_vm9, %v2340_v28, %v2341_v8  ;;  %v4075_v8 = vshll.u32 %v3854_v14, 16 }
 0x2a2   : > { %v3396_v31 = vadd.f32 %v3395_v9, %v3307_v6  ;;  %v4065_v6 = vrot.slane %v4063_v16, 1  ;;  %v2163_v16 = vshll.u32 %v9323_v26, 16  ;;  %v9332_v60 = vpack.c.b16 %v4029_v49, %v4029_v49 }
 0x2a3   : > { %v3308_v43 = vpop.f32.mrf.mxu1  ;;  %v9312_v36 = vpop.f32.mrf.mxu0 }
 0x2a4   : > { %v3628_v22 = vpop.f32.mrf.mxu3  ;;  %v3309_v29 = vadd.f32 %v3308_v43, %v9188_v53  ;;  %v4066_v27 = vor.u32 %v4065_v6, %v4061_v32  ;;  %v2165_v6 = vrot.slane %v2163_v16, 1  ;;  %12296 = vst [vmem:[#allocation36_spill] sm:$0xff] %v9332_v60  ;;  %v4080_v13 = vshll.u32 %v9332_v60, 16 }
 0x2a5   : > { %v9310_v61 = vadd.f32 %v3628_v22, %v3396_v31  ;;  %v4070_v22 = vrot.slane %v4068_v7, 1 }
 0x2a6   : > { %3706 = vmatmul.bf16.gmra.mxu0 %v2154_v10  ;;  %v4082_v49 = vrot.slane %v4080_v13, 1  ;;  %v2175_v13 = vshll.u32 %v8993_v50, 16 }
 0x2a7   : > { %v4071_v43 = vsel %vm2082_vm10, %v4066_v27, %v4070_v22 }
 0x2a9   : > { %v3397_v51 = vpop.f32.mrf.mxu2 }
 0x2aa   : > { %v3398_v9 = vadd.f32 %v3397_v51, %v3309_v29 }
 0x2ab   : > { %v3311_v5 = vpop.f32.mrf.mxu1  ;;  %v9325_v53 = vpop.f32.mrf.mxu0 }
 0x2ac   : > { %v3630_v31 = vpop.f32.mrf.mxu3  ;;  %v3312_v47 = vadd.f32 %v3311_v5, %v9200_v45  ;;  %v2166_v45 = vsel %vm2082_vm10, %v9028_v59, %v2165_v6 }
 0x2ad   : > { %v9321_v55 = vadd.f32 %v3630_v31, %v3398_v9  ;;  %v4073_v9 = vshrl.u32 %v3854_v14, 16 }
 0x2ae   : > { %3770 = vmatmul.bf16.vlgmr.msrb.gmra.mxu1 %v2342_v37  ;;  %4581 = vmatmul.bf16.vlgmr.msrb.gmra.mxu2 %v7527_v39  ;;  %v4077_v39 = vrot.slane %v4075_v8, 1 }
 0x2b0   : > { %v4078_v37 = vor.u32 %v4077_v39, %v4073_v9  ;;  %v7621_v39 = vld [vmem:[#allocation2 + $0x30] sm:$0xff]   ;;  %v2168_v9 = vshrl.u32 %v8990_v18, 16 }
 0x2b1   : > { %4670 = vmatmul.bf16.vlgmr.msrb.gmra.mxu3 %v4071_v43  ;;  %v3400_v1 = vpop.f32.mrf.mxu2  ;;  %v3886_v43 = vld [vmem:[#allocation2 + $0x38] sm:$0x1] }
 0x2b2   : > { %v3401_v7 = vadd.f32 %v3400_v1, %v3312_v47  ;;  %v2170_v47 = vshll.u32 %v8990_v18, 16  ;;  %v7424_v1 = vld [vmem:[#allocation10 + $0x218] sm:$0xff]  ;;  %v4083_v59 = vsel %vm2082_vm10, %v4078_v37, %v4082_v49  ;;  %v1914_v49 = vld [vmem:[#allocation2 + $0x68] sm:$0x1]  ;;  %v9359_v18 = vld [vmem:[#allocation2 + $0x3c] sm:$0xf0] }
 0x2b3   : > { %v3313_v29 = vpop.f32.mrf.mxu1  ;;  %v9334_v51 = vpop.f32.mrf.mxu0  ;;  %4755 = vmatpush.bf16.msrb.mxu0 %v7424_v1  ;;  %v7568_v37 = vld [vmem:[#allocation2 + $0x18] sm:$0xf0]  ;;  %12301 = vst [vmem:[#allocation39_spill] sm:$0xff] %v9359_v18 }
 0x2b4   : > { %v3633_v28 = vpop.f32.mrf.mxu3  ;;  %v3314_v32 = vadd.f32 %v3313_v29, %v9213_v48  ;;  %v2172_v29 = vrot.slane %v2170_v47, 1 }
 0x2b5   : > { %v9330_v10 = vadd.f32 %v3633_v28, %v3401_v7  ;;  %v12298_v7 = vld [vmem:[#allocation24_spill] sm:$0xff]  ;;  %v4030_v28 = vunpack.c.l.b16 %v3886_v43  ;;  %v4087_v43 = vshll.u32 %v7621_v39, 16 }
 0x2b6   : > { %3711 = vmatmul.bf16.gmra.mxu0 %v2166_v45 }
 0x2b9   : > { %v3402_v31 = vpop.f32.mrf.mxu2 }
 0x2ba   : > { %v3403_v22 = vadd.f32 %v3402_v31, %v3314_v32  ;;  %v9350_v31 = vpack.c.b16 %v4030_v28, %v4030_v28 }
 0x2bb   : > { %v3316_v27 = vpop.f32.mrf.mxu1  ;;  %v9343_v48 = vpop.f32.mrf.mxu0 }
 0x2bc   : > { %v3635_v5 = vpop.f32.mrf.mxu3  ;;  %v3317_v8 = vadd.f32 %v3316_v27, %v9223_v0  ;;  %12299 = vst [vmem:[#allocation24_spill] sm:$0xff] %v9350_v31  ;;  %v2177_v0 = vrot.slane %v2175_v13, 1  ;;  %v7569_v27 = vld [vmem:[#allocation2 + $0x18] sm:$0xe]  ;;  %v4092_v47 = vshll.u32 %v9350_v31, 16 }
 0x2bd   : > { %v9341_v16 = vadd.f32 %v3635_v5, %v3403_v22  ;;  %v2173_v5 = vor.u32 %v2172_v29, %v2168_v9  ;;  %v2058_v29 = vunpack.c.l.b16 %v1914_v49  ;;  %v8274_v31 = vld [vmem:[#allocation2 + $0x9c] sm:$0xe]  ;;  %v3887_v49 = vld [vmem:[#allocation2 + $0x44] sm:$0x1] }
 0x2be   : > { %3775 = vmatmul.bf16.gmra.mxu1 %v12298_v7  ;;  %4586 = vmatmul.bf16.gmra.mxu2 %v3854_v14  ;;  %v7570_v7 = vor.u32 %v7569_v27, %v7568_v37 }
 0x2bf   : > { %12297 = vst [vmem:[#allocation37_spill] sm:$0xff] %v9341_v16  ;;  %v2178_v28 = vsel %vm2082_vm10, %v2173_v5, %v2177_v0  ;;  %v9366_v16 = vpack.c.b16 %v2058_v29, %v2058_v29  ;;  %v3895_v5 = vld [vmem:[#allocation2 + $0xa4] sm:$0x1]  ;;  %v4031_v29 = vunpack.c.l.b16 %v3887_v49 }
 0x2c0   : > { %v2346_v27 = vrot.slane %v7570_v7, 1 }
 0x2c1   : > { %4675 = vmatmul.bf16.gmra.mxu3 %v4083_v59  ;;  %v3405_v6 = vpop.f32.mrf.mxu2  ;;  %v9357_v59 = vld [vmem:[#allocation2 + $0x3c] sm:$0xff]  }
 0x2c2   : > { %v3406_v32 = vadd.f32 %v3405_v6, %v3317_v8  ;;  %v4089_v8 = vrot.slane %v4087_v43, 1 }
 0x2c3   : > { %v3318_v22 = vpop.f32.mrf.mxu1  ;;  %v9354_v1 = vpop.f32.mrf.mxu0 }
 0x2c4   : > { %v3638_v45 = vpop.f32.mrf.mxu3  ;;  %v3319_v50 = vadd.f32 %v3318_v22, %v9234_v46  ;;  %v9368_v46 = vld [vmem:[#allocation2 + $0x9c] sm:$0xff]  }
 0x2c5   : > { %v9352_v14 = vadd.f32 %v3638_v45, %v3406_v32  ;;  %v2347_v32 = vrot.slane %v9230_v23, 1  ;;  %v4085_v45 = vshrl.u32 %v7621_v39, 16  ;;  %v8273_v22 = vld [vmem:[#allocation2 + $0x9c] sm:$0xf0]  ;;  %v4039_v23 = vunpack.c.l.b16 %v3895_v5 }
 0x2c6   : > { %3716 = vmatmul.bf16.gmra.mxu0 %v2178_v28 }
 0x2c7   : > { %12300 = vst [vmem:[#allocation38_spill] sm:$0xff] %v9352_v14  ;;  %v4094_v14 = vrot.slane %v4092_v47, 1  ;;  %v4090_v18 = vor.u32 %v4089_v8, %v4085_v45  ;;  %v2348_v43 = vsel %vm2339_vm9, %v2346_v27, %v2347_v32  ;;  %v9374_v7 = vpack.c.b16 %v4039_v23, %v4039_v23 }
 0x2c8   : > { %v2187_v8 = vshll.u32 %v9366_v16, 16  ;;  %v4097_v23 = vshrl.u32 %v9357_v59, 16 }
 0x2c9   : > { %v3407_v6 = vpop.f32.mrf.mxu2  ;;  %v4095_v47 = vsel %vm2082_vm10, %v4090_v18, %v4094_v14  ;;  %v4350_v27 = vrot.slane %v9374_v7, 1  ;;  %v9382_v18 = vpack.c.b16 %v4031_v29, %v4031_v29 }
 0x2ca   : > { %v3408_v9 = vadd.f32 %v3407_v6, %v3319_v50  ;;  %v8275_v50 = vor.u32 %v8274_v31, %v8273_v22  ;;  %v2189_v14 = vrot.slane %v2187_v8, 1 }
 0x2cb   : > { %v3321_v37 = vpop.f32.mrf.mxu1  ;;  %v9371_v0 = vpop.f32.mrf.mxu0 }
 0x2cc   : > { %v3640_v13 = vpop.f32.mrf.mxu3  ;;  %v3322_v28 = vadd.f32 %v3321_v37, %v9246_v12  ;;  %v2190_v49 = vsel %vm2082_vm10, %v9092_v21, %v2189_v14 }
 0x2cd   : > { %v9364_v60 = vadd.f32 %v3640_v13, %v3408_v9  ;;  %v4099_v9 = vshll.u32 %v9357_v59, 16  ;;  %v4349_v13 = vrot.slane %v8275_v50, 1 }
 0x2ce   : > { %3780 = vmatmul.bf16.gmra.mxu1 %v2348_v43  ;;  %4591 = vmatmul.bf16.gmra.mxu2 %v7621_v39 }
 0x2cf   : > { %v9385_v31 = vsel %vm2339_vm9, %v4349_v13, %v4350_v27  ;;  %v4101_v37 = vrot.slane %v4099_v9, 1  ;;  %v12303_v27 = vld [vmem:[#allocation25_spill] sm:$0xff] }
 0x2d0   : > { %12302 = vst [vmem:[#allocation40_spill] sm:$0xff] %v9385_v31 }
 0x2d1   : > { %4680 = vmatmul.bf16.gmra.mxu3 %v4095_v47  ;;  %v3410_v6 = vpop.f32.mrf.mxu2  ;;  %v4104_v47 = vshll.u32 %v9382_v18, 16  ;;  %v4102_v29 = vor.u32 %v4101_v37, %v4097_v23 }
 0x2d2   : > { %v3411_v45 = vadd.f32 %v3410_v6, %v3322_v28 }
 0x2d3   : > { %v3323_v39 = vpop.f32.mrf.mxu1  ;;  %v3682_v12 = vpop.f32.mrf.mxu0  ;;  %v4106_v9 = vrot.slane %v4104_v47, 1 }
 0x2d4   : > { %v3643_v32 = vpop.f32.mrf.mxu3  ;;  %v9388_v22 = vadd.f32 %v3682_v12, %v9145_v30  ;;  %v3324_v43 = vadd.f32 %v3323_v39, %v9259_v19  ;;  %v7423_v19 = vld [vmem:[#allocation10 + $0x210] sm:$0xff] }
 0x2d5   : > { %v9380_v5 = vadd.f32 %v3643_v32, %v3411_v45  ;;  %v3888_v45 = vld [vmem:[#allocation2 + $0x50] sm:$0x1]  ;;  %v2194_v32 = vshll.u32 %v9081_v56, 16  ;;  %v4107_v21 = vsel %vm2082_vm10, %v4102_v29, %v4106_v9  ;;  %4756 = vmatpush.bf16.msrb.mxu0 %v7423_v19  ;;  %v1916_v19 = vld [vmem:[#allocation2 + $0x80] sm:$0x1] }
 0x2d6   : > { %3721 = vmatmul.bf16.gmra.mxu0 %v2190_v49  ;;  %v4032_v39 = vunpack.c.l.b16 %v3888_v45  ;;  %v7622_v49 = vld [vmem:[#allocation2 + $0x48] sm:$0xff]   ;;  %v7571_v45 = vld [vmem:[#allocation2 + $0x30] sm:$0xf0] }
 0x2d7   : > { %v2196_v37 = vrot.slane %v2194_v32, 1  ;;  %v4111_v9 = vshll.u32 %v7622_v49, 16 }
 0x2d9   : > { %v3412_v50 = vpop.f32.mrf.mxu2 }
 0x2da   : > { %v3413_v28 = vadd.f32 %v3412_v50, %v3324_v43  ;;  %v2192_v50 = vshrl.u32 %v9081_v56, 16 }
 0x2db   : > { %v3326_v6 = vpop.f32.mrf.mxu1  ;;  %v3684_v13 = vpop.f32.mrf.mxu0 }
 0x2dc   : > { %v3645_v8 = vpop.f32.mrf.mxu3  ;;  %v9402_v14 = vadd.f32 %v3684_v13, %v9162_v63  ;;  %v3327_v12 = vadd.f32 %v3326_v6, %v9269_v42  ;;  %v2197_v63 = vor.u32 %v2196_v37, %v2192_v50  ;;  %v7572_v6 = vld [vmem:[#allocation2 + $0x30] sm:$0xe]  ;;  %v4113_v37 = vrot.slane %v4111_v9, 1 }
 0x2dd   : > { %v9396_v30 = vadd.f32 %v3645_v8, %v3413_v28  ;;  %v2199_v28 = vshll.u32 %v9094_v44, 16  ;;  %v7573_v56 = vor.u32 %v7572_v6, %v7571_v45  ;;  %v9417_v44 = vld [vmem:[#allocation2 + $0x54] sm:$0xf0]  ;;  %v4109_v50 = vshrl.u32 %v7622_v49, 16  ;;  %v8277_v6 = vld [vmem:[#allocation2 + $0xb4] sm:$0xe] }
 0x2de   : > { %3785 = vmatmul.bf16.gmra.mxu1 %v12303_v27  ;;  %4596 = vmatmul.bf16.gmra.mxu2 %v9357_v59  ;;  %v9407_v59 = vpack.c.b16 %v4032_v39, %v4032_v39  ;;  %12306 = vst [vmem:[#allocation42_spill] sm:$0xff] %v9417_v44 }
 0x2df   : > { %v2201_v42 = vrot.slane %v2199_v28, 1  ;;  %v2352_v45 = vrot.slane %v7573_v56, 1  ;;  %v4114_v44 = vor.u32 %v4113_v37, %v4109_v50 }
 0x2e0   : > { %12304 = vst [vmem:[#allocation25_spill] sm:$0xff] %v9407_v59  ;;  %v4116_v32 = vshll.u32 %v9407_v59, 16 }
 0x2e1   : > { %4685 = vmatmul.bf16.gmra.mxu3 %v4107_v21  ;;  %v3415_v43 = vpop.f32.mrf.mxu2  ;;  %v9415_v21 = vld [vmem:[#allocation2 + $0x54] sm:$0xff]  }
 0x2e2   : > { %v3416_v23 = vadd.f32 %v3415_v43, %v3327_v12  ;;  %v2202_v12 = vsel %vm2082_vm10, %v2197_v63, %v2201_v42  ;;  %v2060_v43 = vunpack.c.l.b16 %v1916_v19  ;;  %v3897_v63 = vld [vmem:[#allocation2 + $0xbc] sm:$0x1] }
 0x2e3   : > { %v3328_v8 = vpop.f32.mrf.mxu1  ;;  %v3687_v13 = vpop.f32.mrf.mxu0  ;;  %v3889_v19 = vld [vmem:[#allocation2 + $0x5c] sm:$0x1] }
 0x2e4   : > { %v3648_v47 = vpop.f32.mrf.mxu3  ;;  %v9413_v27 = vadd.f32 %v3687_v13, %v9172_v38  ;;  %v3329_v39 = vadd.f32 %v3328_v8, %v9280_v57  ;;  %v4118_v38 = vrot.slane %v4116_v32, 1  ;;  %v9426_v57 = vld [vmem:[#allocation2 + $0xb4] sm:$0xff]   ;;  %v4033_v37 = vunpack.c.l.b16 %v3889_v19 }
 0x2e5   : > { %v9409_v29 = vadd.f32 %v3648_v47, %v3416_v23  ;;  %v2353_v47 = vrot.slane %v9276_v24, 1  ;;  %v8276_v8 = vld [vmem:[#allocation2 + $0xb4] sm:$0xf0]  ;;  %v4041_v24 = vunpack.c.l.b16 %v3897_v63 }
 0x2e6   : > { %3726 = vmatmul.bf16.gmra.mxu0 %v2202_v12  ;;  %v4119_v32 = vsel %vm2082_vm10, %v4114_v44, %v4118_v38  ;;  %v9441_v63 = vpack.c.b16 %v4033_v37, %v4033_v37 }
 0x2e7   : > { %12305 = vst [vmem:[#allocation41_spill] sm:$0xff] %v9409_v29  ;;  %v9424_v29 = vpack.c.b16 %v2060_v43, %v2060_v43  ;;  %v2354_v9 = vsel %vm2339_vm9, %v2352_v45, %v2353_v47  ;;  %v8278_v43 = vor.u32 %v8277_v6, %v8276_v8  ;;  %v1917_v8 = vld [vmem:[#allocation2 + $0x8c] sm:$0x1] }
 0x2e9   : > { %v3417_v23 = vpop.f32.mrf.mxu2  ;;  %v2211_v12 = vshll.u32 %v9424_v29, 16 }
 0x2ea   : > { %v3418_v28 = vadd.f32 %v3417_v23, %v3329_v39 }
 0x2eb   : > { %v3331_v13 = vpop.f32.mrf.mxu1  ;;  %v3689_v42 = vpop.f32.mrf.mxu0  ;;  %v2213_v45 = vrot.slane %v2211_v12, 1 }
 0x2ec   : > { %v3650_v31 = vpop.f32.mrf.mxu3  ;;  %v9431_v56 = vadd.f32 %v3689_v42, %v9184_v11  ;;  %v3332_v39 = vadd.f32 %v3331_v13, %v9292_v41  ;;  %v4121_v42 = vshrl.u32 %v9415_v21, 16 }
 0x2ed   : > { %v9422_v59 = vadd.f32 %v3650_v31, %v3418_v28  ;;  %v9433_v31 = vpack.c.b16 %v4041_v24, %v4041_v24  ;;  %v4123_v28 = vshll.u32 %v9415_v21, 16  ;;  %v2214_v24 = vsel %vm2082_vm10, %v9156_v33, %v2213_v45  ;;  %v12308_v33 = vld [vmem:[#allocation26_spill] sm:$0xff] }
 0x2ee   : > { %3790 = vmatmul.bf16.gmra.mxu1 %v2354_v9  ;;  %4601 = vmatmul.bf16.gmra.mxu2 %v7622_v49  ;;  %v4355_v49 = vrot.slane %v8278_v43, 1 }
 0x2ef   : > { %v4356_v44 = vrot.slane %v9433_v31, 1  ;;  %v4125_v9 = vrot.slane %v4123_v28, 1 }
 0x2f1   : > { %4690 = vmatmul.bf16.gmra.mxu3 %v4119_v32  ;;  %v3420_v23 = vpop.f32.mrf.mxu2  ;;  %v9444_v41 = vsel %vm2339_vm9, %v4355_v49, %v4356_v44  ;;  %v4128_v32 = vshll.u32 %v9441_v63, 16  ;;  %v4126_v43 = vor.u32 %v4125_v9, %v4121_v42  ;;  %v7422_v49 = vld [vmem:[#allocation10 + $0x208] sm:$0xff] }
 0x2f2   : > { %v3421_v47 = vadd.f32 %v3420_v23, %v3332_v39  ;;  %12307 = vst [vmem:[#allocation43_spill] sm:$0xff] %v9444_v41  ;;  %v2061_v23 = vunpack.c.l.b16 %v1917_v8  ;;  %4757 = vmatpush.bf16.msrb.mxu0 %v7422_v49  ;;  %v7623_v42 = vld [vmem:[#allocation2 + $0x60] sm:$0xff]   ;;  %v1918_v49 = vld [vmem:[#allocation2 + $0x98] sm:$0x1] }
 0x2f3   : > { %v3333_v38 = vpop.f32.mrf.mxu1  ;;  %v3692_v13 = vpop.f32.mrf.mxu0 }
 0x2f4   : > { %v3653_v50 = vpop.f32.mrf.mxu3  ;;  %v9447_v6 = vadd.f32 %v3692_v13, %v9194_v17  ;;  %v3334_v19 = vadd.f32 %v3333_v38, %v9302_v20  ;;  %v2218_v17 = vshll.u32 %v9196_v35, 16  ;;  %v4130_v20 = vrot.slane %v4128_v32, 1 }
 0x2f5   : > { %v9439_v11 = vadd.f32 %v3653_v50, %v3421_v47  ;;  %v3890_v50 = vld [vmem:[#allocation2 + $0x68] sm:$0x1]  ;;  %v9460_v45 = vpack.c.b16 %v2061_v23, %v2061_v23 }
 0x2f6   : > { %3731 = vmatmul.bf16.gmra.mxu0 %v2214_v24  ;;  %v4131_v38 = vsel %vm2082_vm10, %v4126_v43, %v4130_v20  ;;  %v4034_v13 = vunpack.c.l.b16 %v3890_v50  ;;  %v7574_v50 = vld [vmem:[#allocation2 + $0x48] sm:$0xf0]  ;;  %v4135_v20 = vshll.u32 %v7623_v42, 16 }
 0x2f9   : > { %v3422_v39 = vpop.f32.mrf.mxu2 }
 0x2fa   : > { %v3423_v12 = vadd.f32 %v3422_v39, %v3334_v19  ;;  %v2220_v19 = vrot.slane %v2218_v17, 1 }
 0x2fb   : > { %v3336_v47 = vpop.f32.mrf.mxu1  ;;  %v3694_v44 = vpop.f32.mrf.mxu0 }
 0x2fc   : > { %v3655_v37 = vpop.f32.mrf.mxu3  ;;  %v9463_v9 = vadd.f32 %v3694_v44, %v9208_v52  ;;  %v3337_v8 = vadd.f32 %v3336_v47, %v9312_v36  ;;  %v7575_v47 = vld [vmem:[#allocation2 + $0x48] sm:$0xe] }
 0x2fd   : > { %v9455_v28 = vadd.f32 %v3655_v37, %v3423_v12  ;;  %v2216_v12 = vshrl.u32 %v9196_v35, 16  ;;  %v9468_v37 = vpack.c.b16 %v4034_v13, %v4034_v13  ;;  %v7576_v35 = vor.u32 %v7575_v47, %v7574_v50 }
 0x2fe   : > { %3795 = vmatmul.bf16.gmra.mxu1 %v12308_v33  ;;  %4606 = vmatmul.bf16.gmra.mxu2 %v9415_v21  ;;  %v2223_v21 = vshll.u32 %v9460_v45, 16 }
 0x2ff   : > { %12309 = vst [vmem:[#allocation26_spill] sm:$0xff] %v9468_v37  ;;  %v2221_v52 = vor.u32 %v2220_v19, %v2216_v12  ;;  %v4140_v17 = vshll.u32 %v9468_v37, 16  ;;  %v4137_v19 = vrot.slane %v4135_v20, 1  ;;  %v2359_v12 = vrot.slane %v9323_v26, 1 }
 0x300   : > { %v2225_v36 = vrot.slane %v2223_v21, 1  ;;  %v4133_v21 = vshrl.u32 %v7623_v42, 16 }
 0x301   : > { %4695 = vmatmul.bf16.gmra.mxu3 %v4131_v38  ;;  %v3425_v24 = vpop.f32.mrf.mxu2  ;;  %v3866_v38 = vld [vmem:[#allocation2 + $0x6c] sm:$0xff]  }
 0x302   : > { %v3426_v32 = vadd.f32 %v3425_v24, %v3337_v8  ;;  %v9476_v8 = vld [vmem:[#allocation2 + $0x6c] sm:$0xf0]  ;;  %v2226_v24 = vsel %vm2082_vm10, %v2221_v52, %v2225_v36  ;;  %v4138_v47 = vor.u32 %v4137_v19, %v4133_v21 }
 0x303   : > { %v3338_v43 = vpop.f32.mrf.mxu1  ;;  %v3697_v44 = vpop.f32.mrf.mxu0  ;;  %12311 = vst [vmem:[#allocation45_spill] sm:$0xff] %v9476_v8 }
 0x304   : > { %v3658_v39 = vpop.f32.mrf.mxu3  ;;  %v9474_v33 = vadd.f32 %v3697_v44, %v9220_v15  ;;  %v3339_v13 = vadd.f32 %v3338_v43, %v9325_v53  ;;  %v2358_v44 = vrot.slane %v7576_v35, 1  ;;  %v3891_v43 = vld [vmem:[#allocation2 + $0x74] sm:$0x1] }
 0x305   : > { %v9470_v23 = vadd.f32 %v3658_v39, %v3426_v32  ;;  %v2062_v32 = vunpack.c.l.b16 %v1918_v49 }
 0x306   : > { %3736 = vmatmul.bf16.gmra.mxu0 %v2226_v24  ;;  %v2360_v53 = vsel %vm2339_vm9, %v2358_v44, %v2359_v12  ;;  %v1919_v12 = vld [vmem:[#allocation2 + $0xa4] sm:$0x1] }
 0x307   : > { %12310 = vst [vmem:[#allocation44_spill] sm:$0xff] %v9470_v23  ;;  %v4142_v23 = vrot.slane %v4140_v17, 1  ;;  %v9483_v8 = vpack.c.b16 %v2062_v32, %v2062_v32 }
 0x309   : > { %v3427_v39 = vpop.f32.mrf.mxu2  ;;  %v4143_v20 = vsel %vm2082_vm10, %v4138_v47, %v4142_v23 }
 0x30a   : > { %v3428_v41 = vadd.f32 %v3427_v39, %v3339_v13  ;;  %v4147_v13 = vshll.u32 %v3866_v38, 16 }
 0x30b   : > { %v3341_v15 = vpop.f32.mrf.mxu1  ;;  %v3699_v52 = vpop.f32.mrf.mxu0 }
 0x30c   : > { %v3660_v37 = vpop.f32.mrf.mxu3  ;;  %v9488_v26 = vadd.f32 %v3699_v52, %v9228_v34  ;;  %v3342_v49 = vadd.f32 %v3341_v15, %v9334_v51  ;;  %v4149_v39 = vrot.slane %v4147_v13, 1  ;;  %v4145_v15 = vshrl.u32 %v3866_v38, 16 }
 0x30d   : > { %v9481_v50 = vadd.f32 %v3660_v37, %v3428_v41  ;;  %v2235_v41 = vshll.u32 %v9483_v8, 16  ;;  %v4035_v37 = vunpack.c.l.b16 %v3891_v43 }
 0x30e   : > { %3800 = vmatmul.bf16.gmra.mxu1 %v2360_v53  ;;  %4611 = vmatmul.bf16.gmra.mxu2 %v7623_v42  ;;  %v4150_v52 = vor.u32 %v4149_v39, %v4145_v15 }
 0x30f   : > { %v2237_v32 = vrot.slane %v2235_v41, 1  ;;  %v9494_v42 = vpack.c.b16 %v4035_v37, %v4035_v37  ;;  %v3892_v41 = vld [vmem:[#allocation2 + $0x80] sm:$0x1] }
 0x310   : > { %v7421_v37 = vld [vmem:[#allocation10 + $0x200] sm:$0xff] }
 0x311   : > { %4700 = vmatmul.bf16.gmra.mxu3 %v4143_v20  ;;  %v3430_v36 = vpop.f32.mrf.mxu2  ;;  %v2238_v21 = vsel %vm2082_vm10, %v9205_v3, %v2237_v32  ;;  %v4152_v44 = vshll.u32 %v9494_v42, 16  ;;  %v2063_v20 = vunpack.c.l.b16 %v1919_v12  ;;  %4758 = vmatpush.bf16.msrb.mxu0 %v7421_v37  ;;  %v12313_v3 = vld [vmem:[#allocation27_spill] sm:$0xff]  ;;  %v12314_v32 = vld [vmem:[#allocation32_spill] sm:$0xff] }
 0x312   : > { %v3431_v17 = vadd.f32 %v3430_v36, %v3342_v49 }
 0x313   : > { %v3343_v24 = vpop.f32.mrf.mxu1  ;;  %v3702_v23 = vpop.f32.mrf.mxu0  ;;  %v9508_v13 = vpack.c.b16 %v2063_v20, %v2063_v20 }
 0x314   : > { %v3663_v35 = vpop.f32.mrf.mxu3  ;;  %v9497_v34 = vadd.f32 %v3702_v23, %v9240_v62  ;;  %v3344_v51 = vadd.f32 %v3343_v24, %v9343_v48  ;;  %v2242_v62 = vshll.u32 %v9242_v40, 16  ;;  %v4154_v48 = vrot.slane %v4152_v44, 1 }
 0x315   : > { %v9492_v19 = vadd.f32 %v3663_v35, %v3431_v17  ;;  %v4036_v24 = vunpack.c.l.b16 %v3892_v41  ;;  %v7577_v41 = vld [vmem:[#allocation2 + $0x60] sm:$0xf0] }
 0x316   : > { %12312 = vst [vmem:[#allocation46_spill] sm:$0xff] %v9497_v34  ;;  %3741 = vmatmul.bf16.gmra.mxu0 %v2238_v21  ;;  %v4155_v35 = vsel %vm2082_vm10, %v4150_v52, %v4154_v48  ;;  %v2244_v12 = vrot.slane %v2242_v62, 1  ;;  %v7624_v21 = vld [vmem:[#allocation2 + $0x78] sm:$0xff]   ;;  %v1920_v48 = vld [vmem:[#allocation2 + $0xb0] sm:$0x1] }
 0x317   : > { %v4159_v37 = vshll.u32 %v7624_v21, 16 }
 0x319   : > { %v3432_v47 = vpop.f32.mrf.mxu2 }
 0x31a   : > { %v3433_v53 = vadd.f32 %v3432_v47, %v3344_v51  ;;  %v2240_v47 = vshrl.u32 %v9242_v40, 16 }
 0x31b   : > { %v3346_v49 = vpop.f32.mrf.mxu1  ;;  %v3704_v17 = vpop.f32.mrf.mxu0 }
 0x31c   : > { %v3665_v43 = vpop.f32.mrf.mxu3  ;;  %v9511_v23 = vadd.f32 %v3704_v17, %v12314_v32  ;;  %v3347_v39 = vadd.f32 %v3346_v49, %v9354_v1  ;;  %v2245_v20 = vor.u32 %v2244_v12, %v2240_v47  ;;  %v7578_v49 = vld [vmem:[#allocation2 + $0x60] sm:$0xe]  ;;  %v2064_v32 = vunpack.c.l.b16 %v1920_v48 }
 0x31d   : > { %v9504_v36 = vadd.f32 %v3665_v43, %v3433_v53  ;;  %v9516_v53 = vpack.c.b16 %v4036_v24, %v4036_v24  ;;  %v7579_v40 = vor.u32 %v7578_v49, %v7577_v41  ;;  %v9526_v24 = vld [vmem:[#allocation2 + $0x84] sm:$0xf0]  ;;  %v2365_v47 = vrot.slane %v9366_v16, 1 }
 0x31e   : > { %3805 = vmatmul.bf16.gmra.mxu1 %v12313_v3  ;;  %4616 = vmatmul.bf16.gmra.mxu2 %v3866_v38  ;;  %12315 = vst [vmem:[#allocation27_spill] sm:$0xff] %v9511_v23  ;;  %v2247_v38 = vshll.u32 %v9508_v13, 16  ;;  %v12316_v3 = vld [vmem:[#allocation33_spill] sm:$0xff]  ;;  %v9531_v48 = vpack.c.b16 %v2064_v32, %v2064_v32 }
 0x31f   : > { %v4164_v62 = vshll.u32 %v9516_v53, 16  ;;  %v2364_v41 = vrot.slane %v7579_v40, 1 }
 0x320   : > { %v2249_v1 = vrot.slane %v2247_v38, 1  ;;  %v4157_v38 = vshrl.u32 %v7624_v21, 16 }
 0x321   : > { %4705 = vmatmul.bf16.gmra.mxu3 %v4155_v35  ;;  %v3435_v51 = vpop.f32.mrf.mxu2 }
 0x322   : > { %v3436_v15 = vadd.f32 %v3435_v51, %v3347_v39  ;;  %v9524_v39 = vld [vmem:[#allocation2 + $0x84] sm:$0xff]   ;;  %v2250_v12 = vsel %vm2082_vm10, %v2245_v20, %v2249_v1  ;;  %v3893_v20 = vld [vmem:[#allocation2 + $0x8c] sm:$0x1] }
 0x323   : > { %v3348_v43 = vpop.f32.mrf.mxu1  ;;  %v3707_v17 = vpop.f32.mrf.mxu0 }
 0x324   : > { %v3668_v44 = vpop.f32.mrf.mxu3  ;;  %v9522_v35 = vadd.f32 %v3707_v17, %v12316_v3  ;;  %v3349_v51 = vadd.f32 %v3348_v43, %v9371_v0  ;;  %v4166_v17 = vrot.slane %v4164_v62, 1  ;;  %v2366_v43 = vsel %vm2339_vm9, %v2364_v41, %v2365_v47  ;;  %v7308_v47 = vld [vmem:[#allocation11 + $0xe8] sm:$0xf] }
 0x325   : > { %v9518_v52 = vadd.f32 %v3668_v44, %v3436_v15  ;;  %v4161_v15 = vrot.slane %v4159_v37, 1  ;;  %v2259_v62 = vshll.u32 %v9531_v48, 16 }
 0x326   : > { %12317 = vst [vmem:[#allocation32_spill] sm:$0xff] %v9522_v35  ;;  %3746 = vmatmul.bf16.gmra.mxu0 %v2250_v12 }
 0x327   : > { %v4162_v0 = vor.u32 %v4161_v15, %v4157_v38  ;;  %v2261_v12 = vrot.slane %v2259_v62, 1 }
 0x329   : > { %v3437_v44 = vpop.f32.mrf.mxu2  ;;  %v4167_v16 = vsel %vm2082_vm10, %v4162_v0, %v4166_v17  ;;  %v7460_v17 = vld [vmem:[#allocation11 + $0xf4] sm:$0xf0] }
 0x32a   : > { %v3438_v23 = vadd.f32 %v3437_v44, %v3349_v51  ;;  %v7457_v44 = vld [vmem:[#allocation11 + $0xe4] sm:$0xf]  ;;  %v7309_v0 = vor.u32 %v7460_v17, %v7308_v47  ;;  %v7310_v47 = vld [vmem:[#allocation11 + $0xf8] sm:$0xf0] }
 0x32b   : > { %v3771_v3 = vpop.f32.mrf.mxu1  ;;  %v3709_v37 = vpop.f32.mrf.mxu0 }
 0x32c   : > { %v3670_v34 = vpop.f32.mrf.mxu3  ;;  %v9536_v35 = vadd.f32 %v3771_v3, %v9388_v22  ;;  %v9541_v1 = vadd.f32 %v3709_v37, %v9274_v4  ;;  %v4171_v22 = vshll.u32 %v9524_v39, 16  ;;  %v7302_v4 = vld [vmem:[#allocation11 + $0xf0] sm:$0xf0]  ;;  %v12320_v37 = vld [vmem:[#allocation31_spill] sm:$0xff]  ;;  %5358 = vmatpush.bf16.msra.mxu3 %v7309_v0  ;;  %v7459_v0 = vld [vmem:[#allocation11 + $0xec] sm:$0xf0] }
 0x32d   : > { %v9533_v49 = vadd.f32 %v3670_v34, %v3438_v23  ;;  %v4037_v34 = vunpack.c.l.b16 %v3893_v20  ;;  %v7305_v38 = vor.u32 %v7457_v44, %v7302_v4  ;;  %v1921_v20 = vld [vmem:[#allocation2 + $0xbc] sm:$0x1]  ;;  %v7458_v4 = vld [vmem:[#allocation11 + $0xec] sm:$0xf] }
 0x32e   : > { %3810 = vmatmul.bf16.gmra.mxu1 %v2366_v43  ;;  %4621 = vmatmul.bf16.gmra.mxu2 %v7624_v21  ;;  %12318 = vst [vmem:[#allocation33_spill] sm:$0xff] %v9541_v1  ;;  %v4173_v41 = vrot.slane %v4171_v22, 1  ;;  %v12321_v1 = vld [vmem:[#allocation28_spill] sm:$0xff] }
 0x32f   : > { %v9550_v21 = vpack.c.b16 %v4037_v34, %v4037_v34  ;;  %5269 = vmatpush.bf16.msra.mxu2 %v7305_v38  ;;  %v2266_v38 = vshll.u32 %v9288_v25, 16 }
 0x331   : > { %4710 = vmatmul.bf16.gmra.mxu3 %v4167_v16  ;;  %v4582_v23 = vpop.f32.mrf.mxu2  ;;  %v2262_v16 = vsel %vm2082_vm10, %v12320_v37, %v2261_v12  ;;  %v4176_v62 = vshll.u32 %v9550_v21, 16  ;;  %v7300_v37 = vld [vmem:[#allocation11 + $0xe0] sm:$0xf] }
 0x333   : > { %v3773_v51 = vpop.f32.mrf.mxu1  ;;  %v3712_v3 = vpop.f32.mrf.mxu0  ;;  %v4178_v17 = vrot.slane %v4176_v62, 1 }
 0x334   : > { %v4671_v40 = vpop.f32.mrf.mxu3  ;;  %v9548_v15 = vadd.f32 %v3773_v51, %v9402_v14  ;;  %v9553_v43 = vadd.f32 %v3712_v3, %v9286_v58  ;;  %v4169_v14 = vshrl.u32 %v9524_v39, 16  ;;  %v2065_v51 = vunpack.c.l.b16 %v1921_v20  ;;  %v3894_v58 = vld [vmem:[#allocation2 + $0x98] sm:$0x1] }
 0x335   : > { %v9545_v32 = vadd.f32 %v4671_v40, %v4582_v23  ;;  %v7313_v3 = vor.u32 %v7458_v4, %v7310_v47  ;;  %v2264_v4 = vshrl.u32 %v9288_v25, 16 }
 0x336   : > { %12319 = vst [vmem:[#allocation47_spill] sm:$0xff] %v9553_v43  ;;  %3751 = vmatmul.bf16.gmra.mxu0 %v2262_v16  ;;  %v4174_v40 = vor.u32 %v4173_v41, %v4169_v14  ;;  %v7301_v16 = vor.u32 %v7459_v0, %v7300_v37  ;;  %v9568_v20 = vpack.c.b16 %v2065_v51, %v2065_v51  ;;  %v4038_v14 = vunpack.c.l.b16 %v3894_v58 }
 0x337   : > { %5447 = vmatpush.bf16.msra.mxu0 %v7313_v3  ;;  %v7581_v3 = vld [vmem:[#allocation2 + $0x78] sm:$0xe] }
 0x338   : > { %v4179_v41 = vsel %vm2082_vm10, %v4174_v40, %v4178_v17  ;;  %5180 = vmatpush.bf16.msra.mxu1 %v7301_v16 }
 0x339   : > { %v4584_v34 = vpop.f32.mrf.mxu2 }
 0x33b   : > { %v3776_v44 = vpop.f32.mrf.mxu1  ;;  %v3714_v43 = vpop.f32.mrf.mxu0 }
 0x33c   : > { %v4673_v23 = vpop.f32.mrf.mxu3  ;;  %v9563_v12 = vadd.f32 %v3776_v44, %v9413_v27  ;;  %v2268_v27 = vrot.slane %v2266_v38, 1 }
 0x33d   : > { %v9559_v22 = vadd.f32 %v4673_v23, %v4584_v34  ;;  %v9571_v34 = vadd.f32 %v3714_v43, %v9298_v54  ;;  %v7625_v23 = vld [vmem:[#allocation2 + $0x90] sm:$0xff]   ;;  %v7580_v43 = vld [vmem:[#allocation2 + $0x78] sm:$0xf0] }
 0x33e   : > { %3815 = vmatmul.bf16.gmra.mxu1 %v12321_v1  ;;  %4626 = vmatmul.bf16.gmra.mxu2 %v9524_v39  ;;  %v2271_v1 = vshll.u32 %v9568_v20, 16  ;;  %v9575_v39 = vpack.c.b16 %v4038_v14, %v4038_v14  ;;  %v2269_v54 = vor.u32 %v2268_v27, %v2264_v4  ;;  %v4183_v47 = vshll.u32 %v7625_v23, 16 }
 0x33f   : > { %12322 = vst [vmem:[#allocation31_spill] sm:$0xff] %v9571_v34  ;;  %v7582_v0 = vor.u32 %v7581_v3, %v7580_v43  ;;  %v4181_v27 = vshrl.u32 %v7625_v23, 16 }
 0x340   : > { %v2273_v17 = vrot.slane %v2271_v1, 1  ;;  %v4188_v37 = vshll.u32 %v9575_v39, 16 }
 0x341   : > { %4715 = vmatmul.bf16.gmra.mxu3 %v4179_v41  ;;  %v4587_v62 = vpop.f32.mrf.mxu2  ;;  %v4185_v41 = vrot.slane %v4183_v47, 1  ;;  %v7628_v47 = vld [vmem:[#allocation2 + $0x18] sm:$0xf0] }
 0x342   : > { %v2274_v16 = vsel %vm2082_vm10, %v2269_v54, %v2273_v17  ;;  %v7969_v17 = vld [vmem:[#allocation2 + $0x84] sm:$0xe] }
 0x343   : > { %v3778_v51 = vpop.f32.mrf.mxu1  ;;  %v3717_v38 = vpop.f32.mrf.mxu0 }
 0x344   : > { %v4676_v44 = vpop.f32.mrf.mxu3  ;;  %v9580_v58 = vadd.f32 %v3778_v51, %v9431_v56  ;;  %v9584_v25 = vadd.f32 %v3717_v38, %v9310_v61  ;;  %v2371_v56 = vrot.slane %v9424_v29, 1  ;;  %v2370_v51 = vrot.slane %v7582_v0, 1 }
 0x345   : > { %v9577_v40 = vadd.f32 %v4676_v44, %v4587_v62  ;;  %v4190_v44 = vrot.slane %v4188_v37, 1  ;;  %v4186_v61 = vor.u32 %v4185_v41, %v4181_v27  ;;  %v7629_v37 = vld [vmem:[#allocation2 + $0x18] sm:$0xe]  ;;  %v7292_v27 = vld [vmem:[#allocation11 + $0xc8] sm:$0xf] }
 0x346   : > { %12323 = vst [vmem:[#allocation28_spill] sm:$0xff] %v9584_v25  ;;  %3756 = vmatmul.bf16.gmra.mxu0 %v2274_v16  ;;  %v2372_v43 = vsel %vm2339_vm9, %v2370_v51, %v2371_v56  ;;  %v7630_v16 = vor.u32 %v7629_v37, %v7628_v47  ;;  %v4317_v56 = vrot.slane %v9308_v2, 1  ;;  %v4200_v37 = vshll.u32 %v9374_v7, 16  ;;  %v7440_v25 = vld [vmem:[#allocation11 + $0x54] sm:$0xf0] }
 0x347   : > { %v4191_v54 = vsel %vm2082_vm10, %v4186_v61, %v4190_v44  ;;  %v12325_v44 = vld [vmem:[#allocation29_spill] sm:$0xff] }
 0x348   : > { %v7456_v61 = vld [vmem:[#allocation11 + $0xd4] sm:$0xf0] }
 0x349   : > { %v4589_v14 = vpop.f32.mrf.mxu2  ;;  %v7293_v47 = vor.u32 %v7456_v61, %v7292_v27  ;;  %v3896_v27 = vld [vmem:[#allocation2 + $0xb0] sm:$0x1]  ;;  %v4202_v61 = vrot.slane %v4200_v37, 1 }
 0x34b   : > { %v3781_v1 = vpop.f32.mrf.mxu1  ;;  %v3719_v38 = vpop.f32.mrf.mxu0  ;;  %5359 = vmatpush.bf16.msra.mxu3 %v7293_v47 }
 0x34c   : > { %v4678_v62 = vpop.f32.mrf.mxu3  ;;  %v9591_v34 = vadd.f32 %v3781_v1, %v9447_v6  ;;  %v9596_v29 = vadd.f32 %v3719_v38, %v9321_v55  ;;  %v4195_v6 = vshll.u32 %v9368_v46, 16  ;;  %v7286_v55 = vld [vmem:[#allocation11 + $0xd0] sm:$0xf0]  ;;  %v7970_v1 = vor.u32 %v7969_v17, %v12325_v44  ;;  %v7454_v44 = vld [vmem:[#allocation11 + $0xcc] sm:$0xf] }
 0x34d   : > { %v9588_v4 = vadd.f32 %v4678_v62, %v4589_v14  ;;  %v7453_v62 = vld [vmem:[#allocation11 + $0xc4] sm:$0xf]  ;;  %v4316_v38 = vrot.slane %v7630_v16, 1 }
 0x34e   : > { %3820 = vmatmul.bf16.gmra.mxu1 %v2372_v43  ;;  %4631 = vmatmul.bf16.gmra.mxu2 %v7625_v23  ;;  %12324 = vst [vmem:[#allocation48_spill] sm:$0xff] %v9596_v29  ;;  %v7289_v51 = vor.u32 %v7453_v62, %v7286_v55  ;;  %v2373_v17 = vrot.slane %v7970_v1, 1  ;;  %v7228_v29 = vld [vmem:[#allocation11 + $0x48] sm:$0xf] }
 0x34f   : > { %v4318_v2 = vsel %vm2339_vm9, %v4316_v38, %v4317_v56  ;;  %v7455_v38 = vld [vmem:[#allocation11 + $0xcc] sm:$0xf0] }
 0x350   : > { %5270 = vmatpush.bf16.msra.mxu2 %v7289_v51  ;;  %v7294_v51 = vld [vmem:[#allocation11 + $0xd8] sm:$0xf0] }
 0x351   : > { %4720 = vmatmul.bf16.gmra.mxu3 %v4191_v54  ;;  %v4592_v3 = vpop.f32.mrf.mxu2  ;;  %v4197_v54 = vrot.slane %v4195_v6, 1  ;;  %v7972_v6 = vld [vmem:[#allocation2 + $0x24] sm:$0xe]  ;;  %v7297_v7 = vor.u32 %v7454_v44, %v7294_v51 }
 0x353   : > { %v3783_v14 = vpop.f32.mrf.mxu1  ;;  %v3722_v43 = vpop.f32.mrf.mxu0  ;;  %5448 = vmatpush.bf16.msra.mxu0 %v7297_v7 }
 0x354   : > { %v4681_v0 = vpop.f32.mrf.mxu3  ;;  %v9603_v23 = vadd.f32 %v3783_v14, %v9463_v9  ;;  %v4193_v9 = vshrl.u32 %v9368_v46, 16  ;;  %v2374_v14 = vrot.slane %v9460_v45, 1 }
 0x355   : > { %v9599_v41 = vadd.f32 %v4681_v0, %v4592_v3  ;;  %v9607_v3 = vadd.f32 %v3722_v43, %v9330_v10  ;;  %v7284_v43 = vld [vmem:[#allocation11 + $0xc0] sm:$0xf] }
 0x356   : > { %4759 = vmatmul.bf16.vlgmr.msrb.gmra.mxu0 %v4318_v2  ;;  %v4198_v16 = vor.u32 %v4197_v54, %v4193_v9  ;;  %v2375_v1 = vsel %vm2339_vm9, %v2373_v17, %v2374_v14  ;;  %v7285_v47 = vor.u32 %v7455_v38, %v7284_v43  ;;  %v4040_v2 = vunpack.c.l.b16 %v3896_v27  ;;  %v12327_v9 = vld [vmem:[#allocation37_spill] sm:$0xff]  ;;  %v12330_v27 = vld [vmem:[#allocation36_spill] sm:$0xff] }
 0x357   : > { %12326 = vst [vmem:[#allocation29_spill] sm:$0xff] %v9607_v3  ;;  %v7583_v43 = vld [vmem:[#allocation2 + $0x90] sm:$0xf0] }
 0x358   : > { %v4203_v54 = vsel %vm2082_vm10, %v4198_v16, %v4202_v61  ;;  %5181 = vmatpush.bf16.msra.mxu1 %v7285_v47  ;;  %v9625_v17 = vpack.c.b16 %v4040_v2, %v4040_v2  ;;  %v4320_v61 = vrot.slane %v12330_v27, 1  ;;  %v12331_v47 = vld [vmem:[#allocation38_spill] sm:$0xff]  ;;  %v7222_v3 = vld [vmem:[#allocation11 + $0x50] sm:$0xf0] }
 0x359   : > { %v4594_v0 = vpop.f32.mrf.mxu2 }
 0x35b   : > { %v3786_v10 = vpop.f32.mrf.mxu1  ;;  %v3724_v45 = vpop.f32.mrf.mxu0 }
 0x35c   : > { %v4683_v62 = vpop.f32.mrf.mxu3  ;;  %v9616_v56 = vadd.f32 %v3786_v10, %v9474_v33  ;;  %v12329_v33 = vld [vmem:[#allocation35_spill] sm:$0xff] }
 0x35d   : > { %v9613_v55 = vadd.f32 %v4683_v62, %v4594_v0  ;;  %v9622_v0 = vadd.f32 %v3724_v45, %v12327_v9  ;;  %v7973_v37 = vor.u32 %v7972_v6, %v12329_v33  ;;  %v7626_v10 = vld [vmem:[#allocation2 + $0xa8] sm:$0xff]   ;;  %v4212_v6 = vshll.u32 %v9625_v17, 16 }
 0x35e   : > { %3825 = vmatmul.bf16.gmra.mxu1 %v2375_v1  ;;  %4636 = vmatmul.bf16.gmra.mxu2 %v9368_v46  ;;  %v4207_v38 = vshll.u32 %v7626_v10, 16  ;;  %v7584_v1 = vld [vmem:[#allocation2 + $0x90] sm:$0xe]  ;;  %v4205_v33 = vshrl.u32 %v7626_v10, 16 }
 0x35f   : > { %12328 = vst [vmem:[#allocation37_spill] sm:$0xff] %v9622_v0  ;;  %v4319_v16 = vrot.slane %v7973_v37, 1  ;;  %v4214_v37 = vrot.slane %v4212_v6, 1 }
 0x360   : > { %v4209_v9 = vrot.slane %v4207_v38, 1 }
 0x361   : > { %4725 = vmatmul.bf16.gmra.mxu3 %v4203_v54  ;;  %v4597_v62 = vpop.f32.mrf.mxu2  ;;  %v7585_v54 = vor.u32 %v7584_v1, %v7583_v43  ;;  %v4321_v2 = vsel %vm2339_vm9, %v4319_v16, %v4320_v61  ;;  %v7631_v16 = vld [vmem:[#allocation2 + $0x30] sm:$0xf0]  ;;  %v7975_v61 = vld [vmem:[#allocation2 + $0x9c] sm:$0xe]  ;;  %v7632_v43 = vld [vmem:[#allocation2 + $0x30] sm:$0xe] }
 0x362   : > { %v7633_v38 = vor.u32 %v7632_v43, %v7631_v16  ;;  %v12334_v1 = vld [vmem:[#allocation24_spill] sm:$0xff]  ;;  %v4224_v16 = vshll.u32 %v9433_v31, 16 }
 0x363   : > { %v3788_v51 = vpop.f32.mrf.mxu1  ;;  %v3727_v7 = vpop.f32.mrf.mxu0  ;;  %v4323_v6 = vrot.slane %v12334_v1, 1 }
 0x364   : > { %v4686_v44 = vpop.f32.mrf.mxu3  ;;  %v9630_v46 = vadd.f32 %v3788_v51, %v9488_v26  ;;  %v9635_v45 = vadd.f32 %v3727_v7, %v12331_v47  ;;  %v2377_v26 = vrot.slane %v9483_v8, 1  ;;  %v4219_v8 = vshll.u32 %v9426_v57, 16  ;;  %v7449_v47 = vld [vmem:[#allocation11 + $0xa4] sm:$0xf] }
 0x365   : > { %v9627_v14 = vadd.f32 %v4686_v44, %v4597_v62  ;;  %v2376_v62 = vrot.slane %v7585_v54, 1  ;;  %v4210_v44 = vor.u32 %v4209_v9, %v4205_v33  ;;  %v7270_v54 = vld [vmem:[#allocation11 + $0xb0] sm:$0xf0]  ;;  %v12335_v9 = vld [vmem:[#allocation30_spill] sm:$0xff]  ;;  %v7452_v33 = vld [vmem:[#allocation11 + $0xb4] sm:$0xf0] }
 0x366   : > { %12332 = vst [vmem:[#allocation35_spill] sm:$0xff] %v9635_v45  ;;  %4764 = vmatmul.bf16.gmra.mxu0 %v4321_v2  ;;  %v7276_v2 = vld [vmem:[#allocation11 + $0xa8] sm:$0xf] }
 0x367   : > { %v2378_v51 = vsel %vm2339_vm9, %v2376_v62, %v2377_v26  ;;  %v4215_v0 = vsel %vm2082_vm10, %v4210_v44, %v4214_v37  ;;  %v7976_v26 = vor.u32 %v7975_v61, %v12335_v9  ;;  %v4322_v62 = vrot.slane %v7633_v38, 1  ;;  %v3898_v38 = vld [vmem:[#allocation2 + $0xc8] sm:$0x1]  ;;  %v7268_v9 = vld [vmem:[#allocation11 + $0xa0] sm:$0xf] }
 0x368   : > { %v7277_v44 = vor.u32 %v7452_v33, %v7276_v2  ;;  %v2380_v61 = vrot.slane %v9508_v13, 1  ;;  %v4226_v2 = vrot.slane %v4224_v16, 1  ;;  %v4326_v16 = vrot.slane %v9382_v18, 1 }
 0x369   : > { %v2379_v43 = vrot.slane %v7976_v26, 1  ;;  %v4042_v26 = vunpack.c.l.b16 %v3898_v38  ;;  %v9665_v38 = vpop.f32.mrf.mxu2  ;;  %v2383_v18 = vrot.slane %v9531_v48, 1  ;;  %v7635_v48 = vld [vmem:[#allocation2 + $0x48] sm:$0xe] }
 0x36a   : > { %5360 = vmatpush.bf16.msra.mxu3 %v7277_v44  ;;  %v7627_v44 = vld [vmem:[#allocation2 + $0xc0] sm:$0xff]  }
 0x36b   : > { %v3729_v27 = vpop.f32.mrf.mxu0 }
 0x36c   : > { %v9642_v7 = vadd.f32 %v3729_v27, %v9364_v60  ;;  %v4221_v60 = vrot.slane %v4219_v8, 1  ;;  %v4217_v27 = vshrl.u32 %v9426_v57, 16  ;;  %v7450_v8 = vld [vmem:[#allocation11 + $0xac] sm:$0xf] }
 0x36e   : > { %3830 = vmatmul.bf16.gmra.mxu1 %v2378_v51  ;;  %4641 = vmatmul.bf16.gmra.mxu2 %v7626_v10  ;;  %12333 = vst [vmem:[#allocation36_spill] sm:$0xff] %v9642_v7  ;;  %v7273_v10 = vor.u32 %v7449_v47, %v7270_v54  ;;  %v4324_v51 = vsel %vm2339_vm9, %v4322_v62, %v4323_v6  ;;  %v7978_v47 = vld [vmem:[#allocation2 + $0x3c] sm:$0xe]  ;;  %v12338_v62 = vld [vmem:[#allocation39_spill] sm:$0xff] }
 0x36f   : > { %v4222_v1 = vor.u32 %v4221_v60, %v4217_v27  ;;  %v7278_v54 = vld [vmem:[#allocation11 + $0xb8] sm:$0xf0]  ;;  %v2381_v6 = vsel %vm2339_vm9, %v2379_v43, %v2380_v61  ;;  %v7979_v60 = vor.u32 %v7978_v47, %v12338_v62  ;;  %v7586_v43 = vld [vmem:[#allocation2 + $0xa8] sm:$0xf0]  ;;  %v4231_v61 = vshll.u32 %v7627_v44, 16 }
 0x370   : > { %5271 = vmatpush.bf16.msra.mxu2 %v7273_v10  ;;  %v7451_v10 = vld [vmem:[#allocation11 + $0xac] sm:$0xf0] }
 0x371   : > { %4730 = vmatmul.bf16.gmra.mxu3 %v4215_v0  ;;  %v7269_v33 = vor.u32 %v7451_v10, %v7268_v9  ;;  %v4227_v31 = vsel %vm2082_vm10, %v4222_v1, %v4226_v2  ;;  %v4325_v27 = vrot.slane %v7979_v60, 1  ;;  %v9671_v9 = vpop.f32.mrf.mxu3  ;;  %v4229_v10 = vshrl.u32 %v7627_v44, 16 }
 0x373   : > { %v3732_v37 = vpop.f32.mrf.mxu0  ;;  %5182 = vmatpush.bf16.msra.mxu1 %v7269_v33  ;;  %v4327_v47 = vsel %vm2339_vm9, %v4325_v27, %v4326_v16  ;;  %v7634_v27 = vld [vmem:[#allocation2 + $0x48] sm:$0xf0]  ;;  %v7981_v16 = vld [vmem:[#allocation2 + $0xb4] sm:$0xe] }
 0x374   : > { %v9648_v0 = vadd.f32 %v3732_v37, %v9380_v5  ;;  %v7281_v5 = vor.u32 %v7450_v8, %v7278_v54  ;;  %v7587_v8 = vld [vmem:[#allocation2 + $0xa8] sm:$0xe] }
 0x375   : > { %v7588_v2 = vor.u32 %v7587_v8, %v7586_v43  ;;  %v9679_v43 = vpop.f32.mrf.mxu2  ;;  %v12342_v8 = vld [vmem:[#allocation25_spill] sm:$0xff] }
 0x376   : > { %12336 = vst [vmem:[#allocation38_spill] sm:$0xff] %v9648_v0  ;;  %4769 = vmatmul.bf16.gmra.mxu0 %v4324_v51  ;;  %v9661_v51 = vpack.c.b16 %v4042_v26, %v4042_v26 }
 0x377   : > { %5449 = vmatpush.bf16.msra.mxu0 %v7281_v5  ;;  %v4233_v5 = vrot.slane %v4231_v61, 1  ;;  %v2382_v33 = vrot.slane %v7588_v2, 1  ;;  %v7636_v61 = vor.u32 %v7635_v48, %v7634_v27  ;;  %v7254_v2 = vld [vmem:[#allocation11 + $0x90] sm:$0xf0]  ;;  %v2386_v27 = vrot.slane %v9568_v20, 1  ;;  %v12346_v20 = vld [vmem:[#allocation42_spill] sm:$0xff] }
 0x378   : > { %v4236_v1 = vshll.u32 %v9661_v51, 16 }
 0x37b   : > { %v3734_v37 = vpop.f32.mrf.mxu0 }
 0x37c   : > { %v9658_v13 = vadd.f32 %v3734_v37, %v9396_v30  ;;  %v12339_v30 = vld [vmem:[#allocation41_spill] sm:$0xff]  ;;  %v4234_v37 = vor.u32 %v4233_v5, %v4229_v10 }
 0x37d   : > { %v7448_v10 = vld [vmem:[#allocation11 + $0x94] sm:$0xf0]  ;;  %v9692_v48 = vpop.f32.mrf.mxu2 }
 0x37e   : > { %3835 = vmatmul.bf16.gmra.mxu1 %v2381_v6  ;;  %4646 = vmatmul.bf16.gmra.mxu2 %v9426_v57  ;;  %12337 = vst [vmem:[#allocation24_spill] sm:$0xff] %v9658_v13  ;;  %v4238_v6 = vrot.slane %v4236_v1, 1  ;;  %v4329_v1 = vrot.slane %v12342_v8, 1  ;;  %v7446_v8 = vld [vmem:[#allocation11 + $0x8c] sm:$0xf] }
 0x380   : > { %v4239_v62 = vsel %vm2082_vm10, %v4234_v37, %v4238_v6  ;;  %v4328_v6 = vrot.slane %v7636_v61, 1  ;;  %v9685_v37 = vpop.f32.mrf.mxu1 }
 0x381   : > { %4735 = vmatmul.bf16.gmra.mxu3 %v4227_v31  ;;  %v2384_v31 = vsel %vm2339_vm9, %v2382_v33, %v2383_v18 }
 0x383   : > { %v3737_v57 = vpop.f32.mrf.mxu0 }
 0x384   : > { %v9668_v54 = vadd.f32 %v3737_v57, %v12339_v30  ;;  %v9681_v57 = vpop.f32.mrf.mxu3  ;;  %v7445_v30 = vld [vmem:[#allocation11 + $0x84] sm:$0xf] }
 0x385   : > { %v7257_v18 = vor.u32 %v7445_v30, %v7254_v2  ;;  %v7262_v30 = vld [vmem:[#allocation11 + $0x98] sm:$0xf0]  ;;  %v7252_v2 = vld [vmem:[#allocation11 + $0x80] sm:$0xf] }
 0x386   : > { %12340 = vst [vmem:[#allocation30_spill] sm:$0xff] %v9668_v54  ;;  %4774 = vmatmul.bf16.gmra.mxu0 %v4327_v47  ;;  %v7260_v47 = vld [vmem:[#allocation11 + $0x88] sm:$0xf]  ;;  %v7265_v61 = vor.u32 %v7446_v8, %v7262_v30 }
 0x387   : > { %v7261_v33 = vor.u32 %v7448_v10, %v7260_v47  ;;  %5272 = vmatpush.bf16.msra.mxu2 %v7257_v18  ;;  %v7447_v47 = vld [vmem:[#allocation11 + $0x8c] sm:$0xf0] }
 0x388   : > { %v7253_v18 = vor.u32 %v7447_v47, %v7252_v2  ;;  %5450 = vmatpush.bf16.msra.mxu0 %v7265_v61 }
 0x389   : > { %5361 = vmatpush.bf16.msra.mxu3 %v7261_v33  ;;  %v4332_v33 = vrot.slane %v9441_v63, 1  ;;  %v7637_v63 = vld [vmem:[#allocation2 + $0x60] sm:$0xf0] }
 0x38a   : > { %5183 = vmatpush.bf16.msra.mxu1 %v7253_v18  ;;  %v7638_v18 = vld [vmem:[#allocation2 + $0x60] sm:$0xe] }
 0x38b   : > { %v3739_v26 = vpop.f32.mrf.mxu0 }
 0x38c   : > { %v9677_v60 = vadd.f32 %v3739_v26, %v9422_v59  ;;  %v4330_v26 = vsel %vm2339_vm9, %v4328_v6, %v4329_v1 }
 0x38e   : > { %3840 = vmatmul.bf16.gmra.mxu1 %v2384_v31  ;;  %4651 = vmatmul.bf16.gmra.mxu2 %v7627_v44  ;;  %12341 = vst [vmem:[#allocation39_spill] sm:$0xff] %v9677_v60  ;;  %v12343_v44 = vld [vmem:[#allocation34_spill] sm:$0xff] }
 0x38f   : > { %v7982_v5 = vor.u32 %v7981_v16, %v12343_v44  ;;  %v7984_v16 = vld [vmem:[#allocation2 + $0x54] sm:$0xe]  ;;  %v9694_v44 = vpop.f32.mrf.mxu3 }
 0x391   : > { %4740 = vmatmul.bf16.gmra.mxu3 %v4239_v62  ;;  %v2385_v62 = vrot.slane %v7982_v5, 1  ;;  %v7985_v5 = vor.u32 %v7984_v16, %v12346_v20  ;;  %v12350_v20 = vld [vmem:[#allocation26_spill] sm:$0xff] }
 0x393   : > { %v3742_v59 = vpop.f32.mrf.mxu0  ;;  %v4331_v6 = vrot.slane %v7985_v5, 1  ;;  %v4335_v5 = vrot.slane %v12350_v20, 1  ;;  %v7987_v20 = vld [vmem:[#allocation2 + $0x6c] sm:$0xe] }
 0x394   : > { %v9688_v31 = vadd.f32 %v3742_v59, %v9439_v11  ;;  %v2387_v11 = vsel %vm2339_vm9, %v2385_v62, %v2386_v27  ;;  %v9701_v59 = vpop.f32.mrf.mxu1  ;;  %v12347_v62 = vld [vmem:[#allocation44_spill] sm:$0xff] }
 0x395   : > { %v4333_v61 = vsel %vm2339_vm9, %v4331_v6, %v4332_v33 }
 0x396   : > { %12344 = vst [vmem:[#allocation41_spill] sm:$0xff] %v9688_v31  ;;  %4779 = vmatmul.bf16.gmra.mxu0 %v4330_v26  ;;  %v9704_v26 = vpop.f32.mrf.mxu2 }
 0x397   : > { %v9706_v30 = vpop.f32.mrf.mxu3 }
 0x39b   : > { %v3744_v10 = vpop.f32.mrf.mxu0 }
 0x39c   : > { %v9698_v1 = vadd.f32 %v3744_v10, %v9455_v28  ;;  %v9712_v28 = vpop.f32.mrf.mxu1  ;;  %v7639_v10 = vor.u32 %v7638_v18, %v7637_v63 }
 0x39e   : > { %3845 = vmatmul.bf16.gmra.mxu1 %v2387_v11  ;;  %12345 = vst [vmem:[#allocation25_spill] sm:$0xff] %v9698_v1  ;;  %v9714_v16 = vpop.f32.mrf.mxu2  ;;  %v4334_v31 = vrot.slane %v7639_v10, 1  ;;  %v7246_v10 = vld [vmem:[#allocation11 + $0x78] sm:$0xf0] }
 0x39f   : > { %v9719_v11 = vpop.f32.mrf.mxu3 }
 0x3a3   : > { %v3747_v8 = vpop.f32.mrf.mxu0 }
 0x3a4   : > { %v9709_v27 = vadd.f32 %v3747_v8, %v12347_v62  ;;  %v7441_v8 = vld [vmem:[#allocation11 + $0x64] sm:$0xf]  ;;  %v7238_v62 = vld [vmem:[#allocation11 + $0x70] sm:$0xf0]  ;;  %v9722_v6 = vpop.f32.mrf.mxu1 }
 0x3a5   : > { %v7241_v33 = vor.u32 %v7441_v8, %v7238_v62  ;;  %v12353_v62 = vld [vmem:[#allocation45_spill] sm:$0xff] }
 0x3a6   : > { %12348 = vst [vmem:[#allocation34_spill] sm:$0xff] %v9709_v27  ;;  %4784 = vmatmul.bf16.gmra.mxu0 %v4333_v61  ;;  %v7244_v27 = vld [vmem:[#allocation11 + $0x68] sm:$0xf]  ;;  %v7444_v61 = vld [vmem:[#allocation11 + $0x74] sm:$0xf0]  ;;  %v9728_v63 = vpop.f32.mrf.mxu2 }
 0x3a7   : > { %v7245_v60 = vor.u32 %v7444_v61, %v7244_v27  ;;  %5273 = vmatpush.bf16.msra.mxu2 %v7241_v33  ;;  %v9730_v18 = vpop.f32.mrf.mxu3  ;;  %v7442_v27 = vld [vmem:[#allocation11 + $0x6c] sm:$0xf]  ;;  %v7236_v33 = vld [vmem:[#allocation11 + $0x60] sm:$0xf]  ;;  %v7443_v61 = vld [vmem:[#allocation11 + $0x6c] sm:$0xf0] }
 0x3a9   : > { %5362 = vmatpush.bf16.msra.mxu3 %v7245_v60  ;;  %v7249_v60 = vor.u32 %v7442_v27, %v7246_v10 }
 0x3ab   : > { %v3749_v2 = vpop.f32.mrf.mxu0  ;;  %5451 = vmatpush.bf16.msra.mxu0 %v7249_v60 }
 0x3ac   : > { %v9717_v47 = vadd.f32 %v3749_v2, %v9481_v50  ;;  %v4336_v2 = vsel %vm2339_vm9, %v4334_v31, %v4335_v5  ;;  %v9732_v54 = vpop.f32.mrf.mxu1  ;;  %v7988_v31 = vor.u32 %v7987_v20, %v12353_v62  ;;  %v3899_v5 = vld [vmem:[#allocation2 + $0xd4] sm:$0x1] }
 0x3ae   : > { %12349 = vst [vmem:[#allocation42_spill] sm:$0xff] %v9717_v47  ;;  %v9740_v13 = vpop.f32.mrf.mxu2 }
 0x3af   : > { %v9745_v45 = vpop.f32.mrf.mxu3 }
 0x3b3   : > { %v3752_v1 = vpop.f32.mrf.mxu0 }
 0x3b4   : > { %v9725_v50 = vadd.f32 %v3752_v1, %v9492_v19  ;;  %v3882_v19 = vld [vmem:[#allocation2 + $0xcc] sm:$0xff]  }
 0x3b5   : > { %v9737_v1 = vld [vmem:[#allocation2 + $0xcc] sm:$0xf0]  ;;  %4656 = vmatmul.bf16.gmra.mxu2 %v3882_v19  ;;  %v4241_v7 = vshrl.u32 %v3882_v19, 16 }
 0x3b6   : > { %12351 = vst [vmem:[#allocation44_spill] sm:$0xff] %v9725_v50  ;;  %4789 = vmatmul.bf16.gmra.mxu0 %v4336_v2  ;;  %v4043_v2 = vunpack.c.l.b16 %v3899_v5  ;;  %v7237_v50 = vor.u32 %v7443_v61, %v7236_v33  ;;  %v7437_v61 = vld [vmem:[#allocation11 + $0x44] sm:$0xf] }
 0x3b8   : > { %v9742_v0 = vpack.c.b16 %v4043_v2, %v4043_v2  ;;  %5184 = vmatpush.bf16.msra.mxu1 %v7237_v50  ;;  %v9752_v50 = vpop.f32.mrf.mxu1 }
 0x3ba   : > { %12354 = vst [vmem:[#allocation45_spill] sm:$0xff] %v9742_v0  ;;  %v4248_v20 = vshll.u32 %v9742_v0, 16  ;;  %v9757_v0 = vpop.f32.mrf.mxu3 }
 0x3bb   : > { %v3754_v47 = vpop.f32.mrf.mxu0 }
 0x3bc   : > { %v9735_v8 = vadd.f32 %v3754_v47, %v9504_v36  ;;  %v4337_v36 = vrot.slane %v7988_v31, 1  ;;  %v4338_v47 = vrot.slane %v9494_v42, 1  ;;  %v4250_v60 = vrot.slane %v4248_v20, 1  ;;  %v7220_v42 = vld [vmem:[#allocation11 + $0x40] sm:$0xf] }
 0x3bd   : > { %v7439_v31 = vld [vmem:[#allocation11 + $0x4c] sm:$0xf0] }
 0x3be   : > { %12352 = vst [vmem:[#allocation26_spill] sm:$0xff] %v9735_v8  ;;  %v4243_v8 = vshll.u32 %v3882_v19, 16  ;;  %v4339_v5 = vsel %vm2339_vm9, %v4337_v36, %v4338_v47  ;;  %v7221_v2 = vor.u32 %v7439_v31, %v7220_v42  ;;  %v7435_v20 = vld [vmem:[#allocation11 + $0x2c] sm:$0xf0]  ;;  %v7206_v36 = vld [vmem:[#allocation11 + $0x30] sm:$0xf0] }
 0x3bf   : > { %v7212_v47 = vld [vmem:[#allocation11 + $0x28] sm:$0xf]  ;;  %v7640_v31 = vld [vmem:[#allocation2 + $0x78] sm:$0xf0] }
 0x3c0   : > { %v4245_v10 = vrot.slane %v4243_v8, 1  ;;  %v7225_v8 = vor.u32 %v7437_v61, %v7222_v3  ;;  %5185 = vmatpush.bf16.msra.mxu1 %v7221_v2  ;;  %v7431_v3 = vld [vmem:[#allocation11 + $0xc] sm:$0xf0]  ;;  %v7429_v61 = vld [vmem:[#allocation11 + $0x4] sm:$0xf] }
 0x3c1   : > { %v7190_v2 = vld [vmem:[#allocation11 + $0x10] sm:$0xf0] }
 0x3c2   : > { %v4246_v33 = vor.u32 %v4245_v10, %v4241_v7  ;;  %v7436_v10 = vld [vmem:[#allocation11 + $0x34] sm:$0xf0]  ;;  %5274 = vmatpush.bf16.msra.mxu2 %v7225_v8 }
 0x3c3   : > { %v3757_v27 = vpop.f32.mrf.mxu0 }
 0x3c4   : > { %v9749_v62 = vadd.f32 %v3757_v27, %v9518_v52  ;;  %v4251_v19 = vsel %vm2082_vm10, %v4246_v33, %v4250_v60  ;;  %v7229_v52 = vor.u32 %v7440_v25, %v7228_v29  ;;  %v7204_v27 = vld [vmem:[#allocation11 + $0x20] sm:$0xf]  ;;  %v7213_v33 = vor.u32 %v7436_v10, %v7212_v47 }
 0x3c5   : > { %4745 = vmatmul.bf16.gmra.mxu3 %v4251_v19  ;;  %v7205_v7 = vor.u32 %v7435_v20, %v7204_v27  ;;  %v7188_v29 = vld [vmem:[#allocation11] sm:$0xf]  ;;  %v7196_v27 = vld [vmem:[#allocation11 + $0x8] sm:$0xf]  ;;  %v7432_v20 = vld [vmem:[#allocation11 + $0x14] sm:$0xf0] }
 0x3c6   : > { %12355 = vst [vmem:[#allocation49_spill] sm:$0xff] %v9749_v62  ;;  %4794 = vmatmul.bf16.gmra.mxu0 %v4339_v5  ;;  %v7433_v62 = vld [vmem:[#allocation11 + $0x24] sm:$0xf]  ;;  %v9755_v5 = vpop.f32.mrf.mxu2  ;;  %5363 = vmatpush.bf16.msra.mxu3 %v7229_v52  ;;  %v7189_v19 = vor.u32 %v7431_v3, %v7188_v29  ;;  %v7197_v8 = vor.u32 %v7432_v20, %v7196_v27  ;;  %v4341_v47 = vrot.slane %v9516_v53, 1  ;;  %v7230_v27 = vld [vmem:[#allocation11 + $0x58] sm:$0xf0] }
 0x3c7   : > { %12356 = vst [vmem:[#allocation50_spill] sm:$0xff] %v9755_v5  ;;  %v7209_v60 = vor.u32 %v7433_v62, %v7206_v36  ;;  %5186 = vmatpush.bf16.msra.mxu1 %v7205_v7  ;;  %v7641_v5 = vld [vmem:[#allocation2 + $0x78] sm:$0xe]  ;;  %v7193_v62 = vor.u32 %v7429_v61, %v7190_v2  ;;  %v9762_v36 = vpop.f32.mrf.mxu1 }
 0x3c8   : > { %v7642_v52 = vor.u32 %v7641_v5, %v7640_v31  ;;  %v9772_v5 = vld [vmem:[#allocation13 + $0x2] ss:$0 sm:$0xff]  ;;  %v7990_v31 = vld [vmem:[#allocation2 + $0x84] sm:$0xe] }
 0x3c9   : > { %5275 = vmatpush.bf16.msra.mxu2 %v7209_v60  ;;  %v9769_v60 = vpop.f32.mrf.mxu3  ;;  %v7991_v20 = vor.u32 %v7990_v31, %v9526_v24 }
 0x3ca   : > { %5364 = vmatpush.bf16.msra.mxu3 %v7213_v33  ;;  %v4340_v10 = vrot.slane %v7642_v52, 1 }
 0x3cb   : > { %v3759_v42 = vpop.f32.mrf.mxu0  ;;  %5187 = vmatpush.bf16.msra.mxu1 %v7189_v19  ;;  %v9777_v19 = vld [vmem:[#allocation13 + $0x3] ss:$0 sm:$0xff] }
 0x3cc   : > { %v9760_v25 = vadd.f32 %v3759_v42, %v9533_v49  ;;  %v4342_v29 = vsel %vm2339_vm9, %v4340_v10, %v4341_v47  ;;  %v4343_v10 = vrot.slane %v7991_v20, 1 }
 0x3cd   : > { %5276 = vmatpush.bf16.msra.mxu2 %v7193_v62 }
 0x3ce   : > { %5365 = vmatpush.bf16.msra.mxu3 %v7197_v8  ;;  %v9765_v7 = vpop.f32.mrf.mxu2 }
 0x3cf   : > { %v9774_v53 = vpop.f32.mrf.mxu1 }
 0x3d1   : > { %v9784_v52 = vpop.f32.mrf.mxu3 }
 0x3d3   : > { %v4760_v49 = vpop.f32.mrf.mxu0 }
 0x3d4   : > { %v4761_v42 = vadd.f32 %v4760_v49, %v9545_v32  ;;  %v7438_v32 = vld [vmem:[#allocation11 + $0x4c] sm:$0xf] }
 0x3d5   : > { %v7233_v62 = vor.u32 %v7438_v32, %v7230_v27 }
 0x3d6   : > { %v4840_v33 = vadd.f32 %v4761_v42, %v9536_v35  ;;  %4799 = vmatmul.bf16.gmra.mxu0 %v4342_v29  ;;  %v9781_v8 = vpop.f32.mrf.mxu2  ;;  %v4344_v42 = vrot.slane %v9550_v21, 1 }
 0x3d7   : > { %5452 = vmatpush.bf16.msra.mxu0 %v7233_v62  ;;  %v7643_v62 = vld [vmem:[#allocation2 + $0x90] sm:$0xf0] }
 0x3d8   : > { %v4874_v61 = vmul.f32 %v9772_v5, %v4840_v33  ;;  %v9790_v33 = vpop.f32.mrf.mxu1 }
 0x3d9   : > { %v9802_v21 = vpop.f32.mrf.mxu3 }
 0x3da   : > { %v4908_v47 = vadd.f32 %v9777_v19, %v4874_v61 }
 0x3db   : > { %v4762_v3 = vpop.f32.mrf.mxu0 }
 0x3dc   : > { %v4763_v2 = vadd.f32 %v4762_v3, %v9559_v22  ;;  %v4940_v24 = vmax.f32 %v4908_v47, 0.0  ;;  %v7644_v47 = vld [vmem:[#allocation2 + $0x90] sm:$0xe] }
 0x3de   : > { %v4841_v35 = vadd.f32 %v4763_v2, %v9548_v15  ;;  %v4345_v15 = vsel %vm2339_vm9, %v4343_v10, %v4344_v42  ;;  %v9797_v32 = vpop.f32.mrf.mxu2 }
 0x3e0   : > { %v4875_v49 = vmul.f32 %v9772_v5, %v4841_v35  ;;  %v9806_v35 = vpop.f32.mrf.mxu1 }
 0x3e2   : > { %v4909_v22 = vadd.f32 %v9777_v19, %v4875_v49  ;;  %v7645_v49 = vor.u32 %v7644_v47, %v7643_v62 }
 0x3e3   : > { %v4765_v29 = vpop.f32.mrf.mxu0 }
 0x3e4   : > { %v4941_v31 = vmax.f32 %v4909_v22, 0.0  ;;  %v4766_v3 = vadd.f32 %v4765_v29, %v9577_v40  ;;  %v4347_v22 = vrot.slane %v9575_v39, 1 }
 0x3e6   : > { %v9794_v2 = vpack.c.bf16 %v4941_v31, %v4940_v24  ;;  %v4842_v61 = vadd.f32 %v4766_v3, %v9563_v12  ;;  %4804 = vmatmul.bf16.gmra.mxu0 %v4345_v15  ;;  %v9812_v29 = vpop.f32.mrf.mxu2  ;;  %v4346_v3 = vrot.slane %v7645_v49, 1  ;;  %v7434_v49 = vld [vmem:[#allocation11 + $0x2c] sm:$0xf] }
 0x3e8   : > { %5188 = vmatmul.bf16.vlgmr.msra.gmra.mxu1 %v9794_v2  ;;  %5277 = vmatmul.bf16.vlgmr.msra.gmra.mxu2 %v9794_v2  ;;  %v4876_v40 = vmul.f32 %v9772_v5, %v4842_v61  ;;  %v9822_v39 = vpop.f32.mrf.mxu1 }
 0x3e9   : > { %5366 = vmatmul.bf16.vlgmr.msra.gmra.mxu3 %v9794_v2 }
 0x3ea   : > { %v4910_v10 = vadd.f32 %v9777_v19, %v4876_v40 }
 0x3eb   : > { %v4767_v27 = vpop.f32.mrf.mxu0 }
 0x3ec   : > { %v4768_v20 = vadd.f32 %v4767_v27, %v9588_v4  ;;  %v9815_v4 = vpop.f32.mrf.mxu3  ;;  %v4942_v15 = vmax.f32 %v4910_v10, 0.0  ;;  %v4348_v27 = vsel %vm2339_vm9, %v4346_v3, %v4347_v22 }
 0x3ee   : > { %v4843_v12 = vadd.f32 %v4768_v20, %v9580_v58 }
 0x3f0   : > { %v4877_v42 = vmul.f32 %v9772_v5, %v4843_v12  ;;  %v9827_v12 = vpop.f32.mrf.mxu2  ;;  %v9836_v3 = vpop.f32.mrf.mxu1 }
 0x3f2   : > { %v4911_v24 = vadd.f32 %v9777_v19, %v4877_v42 }
 0x3f3   : > { %v4770_v31 = vpop.f32.mrf.mxu0 }
 0x3f4   : > { %v4943_v61 = vmax.f32 %v4911_v24, 0.0  ;;  %v4771_v58 = vadd.f32 %v4770_v31, %v9599_v41  ;;  %v9831_v42 = vpop.f32.mrf.mxu3 }
 0x3f6   : > { %v4844_v40 = vadd.f32 %v4771_v58, %v9591_v34  ;;  %4809 = vmatmul.bf16.gmra.mxu0 %v4348_v27  ;;  %v9820_v20 = vpack.c.bf16 %v4943_v61, %v4942_v15  ;;  %v7214_v34 = vld [vmem:[#allocation11 + $0x38] sm:$0xf0] }
 0x3f7   : > { %v7217_v10 = vor.u32 %v7434_v49, %v7214_v34  ;;  %v12357_v49 = vld [vmem:[#allocation40_spill] sm:$0xff] }
 0x3f8   : > { %5193 = vmatmul.bf16.gmra.mxu1 %v9820_v20  ;;  %5282 = vmatmul.bf16.gmra.mxu2 %v9820_v20  ;;  %v4878_v41 = vmul.f32 %v9772_v5, %v4844_v40  ;;  %v9840_v40 = vpop.f32.mrf.mxu2  ;;  %v9853_v34 = vpop.f32.mrf.mxu1 }
 0x3f9   : > { %5371 = vmatmul.bf16.gmra.mxu3 %v9820_v20  ;;  %5453 = vmatpush.bf16.msra.mxu0 %v7217_v10 }
 0x3fa   : > { %v4912_v24 = vadd.f32 %v9777_v19, %v4878_v41 }
 0x3fb   : > { %v4772_v62 = vpop.f32.mrf.mxu0 }
 0x3fc   : > { %v4773_v47 = vadd.f32 %v4772_v62, %v9613_v55  ;;  %v4944_v58 = vmax.f32 %v4912_v24, 0.0  ;;  %v9846_v41 = vpop.f32.mrf.mxu3 }
 0x3fe   : > { %v4845_v22 = vadd.f32 %v4773_v47, %v9603_v23  ;;  %v4689_v47 = vadd.f32 %v9671_v9, %v9665_v38  ;;  %v4692_v38 = vadd.f32 %v9681_v57, %v9679_v43  ;;  %v4694_v57 = vadd.f32 %v9694_v44, %v9692_v48 }
 0x400   : > { %v4879_v31 = vmul.f32 %v9772_v5, %v4845_v22  ;;  %v7646_v22 = vld [vmem:[#allocation2 + $0xa8] sm:$0xf0] }
 0x402   : > { %v4913_v15 = vadd.f32 %v9777_v19, %v4879_v31  ;;  %v7647_v31 = vld [vmem:[#allocation2 + $0xa8] sm:$0xe] }
 0x403   : > { %v4775_v61 = vpop.f32.mrf.mxu0 }
 0x404   : > { %v4945_v27 = vmax.f32 %v4913_v15, 0.0  ;;  %v4776_v55 = vadd.f32 %v4775_v61, %v9627_v14  ;;  %v7648_v15 = vor.u32 %v7647_v31, %v7646_v22  ;;  %v9857_v61 = vpop.f32.mrf.mxu2  ;;  %v9864_v9 = vpop.f32.mrf.mxu3  ;;  %v12358_v31 = vld [vmem:[#allocation46_spill] sm:$0xff] }
 0x406   : > { %v4846_v62 = vadd.f32 %v4776_v55, %v9616_v56  ;;  %4814 = vmatmul.bf16.gmra.mxu0 %v12357_v49  ;;  %v9844_v23 = vpack.c.bf16 %v4945_v27, %v4944_v58  ;;  %v4353_v55 = vrot.slane %v9625_v17, 1 }
 0x408   : > { %5198 = vmatmul.bf16.gmra.mxu1 %v9844_v23  ;;  %5287 = vmatmul.bf16.gmra.mxu2 %v9844_v23  ;;  %v4880_v56 = vmul.f32 %v9772_v5, %v4846_v62 }
 0x409   : > { %5376 = vmatmul.bf16.gmra.mxu3 %v9844_v23 }
 0x40a   : > { %v4914_v58 = vadd.f32 %v9777_v19, %v4880_v56  ;;  %v3792_v56 = vadd.f32 %v9685_v37, %v12358_v31 }
 0x40b   : > { %v4777_v14 = vpop.f32.mrf.mxu0 }
 0x40c   : > { %v4778_v10 = vadd.f32 %v4777_v14, %v4689_v47  ;;  %v4352_v47 = vrot.slane %v7648_v15, 1  ;;  %v9879_v15 = vpop.f32.mrf.mxu2 }
 0x40e   : > { %v4847_v24 = vadd.f32 %v4778_v10, %v9630_v46  ;;  %v4946_v46 = vmax.f32 %v4914_v58, 0.0  ;;  %v4354_v22 = vsel %vm2339_vm9, %v4352_v47, %v4353_v55  ;;  %v9883_v55 = vpop.f32.mrf.mxu3  ;;  %v7198_v47 = vld [vmem:[#allocation11 + $0x18] sm:$0xf0] }
 0x410   : > { %v4881_v27 = vmul.f32 %v9772_v5, %v4847_v24  ;;  %v9870_v24 = vpop.f32.mrf.mxu1 }
 0x412   : > { %v4915_v62 = vadd.f32 %v9777_v19, %v4881_v27  ;;  %v12359_v27 = vld [vmem:[#allocation27_spill] sm:$0xff] }
 0x413   : > { %v4780_v49 = vpop.f32.mrf.mxu0  ;;  %v3794_v37 = vadd.f32 %v9701_v59, %v12359_v27  ;;  %v12360_v27 = vld [vmem:[#allocation32_spill] sm:$0xff] }
 0x414   : > { %v4947_v14 = vmax.f32 %v4915_v62, 0.0  ;;  %v4781_v10 = vadd.f32 %v4780_v49, %v4692_v38  ;;  %v7430_v49 = vld [vmem:[#allocation11 + $0xc] sm:$0xf] }
 0x416   : > { %4819 = vmatmul.bf16.gmra.mxu0 %v4354_v22  ;;  %v9872_v17 = vpack.c.bf16 %v4947_v14, %v4946_v46  ;;  %v4848_v43 = vadd.f32 %v4781_v10, %v3792_v56  ;;  %v7201_v46 = vor.u32 %v7430_v49, %v7198_v47  ;;  %v4697_v22 = vadd.f32 %v9706_v30, %v9704_v26  ;;  %v9893_v56 = vpop.f32.mrf.mxu2  ;;  %v12361_v49 = vld [vmem:[#allocation43_spill] sm:$0xff] }
 0x417   : > { %v4699_v26 = vadd.f32 %v9719_v11, %v9714_v16  ;;  %v4359_v11 = vrot.slane %v9661_v51, 1 }
 0x418   : > { %5203 = vmatmul.bf16.gmra.mxu1 %v9872_v17  ;;  %5292 = vmatmul.bf16.gmra.mxu2 %v9872_v17  ;;  %v4882_v38 = vmul.f32 %v9772_v5, %v4848_v43  ;;  %v9886_v10 = vpop.f32.mrf.mxu1 }
 0x419   : > { %5381 = vmatmul.bf16.gmra.mxu3 %v9872_v17  ;;  %5454 = vmatpush.bf16.msra.mxu0 %v7201_v46 }
 0x41a   : > { %v4916_v48 = vadd.f32 %v9777_v19, %v4882_v38 }
 0x41b   : > { %v4782_v58 = vpop.f32.mrf.mxu0 }
 0x41c   : > { %v4783_v62 = vadd.f32 %v4782_v58, %v4694_v57  ;;  %v4948_v43 = vmax.f32 %v4916_v48, 0.0 }
 0x41e   : > { %v4849_v14 = vadd.f32 %v4783_v62, %v3794_v37  ;;  %v3797_v37 = vadd.f32 %v9712_v28, %v12360_v27  ;;  %v9897_v62 = vpop.f32.mrf.mxu3  ;;  %v12362_v28 = vld [vmem:[#allocation33_spill] sm:$0xff] }
 0x420   : > { %v4883_v44 = vmul.f32 %v9772_v5, %v4849_v14  ;;  %v9907_v30 = vpop.f32.mrf.mxu1  ;;  %v3799_v14 = vadd.f32 %v9722_v6, %v12362_v28  ;;  %v4702_v6 = vadd.f32 %v9730_v18, %v9728_v63  ;;  %v4704_v18 = vadd.f32 %v9745_v45, %v9740_v13  ;;  %v12366_v13 = vld [vmem:[#allocation50_spill] sm:$0xff] }
 0x422   : > { %v4917_v59 = vadd.f32 %v9777_v19, %v4883_v44 }
 0x423   : > { %v4785_v31 = vpop.f32.mrf.mxu0 }
 0x424   : > { %v4949_v57 = vmax.f32 %v4917_v59, 0.0  ;;  %v4786_v58 = vadd.f32 %v4785_v31, %v4697_v22  ;;  %v7649_v22 = vld [vmem:[#allocation2 + $0xc0] sm:$0xf0]  ;;  %v9912_v59 = vpop.f32.mrf.mxu2 }
 0x426   : > { %4824 = vmatmul.bf16.gmra.mxu0 %v12361_v49  ;;  %v9900_v38 = vpack.c.bf16 %v4949_v57, %v4948_v43  ;;  %v4850_v47 = vadd.f32 %v4786_v58, %v3797_v37  ;;  %v7650_v43 = vld [vmem:[#allocation2 + $0xc0] sm:$0xe]  ;;  %v9914_v58 = vpop.f32.mrf.mxu3 }
 0x427   : > { %v7651_v57 = vor.u32 %v7650_v43, %v7649_v22 }
 0x428   : > { %5208 = vmatmul.bf16.gmra.mxu1 %v9900_v38  ;;  %5297 = vmatmul.bf16.gmra.mxu2 %v9900_v38  ;;  %v4884_v48 = vmul.f32 %v9772_v5, %v4850_v47 }
 0x429   : > { %5386 = vmatmul.bf16.gmra.mxu3 %v9900_v38  ;;  %v4358_v47 = vrot.slane %v7651_v57, 1 }
 0x42a   : > { %v4918_v27 = vadd.f32 %v9777_v19, %v4884_v48  ;;  %v12363_v48 = vld [vmem:[#allocation47_spill] sm:$0xff] }
 0x42b   : > { %v4787_v46 = vpop.f32.mrf.mxu0  ;;  %v4360_v22 = vsel %vm2339_vm9, %v4358_v47, %v4359_v11 }
 0x42c   : > { %v4788_v44 = vadd.f32 %v4787_v46, %v4699_v26  ;;  %v9922_v26 = vpop.f32.mrf.mxu1  ;;  %v4950_v46 = vmax.f32 %v4918_v27, 0.0  ;;  %v9929_v43 = vpop.f32.mrf.mxu2 }
 0x42e   : > { %v4851_v31 = vadd.f32 %v4788_v44, %v3799_v14  ;;  %v7993_v44 = vld [vmem:[#allocation2 + $0xcc] sm:$0xe]  ;;  %v9936_v57 = vpop.f32.mrf.mxu3 }
 0x430   : > { %v4885_v16 = vmul.f32 %v9772_v5, %v4851_v31  ;;  %v3802_v31 = vadd.f32 %v9732_v54, %v12363_v48  ;;  %v7994_v54 = vor.u32 %v7993_v44, %v9737_v1  ;;  %v4707_v48 = vadd.f32 %v9757_v0, %v12366_v13 }
 0x432   : > { %v4919_v37 = vadd.f32 %v9777_v19, %v4885_v16  ;;  %v12364_v16 = vld [vmem:[#allocation31_spill] sm:$0xff] }
 0x433   : > { %v4790_v49 = vpop.f32.mrf.mxu0  ;;  %v3804_v11 = vadd.f32 %v9752_v50, %v12364_v16  ;;  %v12367_v16 = vld [vmem:[#allocation28_spill] sm:$0xff] }
 0x434   : > { %v4951_v28 = vmax.f32 %v4919_v37, 0.0  ;;  %v4791_v14 = vadd.f32 %v4790_v49, %v4702_v6  ;;  %v9942_v49 = vpop.f32.mrf.mxu1  ;;  %v9949_v1 = vpop.f32.mrf.mxu2 }
 0x436   : > { %4829 = vmatmul.bf16.gmra.mxu0 %v4360_v22  ;;  %v9927_v51 = vpack.c.bf16 %v4951_v28, %v4950_v46  ;;  %v4852_v63 = vadd.f32 %v4791_v14, %v3802_v31  ;;  %v4361_v46 = vrot.slane %v7994_v54, 1  ;;  %v12365_v28 = vld [vmem:[#allocation45_spill] sm:$0xff] }
 0x437   : > { %v4362_v14 = vrot.slane %v12365_v28, 1  ;;  %v12368_v28 = vld [vmem:[#allocation48_spill] sm:$0xff] }
 0x438   : > { %5213 = vmatmul.bf16.gmra.mxu1 %v9927_v51  ;;  %5302 = vmatmul.bf16.gmra.mxu2 %v9927_v51  ;;  %v4886_v6 = vmul.f32 %v9772_v5, %v4852_v63  ;;  %v9953_v63 = vpop.f32.mrf.mxu3 }
 0x439   : > { %5391 = vmatmul.bf16.gmra.mxu3 %v9927_v51  ;;  %v4363_v31 = vsel %vm2339_vm9, %v4361_v46, %v4362_v14  ;;  %v3809_v14 = vadd.f32 %v9774_v53, %v12368_v28 }
 0x43a   : > { %v4920_v22 = vadd.f32 %v9777_v19, %v4886_v6 }
 0x43b   : > { %v4792_v27 = vpop.f32.mrf.mxu0 }
 0x43c   : > { %v4793_v37 = vadd.f32 %v4792_v27, %v4704_v18  ;;  %v4952_v18 = vmax.f32 %v4920_v22, 0.0 }
 0x43e   : > { %v4853_v47 = vadd.f32 %v4793_v37, %v3804_v11  ;;  %v3807_v11 = vadd.f32 %v9762_v36, %v12367_v16  ;;  %v9959_v37 = vpop.f32.mrf.mxu1  ;;  %v9968_v36 = vpop.f32.mrf.mxu2  ;;  %v12369_v16 = vld [vmem:[#allocation29_spill] sm:$0xff] }
 0x440   : > { %v4887_v45 = vmul.f32 %v9772_v5, %v4853_v47  ;;  %v4709_v47 = vadd.f32 %v9769_v60, %v9765_v7  ;;  %v9971_v13 = vpop.f32.mrf.mxu3 }
 0x442   : > { %v4921_v50 = vadd.f32 %v9777_v19, %v4887_v45 }
 0x443   : > { %v4795_v44 = vpop.f32.mrf.mxu0 }
 0x444   : > { %v4953_v27 = vmax.f32 %v4921_v50, 0.0  ;;  %v4796_v54 = vadd.f32 %v4795_v44, %v4707_v48 }
 0x446   : > { %4834 = vmatmul.bf16.gmra.mxu0 %v4363_v31  ;;  %v9957_v6 = vpack.c.bf16 %v4953_v27, %v4952_v18  ;;  %v4854_v0 = vadd.f32 %v4796_v54, %v3807_v11  ;;  %v4712_v31 = vadd.f32 %v9784_v52, %v9781_v8  ;;  %v9977_v7 = vpop.f32.mrf.mxu1  ;;  %v3812_v11 = vadd.f32 %v9790_v33, %v12369_v16  ;;  %v12370_v33 = vld [vmem:[#allocation37_spill] sm:$0xff] }
 0x447   : > { %v4714_v52 = vadd.f32 %v9802_v21, %v9797_v32 }
 0x448   : > { %5218 = vmatmul.bf16.gmra.mxu1 %v9957_v6  ;;  %5307 = vmatmul.bf16.gmra.mxu2 %v9957_v6  ;;  %v4888_v22 = vmul.f32 %v9772_v5, %v4854_v0  ;;  %v9982_v0 = vpop.f32.mrf.mxu2 }
 0x449   : > { %5396 = vmatmul.bf16.gmra.mxu3 %v9957_v6 }
 0x44a   : > { %v4922_v50 = vadd.f32 %v9777_v19, %v4888_v22 }
 0x44b   : > { %v4797_v46 = vpop.f32.mrf.mxu0 }
 0x44c   : > { %v4798_v45 = vadd.f32 %v4797_v46, %v4709_v47  ;;  %v4954_v18 = vmax.f32 %v4922_v50, 0.0  ;;  %v9987_v46 = vpop.f32.mrf.mxu3 }
 0x44e   : > { %v4855_v48 = vadd.f32 %v4798_v45, %v3809_v14  ;;  %v3814_v14 = vadd.f32 %v9806_v35, %v12370_v33  ;;  %v9996_v22 = vpop.f32.mrf.mxu1  ;;  %v12372_v33 = vld [vmem:[#allocation36_spill] sm:$0xff] }
 0x450   : > { %v4889_v44 = vmul.f32 %v9772_v5, %v4855_v48  ;;  %v9999_v50 = vpop.f32.mrf.mxu2 }
 0x452   : > { %v4923_v60 = vadd.f32 %v9777_v19, %v4889_v44 }
 0x453   : > { %v4800_v53 = vpop.f32.mrf.mxu0 }
 0x454   : > { %v4955_v27 = vmax.f32 %v4923_v60, 0.0  ;;  %v4801_v54 = vadd.f32 %v4800_v53, %v4712_v31  ;;  %v4717_v60 = vadd.f32 %v9815_v4, %v9812_v29  ;;  %v10005_v32 = vpop.f32.mrf.mxu3  ;;  %v4719_v4 = vadd.f32 %v9831_v42, %v9827_v12 }
 0x456   : > { %5455 = vmatmul.bf16.vlgmr.msra.gmra.mxu0 %v9794_v2  ;;  %v9985_v47 = vpack.c.bf16 %v4955_v27, %v4954_v18  ;;  %v4856_v8 = vadd.f32 %v4801_v54, %v3812_v11  ;;  %v12371_v54 = vld [vmem:[#allocation35_spill] sm:$0xff]  ;;  %v10010_v11 = vpop.f32.mrf.mxu1 }
 0x457   : > { %v3817_v16 = vadd.f32 %v9822_v39, %v12371_v54 }
 0x458   : > { %5223 = vmatmul.bf16.gmra.mxu1 %v9985_v47  ;;  %5312 = vmatmul.bf16.gmra.mxu2 %v9985_v47  ;;  %v4890_v2 = vmul.f32 %v9772_v5, %v4856_v8 }
 0x459   : > { %5401 = vmatmul.bf16.gmra.mxu3 %v9985_v47 }
 0x45a   : > { %v4924_v44 = vadd.f32 %v9777_v19, %v4890_v2 }
 0x45b   : > { %v4802_v28 = vpop.f32.mrf.mxu0 }
 0x45c   : > { %v4803_v45 = vadd.f32 %v4802_v28, %v4714_v52  ;;  %v4956_v53 = vmax.f32 %v4924_v44, 0.0  ;;  %v10015_v52 = vpop.f32.mrf.mxu2  ;;  %v10022_v28 = vpop.f32.mrf.mxu3 }
 0x45e   : > { %v4857_v48 = vadd.f32 %v4803_v45, %v3814_v14 }
 0x460   : > { %v4891_v31 = vmul.f32 %v9772_v5, %v4857_v48  ;;  %v10027_v48 = vpop.f32.mrf.mxu1 }
 0x462   : > { %v4925_v21 = vadd.f32 %v9777_v19, %v4891_v31 }
 0x463   : > { %v4805_v35 = vpop.f32.mrf.mxu0 }
 0x464   : > { %v4957_v18 = vmax.f32 %v4925_v21, 0.0  ;;  %v4806_v27 = vadd.f32 %v4805_v35, %v4717_v60  ;;  %v4722_v60 = vadd.f32 %v9846_v41, %v9840_v40  ;;  %v10033_v12 = vpop.f32.mrf.mxu2  ;;  %v10036_v35 = vpop.f32.mrf.mxu3  ;;  %v4724_v40 = vadd.f32 %v9864_v9, %v9857_v61 }
 0x465   : > { %v4727_v61 = vadd.f32 %v9883_v55, %v9879_v15  ;;  %v4729_v55 = vadd.f32 %v9897_v62, %v9893_v56 }
 0x466   : > { %5460 = vmatmul.bf16.gmra.mxu0 %v9820_v20  ;;  %v10013_v8 = vpack.c.bf16 %v4957_v18, %v4956_v53  ;;  %v4858_v29 = vadd.f32 %v4806_v27, %v3817_v16  ;;  %v3819_v20 = vadd.f32 %v9836_v3, %v12372_v33  ;;  %v12373_v27 = vld [vmem:[#allocation38_spill] sm:$0xff] }
 0x467   : > { %v3822_v54 = vadd.f32 %v9853_v34, %v12373_v27 }
 0x468   : > { %5228 = vmatmul.bf16.gmra.mxu1 %v10013_v8  ;;  %5317 = vmatmul.bf16.gmra.mxu2 %v10013_v8  ;;  %v4892_v14 = vmul.f32 %v9772_v5, %v4858_v29  ;;  %v10048_v41 = vpop.f32.mrf.mxu1 }
 0x469   : > { %5406 = vmatmul.bf16.gmra.mxu3 %v10013_v8 }
 0x46a   : > { %v4926_v44 = vadd.f32 %v9777_v19, %v4892_v14 }
 0x46b   : > { %v4807_v39 = vpop.f32.mrf.mxu0 }
 0x46c   : > { %v4808_v2 = vadd.f32 %v4807_v39, %v4719_v4  ;;  %v4958_v3 = vmax.f32 %v4926_v44, 0.0  ;;  %v12374_v39 = vld [vmem:[#allocation24_spill] sm:$0xff]  ;;  %v10052_v33 = vpop.f32.mrf.mxu2  ;;  %v10055_v14 = vpop.f32.mrf.mxu3 }
 0x46d   : > { %v3824_v34 = vadd.f32 %v9870_v24, %v12374_v39 }
 0x46e   : > { %v4859_v45 = vadd.f32 %v4808_v2, %v3819_v20 }
 0x470   : > { %v4893_v31 = vmul.f32 %v9772_v5, %v4859_v45  ;;  %v10061_v9 = vpop.f32.mrf.mxu1 }
 0x472   : > { %v4927_v42 = vadd.f32 %v9777_v19, %v4893_v31 }
 0x473   : > { %v4810_v21 = vpop.f32.mrf.mxu0 }
 0x474   : > { %v4959_v53 = vmax.f32 %v4927_v42, 0.0  ;;  %v4811_v18 = vadd.f32 %v4810_v21, %v4722_v60 }
 0x476   : > { %5465 = vmatmul.bf16.gmra.mxu0 %v9844_v23  ;;  %v10041_v16 = vpack.c.bf16 %v4959_v53, %v4958_v3  ;;  %v4860_v29 = vadd.f32 %v4811_v18, %v3822_v54  ;;  %v12375_v3 = vld [vmem:[#allocation30_spill] sm:$0xff]  ;;  %v10066_v18 = vpop.f32.mrf.mxu2  ;;  %v10071_v54 = vpop.f32.mrf.mxu3 }
 0x477   : > { %v3827_v53 = vadd.f32 %v9886_v10, %v12375_v3  ;;  %v12376_v10 = vld [vmem:[#allocation39_spill] sm:$0xff] }
 0x478   : > { %5233 = vmatmul.bf16.gmra.mxu1 %v10041_v16  ;;  %5322 = vmatmul.bf16.gmra.mxu2 %v10041_v16  ;;  %v4894_v23 = vmul.f32 %v9772_v5, %v4860_v29 }
 0x479   : > { %5411 = vmatmul.bf16.gmra.mxu3 %v10041_v16 }
 0x47a   : > { %v4928_v45 = vadd.f32 %v9777_v19, %v4894_v23 }
 0x47b   : > { %v4812_v4 = vpop.f32.mrf.mxu0 }
 0x47c   : > { %v4813_v20 = vadd.f32 %v4812_v4, %v4724_v40  ;;  %v4960_v60 = vmax.f32 %v4928_v45, 0.0  ;;  %v3829_v40 = vadd.f32 %v9907_v30, %v12376_v10  ;;  %v10080_v4 = vpop.f32.mrf.mxu1  ;;  %v4732_v45 = vadd.f32 %v9914_v58, %v9912_v59 }
 0x47d   : > { %v4734_v59 = vadd.f32 %v9936_v57, %v9929_v43  ;;  %v4737_v43 = vadd.f32 %v9953_v63, %v9949_v1  ;;  %v4739_v1 = vadd.f32 %v9971_v13, %v9968_v36  ;;  %v4742_v36 = vadd.f32 %v9987_v46, %v9982_v0 }
 0x47e   : > { %v4861_v2 = vadd.f32 %v4813_v20, %v3824_v34  ;;  %v10083_v23 = vpop.f32.mrf.mxu2  ;;  %v10089_v56 = vpop.f32.mrf.mxu3  ;;  %v4744_v0 = vadd.f32 %v10005_v32, %v9999_v50 }
 0x480   : > { %v4895_v44 = vmul.f32 %v9772_v5, %v4861_v2 }
 0x482   : > { %v4929_v31 = vadd.f32 %v9777_v19, %v4895_v44 }
 0x483   : > { %v4815_v24 = vpop.f32.mrf.mxu0 }
 0x484   : > { %v4961_v42 = vmax.f32 %v4929_v31, 0.0  ;;  %v4816_v21 = vadd.f32 %v4815_v24, %v4727_v61  ;;  %v12377_v24 = vld [vmem:[#allocation41_spill] sm:$0xff] }
 0x486   : > { %5470 = vmatmul.bf16.gmra.mxu0 %v9872_v17  ;;  %v10069_v27 = vpack.c.bf16 %v4961_v42, %v4960_v60  ;;  %v4862_v15 = vadd.f32 %v4816_v21, %v3827_v53  ;;  %v3832_v60 = vadd.f32 %v9922_v26, %v12377_v24  ;;  %v10094_v42 = vpop.f32.mrf.mxu1  ;;  %v10104_v58 = vpop.f32.mrf.mxu2  ;;  %v12378_v26 = vld [vmem:[#allocation25_spill] sm:$0xff] }
 0x488   : > { %5238 = vmatmul.bf16.gmra.mxu1 %v10069_v27  ;;  %5327 = vmatmul.bf16.gmra.mxu2 %v10069_v27  ;;  %v4896_v17 = vmul.f32 %v9772_v5, %v4862_v15  ;;  %v3834_v15 = vadd.f32 %v9942_v49, %v12378_v26 }
 0x489   : > { %5416 = vmatmul.bf16.gmra.mxu3 %v10069_v27 }
 0x48a   : > { %v4930_v20 = vadd.f32 %v9777_v19, %v4896_v17 }
 0x48b   : > { %v4817_v29 = vpop.f32.mrf.mxu0 }
 0x48c   : > { %v4818_v39 = vadd.f32 %v4817_v29, %v4729_v55  ;;  %v4962_v44 = vmax.f32 %v4930_v20, 0.0  ;;  %v10108_v55 = vpop.f32.mrf.mxu3 }
 0x48e   : > { %v4863_v34 = vadd.f32 %v4818_v39, %v3829_v40  ;;  %v10111_v40 = vpop.f32.mrf.mxu1  ;;  %v10118_v20 = vpop.f32.mrf.mxu2 }
 0x490   : > { %v4897_v2 = vmul.f32 %v9772_v5, %v4863_v34 }
 0x492   : > { %v4931_v62 = vadd.f32 %v9777_v19, %v4897_v2 }
 0x493   : > { %v4820_v30 = vpop.f32.mrf.mxu0 }
 0x494   : > { %v4963_v61 = vmax.f32 %v4931_v62, 0.0  ;;  %v4821_v31 = vadd.f32 %v4820_v30, %v4732_v45  ;;  %v12379_v62 = vld [vmem:[#allocation34_spill] sm:$0xff] }
 0x495   : > { %v3837_v30 = vadd.f32 %v9959_v37, %v12379_v62  ;;  %v12380_v37 = vld [vmem:[#allocation42_spill] sm:$0xff] }
 0x496   : > { %5475 = vmatmul.bf16.gmra.mxu0 %v9900_v38  ;;  %v10097_v21 = vpack.c.bf16 %v4963_v61, %v4962_v44  ;;  %v4864_v3 = vadd.f32 %v4821_v31, %v3832_v60  ;;  %v10122_v44 = vpop.f32.mrf.mxu3  ;;  %v10132_v63 = vpop.f32.mrf.mxu1  ;;  %v3839_v60 = vadd.f32 %v9977_v7, %v12380_v37 }
 0x498   : > { %5243 = vmatmul.bf16.gmra.mxu1 %v10097_v21  ;;  %5332 = vmatmul.bf16.gmra.mxu2 %v10097_v21  ;;  %v4898_v38 = vmul.f32 %v9772_v5, %v4864_v3 }
 0x499   : > { %5421 = vmatmul.bf16.gmra.mxu3 %v10097_v21 }
 0x49a   : > { %v4932_v17 = vadd.f32 %v9777_v19, %v4898_v38 }
 0x49b   : > { %v4822_v53 = vpop.f32.mrf.mxu0 }
 0x49c   : > { %v4823_v29 = vadd.f32 %v4822_v53, %v4734_v59  ;;  %v4964_v49 = vmax.f32 %v4932_v17, 0.0  ;;  %v10137_v59 = vpop.f32.mrf.mxu2 }
 0x49e   : > { %v4865_v10 = vadd.f32 %v4823_v29, %v3834_v15  ;;  %v10139_v26 = vpop.f32.mrf.mxu3 }
 0x4a0   : > { %v4899_v39 = vmul.f32 %v9772_v5, %v4865_v10  ;;  %v10146_v10 = vpop.f32.mrf.mxu1 }
 0x4a2   : > { %v4933_v57 = vadd.f32 %v9777_v19, %v4899_v39 }
 0x4a3   : > { %v4825_v34 = vpop.f32.mrf.mxu0 }
 0x4a4   : > { %v4965_v2 = vmax.f32 %v4933_v57, 0.0  ;;  %v4826_v45 = vadd.f32 %v4825_v34, %v4737_v43  ;;  %v12381_v43 = vld [vmem:[#allocation44_spill] sm:$0xff] }
 0x4a5   : > { %v3842_v57 = vadd.f32 %v9996_v22, %v12381_v43  ;;  %v12382_v22 = vld [vmem:[#allocation26_spill] sm:$0xff] }
 0x4a6   : > { %5480 = vmatmul.bf16.gmra.mxu0 %v9927_v51  ;;  %v10125_v61 = vpack.c.bf16 %v4965_v2, %v4964_v49  ;;  %v4866_v31 = vadd.f32 %v4826_v45, %v3837_v30  ;;  %v10153_v49 = vpop.f32.mrf.mxu2  ;;  %v10160_v46 = vpop.f32.mrf.mxu3 }
 0x4a8   : > { %5248 = vmatmul.bf16.gmra.mxu1 %v10125_v61  ;;  %5337 = vmatmul.bf16.gmra.mxu2 %v10125_v61  ;;  %v4900_v51 = vmul.f32 %v9772_v5, %v4866_v31  ;;  %v10165_v31 = vpop.f32.mrf.mxu1 }
 0x4a9   : > { %5426 = vmatmul.bf16.gmra.mxu3 %v10125_v61 }
 0x4aa   : > { %v4934_v15 = vadd.f32 %v9777_v19, %v4900_v51 }
 0x4ab   : > { %v4827_v24 = vpop.f32.mrf.mxu0 }
 0x4ac   : > { %v4828_v3 = vadd.f32 %v4827_v24, %v4739_v1  ;;  %v4966_v7 = vmax.f32 %v4934_v15, 0.0  ;;  %v4747_v24 = vadd.f32 %v10022_v28, %v10015_v52 }
 0x4ae   : > { %v4867_v53 = vadd.f32 %v4828_v3, %v3839_v60  ;;  %v10171_v50 = vpop.f32.mrf.mxu2  ;;  %v10174_v3 = vpop.f32.mrf.mxu3 }
 0x4b0   : > { %v4901_v38 = vmul.f32 %v9772_v5, %v4867_v53  ;;  %v10181_v28 = vpop.f32.mrf.mxu1 }
 0x4b2   : > { %v4935_v13 = vadd.f32 %v9777_v19, %v4901_v38  ;;  %v12383_v38 = vld [vmem:[#allocation49_spill] sm:$0xff] }
 0x4b3   : > { %v4830_v29 = vpop.f32.mrf.mxu0 }
 0x4b4   : > { %v4967_v17 = vmax.f32 %v4935_v13, 0.0  ;;  %v4831_v39 = vadd.f32 %v4830_v29, %v4742_v36  ;;  %v3847_v36 = vadd.f32 %v10027_v48, %v12383_v38  ;;  %v4749_v29 = vadd.f32 %v10036_v35, %v10033_v12 }
 0x4b5   : > { %v3849_v48 = vadd.f32 %v10048_v41, %v9760_v25 }
 0x4b6   : > { %5485 = vmatmul.bf16.gmra.mxu0 %v9957_v6  ;;  %v10151_v34 = vpack.c.bf16 %v4967_v17, %v4966_v7  ;;  %v4868_v2 = vadd.f32 %v4831_v39, %v3842_v57  ;;  %v3844_v6 = vadd.f32 %v10010_v11, %v12382_v22  ;;  %v10190_v17 = vpop.f32.mrf.mxu2  ;;  %v10193_v43 = vpop.f32.mrf.mxu3 }
 0x4b8   : > { %5253 = vmatmul.bf16.gmra.mxu1 %v10151_v34  ;;  %5342 = vmatmul.bf16.gmra.mxu2 %v10151_v34  ;;  %v4902_v62 = vmul.f32 %v9772_v5, %v4868_v2 }
 0x4b9   : > { %5431 = vmatmul.bf16.gmra.mxu3 %v10151_v34 }
 0x4ba   : > { %v4936_v37 = vadd.f32 %v9777_v19, %v4902_v62 }
 0x4bb   : > { %v4832_v45 = vpop.f32.mrf.mxu0 }
 0x4bc   : > { %v4833_v30 = vadd.f32 %v4832_v45, %v4744_v0  ;;  %v4968_v11 = vmax.f32 %v4936_v37, 0.0  ;;  %v10197_v45 = vpop.f32.mrf.mxu1 }
 0x4be   : > { %v4869_v1 = vadd.f32 %v4833_v30, %v3844_v6  ;;  %v10202_v41 = vpop.f32.mrf.mxu2  ;;  %v10205_v62 = vpop.f32.mrf.mxu3 }
 0x4c0   : > { %v4903_v60 = vmul.f32 %v9772_v5, %v4869_v1 }
 0x4c2   : > { %v4937_v32 = vadd.f32 %v9777_v19, %v4903_v60 }
 0x4c3   : > { %v4835_v51 = vpop.f32.mrf.mxu0 }
 0x4c4   : > { %v4969_v53 = vmax.f32 %v4937_v32, 0.0  ;;  %v4836_v15 = vadd.f32 %v4835_v51, %v4747_v24 }
 0x4c6   : > { %5490 = vmatmul.bf16.gmra.mxu0 %v9985_v47  ;;  %v10179_v52 = vpack.c.bf16 %v4969_v53, %v4968_v11  ;;  %v4870_v13 = vadd.f32 %v4836_v15, %v3847_v36  ;;  %v10211_v1 = vpop.f32.mrf.mxu2 }
 0x4c8   : > { %5258 = vmatmul.bf16.gmra.mxu1 %v10179_v52  ;;  %5347 = vmatmul.bf16.gmra.mxu2 %v10179_v52  ;;  %v4904_v47 = vmul.f32 %v9772_v5, %v4870_v13 }
 0x4c9   : > { %5436 = vmatmul.bf16.gmra.mxu3 %v10179_v52 }
 0x4ca   : > { %v4938_v2 = vadd.f32 %v9777_v19, %v4904_v47 }
 0x4cb   : > { %v4837_v7 = vpop.f32.mrf.mxu0 }
 0x4cc   : > { %v4838_v39 = vadd.f32 %v4837_v7, %v4749_v29  ;;  %v4970_v22 = vmax.f32 %v4938_v2, 0.0 }
 0x4ce   : > { %v4871_v57 = vadd.f32 %v4838_v39, %v3849_v48 }
 0x4d0   : > { %v4905_v0 = vmul.f32 %v9772_v5, %v4871_v57  ;;  %v10209_v5 = vpop.f32.mrf.mxu1 }
 0x4d2   : > { %v4939_v12 = vadd.f32 %v9777_v19, %v4905_v0  ;;  %v10213_v19 = vpop.f32.mrf.mxu3 }
 0x4d3   : > { %v10200_v35 = vpop.f32.mrf.mxu0 }
 0x4d4   : > { %v4971_v25 = vmax.f32 %v4939_v12, 0.0 }
 0x4d6   : > { %5495 = vmatmul.bf16.gmra.mxu0 %v10013_v8  ;;  %v4987_v6 = vpack.c.bf16 %v4971_v25, %v4970_v22  ;;  %v10220_v8 = vpop.f32.mrf.mxu2 }
 0x4d8   : > { %5263 = vmatmul.bf16.gmra.mxu1 %v4987_v6  ;;  %5352 = vmatmul.bf16.gmra.mxu2 %v4987_v6  ;;  %v10217_v37 = vpop.f32.mrf.mxu1 }
 0x4d9   : > { %5441 = vmatmul.bf16.gmra.mxu3 %v4987_v6 }
 0x4da   : > { %v10224_v32 = vpop.f32.mrf.mxu3 }
 0x4db   : > { %v10207_v30 = vpop.f32.mrf.mxu0 }
 0x4de   : > { %v10230_v53 = vpop.f32.mrf.mxu2 }
 0x4e0   : > { %v10226_v51 = vpop.f32.mrf.mxu1 }
 0x4e2   : > { %v10232_v15 = vpop.f32.mrf.mxu3 }
 0x4e3   : > { %v10215_v24 = vpop.f32.mrf.mxu0 }
 0x4e4   : > { %12384 = vst [vmem:[#allocation40_spill] sm:$0xff] %v10215_v24 }
 0x4e6   : > { %5500 = vmatmul.bf16.gmra.mxu0 %v10041_v16  ;;  %v10239_v16 = vpop.f32.mrf.mxu2 }
 0x4e8   : > { %v10235_v38 = vpop.f32.mrf.mxu1 }
 0x4ea   : > { %v10241_v13 = vpop.f32.mrf.mxu3 }
 0x4eb   : > { %v10222_v60 = vpop.f32.mrf.mxu0 }
 0x4ec   : > { %12385 = vst [vmem:[#allocation46_spill] sm:$0xff] %v10222_v60 }
 0x4ee   : > { %v10248_v48 = vpop.f32.mrf.mxu2 }
 0x4f0   : > { %v10245_v7 = vpop.f32.mrf.mxu1 }
 0x4f2   : > { %v10250_v47 = vpop.f32.mrf.mxu3 }
 0x4f3   : > { %v10228_v11 = vpop.f32.mrf.mxu0 }
 0x4f4   : > { %12386 = vst [vmem:[#allocation27_spill] sm:$0xff] %v10228_v11 }
 0x4f6   : > { %5505 = vmatmul.bf16.gmra.mxu0 %v10069_v27  ;;  %v10256_v57 = vpop.f32.mrf.mxu2 }
 0x4f7   : > { %12390 = vst [vmem:[#allocation47_spill] sm:$0xff] %v10256_v57 }
 0x4f8   : > { %v10254_v27 = vpop.f32.mrf.mxu1 }
 0x4fa   : > { %v10260_v0 = vpop.f32.mrf.mxu3 }
 0x4fb   : > { %v10237_v36 = vpop.f32.mrf.mxu0  ;;  %12392 = vst [vmem:[#allocation45_spill] sm:$0xff] %v10260_v0 }
 0x4fc   : > { %12387 = vst [vmem:[#allocation32_spill] sm:$0xff] %v10237_v36 }
 0x500   : > { %v10263_v12 = vpop.f32.mrf.mxu1 }
 0x502   : > { %v10269_v25 = vpop.f32.mrf.mxu3 }
 0x503   : > { %v10243_v29 = vpop.f32.mrf.mxu0  ;;  %12395 = vst [vmem:[#allocation48_spill] sm:$0xff] %v10269_v25 }
 0x504   : > { %12388 = vst [vmem:[#allocation43_spill] sm:$0xff] %v10243_v29 }
 0x506   : > { %5510 = vmatmul.bf16.gmra.mxu0 %v10097_v21  ;;  %v10267_v21 = vpop.f32.mrf.mxu2 }
 0x507   : > { %12394 = vst [vmem:[#allocation28_spill] sm:$0xff] %v10267_v21 }
 0x508   : > { %v10271_v29 = vpop.f32.mrf.mxu1 }
 0x509   : > { %12396 = vst [vmem:[#allocation29_spill] sm:$0xff] %v10271_v29 }
 0x50b   : > { %v10252_v39 = vpop.f32.mrf.mxu0 }
 0x50c   : > { %12389 = vst [vmem:[#allocation33_spill] sm:$0xff] %v10252_v39 }
 0x50e   : > { %v10275_v36 = vpop.f32.mrf.mxu2 }
 0x50f   : > { %12398 = vst [vmem:[#allocation35_spill] sm:$0xff] %v10275_v36 }
 0x513   : > { %v10258_v2 = vpop.f32.mrf.mxu0 }
 0x514   : > { %12391 = vst [vmem:[#allocation31_spill] sm:$0xff] %v10258_v2  ;;  %v10278_v2 = vpop.f32.mrf.mxu3 }
 0x515   : > { %12399 = vst [vmem:[#allocation36_spill] sm:$0xff] %v10278_v2 }
 0x516   : > { %5515 = vmatmul.bf16.gmra.mxu0 %v10125_v61  ;;  %v10282_v61 = vpop.f32.mrf.mxu1  ;;  %v10284_v60 = vpop.f32.mrf.mxu2 }
 0x517   : > { %12401 = vst [vmem:[#allocation24_spill] sm:$0xff] %v10282_v61 }
 0x518   : > { %12402 = vst [vmem:[#allocation30_spill] sm:$0xff] %v10284_v60 }
 0x51b   : > { %v10265_v22 = vpop.f32.mrf.mxu0 }
 0x51c   : > { %12393 = vst [vmem:[#allocation50_spill] sm:$0xff] %v10265_v22  ;;  %v10286_v22 = vpop.f32.mrf.mxu3 }
 0x51d   : > { %12403 = vst [vmem:[#allocation39_spill] sm:$0xff] %v10286_v22 }
 0x51e   : > { %v10290_v25 = vpop.f32.mrf.mxu1 }
 0x51f   : > { %12405 = vst [vmem:[#allocation25_spill] sm:$0xff] %v10290_v25 }
 0x523   : > { %v10273_v39 = vpop.f32.mrf.mxu0 }
 0x524   : > { %12397 = vst [vmem:[#allocation37_spill] sm:$0xff] %v10273_v39  ;;  %v10293_v39 = vpop.f32.mrf.mxu2 }
 0x525   : > { %12406 = vst [vmem:[#allocation34_spill] sm:$0xff] %v10293_v39 }
 0x526   : > { %5520 = vmatmul.bf16.gmra.mxu0 %v10151_v34  ;;  %v10297_v34 = vpop.f32.mrf.mxu3  ;;  %v10299_v2 = vpop.f32.mrf.mxu1 }
 0x527   : > { %12408 = vst [vmem:[#allocation44_spill] sm:$0xff] %v10297_v34 }
 0x528   : > { %12409 = vst [vmem:[#allocation26_spill] sm:$0xff] %v10299_v2 }
 0x52b   : > { %v10280_v11 = vpop.f32.mrf.mxu0 }
 0x52c   : > { %12400 = vst [vmem:[#allocation38_spill] sm:$0xff] %v10280_v11  ;;  %v10303_v61 = vpop.f32.mrf.mxu2 }
 0x52d   : > { %12411 = vst [vmem:[#allocation51_spill] sm:$0xff] %v10303_v61 }
 0x52e   : > { %v10305_v60 = vpop.f32.mrf.mxu3 }
 0x52f   : > { %12412 = vst [vmem:[#allocation52_spill] sm:$0xff] %v10305_v60  ;;  %v10325_v60 = vld [vmem:[#allocation14] ss:$2 sm:$0xf] }
 0x533   : > { %v10288_v21 = vpop.f32.mrf.mxu0 }
 0x534   : > { %12404 = vst [vmem:[#allocation41_spill] sm:$0xff] %v10288_v21  ;;  %v10307_v21 = vpop.f32.mrf.mxu1 }
 0x535   : > { %12413 = vst [vmem:[#allocation53_spill] sm:$0xff] %v10307_v21 }
 0x536   : > { %5525 = vmatmul.bf16.gmra.mxu0 %v10179_v52  ;;  %v10311_v52 = vpop.f32.mrf.mxu2  ;;  %v10313_v39 = vpop.f32.mrf.mxu3 }
 0x537   : > { %12415 = vst [vmem:[#allocation55_spill] sm:$0xff] %v10311_v52  ;;  %v10332_v52 = vld [vmem:[#allocation14 + $0x1] ss:$2 sm:$0xf] }
 0x538   : > { %12416 = vst [vmem:[#allocation56_spill] sm:$0xff] %v10313_v39  ;;  %v10335_v39 = vperm.slane %v10325_v60, 1  ;;  %v10353_v25 = vperm.slane %v10332_v52, 0  ;;  %v10356_v29 = vperm.slane %v10332_v52, 1 }
 0x53a   : > { %v5559_v24 = vmul.f32 %v10335_v39, %v10104_v58 }
 0x53b   : > { %v10295_v36 = vpop.f32.mrf.mxu0 }
 0x53c   : > { %12407 = vst [vmem:[#allocation42_spill] sm:$0xff] %v10295_v36  ;;  %v10317_v34 = vpop.f32.mrf.mxu1 }
 0x53d   : > { %12418 = vst [vmem:[#allocation58_spill] sm:$0xff] %v10317_v34 }
 0x53e   : > { %v10319_v2 = vpop.f32.mrf.mxu2 }
 0x53f   : > { %12419 = vst [vmem:[#allocation59_spill] sm:$0xff] %v10319_v2 }
 0x543   : > { %v10301_v11 = vpop.f32.mrf.mxu0 }
 0x544   : > { %12410 = vst [vmem:[#allocation49_spill] sm:$0xff] %v10301_v11  ;;  %v10321_v11 = vpop.f32.mrf.mxu3 }
 0x545   : > { %12420 = vst [vmem:[#allocation60_spill] sm:$0xff] %v10321_v11 }
 0x546   : > { %5530 = vmatmul.bf16.gmra.mxu0 %v4987_v6  ;;  %v10327_v6 = vpop.f32.mrf.mxu1  ;;  %v10342_v2 = vpop.f32.mrf.mxu2 }
 0x547   : > { %12422 = vst [vmem:[#allocation62_spill] sm:$0xff] %v10327_v6 }
 0x548   : > { %12423 = vst [vmem:[#allocation63_spill] sm:$0xff] %v10342_v2 }
 0x54b   : > { %v10309_v22 = vpop.f32.mrf.mxu0 }
 0x54c   : > { %12414 = vst [vmem:[#allocation54_spill] sm:$0xff] %v10309_v22  ;;  %v10330_v22 = vperm.slane %v10325_v60, 0  ;;  %v10360_v2 = vpop.f32.mrf.mxu3 }
 0x54d   : > { %12425 = vst [vmem:[#allocation65_spill] sm:$0xff] %v10360_v2 }
 0x54e   : > { %v5550_v11 = vmul.f32 %v10330_v22, %v10080_v4  ;;  %v5546_v21 = vmul.f32 %v10330_v22, %v10061_v9  ;;  %v5554_v4 = vmul.f32 %v10330_v22, %v10094_v42  ;;  %v5555_v9 = vmul.f32 %v10335_v39, %v10083_v23 }
 0x54f   : > { %v5558_v2 = vmul.f32 %v10330_v22, %v10111_v40  ;;  %v5562_v40 = vmul.f32 %v10330_v22, %v10132_v63 }
 0x550   : > { %v10372_v0 = vadd.f32 %v10353_v25, %v5550_v11  ;;  %v10387_v23 = vadd.f32 %v10353_v25, %v5546_v21  ;;  %v10390_v11 = vadd.f32 %v10353_v25, %v5554_v4  ;;  %v10405_v58 = vadd.f32 %v10356_v29, %v5555_v9 }
 0x551   : > { %v5563_v21 = vmul.f32 %v10335_v39, %v10118_v20  ;;  %v10415_v63 = vadd.f32 %v10353_v25, %v5558_v2  ;;  %v10424_v20 = vadd.f32 %v10356_v29, %v5559_v24 }
 0x552   : > { %12426 = vst [vmem:[#allocation66_spill] sm:$0xff] %v10372_v0 }
 0x553   : > { %v10315_v36 = vpop.f32.mrf.mxu0  ;;  %12429 = vst [vmem:[#allocation69_spill] sm:$0xff] %v10387_v23 }
 0x554   : > { %12417 = vst [vmem:[#allocation57_spill] sm:$0xff] %v10315_v36  ;;  %v10338_v36 = vperm.slane %v10325_v60, 2 }
 0x555   : > { %12432 = vst [vmem:[#allocation72_spill] sm:$0xff] %v10405_v58 }
 0x556   : > { %v5552_v6 = vmul.f32 %v10338_v36, %v10071_v54  ;;  %v5548_v54 = vmul.f32 %v10338_v36, %v10055_v14  ;;  %v5556_v42 = vmul.f32 %v10338_v36, %v10089_v56  ;;  %v5560_v56 = vmul.f32 %v10338_v36, %v10108_v55  ;;  %12434 = vst [vmem:[#allocation74_spill] sm:$0xff] %v10424_v20 }
 0x557   : > { %v5813_v55 = vadd.f32 %v10372_v0, %v10387_v23  ;;  %v5566_v0 = vmul.f32 %v10330_v22, %v10146_v10  ;;  %v5568_v10 = vmul.f32 %v10338_v36, %v10139_v26  ;;  %v5572_v26 = vmul.f32 %v10338_v36, %v10160_v46 }
 0x559   : > { %v5814_v2 = vadd.f32 %v5813_v55, %v10390_v11 }
 0x55b   : > { %v10323_v61 = vpop.f32.mrf.mxu0 }
 0x55c   : > { %12421 = vst [vmem:[#allocation61_spill] sm:$0xff] %v10323_v61  ;;  %v5551_v61 = vmul.f32 %v10335_v39, %v10066_v18  ;;  %v5547_v18 = vmul.f32 %v10335_v39, %v10052_v33 }
 0x55e   : > { %v10379_v33 = vadd.f32 %v10356_v29, %v5551_v61  ;;  %v10396_v61 = vpop.f32.mrf.mxu1 }
 0x560   : > { %12427 = vst [vmem:[#allocation67_spill] sm:$0xff] %v10379_v33 }
 0x563   : > { %v10348_v34 = vpop.f32.mrf.mxu0 }
 0x564   : > { %12424 = vst [vmem:[#allocation64_spill] sm:$0xff] %v10348_v34  ;;  %v10367_v34 = vperm.slane %v10332_v52, 2 }
 0x566   : > { %v10382_v14 = vadd.f32 %v10367_v34, %v5552_v6  ;;  %v10399_v6 = vadd.f32 %v10356_v29, %v5547_v18  ;;  %v10402_v57 = vadd.f32 %v10367_v34, %v5548_v54  ;;  %v10412_v4 = vadd.f32 %v10367_v34, %v5556_v42 }
 0x567   : > { %v5564_v18 = vmul.f32 %v10338_v36, %v10122_v44  ;;  %v10432_v23 = vadd.f32 %v10367_v34, %v5560_v56  ;;  %v10435_v44 = vadd.f32 %v10353_v25, %v5562_v40  ;;  %v5570_v56 = vmul.f32 %v10330_v22, %v10165_v31 }
 0x568   : > { %12428 = vst [vmem:[#allocation68_spill] sm:$0xff] %v10382_v14  ;;  %v5850_v54 = vadd.f32 %v10379_v33, %v10399_v6  ;;  %v5887_v9 = vadd.f32 %v10382_v14, %v10402_v57  ;;  %v5567_v33 = vmul.f32 %v10335_v39, %v10137_v59  ;;  %v10439_v14 = vpop.f32.mrf.mxu2  ;;  %v5815_v40 = vadd.f32 %v5814_v2, %v10415_v63 }
 0x569   : > { %12430 = vst [vmem:[#allocation70_spill] sm:$0xff] %v10399_v6  ;;  %v10452_v6 = vadd.f32 %v10367_v34, %v5564_v18  ;;  %v5571_v59 = vmul.f32 %v10335_v39, %v10153_v49  ;;  %v5574_v31 = vmul.f32 %v10330_v22, %v10181_v28  ;;  %v5575_v49 = vmul.f32 %v10335_v39, %v10171_v50 }
 0x56a   : > { %12431 = vst [vmem:[#allocation71_spill] sm:$0xff] %v10402_v57  ;;  %v5851_v24 = vadd.f32 %v5850_v54, %v10405_v58  ;;  %v10443_v57 = vadd.f32 %v10356_v29, %v5563_v21  ;;  %v5888_v55 = vadd.f32 %v5887_v9, %v10412_v4  ;;  %v10456_v54 = vpop.f32.mrf.mxu3  ;;  %v10460_v58 = vadd.f32 %v10353_v25, %v5566_v0 }
 0x56b   : > { %12433 = vst [vmem:[#allocation73_spill] sm:$0xff] %v10412_v4  ;;  %v10428_v42 = vpop.f32.mrf.mxu0  ;;  %v5816_v18 = vadd.f32 %v5815_v40, %v10435_v44  ;;  %v10469_v2 = vadd.f32 %v10356_v29, %v5567_v33  ;;  %v10475_v0 = vadd.f32 %v10367_v34, %v5568_v10  ;;  %v10478_v46 = vadd.f32 %v10353_v25, %v5570_v56 }
 0x56c   : > { %12435 = vst [vmem:[#allocation75_spill] sm:$0xff] %v10432_v23  ;;  %v5852_v21 = vadd.f32 %v5851_v24, %v10424_v20  ;;  %v5889_v9 = vadd.f32 %v5888_v55, %v10432_v23  ;;  %v5576_v28 = vmul.f32 %v10338_v36, %v10174_v3  ;;  %v10484_v40 = vadd.f32 %v10356_v29, %v5571_v59  ;;  %v12481_v23 = vld [vmem:[#allocation27_spill] sm:$0xff] }
 0x56d   : > { %12436 = vst [vmem:[#allocation76_spill] sm:$0xff] %v10443_v57  ;;  %v5578_v33 = vmul.f32 %v10330_v22, %v10197_v45  ;;  %v5579_v50 = vmul.f32 %v10335_v39, %v10190_v17  ;;  %v5817_v10 = vadd.f32 %v5816_v18, %v10460_v58  ;;  %v10494_v56 = vadd.f32 %v10367_v34, %v5572_v26 }
 0x56e   : > { %12437 = vst [vmem:[#allocation77_spill] sm:$0xff] %v10452_v6  ;;  %v5853_v24 = vadd.f32 %v5852_v21, %v10443_v57  ;;  %v5890_v55 = vadd.f32 %v5889_v9, %v10452_v6  ;;  %v10490_v21 = vpop.f32.mrf.mxu1  ;;  %v10497_v3 = vadd.f32 %v10353_v25, %v5574_v31  ;;  %v5580_v59 = vmul.f32 %v10338_v36, %v10193_v43 }
 0x56f   : > { %12438 = vst [vmem:[#allocation78_spill] sm:$0xff] %v10469_v2  ;;  %v10505_v6 = vadd.f32 %v10356_v29, %v5575_v49  ;;  %v5582_v17 = vmul.f32 %v10330_v22, %v10209_v5  ;;  %v5583_v26 = vmul.f32 %v10335_v39, %v10202_v41  ;;  %v5818_v31 = vadd.f32 %v5817_v10, %v10478_v46 }
 0x570   : > { %12439 = vst [vmem:[#allocation79_spill] sm:$0xff] %v10475_v0  ;;  %v5854_v45 = vadd.f32 %v5853_v24, %v10469_v2  ;;  %v5891_v18 = vadd.f32 %v5890_v55, %v10475_v0  ;;  %v10514_v57 = vadd.f32 %v10367_v34, %v5576_v28  ;;  %v5584_v43 = vmul.f32 %v10338_v36, %v10205_v62  ;;  %v10525_v2 = vpop.f32.mrf.mxu2 }
 0x571   : > { %12440 = vst [vmem:[#allocation80_spill] sm:$0xff] %v10484_v40  ;;  %v10520_v49 = vadd.f32 %v10353_v25, %v5578_v33  ;;  %v10523_v5 = vadd.f32 %v10356_v29, %v5579_v50  ;;  %v5819_v55 = vadd.f32 %v5818_v31, %v10497_v3  ;;  %v10530_v28 = vadd.f32 %v10367_v34, %v5580_v59 }
 0x572   : > { %12441 = vst [vmem:[#allocation81_spill] sm:$0xff] %v10494_v56  ;;  %v5855_v24 = vadd.f32 %v5854_v45, %v10484_v40  ;;  %v5892_v41 = vadd.f32 %v5891_v18, %v10494_v56  ;;  %v5586_v62 = vmul.f32 %v10330_v22, %v10217_v37  ;;  %v10536_v33 = vadd.f32 %v10353_v25, %v5582_v17  ;;  %v10543_v18 = vpop.f32.mrf.mxu3  ;;  %v12478_v56 = vld [vmem:[#allocation35_spill] sm:$0xff] }
 0x573   : > { %v10501_v9 = vpop.f32.mrf.mxu0  ;;  %12442 = vst [vmem:[#allocation82_spill] sm:$0xff] %v10505_v6  ;;  %v10539_v50 = vadd.f32 %v10356_v29, %v5583_v26  ;;  %v5587_v45 = vmul.f32 %v10335_v39, %v10211_v1  ;;  %v10547_v59 = vadd.f32 %v10367_v34, %v5584_v43  ;;  %v5588_v37 = vmul.f32 %v10338_v36, %v10213_v19 }
 0x574   : > { %12443 = vst [vmem:[#allocation83_spill] sm:$0xff] %v10514_v57  ;;  %v5856_v10 = vadd.f32 %v5855_v24, %v10505_v6  ;;  %v5893_v31 = vadd.f32 %v5892_v41, %v10514_v57  ;;  %v5590_v17 = vmul.f32 %v10330_v22, %v10226_v51  ;;  %v5820_v24 = vadd.f32 %v5819_v55, %v10520_v49 }
 0x575   : > { %12444 = vst [vmem:[#allocation84_spill] sm:$0xff] %v10523_v5  ;;  %v5591_v1 = vmul.f32 %v10335_v39, %v10220_v8  ;;  %v10559_v41 = vadd.f32 %v10353_v25, %v5586_v62  ;;  %v5592_v43 = vmul.f32 %v10338_v36, %v10224_v32  ;;  %v10568_v55 = vadd.f32 %v10356_v29, %v5587_v45 }
 0x576   : > { %12445 = vst [vmem:[#allocation85_spill] sm:$0xff] %v10530_v28  ;;  %v5857_v26 = vadd.f32 %v5856_v10, %v10523_v5  ;;  %v5894_v6 = vadd.f32 %v5893_v31, %v10530_v28  ;;  %v5821_v19 = vadd.f32 %v5820_v24, %v10536_v33  ;;  %v5594_v8 = vmul.f32 %v10330_v22, %v10235_v38  ;;  %v10572_v10 = vpop.f32.mrf.mxu1 }
 0x577   : > { %12446 = vst [vmem:[#allocation86_spill] sm:$0xff] %v10539_v50  ;;  %v10576_v31 = vadd.f32 %v10367_v34, %v5588_v37  ;;  %v10579_v32 = vadd.f32 %v10353_v25, %v5590_v17  ;;  %v5595_v24 = vmul.f32 %v10335_v39, %v10230_v53  ;;  %v5596_v45 = vmul.f32 %v10338_v36, %v10232_v15 }
 0x578   : > { %12447 = vst [vmem:[#allocation87_spill] sm:$0xff] %v10547_v59  ;;  %v5858_v51 = vadd.f32 %v5857_v26, %v10539_v50  ;;  %v5895_v62 = vadd.f32 %v5894_v6, %v10547_v59  ;;  %v10584_v26 = vadd.f32 %v10356_v29, %v5591_v1  ;;  %v5598_v38 = vmul.f32 %v10330_v22, %v10245_v7 }
 0x579   : > { %12448 = vst [vmem:[#allocation88_spill] sm:$0xff] %v10559_v41  ;;  %v10591_v6 = vperm.slane %v10325_v60, 3  ;;  %v5822_v37 = vadd.f32 %v5821_v19, %v10559_v41  ;;  %v10595_v17 = vadd.f32 %v10367_v34, %v5592_v43  ;;  %v5599_v53 = vmul.f32 %v10335_v39, %v10239_v16  ;;  %v10610_v19 = vpop.f32.mrf.mxu2 }
 0x57a   : > { %12449 = vst [vmem:[#allocation89_spill] sm:$0xff] %v10568_v55  ;;  %v10600_v1 = vperm.slane %v10332_v52, 3  ;;  %v5859_v59 = vadd.f32 %v5858_v51, %v10568_v55  ;;  %v10604_v15 = vadd.f32 %v10353_v25, %v5594_v8  ;;  %v5600_v60 = vmul.f32 %v10338_v36, %v10241_v13 }
 0x57b   : > { %v10563_v57 = vpop.f32.mrf.mxu0  ;;  %12450 = vst [vmem:[#allocation90_spill] sm:$0xff] %v10576_v31  ;;  %v5602_v7 = vmul.f32 %v10330_v22, %v10254_v27  ;;  %v5896_v43 = vadd.f32 %v5895_v62, %v10576_v31  ;;  %v5823_v16 = vadd.f32 %v5822_v37, %v10579_v32  ;;  %v10615_v52 = vadd.f32 %v10356_v29, %v5595_v24  ;;  %v10628_v62 = vpop.f32.mrf.mxu3  ;;  %v12463_v31 = vld [vmem:[#allocation40_spill] sm:$0xff] }
 0x57c   : > { %12451 = vst [vmem:[#allocation91_spill] sm:$0xff] %v10579_v32  ;;  %v5603_v51 = vmul.f32 %v10335_v39, %v10248_v48  ;;  %v5860_v8 = vadd.f32 %v5859_v59, %v10584_v26  ;;  %v10621_v55 = vadd.f32 %v10367_v34, %v5596_v45  ;;  %v10624_v13 = vadd.f32 %v10353_v25, %v5598_v38  ;;  %v12519_v32 = vld [vmem:[#allocation50_spill] sm:$0xff] }
 0x57d   : > { %12452 = vst [vmem:[#allocation92_spill] sm:$0xff] %v10584_v26  ;;  %v5553_v27 = vmul.f32 %v10591_v6, %v10207_v30  ;;  %v5897_v37 = vadd.f32 %v5896_v43, %v10595_v17  ;;  %v10632_v24 = vadd.f32 %v10356_v29, %v5599_v53  ;;  %v5604_v48 = vmul.f32 %v10338_v36, %v10250_v47 }
 0x57e   : > { %12453 = vst [vmem:[#allocation93_spill] sm:$0xff] %v10595_v17  ;;  %v5606_v59 = vmul.f32 %v10330_v22, %v10263_v12  ;;  %v5824_v38 = vadd.f32 %v5823_v16, %v10604_v15  ;;  %v10642_v26 = vadd.f32 %v10367_v34, %v5600_v60  ;;  %v5549_v30 = vmul.f32 %v10591_v6, %v10200_v35  ;;  %v12462_v17 = vld [vmem:[#allocation47_spill] sm:$0xff] }
 0x57f   : > { %12454 = vst [vmem:[#allocation94_spill] sm:$0xff] %v10604_v15  ;;  %v10647_v43 = vadd.f32 %v10353_v25, %v5602_v7  ;;  %v5861_v53 = vadd.f32 %v5860_v8, %v10615_v52  ;;  %v10651_v47 = vadd.f32 %v10356_v29, %v5603_v51  ;;  %v5607_v12 = vmul.f32 %v10335_v39, %v12462_v17  ;;  %v12465_v7 = vld [vmem:[#allocation45_spill] sm:$0xff]  ;;  %v10664_v8 = vpop.f32.mrf.mxu1  ;;  %v12514_v15 = vld [vmem:[#allocation62_spill] sm:$0xff] }
 0x580   : > { %12455 = vst [vmem:[#allocation95_spill] sm:$0xff] %v10615_v52  ;;  %v5557_v16 = vmul.f32 %v10591_v6, %v12463_v31  ;;  %v5898_v60 = vadd.f32 %v5897_v37, %v10621_v55  ;;  %v5825_v50 = vadd.f32 %v5824_v38, %v10624_v13  ;;  %v10660_v35 = vadd.f32 %v10600_v1, %v5553_v27  ;;  %v12468_v31 = vld [vmem:[#allocation29_spill] sm:$0xff] }
 0x581   : > { %12456 = vst [vmem:[#allocation96_spill] sm:$0xff] %v10621_v55  ;;  %v5608_v28 = vmul.f32 %v10338_v36, %v12465_v7  ;;  %v5862_v51 = vadd.f32 %v5861_v53, %v10632_v24  ;;  %v10668_v52 = vadd.f32 %v10367_v34, %v5604_v48  ;;  %v10671_v17 = vadd.f32 %v10353_v25, %v5606_v59  ;;  %v12470_v55 = vld [vmem:[#allocation28_spill] sm:$0xff] }
 0x582   : > { %12457 = vst [vmem:[#allocation97_spill] sm:$0xff] %v10624_v13  ;;  %v5610_v37 = vmul.f32 %v10330_v22, %v12468_v31  ;;  %v5899_v38 = vadd.f32 %v5898_v60, %v10642_v26  ;;  %v10677_v27 = vadd.f32 %v10600_v1, %v5549_v30  ;;  %v5826_v7 = vadd.f32 %v5825_v50, %v10647_v43  ;;  %v12475_v50 = vld [vmem:[#allocation48_spill] sm:$0xff]  ;;  %v12513_v13 = vld [vmem:[#allocation31_spill] sm:$0xff] }
 0x583   : > { %12458 = vst [vmem:[#allocation98_spill] sm:$0xff] %v10632_v24  ;;  %v10638_v45 = vpop.f32.mrf.mxu0  ;;  %v5611_v5 = vmul.f32 %v10335_v39, %v12470_v55  ;;  %v5863_v53 = vadd.f32 %v5862_v51, %v10651_v47  ;;  %v10684_v48 = vadd.f32 %v10356_v29, %v5607_v12  ;;  %v10687_v59 = vadd.f32 %v10600_v1, %v5557_v16  ;;  %v12473_v24 = vld [vmem:[#allocation46_spill] sm:$0xff]  ;;  %v10700_v12 = vpop.f32.mrf.mxu2 }
 0x584   : > { %12459 = vst [vmem:[#allocation99_spill] sm:$0xff] %v10642_v26  ;;  %v5561_v31 = vmul.f32 %v10591_v6, %v12473_v24  ;;  %v5924_v30 = vadd.f32 %v10660_v35, %v10677_v27  ;;  %v10694_v60 = vadd.f32 %v10367_v34, %v5608_v28  ;;  %v5612_v55 = vmul.f32 %v10338_v36, %v12475_v50  ;;  %v12476_v26 = vld [vmem:[#allocation24_spill] sm:$0xff] }
 0x585   : > { %12460 = vst [vmem:[#allocation100_spill] sm:$0xff] %v10647_v43  ;;  %v5614_v51 = vmul.f32 %v10330_v22, %v12476_v26  ;;  %v5900_v16 = vadd.f32 %v5899_v38, %v10668_v52  ;;  %v10705_v24 = vadd.f32 %v10353_v25, %v5610_v37  ;;  %v5615_v40 = vmul.f32 %v10335_v39, %v12478_v56  ;;  %v12480_v50 = vld [vmem:[#allocation36_spill] sm:$0xff]  ;;  %v12482_v38 = vld [vmem:[#allocation25_spill] sm:$0xff] }
 0x586   : > { %12461 = vst [vmem:[#allocation101_spill] sm:$0xff] %v10651_v47  ;;  %v5827_v47 = vadd.f32 %v5826_v7, %v10671_v17  ;;  %v10712_v0 = vadd.f32 %v10356_v29, %v5611_v5  ;;  %v5616_v26 = vmul.f32 %v10338_v36, %v12480_v50  ;;  %v5565_v20 = vmul.f32 %v10591_v6, %v12481_v23  ;;  %v12484_v5 = vld [vmem:[#allocation30_spill] sm:$0xff] }
 0x587   : > { %12464 = vst [vmem:[#allocation47_spill] sm:$0xff] %v10660_v35  ;;  %v5618_v7 = vmul.f32 %v10330_v22, %v12482_v38  ;;  %v5864_v37 = vadd.f32 %v5863_v53, %v10684_v48  ;;  %v5925_v56 = vadd.f32 %v5924_v30, %v10687_v59  ;;  %v10725_v4 = vadd.f32 %v10600_v1, %v5561_v31  ;;  %v12487_v38 = vld [vmem:[#allocation32_spill] sm:$0xff]  ;;  %v12489_v31 = vld [vmem:[#allocation39_spill] sm:$0xff] }
 0x588   : > { %12466 = vst [vmem:[#allocation40_spill] sm:$0xff] %v10668_v52  ;;  %v10720_v52 = vpop.f32.mrf.mxu3  ;;  %v5619_v35 = vmul.f32 %v10335_v39, %v12484_v5  ;;  %v5901_v50 = vadd.f32 %v5900_v16, %v10694_v60  ;;  %v10734_v23 = vadd.f32 %v10353_v25, %v5614_v51  ;;  %v5828_v53 = vadd.f32 %v5827_v47, %v10705_v24  ;;  %v12490_v5 = vld [vmem:[#allocation26_spill] sm:$0xff]  ;;  %v10756_v47 = vpop.f32.mrf.mxu1 }
 0x589   : > { %12467 = vst [vmem:[#allocation45_spill] sm:$0xff] %v10671_v17  ;;  %v5569_v17 = vmul.f32 %v10591_v6, %v12487_v38  ;;  %v10740_v30 = vadd.f32 %v10356_v29, %v5615_v40  ;;  %v5622_v16 = vmul.f32 %v10330_v22, %v12490_v5  ;;  %v10751_v51 = vadd.f32 %v10600_v1, %v5565_v20 }
 0x58a   : > { %12469 = vst [vmem:[#allocation29_spill] sm:$0xff] %v10677_v27  ;;  %v10731_v27 = vadd.f32 %v10367_v34, %v5612_v55  ;;  %v5865_v55 = vadd.f32 %v5864_v37, %v10712_v0  ;;  %v10754_v38 = vadd.f32 %v10353_v25, %v5618_v7  ;;  %v5926_v40 = vadd.f32 %v5925_v56, %v10725_v4  ;;  %v12496_v37 = vld [vmem:[#allocation43_spill] sm:$0xff] }
 0x58b   : > { %12471 = vst [vmem:[#allocation28_spill] sm:$0xff] %v10684_v48  ;;  %v10709_v28 = vpop.f32.mrf.mxu0  ;;  %v5620_v48 = vmul.f32 %v10338_v36, %v12489_v31  ;;  %v10760_v31 = vadd.f32 %v10356_v29, %v5619_v35  ;;  %v5829_v20 = vadd.f32 %v5828_v53, %v10734_v23  ;;  %v10769_v7 = vadd.f32 %v10600_v1, %v5569_v17 }
 0x58c   : > { %12472 = vst [vmem:[#allocation102_spill] sm:$0xff] %v10687_v59  ;;  %v12495_v59 = vld [vmem:[#allocation34_spill] sm:$0xff]  ;;  %v5866_v56 = vadd.f32 %v5865_v55, %v10740_v30  ;;  %v5927_v17 = vadd.f32 %v5926_v40, %v10751_v51 }
 0x58d   : > { %12474 = vst [vmem:[#allocation46_spill] sm:$0xff] %v10694_v60  ;;  %v10748_v60 = vadd.f32 %v10367_v34, %v5616_v26  ;;  %v5623_v5 = vmul.f32 %v10335_v39, %v12495_v59  ;;  %v5573_v26 = vmul.f32 %v10591_v6, %v12496_v37  ;;  %v10775_v35 = vadd.f32 %v10367_v34, %v5620_v48 }
 0x58e   : > { %12477 = vst [vmem:[#allocation48_spill] sm:$0xff] %v10705_v24  ;;  %v12498_v24 = vld [vmem:[#allocation44_spill] sm:$0xff]  ;;  %v10778_v59 = vadd.f32 %v10353_v25, %v5622_v16  ;;  %v5867_v48 = vadd.f32 %v5866_v56, %v10760_v31  ;;  %v5928_v40 = vadd.f32 %v5927_v17, %v10769_v7 }
 0x58f   : > { %12479 = vst [vmem:[#allocation24_spill] sm:$0xff] %v10712_v0  ;;  %v5902_v0 = vadd.f32 %v5901_v50, %v10731_v27  ;;  %v5624_v43 = vmul.f32 %v10338_v36, %v12498_v24  ;;  %v12502_v24 = vld [vmem:[#allocation51_spill] sm:$0xff]  ;;  %v10793_v16 = vadd.f32 %v10356_v29, %v5623_v5 }
 0x590   : > { %12483 = vst [vmem:[#allocation35_spill] sm:$0xff] %v10725_v4  ;;  %v12501_v4 = vld [vmem:[#allocation53_spill] sm:$0xff]  ;;  %v5627_v55 = vmul.f32 %v10335_v39, %v12502_v24 }
 0x591   : > { %12485 = vst [vmem:[#allocation36_spill] sm:$0xff] %v10731_v27  ;;  %v5626_v37 = vmul.f32 %v10330_v22, %v12501_v4  ;;  %v5903_v53 = vadd.f32 %v5902_v0, %v10748_v60  ;;  %v5830_v27 = vadd.f32 %v5829_v20, %v10754_v38  ;;  %v10796_v4 = vadd.f32 %v10600_v1, %v5573_v26 }
 0x592   : > { %12486 = vst [vmem:[#allocation27_spill] sm:$0xff] %v10734_v23  ;;  %v12505_v23 = vld [vmem:[#allocation33_spill] sm:$0xff]  ;;  %v10802_v20 = vadd.f32 %v10367_v34, %v5624_v43  ;;  %v10818_v43 = vadd.f32 %v10356_v29, %v5627_v55 }
 0x593   : > { %12488 = vst [vmem:[#allocation25_spill] sm:$0xff] %v10740_v30  ;;  %v10782_v50 = vpop.f32.mrf.mxu0  ;;  %v10789_v30 = vpop.f32.mrf.mxu2  ;;  %v5577_v0 = vmul.f32 %v10591_v6, %v12505_v23  ;;  %v5904_v5 = vadd.f32 %v5903_v53, %v10775_v35  ;;  %v5831_v26 = vadd.f32 %v5830_v27, %v10778_v59  ;;  %v12510_v23 = vld [vmem:[#allocation55_spill] sm:$0xff]  ;;  %v5634_v53 = vmul.f32 %v10330_v22, %v12514_v15 }
 0x594   : > { %12491 = vst [vmem:[#allocation30_spill] sm:$0xff] %v10748_v60  ;;  %v12507_v60 = vld [vmem:[#allocation52_spill] sm:$0xff]  ;;  %v5631_v17 = vmul.f32 %v10335_v39, %v12510_v23  ;;  %v5868_v27 = vadd.f32 %v5867_v48, %v10793_v16  ;;  %v12516_v23 = vld [vmem:[#allocation59_spill] sm:$0xff]  ;;  %v5585_v15 = vmul.f32 %v10591_v6, %v12519_v32  ;;  %v10842_v48 = vpop.f32.mrf.mxu1 }
 0x595   : > { %12492 = vst [vmem:[#allocation32_spill] sm:$0xff] %v10751_v51  ;;  %v5628_v24 = vmul.f32 %v10338_v36, %v12507_v60  ;;  %v12508_v51 = vld [vmem:[#allocation58_spill] sm:$0xff]  ;;  %v5635_v55 = vmul.f32 %v10335_v39, %v12516_v23 }
 0x596   : > { %12493 = vst [vmem:[#allocation39_spill] sm:$0xff] %v10754_v38  ;;  %v5630_v56 = vmul.f32 %v10330_v22, %v12508_v51  ;;  %v10813_v38 = vadd.f32 %v10353_v25, %v5626_v37  ;;  %v5581_v51 = vmul.f32 %v10591_v6, %v12513_v13  ;;  %v5929_v37 = vadd.f32 %v5928_v40, %v10796_v4 }
 0x597   : > { %12494 = vst [vmem:[#allocation26_spill] sm:$0xff] %v10760_v31  ;;  %v10808_v31 = vpop.f32.mrf.mxu3 }
 0x598   : > { %12497 = vst [vmem:[#allocation34_spill] sm:$0xff] %v10769_v7  ;;  %v12512_v7 = vld [vmem:[#allocation56_spill] sm:$0xff]  ;;  %v10838_v13 = vadd.f32 %v10353_v25, %v5630_v56  ;;  %v5832_v40 = vadd.f32 %v5831_v26, %v10813_v38  ;;  %v5869_v56 = vadd.f32 %v5868_v27, %v10818_v43  ;;  %v10859_v32 = vadd.f32 %v10600_v1, %v5581_v51 }
 0x599   : > { %12499 = vst [vmem:[#allocation43_spill] sm:$0xff] %v10775_v35  ;;  %v5632_v60 = vmul.f32 %v10338_v36, %v12512_v7  ;;  %v10829_v35 = vadd.f32 %v10600_v1, %v5577_v0  ;;  %v10835_v7 = vadd.f32 %v10367_v34, %v5628_v24  ;;  %v10846_v0 = vadd.f32 %v10356_v29, %v5631_v17 }
 0x59a   : > { %12500 = vst [vmem:[#allocation44_spill] sm:$0xff] %v10778_v59  ;;  %v5905_v59 = vadd.f32 %v5904_v5, %v10802_v20  ;;  %v5638_v24 = vmul.f32 %v10330_v22, %v10396_v61  ;;  %v10862_v26 = vadd.f32 %v10353_v25, %v5634_v53  ;;  %v10875_v51 = vadd.f32 %v10600_v1, %v5585_v15  ;;  %v12527_v53 = vld [vmem:[#allocation65_spill] sm:$0xff] }
 0x59b   : > { %12503 = vst [vmem:[#allocation53_spill] sm:$0xff] %v10793_v16  ;;  %v12521_v16 = vld [vmem:[#allocation60_spill] sm:$0xff]  ;;  %v10852_v5 = vpop.f32.mrf.mxu0  ;;  %v5930_v17 = vadd.f32 %v5929_v37, %v10829_v35  ;;  %v5640_v41 = vmul.f32 %v10338_v36, %v12527_v53  ;;  %v10879_v37 = vpop.f32.mrf.mxu2  ;;  %v5642_v53 = vmul.f32 %v10330_v22, %v10490_v21  ;;  %v5643_v21 = vmul.f32 %v10335_v39, %v10439_v14 }
 0x59c   : > { %12504 = vst [vmem:[#allocation51_spill] sm:$0xff] %v10796_v4  ;;  %v5636_v23 = vmul.f32 %v10338_v36, %v12521_v16  ;;  %v10866_v16 = vadd.f32 %v10356_v29, %v5635_v55  ;;  %v12524_v4 = vld [vmem:[#allocation63_spill] sm:$0xff]  ;;  %v5870_v55 = vadd.f32 %v5869_v56, %v10846_v0  ;;  %v5646_v14 = vmul.f32 %v10330_v22, %v10572_v10 }
 0x59d   : > { %12506 = vst [vmem:[#allocation33_spill] sm:$0xff] %v10802_v20  ;;  %v10856_v20 = vadd.f32 %v10367_v34, %v5632_v60  ;;  %v5639_v61 = vmul.f32 %v10335_v39, %v12524_v4  ;;  %v5906_v60 = vadd.f32 %v5905_v59, %v10835_v7  ;;  %v10886_v4 = vadd.f32 %v10353_v25, %v5638_v24 }
 0x59e   : > { %12509 = vst [vmem:[#allocation52_spill] sm:$0xff] %v10813_v38  ;;  %v12525_v38 = vld [vmem:[#allocation37_spill] sm:$0xff]  ;;  %v5931_v15 = vadd.f32 %v5930_v17, %v10859_v32 }
 0x59f   : > { %12511 = vst [vmem:[#allocation58_spill] sm:$0xff] %v10818_v43  ;;  %v5589_v27 = vmul.f32 %v10591_v6, %v12525_v38  ;;  %v5833_v43 = vadd.f32 %v5832_v40, %v10838_v13  ;;  %v12529_v38 = vld [vmem:[#allocation38_spill] sm:$0xff]  ;;  %v5907_v40 = vadd.f32 %v5906_v60, %v10856_v20  ;;  %v10899_v56 = vadd.f32 %v10356_v29, %v5639_v61 }
 0x5a0   : > { %12515 = vst [vmem:[#allocation55_spill] sm:$0xff] %v10829_v35  ;;  %v10883_v35 = vadd.f32 %v10367_v34, %v5636_v23  ;;  %v5593_v59 = vmul.f32 %v10591_v6, %v12529_v38  ;;  %v5871_v23 = vadd.f32 %v5870_v55, %v10866_v16  ;;  %v12531_v38 = vld [vmem:[#allocation41_spill] sm:$0xff]  ;;  %v5932_v17 = vadd.f32 %v5931_v15, %v10875_v51 }
 0x5a1   : > { %12517 = vst [vmem:[#allocation56_spill] sm:$0xff] %v10835_v7  ;;  %v5834_v7 = vadd.f32 %v5833_v43, %v10862_v26  ;;  %v10902_v24 = vadd.f32 %v10600_v1, %v5589_v27  ;;  %v5597_v60 = vmul.f32 %v10591_v6, %v12531_v38  ;;  %v10908_v43 = vadd.f32 %v10367_v34, %v5640_v41 }
 0x5a2   : > { %12518 = vst [vmem:[#allocation31_spill] sm:$0xff] %v10838_v13  ;;  %v10895_v13 = vpop.f32.mrf.mxu3  ;;  %v5644_v55 = vmul.f32 %v10338_v36, %v10456_v54  ;;  %v5908_v61 = vadd.f32 %v5907_v40, %v10883_v35  ;;  %v10917_v27 = vadd.f32 %v10600_v1, %v5593_v59  ;;  %v10924_v41 = vadd.f32 %v10353_v25, %v5642_v53  ;;  %v10932_v40 = vpop.f32.mrf.mxu1  ;;  %v12536_v53 = vld [vmem:[#allocation49_spill] sm:$0xff] }
 0x5a3   : > { %12520 = vst [vmem:[#allocation62_spill] sm:$0xff] %v10846_v0  ;;  %v10921_v15 = vpop.f32.mrf.mxu0  ;;  %v5647_v54 = vmul.f32 %v10335_v39, %v10525_v2  ;;  %v5872_v59 = vadd.f32 %v5871_v23, %v10899_v56  ;;  %v5605_v0 = vmul.f32 %v10591_v6, %v12536_v53  ;;  %v12540_v53 = vld [vmem:[#allocation54_spill] sm:$0xff] }
 0x5a4   : > { %12522 = vst [vmem:[#allocation59_spill] sm:$0xff] %v10856_v20  ;;  %v12534_v20 = vld [vmem:[#allocation42_spill] sm:$0xff]  ;;  %v5909_v10 = vadd.f32 %v5908_v61, %v10908_v43  ;;  %v10946_v2 = vadd.f32 %v10367_v34, %v5644_v55  ;;  %v5609_v61 = vmul.f32 %v10591_v6, %v12540_v53  ;;  %v12543_v53 = vld [vmem:[#allocation57_spill] sm:$0xff] }
 0x5a5   : > { %12523 = vst [vmem:[#allocation50_spill] sm:$0xff] %v10866_v16  ;;  %v5835_v16 = vadd.f32 %v5834_v7, %v10886_v4  ;;  %v5601_v38 = vmul.f32 %v10591_v6, %v12534_v20  ;;  %v5648_v7 = vmul.f32 %v10338_v36, %v10543_v18  ;;  %v5933_v20 = vadd.f32 %v5932_v17, %v10902_v24 }
 0x5a6   : > { %12526 = vst [vmem:[#allocation60_spill] sm:$0xff] %v10875_v51  ;;  %v10943_v51 = vadd.f32 %v10356_v29, %v5643_v21  ;;  %v5650_v18 = vmul.f32 %v10330_v22, %v10664_v8  ;;  %v10963_v55 = vadd.f32 %v10356_v29, %v5647_v54  ;;  %v5910_v54 = vadd.f32 %v5909_v10, %v10946_v2 }
 0x5a7   : > { %12528 = vst [vmem:[#allocation63_spill] sm:$0xff] %v10883_v35  ;;  %v10937_v35 = vadd.f32 %v10600_v1, %v5597_v60  ;;  %v5934_v23 = vadd.f32 %v5933_v20, %v10917_v27  ;;  %v5651_v60 = vmul.f32 %v10335_v39, %v10610_v19  ;;  %v10954_v17 = vadd.f32 %v10600_v1, %v5601_v38  ;;  %v5353_v20 = vpop.f32.mrf.mxu2 }
 0x5a8   : > { %12530 = vst [vmem:[#allocation37_spill] sm:$0xff] %v10899_v56  ;;  %v5836_v21 = vadd.f32 %v5835_v16, %v10924_v41  ;;  %v10966_v8 = vadd.f32 %v10367_v34, %v5648_v7  ;;  %v5652_v38 = vmul.f32 %v10338_v36, %v10628_v62  ;;  %v10972_v56 = vadd.f32 %v10600_v1, %v5605_v0 }
 0x5a9   : > { %12532 = vst [vmem:[#allocation65_spill] sm:$0xff] %v10908_v43  ;;  %v10960_v43 = vadd.f32 %v10353_v25, %v5646_v14  ;;  %v5935_v19 = vadd.f32 %v5934_v23, %v10937_v35  ;;  %v5613_v16 = vmul.f32 %v10591_v6, %v12543_v53  ;;  %v5873_v14 = vadd.f32 %v5872_v59, %v10943_v51  ;;  %v12545_v53 = vld [vmem:[#allocation61_spill] sm:$0xff] }
 0x5aa   : > { %12533 = vst [vmem:[#allocation38_spill] sm:$0xff] %v10917_v27  ;;  %v10979_v27 = vadd.f32 %v10353_v25, %v5650_v18  ;;  %v5655_v7 = vmul.f32 %v10335_v39, %v10700_v12  ;;  %v5442_v23 = vpop.f32.mrf.mxu3  ;;  %v10988_v0 = vadd.f32 %v10600_v1, %v5609_v61  ;;  %v5617_v59 = vmul.f32 %v10591_v6, %v12545_v53  ;;  %v12547_v53 = vld [vmem:[#allocation64_spill] sm:$0xff] }
 0x5ab   : > { %12535 = vst [vmem:[#allocation41_spill] sm:$0xff] %v10937_v35  ;;  %v10984_v35 = vadd.f32 %v10356_v29, %v5651_v60  ;;  %v5936_v62 = vadd.f32 %v5935_v19, %v10954_v17  ;;  %v5837_v10 = vadd.f32 %v5836_v21, %v10960_v43  ;;  %v5874_v18 = vadd.f32 %v5873_v14, %v10963_v55 }
 0x5ac   : > { %12537 = vst [vmem:[#allocation42_spill] sm:$0xff] %v10943_v51  ;;  %v10992_v51 = vpop.f32.mrf.mxu0  ;;  %v5911_v12 = vadd.f32 %v5910_v54, %v10966_v8  ;;  %v5654_v60 = vmul.f32 %v10330_v22, %v10756_v47  ;;  %v11004_v19 = vadd.f32 %v10600_v1, %v5613_v16  ;;  %v11010_v14 = vadd.f32 %v10356_v29, %v5655_v7 }
 0x5ad   : > { %12538 = vst [vmem:[#allocation49_spill] sm:$0xff] %v10946_v2  ;;  %v11000_v2 = vadd.f32 %v10367_v34, %v5652_v38  ;;  %v5937_v61 = vadd.f32 %v5936_v62, %v10972_v56  ;;  %v5838_v21 = vadd.f32 %v5837_v10, %v10979_v27  ;;  %v5656_v54 = vmul.f32 %v10338_v36, %v10720_v52  ;;  %v5264_v38 = vpop.f32.mrf.mxu1 }
 0x5ae   : > { %12539 = vst [vmem:[#allocation103_spill] sm:$0xff] %v10954_v17  ;;  %v5621_v17 = vmul.f32 %v10591_v6, %v12547_v53  ;;  %v5659_v47 = vmul.f32 %v10335_v39, %v10789_v30  ;;  %v5875_v62 = vadd.f32 %v5874_v18, %v10984_v35  ;;  %v5625_v10 = vmul.f32 %v10591_v6, %v10428_v42 }
 0x5af   : > { %12541 = vst [vmem:[#allocation54_spill] sm:$0xff] %v10963_v55  ;;  %v5938_v16 = vadd.f32 %v5937_v61, %v10988_v0  ;;  %v11024_v7 = vadd.f32 %v10353_v25, %v5654_v60  ;;  %v5658_v52 = vmul.f32 %v10330_v22, %v10842_v48  ;;  %v5660_v30 = vmul.f32 %v10338_v36, %v10808_v31 }
 0x5b0   : > { %12542 = vst [vmem:[#allocation104_spill] sm:$0xff] %v10966_v8  ;;  %v11019_v8 = vadd.f32 %v10600_v1, %v5617_v59  ;;  %v5663_v18 = vmul.f32 %v10335_v39, %v10879_v37  ;;  %v5912_v61 = vadd.f32 %v5911_v12, %v11000_v2  ;;  %v11035_v53 = vadd.f32 %v10600_v1, %v5621_v17  ;;  %v5355_v12 = vpop.f32.mrf.mxu2 }
 0x5b1   : > { %12544 = vst [vmem:[#allocation57_spill] sm:$0xff] %v10984_v35  ;;  %v5939_v59 = vadd.f32 %v5938_v16, %v11004_v19  ;;  %v5629_v42 = vmul.f32 %v10591_v6, %v10501_v9  ;;  %v5876_v60 = vadd.f32 %v5875_v62, %v11010_v14  ;;  %v11041_v48 = vadd.f32 %v10367_v34, %v5656_v54 }
 0x5b2   : > { %12546 = vst [vmem:[#allocation61_spill] sm:$0xff] %v11000_v2  ;;  %v11044_v31 = vadd.f32 %v10356_v29, %v5659_v47  ;;  %v5664_v37 = vmul.f32 %v10338_v36, %v10895_v13  ;;  %v5667_v16 = vmul.f32 %v10335_v39, %v5353_v20  ;;  %v11051_v2 = vadd.f32 %v10600_v1, %v5625_v10 }
 0x5b3   : > { %12548 = vst [vmem:[#allocation64_spill] sm:$0xff] %v11010_v14  ;;  %v5940_v17 = vadd.f32 %v5939_v59, %v11019_v8  ;;  %v5633_v9 = vmul.f32 %v10591_v6, %v10563_v57  ;;  %v11056_v54 = vadd.f32 %v10353_v25, %v5658_v52  ;;  %v11059_v47 = vadd.f32 %v10367_v34, %v5660_v30  ;;  %v5444_v14 = vpop.f32.mrf.mxu3 }
 0x5b4   : > { %12549 = vst [vmem:[#allocation105_spill] sm:$0xff] %v11041_v48  ;;  %v5526_v62 = vpop.f32.mrf.mxu0  ;;  %v11062_v13 = vadd.f32 %v10356_v29, %v5663_v18  ;;  %v5668_v20 = vmul.f32 %v10338_v36, %v5442_v23  ;;  %v5671_v59 = vmul.f32 %v10335_v39, %v5355_v12  ;;  %v11068_v35 = vadd.f32 %v10600_v1, %v5629_v42 }
 0x5b5   : > { %12550 = vst [vmem:[#allocation106_spill] sm:$0xff] %v11044_v31  ;;  %v5941_v10 = vadd.f32 %v5940_v17, %v11035_v53  ;;  %v5637_v57 = vmul.f32 %v10591_v6, %v10638_v45  ;;  %v5913_v52 = vadd.f32 %v5912_v61, %v11041_v48  ;;  %v5877_v30 = vadd.f32 %v5876_v60, %v11044_v31 }
 0x5b6   : > { %12551 = vst [vmem:[#allocation107_spill] sm:$0xff] %v11059_v47  ;;  %v5662_v18 = vmul.f32 %v10330_v22, %v10932_v40  ;;  %v11077_v23 = vadd.f32 %v10367_v34, %v5664_v37  ;;  %v11080_v39 = vadd.f32 %v10356_v29, %v5667_v16  ;;  %v5672_v12 = vmul.f32 %v10338_v36, %v5444_v14  ;;  %v5266_v40 = vpop.f32.mrf.mxu1 }
 0x5b7   : > { %12552 = vst [vmem:[#allocation108_spill] sm:$0xff] %v11062_v13  ;;  %v5942_v42 = vadd.f32 %v5941_v10, %v11051_v2  ;;  %v11085_v17 = vadd.f32 %v10600_v1, %v5633_v9  ;;  %v5914_v45 = vadd.f32 %v5913_v52, %v11059_v47  ;;  %v5878_v61 = vadd.f32 %v5877_v30, %v11062_v13 }
 0x5b8   : > { %12553 = vst [vmem:[#allocation109_spill] sm:$0xff] %v11077_v23  ;;  %v5666_v60 = vmul.f32 %v10330_v22, %v5264_v38  ;;  %v5641_v37 = vmul.f32 %v10591_v6, %v10709_v28  ;;  %v11093_v16 = vadd.f32 %v10367_v34, %v5668_v20  ;;  %v11096_v36 = vadd.f32 %v10356_v29, %v5671_v59 }
 0x5b9   : > { %12554 = vst [vmem:[#allocation110_spill] sm:$0xff] %v11080_v39  ;;  %v5943_v14 = vadd.f32 %v5942_v42, %v11068_v35  ;;  %v11100_v9 = vadd.f32 %v10600_v1, %v5637_v57  ;;  %v5839_v10 = vadd.f32 %v5838_v21, %v11024_v7  ;;  %v11104_v52 = vadd.f32 %v10353_v25, %v5662_v18 }
 0x5ba   : > { %12555 = vst [vmem:[#allocation111_spill] sm:$0xff] %v11093_v16  ;;  %v5915_v38 = vadd.f32 %v5914_v45, %v11077_v23  ;;  %v5645_v28 = vmul.f32 %v10591_v6, %v10782_v50  ;;  %v5879_v20 = vadd.f32 %v5878_v61, %v11080_v39  ;;  %v5670_v29 = vmul.f32 %v10330_v22, %v5266_v40 }
 0x5bb   : > { %12556 = vst [vmem:[#allocation112_spill] sm:$0xff] %v11096_v36  ;;  %v11112_v59 = vadd.f32 %v10367_v34, %v5672_v12  ;;  %v5944_v57 = vadd.f32 %v5943_v14, %v11085_v17  ;;  %v5840_v21 = vadd.f32 %v5839_v10, %v11056_v54  ;;  %v11117_v18 = vadd.f32 %v10600_v1, %v5641_v37 }
 0x5bc   : > { %v5528_v30 = vpop.f32.mrf.mxu0  ;;  %v5649_v42 = vmul.f32 %v10591_v6, %v10852_v5  ;;  %v11122_v50 = vadd.f32 %v10353_v25, %v5666_v60  ;;  %v5916_v45 = vadd.f32 %v5915_v38, %v11093_v16  ;;  %v5880_v22 = vadd.f32 %v5879_v20, %v11096_v36 }
 0x5bd   : > { %12557 = vst [vmem:[#allocation113_spill] sm:$0xff] %v11112_v59  ;;  %v5945_v34 = vadd.f32 %v5944_v57, %v11100_v9  ;;  %v11128_v12 = vadd.f32 %v10600_v1, %v5645_v28  ;;  %v5653_v61 = vmul.f32 %v10591_v6, %v10921_v15  ;;  %v12231_v40 = vlaneseq }
 0x5be   : > { %v5841_v37 = vadd.f32 %v5840_v21, %v11104_v52  ;;  %v11134_v5 = vadd.f32 %v10353_v25, %v5670_v29  ;;  %v8308_v60 = vmov 256.0   ;;  %v5917_v14 = vadd.f32 %v5916_v45, %v11112_v59 }
 0x5bf   : > { %7803 = vrcp.f32 %v8308_v60  ;;  %v5946_v10 = vadd.f32 %v5945_v34, %v11117_v18  ;;  %v11139_v38 = vadd.f32 %v10600_v1, %v5649_v42  ;;  %v5657_v28 = vmul.f32 %v10591_v6, %v10992_v51 }
 0x5c0   : > { %vm5974_vm11 = vcmp.lt.s32.totalorder %v12231_v40, 768  ;;  %v5842_v15 = vadd.f32 %v5841_v37, %v11122_v50  ;;  %v8309_v20 = vmov 0.0   ;;  %v5881_v25 = vrot.slane %v5880_v22, 4 }
 0x5c1   : > { %5976 = vst.msk [vmem:[#allocation3] sm:$0x3f] %vm5974_vm11, %v8309_v20  ;;  %v5947_v29 = vadd.f32 %v5946_v10, %v11128_v12  ;;  %v11147_v57 = vadd.f32 %v10600_v1, %v5653_v61  ;;  %v5661_v21 = vmul.f32 %v10591_v6, %v5526_v62  ;;  %v5918_v34 = vrot.slane %v5917_v14, 4 }
 0x5c2   : > { %v5843_v42 = vadd.f32 %v5842_v15, %v11134_v5  ;;  %v11153_v60 = vadd.f32 %v10600_v1, %v5657_v28  ;;  %v5665_v37 = vmul.f32 %v10591_v6, %v5528_v30  ;;  %v5882_v40 = vadd.f32 %v5881_v25, %v5880_v22 }
 0x5c3   : > { %v5948_v51 = vadd.f32 %v5947_v29, %v11139_v38  ;;  %v11158_v61 = vadd.f32 %v10600_v1, %v5661_v21  ;;  %v5919_v15 = vadd.f32 %v5918_v34, %v5917_v14 }
 0x5c4   : > { %v5531_v45 = vpop.f32.mrf.mxu0  ;;  %v5844_v59 = vrot.slane %v5843_v42, 4  ;;  %v11163_v29 = vadd.f32 %v10600_v1, %v5665_v37  ;;  %v5883_v16 = vrot.slane %v5882_v40, 2 }
 0x5c5   : > { %v7804_v20 = vpop.eup %7803  ;;  %v5949_v10 = vadd.f32 %v5948_v51, %v11147_v57  ;;  %v5669_v62 = vmul.f32 %v10591_v6, %v5531_v45  ;;  %v5920_v21 = vrot.slane %v5919_v15, 2 }
 0x5c6   : > { %v5962_v28 = vmul.f32 256.0, %v7804_v20  ;;  %v5845_v51 = vadd.f32 %v5844_v59, %v5843_v42  ;;  %v5884_v34 = vadd.f32 %v5883_v16, %v5882_v40  ;;  %vm5966_vm12 = vweird.f32 %v7804_v20 }
 0x5c7   : > { %v5950_v36 = vadd.f32 %v5949_v10, %v11153_v60  ;;  %v11167_v22 = vadd.f32 %v10600_v1, %v5669_v62  ;;  %v5921_v13 = vadd.f32 %v5920_v21, %v5919_v15 }
 0x5c8   : > { %v5963_v14 = vsub.f32 1.0, %v5962_v28  ;;  %v5846_v23 = vrot.slane %v5845_v51, 2  ;;  %v5885_v47 = vrot.slane %v5884_v34, 1 }
 0x5c9   : > { %v5951_v30 = vadd.f32 %v5950_v36, %v11158_v61  ;;  %v5922_v42 = vrot.slane %v5921_v13, 1 }
 0x5ca   : > { %v5964_v62 = vmul.f32 %v7804_v20, %v5963_v14  ;;  %v5847_v59 = vadd.f32 %v5846_v23, %v5845_v51 }
 0x5cb   : > { %v5952_v39 = vadd.f32 %v5951_v30, %v11163_v29  ;;  %v5923_v40 = vadd.f32 %v5922_v42, %v5921_v13  ;;  %v6034_v42 = vstv %s7317_s28  ;;  %s6601_s28 = scalar_lea.sflag [#allocation6], %s8485_s23 }
 0x5cc   : > { %v5533_v25 = vpop.f32.mrf.mxu0  ;;  %v5965_v30 = vadd.f32 %v7804_v20, %v5964_v62  ;;  %v5848_v16 = vrot.slane %v5847_v59, 1 }
 0x5cd   : > { %v5673_v45 = vmul.f32 %v10591_v6, %v5533_v25  ;;  %v5953_v10 = vadd.f32 %v5952_v39, %v11167_v22  ;;  %v5886_v6 = vadd.f32 %v5885_v47, %v5884_v34  ;;  %v5999_v34 = vstv %s7314_s15 }
 0x5ce   : > { %v5967_v25 = vsel %vm5966_vm12, %v7804_v20, %v5965_v30  ;;  %v5849_v55 = vadd.f32 %v5848_v16, %v5847_v59  ;;  %v6023_v20 = vstv %s7316_s9  ;;  %s6613_s9 = sshll.u32 %s11764_s22, 4  ;;  %s6614_s9 = int_to_ptr.vmem [resolvable:$true] %s6613_s9 }
 0x5cf   : > { %v11173_v37 = vadd.f32 %v10600_v1, %v5673_v45  ;;  %v5969_v1 = vmul.f32 %v5967_v25, %v5886_v6  ;;  %v5970_v15 = vmul.f32 %v5967_v25, %v5923_v40  ;;  %v6011_v6 = vstv %s7315_s12 }
 0x5d1   : > { %12558 = vst [vmem:[#allocation114_spill] sm:$0xff] %v11173_v37  ;;  %v5954_v36 = vadd.f32 %v5953_v10, %v11173_v37  ;;  %v5981_v10 = vrot.slane %v5969_v1, 7  ;;  %v5968_v37 = vmul.f32 %v5967_v25, %v5849_v55  ;;  %v5982_v23 = vrot.slane %v5970_v15, 6 }
 0x5d3   : > { %v5955_v31 = vrot.slane %v5954_v36, 4  ;;  %v5985_v47 = vsel %vm1305_vm0, %v5968_v37, %v5981_v10  ;;  %vm6005_vm0 = vcmask 1039360  }
 0x5d5   : > { %v5956_v48 = vadd.f32 %v5955_v31, %v5954_v36  ;;  %v12559_v31 = vlaneseq }
 0x5d7   : > { %v5957_v28 = vrot.slane %v5956_v48, 2  ;;  %vm5991_vm15 = vcmp.lt.s32.totalorder %v12559_v31, 512 }
 0x5d9   : > { %v5958_v39 = vadd.f32 %v5957_v28, %v5956_v48 }
 0x5db   : > { %v5959_v45 = vrot.slane %v5958_v39, 1 }
 0x5dd   : > { %v5960_v21 = vadd.f32 %v5959_v45, %v5958_v39 }
 0x5df   : > { %v5971_v14 = vmul.f32 %v5967_v25, %v5960_v21  ;;  %v5996_v25 = vstv %s5994_s19 }
 0x5e1   : > { %v5983_v51 = vrot.slane %v5971_v14, 5 }
 0x5e3   : > { %v5987_v48 = vsel %vm5986_vm13, %v5982_v23, %v5983_v51 }
 0x5e4   : > { %v5989_v13 = vsel %vm5988_vm14, %v5985_v47, %v5987_v48 }
 0x5e5   : > { %5993 = vst.msk [vmem:[#allocation3 + $0x1] sm:$0xf] %vm5991_vm15, %v5989_v13 }
 0x5ec   : > { %v6022_v36 = vld [vmem:[#allocation3 + $0x1] sm:$0x1f] }
 0x5ed   : > { %v5995_v62 = vld [vmem:[#allocation3] sm:$0x1f]  ;;  %v6024_v59 = vmul.f32 %v6023_v20, %v6022_v36  ;;  %v6035_v28 = vmul.f32 %v6034_v42, %v6022_v36 }
 0x5ee   : > { %v6000_v55 = vmul.f32 %v5999_v34, %v5995_v62  ;;  %v6010_v30 = vld [vmem:[#allocation3 + $0x1] sm:$0xf]  ;;  %v5997_v45 = vmul.f32 %v5996_v25, %v5995_v62 }
 0x5ef   : > { %6026 = vrot.lane.b32.xlu1 %v6024_v59, %s8310_s29  ;;  %v6012_v37 = vmul.f32 %v6011_v6, %v6010_v30 }
 0x5f0   : > { %6002 = vrot.lane.b32.xlu0 %v6000_v55, %s8311_s13 }
 0x5f7   : > { %6037 = vrot.lane.b32.xlu1 %v6035_v28, %s8312_s21 }
 0x5f8   : > { %6014 = vrot.lane.b32.xlu0 %v6012_v37, %s8313_s18  ;;  %s8210_s18 = scalar_lea.hbm %s12144_s7, 1024 }
 0x661   : > { %v6027_v16 = vpop.permute.xlu1 %6026 }
 0x662   : > { %v6003_v40 = vpop.permute.xlu0 %6002  ;;  %v6028_v10 = vrot.slane %v6027_v16, 7 }
 0x663   : > { %v6004_v39 = vrot.slane %v6003_v40, 1 }
 0x664   : > { %v6030_v48 = vsel %vm6029_vm2, %v6028_v10, %v6027_v16 }
 0x665   : > { %v6006_v1 = vsel %vm6005_vm0, %v6003_v40, %v6004_v39 }
 0x666   : > { %v6008_v23 = vadd.f32 %v6006_v1, %v5997_v45 }
 0x669   : > { %v6038_v15 = vpop.permute.xlu1 %6037 }
 0x66a   : > { %v6015_v21 = vpop.permute.xlu0 %6014  ;;  %v6039_v51 = vrot.slane %v6038_v15, 7 }
 0x66b   : > { %v6016_v14 = vrot.slane %v6015_v21, 7 }
 0x66c   : > { %v6041_v20 = vsel %vm6040_vm3, %v6039_v51, %v6038_v15 }
 0x66d   : > { %v6018_v31 = vsel %vm6017_vm1, %v6016_v14, %v6015_v21 }
 0x66e   : > { %v6020_v47 = vadd.f32 %v6018_v31, %v6008_v23  ;;  %v12560_v31 = vld [vmem:[#allocation69_spill] sm:$0xff] }
 0x670   : > { %v6032_v13 = vadd.f32 %v6030_v48, %v6020_v47  ;;  %v12561_v48 = vld [vmem:[#allocation66_spill] sm:$0xff] }
 0x672   : > { %v6043_v34 = vadd.f32 %v6041_v20, %v6032_v13 }
 0x674   : > { %v7318_v36 = vmul.f32 -1.442695, %v6043_v34 }
 0x676   : > { %7805 = vpow2.f32 %v7318_v36 }
 0x67c   : > { %v7806_v59 = vpop.eup %7805 }
 0x67d   : > { %v6047_v55 = vadd.f32 1.0, %v7806_v59 }
 0x67f   : > { %7807 = vrcp.f32 %v6047_v55  ;;  %v6059_v6 = vand.u32 2147483648, %v6047_v55  ;;  %v6057_v37 = vand.u32 2147483647, %v6047_v55  ;;  %vm6053_vm5 = vweird.f32 %v6047_v55 }
 0x681   : > { %v6060_v39 = vor.u32 1.1754944e-38, %v6059_v6  ;;  %vm6058_vm7 = vcmp.eq.f32.partialorder %v6057_v37, 8.507059e+37  ;;  %v12562_v6 = vld [vmem:[#allocation88_spill] sm:$0xff]  ;;  %v12563_v37 = vld [vmem:[#allocation91_spill] sm:$0xff] }
 0x685   : > { %v7808_v62 = vpop.eup %7807 }
 0x686   : > { %v6049_v42 = vmul.f32 %v7808_v62, %v6047_v55  ;;  %vm6054_vm4 = vweird.f32 %v7808_v62 }
 0x687   : > { %vm6055_vm6 = vmor %vm6053_vm5, %vm6054_vm4 }
 0x688   : > { %v6050_v30 = vsub.f32 1.0, %v6049_v42 }
 0x68a   : > { %v6051_v28 = vmul.f32 %v7808_v62, %v6050_v30 }
 0x68c   : > { %v6052_v40 = vadd.f32 %v7808_v62, %v6051_v28 }
 0x68e   : > { %v6056_v16 = vsel %vm6055_vm6, %v7808_v62, %v6052_v40 }
 0x68f   : > { %v6061_v25 = vsel %vm6058_vm7, %v6060_v39, %v6056_v16  ;;  %v12564_v39 = vld [vmem:[#allocation94_spill] sm:$0xff]  ;;  %v12565_v16 = vld [vmem:[#allocation97_spill] sm:$0xff] }
 0x690   : > { %v6067_v1 = vperm.slane %v6061_v25, 3  ;;  %v6066_v45 = vperm.slane %v6061_v25, 2  ;;  %v6064_v15 = vperm.slane %v6061_v25, 0  ;;  %v6065_v21 = vperm.slane %v6061_v25, 1 }
 0x691   : > { %v6068_v10 = vperm.slane %v6061_v25, 4  ;;  %v12566_v25 = vld [vmem:[#allocation100_spill] sm:$0xff] }
 0x692   : > { %6075 = vrot.lane.b32.xlu1 %v6067_v1, %s8314_s30  ;;  %6073 = vrot.lane.b32.xlu0 %v6066_v45, %s8314_s30  ;;  %v12567_v1 = vld [vmem:[#allocation45_spill] sm:$0xff]  ;;  %v12568_v45 = vld [vmem:[#allocation48_spill] sm:$0xff] }
 0x693   : > { %6069 = vrot.lane.b32.xlu2 %v6064_v15, %s8314_s30  ;;  %v12569_v15 = vld [vmem:[#allocation27_spill] sm:$0xff] }
 0x69b   : > { %6071 = vrot.lane.b32.xlu2 %v6065_v21, %s8314_s30 }
 0x6a3   : > { %6077 = vrot.lane.b32.xlu2 %v6068_v10, %s8314_s30 }
 0x6ed   : > { %v6070_v14 = vpop.permute.xlu2 %6069 }
 0x6f5   : > { %v11178_v23 = vpop.permute.xlu2 %6071 }
 0x6f6   : > { %v6080_v51 = vsel %vm6079_vm8, %v6070_v14, %v11178_v23  ;;  %v12572_v14 = vld [vmem:[#allocation52_spill] sm:$0xff] }
 0x6f7   : > { %v6088_v47 = vmul.f32 %v6080_v51, %v12560_v31  ;;  %v6092_v13 = vmul.f32 %v6080_v51, %v12561_v48  ;;  %v6096_v20 = vmul.f32 %v6080_v51, %v10390_v11  ;;  %v6100_v34 = vmul.f32 %v6080_v51, %v10415_v63  ;;  %v12573_v48 = vld [vmem:[#allocation31_spill] sm:$0xff] }
 0x6f8   : > { %v6104_v36 = vmul.f32 %v6080_v51, %v10435_v44  ;;  %v6108_v59 = vmul.f32 %v6080_v51, %v10460_v58  ;;  %v6112_v55 = vmul.f32 %v6080_v51, %v10478_v46  ;;  %v6116_v62 = vmul.f32 %v6080_v51, %v10497_v3 }
 0x6f9   : > { %v6120_v42 = vmul.f32 %v6080_v51, %v10520_v49  ;;  %v6124_v30 = vmul.f32 %v6080_v51, %v10536_v33  ;;  %v6128_v28 = vmul.f32 %v6080_v51, %v12562_v6  ;;  %v6132_v40 = vmul.f32 %v6080_v51, %v12563_v37  ;;  %v12570_v49 = vld [vmem:[#allocation39_spill] sm:$0xff]  ;;  %v12571_v33 = vld [vmem:[#allocation44_spill] sm:$0xff] }
 0x6fa   : > { %v6136_v11 = vmul.f32 %v6080_v51, %v12564_v39  ;;  %v6140_v63 = vmul.f32 %v6080_v51, %v12565_v16  ;;  %v6144_v44 = vmul.f32 %v6080_v51, %v12566_v25  ;;  %v6148_v58 = vmul.f32 %v6080_v51, %v12567_v1 }
 0x6fb   : > { %v6152_v46 = vmul.f32 %v6080_v51, %v12568_v45  ;;  %v6156_v3 = vmul.f32 %v6080_v51, %v12569_v15  ;;  %v6160_v21 = vmul.f32 %v6080_v51, %v12570_v49  ;;  %v6164_v10 = vmul.f32 %v6080_v51, %v12571_v33 }
 0x6fc   : > { %v6168_v31 = vmul.f32 %v6080_v51, %v12572_v14  ;;  %v6172_v6 = vmul.f32 %v6080_v51, %v12573_v48  ;;  %v6176_v37 = vmul.f32 %v6080_v51, %v10862_v26  ;;  %v6180_v39 = vmul.f32 %v6080_v51, %v10886_v4  ;;  %v7820_v14 = vld [vmem:[%s8489_s2 + $0x80] sm:$0xff] }
 0x6fd   : > { %v6184_v16 = vmul.f32 %v6080_v51, %v10924_v41  ;;  %v6188_v25 = vmul.f32 %v6080_v51, %v10960_v43  ;;  %v6192_v1 = vmul.f32 %v6080_v51, %v10979_v27  ;;  %v11210_v45 = vmul.f32 %v6080_v51, %v11024_v7  ;;  %v7816_v43 = vld [vmem:[%s8489_s2] sm:$0xff] }
 0x6fe   : > { %v11213_v15 = vmul.f32 %v6080_v51, %v11056_v54  ;;  %v11216_v26 = vmul.f32 %v6080_v51, %v11104_v52  ;;  %v11219_v4 = vmul.f32 %v6080_v51, %v11122_v50  ;;  %v11222_v41 = vmul.f32 %v6080_v51, %v11134_v5  ;;  %v7817_v7 = vld [vmem:[%s8489_s2 + $0x20] sm:$0xff] }
 0x6ff   : > { %v11225_v27 = vadd.f32 %v7816_v43, %v6088_v47  ;;  %v11228_v49 = vadd.f32 %v7817_v7, %v6092_v13  ;;  %v7818_v54 = vld [vmem:[%s8489_s2 + $0x40] sm:$0xff]  ;;  %v11237_v5 = vadd.f32 %v7820_v14, %v6104_v36 }
 0x700   : > { %12574 = vst [vmem:[#allocation69_spill] sm:$0xff] %v11222_v41  ;;  %v11231_v33 = vadd.f32 %v7818_v54, %v6096_v20  ;;  %v7819_v52 = vld [vmem:[%s8489_s2 + $0x60] sm:$0xff] }
 0x701   : > { %12575 = vst [vmem:[#allocation66_spill] sm:$0xff] %v11225_v27  ;;  %v11234_v50 = vadd.f32 %v7819_v52, %v6100_v34  ;;  %v7821_v51 = vld [vmem:[%s8489_s2 + $0xa0] sm:$0xff] }
 0x702   : > { %12576 = vst [vmem:[#allocation88_spill] sm:$0xff] %v11228_v49  ;;  %v11240_v48 = vadd.f32 %v7821_v51, %v6108_v59  ;;  %v7822_v47 = vld [vmem:[%s8489_s2 + $0xc0] sm:$0xff] }
 0x703   : > { %12577 = vst [vmem:[#allocation91_spill] sm:$0xff] %v11231_v33  ;;  %v11243_v43 = vadd.f32 %v7822_v47, %v6112_v55  ;;  %v7823_v13 = vld [vmem:[%s8489_s2 + $0xe0] sm:$0xff] }
 0x704   : > { %v11246_v7 = vadd.f32 %v7823_v13, %v6116_v62  ;;  %v7824_v20 = vld [vmem:[%s8489_s2 + $0x100] sm:$0xff]  ;;  %v11263_v47 = vpop.permute.xlu1 %6075 }
 0x705   : > { %v11249_v54 = vadd.f32 %v7824_v20, %v6120_v42  ;;  %v7825_v34 = vld [vmem:[%s8489_s2 + $0x120] sm:$0xff] }
 0x706   : > { %v11252_v52 = vadd.f32 %v7825_v34, %v6124_v30  ;;  %v7826_v36 = vld [vmem:[%s8489_s2 + $0x140] sm:$0xff] }
 0x707   : > { %v11255_v59 = vadd.f32 %v7826_v36, %v6128_v28  ;;  %v7827_v14 = vld [vmem:[%s8489_s2 + $0x160] sm:$0xff] }
 0x708   : > { %v11258_v55 = vadd.f32 %v7827_v14, %v6132_v40  ;;  %v7828_v51 = vld [vmem:[%s8489_s2 + $0x180] sm:$0xff] }
 0x709   : > { %12578 = vst [vmem:[#allocation94_spill] sm:$0xff] %v11255_v59  ;;  %v11261_v62 = vadd.f32 %v7828_v51, %v6136_v11  ;;  %v7829_v42 = vld [vmem:[%s8489_s2 + $0x1a0] sm:$0xff]  ;;  %v6078_v11 = vpop.permute.xlu2 %6077 }
 0x70a   : > { %12579 = vst [vmem:[#allocation97_spill] sm:$0xff] %v11258_v55  ;;  %v11266_v13 = vadd.f32 %v7829_v42, %v6140_v63  ;;  %v7830_v30 = vld [vmem:[%s8489_s2 + $0x1c0] sm:$0xff]  ;;  %v12672_v55 = vld [vmem:[#allocation36_spill] sm:$0xff] }
 0x70b   : > { %12580 = vst [vmem:[#allocation100_spill] sm:$0xff] %v11261_v62  ;;  %v11269_v20 = vadd.f32 %v7830_v30, %v6144_v44  ;;  %v7831_v28 = vld [vmem:[%s8489_s2 + $0x1e0] sm:$0xff] }
 0x70c   : > { %12581 = vst [vmem:[#allocation45_spill] sm:$0xff] %v11266_v13  ;;  %v11272_v34 = vadd.f32 %v7831_v28, %v6148_v58  ;;  %v7832_v40 = vld [vmem:[%s8489_s2 + $0x200] sm:$0xff]  ;;  %v12664_v13 = vld [vmem:[#allocation40_spill] sm:$0xff] }
 0x70d   : > { %12582 = vst [vmem:[#allocation48_spill] sm:$0xff] %v11269_v20  ;;  %v11275_v36 = vadd.f32 %v7832_v40, %v6152_v46  ;;  %v7833_v14 = vld [vmem:[%s8489_s2 + $0x220] sm:$0xff] }
 0x70e   : > { %12583 = vst [vmem:[#allocation27_spill] sm:$0xff] %v11272_v34  ;;  %v11278_v51 = vadd.f32 %v7833_v14, %v6156_v3  ;;  %v7834_v63 = vld [vmem:[%s8489_s2 + $0x240] sm:$0xff]  ;;  %v12658_v34 = vld [vmem:[#allocation96_spill] sm:$0xff] }
 0x70f   : > { %12584 = vst [vmem:[#allocation39_spill] sm:$0xff] %v11275_v36  ;;  %v11281_v42 = vadd.f32 %v7834_v63, %v6160_v21  ;;  %v7835_v44 = vld [vmem:[%s8489_s2 + $0x260] sm:$0xff]  ;;  %v12656_v36 = vld [vmem:[#allocation93_spill] sm:$0xff] }
 0x710   : > { %12585 = vst [vmem:[#allocation44_spill] sm:$0xff] %v11278_v51  ;;  %v11284_v30 = vadd.f32 %v7835_v44, %v6164_v10  ;;  %v7836_v58 = vld [vmem:[%s8489_s2 + $0x280] sm:$0xff]  ;;  %v6083_v10 = vsel %vm6079_vm8, %v11263_v47, %v6078_v11 }
 0x711   : > { %12586 = vst [vmem:[#allocation52_spill] sm:$0xff] %v11281_v42  ;;  %v11287_v28 = vadd.f32 %v7836_v58, %v6168_v31  ;;  %v7837_v46 = vld [vmem:[%s8489_s2 + $0x2a0] sm:$0xff] }
 0x712   : > { %12587 = vst [vmem:[#allocation31_spill] sm:$0xff] %v11284_v30  ;;  %v11290_v40 = vadd.f32 %v7837_v46, %v6172_v6  ;;  %v7838_v41 = vld [vmem:[%s8489_s2 + $0x2c0] sm:$0xff]  ;;  %v12650_v30 = vld [vmem:[#allocation85_spill] sm:$0xff] }
 0x713   : > { %12588 = vst [vmem:[#allocation115_spill] sm:$0xff] %v11287_v28  ;;  %v11293_v3 = vadd.f32 %v7838_v41, %v6176_v37  ;;  %v7839_v14 = vld [vmem:[%s8489_s2 + $0x2e0] sm:$0xff] }
 0x714   : > { %12589 = vst [vmem:[#allocation116_spill] sm:$0xff] %v11290_v40  ;;  %v11296_v21 = vadd.f32 %v7839_v14, %v6180_v39  ;;  %v7840_v63 = vld [vmem:[%s8489_s2 + $0x300] sm:$0xff] }
 0x715   : > { %12590 = vst [vmem:[#allocation117_spill] sm:$0xff] %v11293_v3  ;;  %v11301_v44 = vadd.f32 %v7840_v63, %v6184_v16  ;;  %v7841_v31 = vld [vmem:[%s8489_s2 + $0x320] sm:$0xff]  ;;  %v12646_v3 = vld [vmem:[#allocation81_spill] sm:$0xff] }
 0x716   : > { %12591 = vst [vmem:[#allocation118_spill] sm:$0xff] %v11296_v21  ;;  %v11304_v58 = vadd.f32 %v7841_v31, %v6188_v25  ;;  %v7842_v28 = vld [vmem:[%s8489_s2 + $0x340] sm:$0xff]  ;;  %v12645_v21 = vld [vmem:[#allocation80_spill] sm:$0xff] }
 0x717   : > { %12592 = vst [vmem:[#allocation119_spill] sm:$0xff] %v11301_v44  ;;  %v11307_v6 = vadd.f32 %v7842_v28, %v6192_v1  ;;  %v7843_v46 = vld [vmem:[%s8489_s2 + $0x360] sm:$0xff]  ;;  %v12599_v1 = vld [vmem:[#allocation29_spill] sm:$0xff] }
 0x718   : > { %12593 = vst [vmem:[#allocation120_spill] sm:$0xff] %v11304_v58  ;;  %v11311_v37 = vadd.f32 %v7843_v46, %v11210_v45  ;;  %v7844_v41 = vld [vmem:[%s8489_s2 + $0x380] sm:$0xff]  ;;  %v11327_v28 = vmul.f32 %v6083_v10, %v12599_v1 }
 0x719   : > { %12594 = vst [vmem:[#allocation121_spill] sm:$0xff] %v11307_v6  ;;  %v11315_v39 = vadd.f32 %v7844_v41, %v11213_v15  ;;  %v7845_v14 = vld [vmem:[%s8489_s2 + $0x3a0] sm:$0xff]  ;;  %v11353_v15 = vmul.f32 %v6083_v10, %v10859_v32  ;;  %v11374_v32 = vmul.f32 %v6083_v10, %v10988_v0  ;;  %v11395_v0 = vmul.f32 %v6083_v10, %v11100_v9  ;;  %v12642_v6 = vld [vmem:[#allocation77_spill] sm:$0xff] }
 0x71a   : > { %12595 = vst [vmem:[#allocation122_spill] sm:$0xff] %v11311_v37  ;;  %v11319_v11 = vadd.f32 %v7845_v14, %v11216_v26  ;;  %v7846_v16 = vld [vmem:[%s8489_s2 + $0x3c0] sm:$0xff]  ;;  %v11416_v9 = vmul.f32 %v6083_v10, %v11163_v29  ;;  %v6074_v29 = vpop.permute.xlu0 %6073  ;;  %v12641_v37 = vld [vmem:[#allocation76_spill] sm:$0xff] }
 0x71b   : > { %12596 = vst [vmem:[#allocation123_spill] sm:$0xff] %v11315_v39  ;;  %v11323_v63 = vadd.f32 %v7846_v16, %v11219_v4  ;;  %v12600_v31 = vld [vmem:[#allocation47_spill] sm:$0xff]  ;;  %v12601_v41 = vld [vmem:[#allocation102_spill] sm:$0xff]  ;;  %v12603_v4 = vld [vmem:[#allocation32_spill] sm:$0xff] }
 0x71c   : > { %12597 = vst [vmem:[#allocation124_spill] sm:$0xff] %v11319_v11  ;;  %v11330_v45 = vmul.f32 %v6083_v10, %v12600_v31  ;;  %v11335_v39 = vmul.f32 %v6083_v10, %v12601_v41  ;;  %v12602_v26 = vld [vmem:[#allocation35_spill] sm:$0xff]  ;;  %v11341_v16 = vmul.f32 %v6083_v10, %v12603_v4  ;;  %v12604_v25 = vld [vmem:[#allocation34_spill] sm:$0xff]  ;;  %v12608_v41 = vld [vmem:[#allocation60_spill] sm:$0xff] }
 0x71d   : > { %12598 = vst [vmem:[#allocation125_spill] sm:$0xff] %v11323_v63  ;;  %v11338_v14 = vmul.f32 %v6083_v10, %v12602_v26  ;;  %v11344_v63 = vmul.f32 %v6083_v10, %v12604_v25  ;;  %v12605_v1 = vld [vmem:[#allocation51_spill] sm:$0xff]  ;;  %v11356_v46 = vmul.f32 %v6083_v10, %v12608_v41  ;;  %v11359_v26 = vmul.f32 %v6083_v10, %v10902_v24  ;;  %v12609_v4 = vld [vmem:[#allocation38_spill] sm:$0xff]  ;;  %v12610_v25 = vld [vmem:[#allocation41_spill] sm:$0xff] }
 0x71e   : > { %v11347_v11 = vmul.f32 %v6083_v10, %v12605_v1  ;;  %v12607_v31 = vld [vmem:[#allocation55_spill] sm:$0xff]  ;;  %v11362_v33 = vmul.f32 %v6083_v10, %v12609_v4  ;;  %v11365_v49 = vmul.f32 %v6083_v10, %v12610_v25  ;;  %12613 = vst [vmem:[#allocation102_spill] sm:$0xff] %v11374_v32  ;;  %v11377_v41 = vmul.f32 %v6083_v10, %v11004_v19  ;;  %v12643_v58 = vld [vmem:[#allocation78_spill] sm:$0xff]  ;;  %v12674_v32 = vld [vmem:[#allocation25_spill] sm:$0xff] }
 0x71f   : > { %v11350_v27 = vmul.f32 %v6083_v10, %v12607_v31  ;;  %v12611_v1 = vld [vmem:[#allocation103_spill] sm:$0xff]  ;;  %v11371_v31 = vmul.f32 %v6083_v10, %v10972_v56  ;;  %v11380_v24 = vmul.f32 %v6083_v10, %v11019_v8  ;;  %v11383_v4 = vmul.f32 %v6083_v10, %v11035_v53  ;;  %12620 = vst [vmem:[#allocation38_spill] sm:$0xff] %v11395_v0  ;;  %v12647_v40 = vld [vmem:[#allocation82_spill] sm:$0xff]  ;;  %v12653_v0 = vld [vmem:[#allocation89_spill] sm:$0xff] }
 0x720   : > { %12606 = vst [vmem:[#allocation29_spill] sm:$0xff] %v11347_v11  ;;  %v11368_v11 = vmul.f32 %v6083_v10, %v12611_v1  ;;  %v11386_v25 = vmul.f32 %v6083_v10, %v11051_v2  ;;  %v11389_v1 = vmul.f32 %v6083_v10, %v11068_v35  ;;  %v11392_v56 = vmul.f32 %v6083_v10, %v11085_v17  ;;  %v12644_v44 = vld [vmem:[#allocation79_spill] sm:$0xff]  ;;  %v12654_v51 = vld [vmem:[#allocation90_spill] sm:$0xff] }
 0x721   : > { %12612 = vst [vmem:[#allocation47_spill] sm:$0xff] %v11371_v31  ;;  %v11398_v19 = vmul.f32 %v6083_v10, %v11117_v18  ;;  %v11401_v8 = vmul.f32 %v6083_v10, %v11128_v12  ;;  %v11404_v53 = vmul.f32 %v6083_v10, %v11139_v38  ;;  %v11407_v2 = vmul.f32 %v6083_v10, %v11147_v57  ;;  %v12629_v12 = vld [vmem:[#allocation114_spill] sm:$0xff]  ;;  %v12652_v42 = vld [vmem:[#allocation87_spill] sm:$0xff]  ;;  %v12736_v31 = vld [vmem:[#allocation88_spill] sm:$0xff] }
 0x722   : > { %12614 = vst [vmem:[#allocation35_spill] sm:$0xff] %v11377_v41  ;;  %v11410_v35 = vmul.f32 %v6083_v10, %v11153_v60  ;;  %v11413_v17 = vmul.f32 %v6083_v10, %v11158_v61  ;;  %v11419_v18 = vmul.f32 %v6083_v10, %v11167_v22  ;;  %v11450_v60 = vsel %vm6079_vm8, %v6074_v29, %v11263_v47  ;;  %v7847_v57 = vld [vmem:[%s8489_s2 + $0x18] sm:$0xff]  ;;  %v12634_v47 = vld [vmem:[#allocation71_spill] sm:$0xff]  ;;  %v12670_v41 = vld [vmem:[#allocation24_spill] sm:$0xff] }
 0x723   : > { %12615 = vst [vmem:[#allocation32_spill] sm:$0xff] %v11380_v24  ;;  %v12660_v20 = vld [vmem:[#allocation99_spill] sm:$0xff]  ;;  %v12666_v24 = vld [vmem:[#allocation28_spill] sm:$0xff]  ;;  %v12668_v62 = vld [vmem:[#allocation46_spill] sm:$0xff] }
 0x724   : > { %12616 = vst [vmem:[#allocation34_spill] sm:$0xff] %v11383_v4  ;;  %v12662_v4 = vld [vmem:[#allocation101_spill] sm:$0xff] }
 0x725   : > { %12617 = vst [vmem:[#allocation51_spill] sm:$0xff] %v11386_v25  ;;  %v12659_v25 = vld [vmem:[#allocation98_spill] sm:$0xff] }
 0x726   : > { %12618 = vst [vmem:[#allocation55_spill] sm:$0xff] %v11389_v1  ;;  %v12657_v1 = vld [vmem:[#allocation95_spill] sm:$0xff] }
 0x727   : > { %12619 = vst [vmem:[#allocation60_spill] sm:$0xff] %v11392_v56  ;;  %v12655_v56 = vld [vmem:[#allocation92_spill] sm:$0xff] }
 0x728   : > { %12621 = vst [vmem:[#allocation41_spill] sm:$0xff] %v11398_v19  ;;  %v12651_v19 = vld [vmem:[#allocation86_spill] sm:$0xff] }
 0x729   : > { %12622 = vst [vmem:[#allocation103_spill] sm:$0xff] %v11401_v8  ;;  %v11422_v8 = vmul.f32 %v6083_v10, %v12629_v12  ;;  %v11443_v10 = vsel %vm6079_vm8, %v11178_v23, %v6074_v29  ;;  %v6090_v29 = vmul.f32 %v11450_v60, %v12634_v47  ;;  %v12637_v23 = vld [vmem:[#allocation72_spill] sm:$0xff]  ;;  %v12640_v47 = vld [vmem:[#allocation75_spill] sm:$0xff] }
 0x72a   : > { %12623 = vst [vmem:[#allocation126_spill] sm:$0xff] %v11404_v53  ;;  %v11476_v22 = vmul.f32 %v11443_v10, %v12637_v23  ;;  %v11496_v23 = vmul.f32 %v11450_v60, %v12642_v6  ;;  %v11516_v6 = vmul.f32 %v11443_v10, %v12647_v40  ;;  %v12648_v53 = vld [vmem:[#allocation83_spill] sm:$0xff]  ;;  %v12649_v12 = vld [vmem:[#allocation84_spill] sm:$0xff]  ;;  %v11536_v40 = vmul.f32 %v11450_v60, %v12652_v42 }
 0x72b   : > { %12624 = vst [vmem:[#allocation127_spill] sm:$0xff] %v11407_v2  ;;  %v11556_v42 = vmul.f32 %v11443_v10, %v12657_v1  ;;  %v11576_v1 = vmul.f32 %v11450_v60, %v12664_v13  ;;  %v11596_v13 = vmul.f32 %v11443_v10, %v12674_v32 }
 0x72c   : > { %12625 = vst [vmem:[#allocation128_spill] sm:$0xff] %v11410_v35  ;;  %v11462_v35 = vadd.f32 %v7847_v57, %v11327_v28  ;;  %v12639_v28 = vld [vmem:[#allocation74_spill] sm:$0xff] }
 0x72d   : > { %12626 = vst [vmem:[#allocation129_spill] sm:$0xff] %v11413_v17  ;;  %v12635_v17 = vld [vmem:[#allocation67_spill] sm:$0xff]  ;;  %v11484_v57 = vmul.f32 %v11443_v10, %v12639_v28  ;;  %v11504_v28 = vmul.f32 %v11450_v60, %v12644_v44  ;;  %v11524_v44 = vmul.f32 %v11443_v10, %v12649_v12  ;;  %v11544_v12 = vmul.f32 %v11450_v60, %v12654_v51 }
 0x72e   : > { %12627 = vst [vmem:[#allocation130_spill] sm:$0xff] %v11416_v9  ;;  %v11468_v61 = vmul.f32 %v11443_v10, %v12635_v17  ;;  %v12636_v9 = vld [vmem:[#allocation68_spill] sm:$0xff]  ;;  %v11488_v17 = vmul.f32 %v11450_v60, %v12640_v47  ;;  %v11508_v47 = vmul.f32 %v11443_v10, %v12645_v21  ;;  %v11528_v21 = vmul.f32 %v11450_v60, %v12650_v30 }
 0x72f   : > { %12628 = vst [vmem:[#allocation131_spill] sm:$0xff] %v11419_v18  ;;  %v12633_v18 = vld [vmem:[#allocation70_spill] sm:$0xff]  ;;  %v11472_v2 = vmul.f32 %v11450_v60, %v12636_v9  ;;  %v11492_v9 = vmul.f32 %v11443_v10, %v12641_v37  ;;  %v11512_v37 = vmul.f32 %v11450_v60, %v12646_v3  ;;  %v11532_v3 = vmul.f32 %v11443_v10, %v12651_v19 }
 0x730   : > { %12630 = vst [vmem:[#allocation114_spill] sm:$0xff] %v11422_v8  ;;  %v6089_v38 = vmul.f32 %v11443_v10, %v12633_v18  ;;  %v12638_v18 = vld [vmem:[#allocation73_spill] sm:$0xff]  ;;  %v11548_v30 = vmul.f32 %v11443_v10, %v12655_v56  ;;  %v11552_v19 = vmul.f32 %v11450_v60, %v12656_v36  ;;  %v11564_v51 = vmul.f32 %v11443_v10, %v12659_v25 }
 0x731   : > { %v11480_v8 = vmul.f32 %v11450_v60, %v12638_v18  ;;  %v11500_v18 = vmul.f32 %v11443_v10, %v12643_v58  ;;  %v11520_v58 = vmul.f32 %v11450_v60, %v12648_v53  ;;  %v11540_v53 = vmul.f32 %v11443_v10, %v12653_v0  ;;  %12665 = vst [vmem:[#allocation67_spill] sm:$0xff] %v11576_v1  ;;  %v12676_v1 = vld [vmem:[#allocation30_spill] sm:$0xff] }
 0x732   : > { %v11560_v0 = vmul.f32 %v11450_v60, %v12658_v34  ;;  %v11568_v56 = vmul.f32 %v11450_v60, %v12660_v20  ;;  %v11572_v36 = vmul.f32 %v11443_v10, %v12662_v4  ;;  %v11580_v34 = vmul.f32 %v11443_v10, %v12666_v24  ;;  %12675 = vst [vmem:[#allocation75_spill] sm:$0xff] %v11596_v13  ;;  %v12686_v13 = vld [vmem:[#allocation58_spill] sm:$0xff] }
 0x733   : > { %v11584_v25 = vmul.f32 %v11450_v60, %v12668_v62  ;;  %v11588_v20 = vmul.f32 %v11443_v10, %v12670_v41  ;;  %v11592_v4 = vmul.f32 %v11450_v60, %v12672_v55  ;;  %v11600_v24 = vmul.f32 %v11450_v60, %v12676_v1 }
 0x734   : > { %12661 = vst [vmem:[#allocation70_spill] sm:$0xff] %v11568_v56  ;;  %v11620_v1 = vmul.f32 %v11443_v10, %v12686_v13 }
 0x735   : > { %12663 = vst [vmem:[#allocation71_spill] sm:$0xff] %v11572_v36 }
 0x736   : > { %12667 = vst [vmem:[#allocation68_spill] sm:$0xff] %v11580_v34  ;;  %v12678_v34 = vld [vmem:[#allocation26_spill] sm:$0xff] }
 0x737   : > { %12669 = vst [vmem:[#allocation72_spill] sm:$0xff] %v11584_v25  ;;  %v11604_v62 = vmul.f32 %v11443_v10, %v12678_v34  ;;  %v12680_v25 = vld [vmem:[#allocation43_spill] sm:$0xff] }
 0x738   : > { %12671 = vst [vmem:[#allocation73_spill] sm:$0xff] %v11588_v20  ;;  %v11608_v41 = vmul.f32 %v11450_v60, %v12680_v25  ;;  %v12682_v20 = vld [vmem:[#allocation53_spill] sm:$0xff] }
 0x739   : > { %12673 = vst [vmem:[#allocation74_spill] sm:$0xff] %v11592_v4  ;;  %v11612_v55 = vmul.f32 %v11443_v10, %v12682_v20  ;;  %v12684_v4 = vld [vmem:[#allocation33_spill] sm:$0xff] }
 0x73a   : > { %12677 = vst [vmem:[#allocation76_spill] sm:$0xff] %v11600_v24  ;;  %v11616_v32 = vmul.f32 %v11450_v60, %v12684_v4  ;;  %v12688_v24 = vld [vmem:[#allocation56_spill] sm:$0xff] }
 0x73b   : > { %12679 = vst [vmem:[#allocation77_spill] sm:$0xff] %v11604_v62  ;;  %v11624_v34 = vmul.f32 %v11450_v60, %v12688_v24  ;;  %v12690_v62 = vld [vmem:[#allocation62_spill] sm:$0xff] }
 0x73c   : > { %12681 = vst [vmem:[#allocation78_spill] sm:$0xff] %v11608_v41  ;;  %v11628_v25 = vmul.f32 %v11443_v10, %v12690_v62  ;;  %v12692_v41 = vld [vmem:[#allocation59_spill] sm:$0xff]  ;;  %v12700_v62 = vld [vmem:[#allocation65_spill] sm:$0xff] }
 0x73d   : > { %12683 = vst [vmem:[#allocation79_spill] sm:$0xff] %v11612_v55  ;;  %v11632_v20 = vmul.f32 %v11450_v60, %v12692_v41  ;;  %v12694_v55 = vld [vmem:[#allocation50_spill] sm:$0xff] }
 0x73e   : > { %12685 = vst [vmem:[#allocation80_spill] sm:$0xff] %v11616_v32  ;;  %v11636_v4 = vmul.f32 %v11443_v10, %v12694_v55  ;;  %v12696_v32 = vld [vmem:[#allocation63_spill] sm:$0xff]  ;;  %v12702_v41 = vld [vmem:[#allocation42_spill] sm:$0xff] }
 0x73f   : > { %12687 = vst [vmem:[#allocation81_spill] sm:$0xff] %v11620_v1  ;;  %v11640_v13 = vmul.f32 %v11450_v60, %v12696_v32  ;;  %v12698_v1 = vld [vmem:[#allocation37_spill] sm:$0xff]  ;;  %v12706_v32 = vld [vmem:[#allocation54_spill] sm:$0xff] }
 0x740   : > { %12689 = vst [vmem:[#allocation82_spill] sm:$0xff] %v11624_v34  ;;  %v11644_v24 = vmul.f32 %v11443_v10, %v12698_v1  ;;  %v12704_v34 = vld [vmem:[#allocation49_spill] sm:$0xff] }
 0x741   : > { %12691 = vst [vmem:[#allocation83_spill] sm:$0xff] %v11628_v25  ;;  %v11648_v25 = vmul.f32 %v11450_v60, %v12700_v62  ;;  %v11656_v55 = vmul.f32 %v11450_v60, %v12704_v34  ;;  %v12710_v62 = vld [vmem:[#allocation57_spill] sm:$0xff]  ;;  %v12714_v34 = vld [vmem:[#allocation64_spill] sm:$0xff] }
 0x742   : > { %12693 = vst [vmem:[#allocation84_spill] sm:$0xff] %v11632_v20  ;;  %v11652_v20 = vmul.f32 %v11443_v10, %v12702_v41  ;;  %v12712_v41 = vld [vmem:[#allocation61_spill] sm:$0xff] }
 0x743   : > { %12695 = vst [vmem:[#allocation85_spill] sm:$0xff] %v11636_v4  ;;  %v12708_v4 = vld [vmem:[#allocation104_spill] sm:$0xff] }
 0x744   : > { %12697 = vst [vmem:[#allocation86_spill] sm:$0xff] %v11640_v13  ;;  %v11660_v13 = vmul.f32 %v11443_v10, %v12706_v32  ;;  %v11664_v1 = vmul.f32 %v11450_v60, %v12708_v4  ;;  %v12716_v32 = vld [vmem:[#allocation105_spill] sm:$0xff] }
 0x745   : > { %12699 = vst [vmem:[#allocation87_spill] sm:$0xff] %v11644_v24  ;;  %v12718_v24 = vld [vmem:[#allocation106_spill] sm:$0xff] }
 0x746   : > { %12701 = vst [vmem:[#allocation89_spill] sm:$0xff] %v11648_v25  ;;  %v11668_v25 = vmul.f32 %v11443_v10, %v12710_v62  ;;  %v11684_v4 = vmul.f32 %v11443_v10, %v12718_v24  ;;  %v7850_v24 = vld [vmem:[%s8489_s2 + $0x38] sm:$0xff] }
 0x747   : > { %12703 = vst [vmem:[#allocation90_spill] sm:$0xff] %v11652_v20  ;;  %v11672_v20 = vmul.f32 %v11450_v60, %v12712_v41 }
 0x748   : > { %12705 = vst [vmem:[#allocation92_spill] sm:$0xff] %v11656_v55  ;;  %v11676_v55 = vmul.f32 %v11443_v10, %v12714_v34 }
 0x749   : > { %12707 = vst [vmem:[#allocation93_spill] sm:$0xff] %v11660_v13  ;;  %v11680_v13 = vmul.f32 %v11450_v60, %v12716_v32  ;;  %v12724_v32 = vld [vmem:[#allocation109_spill] sm:$0xff] }
 0x74a   : > { %12709 = vst [vmem:[#allocation95_spill] sm:$0xff] %v11664_v1  ;;  %v12720_v1 = vld [vmem:[#allocation107_spill] sm:$0xff] }
 0x74b   : > { %12711 = vst [vmem:[#allocation96_spill] sm:$0xff] %v11668_v25  ;;  %v11688_v62 = vmul.f32 %v11450_v60, %v12720_v1  ;;  %v12722_v25 = vld [vmem:[#allocation108_spill] sm:$0xff]  ;;  %v6223_v1 = vadd.f32 %v7850_v24, %v11330_v45 }
 0x74c   : > { %12713 = vst [vmem:[#allocation98_spill] sm:$0xff] %v11672_v20  ;;  %v11692_v41 = vmul.f32 %v11443_v10, %v12722_v25  ;;  %v7848_v20 = vld [vmem:[%s8489_s2 + $0x8] sm:$0xff]  ;;  %v7852_v25 = vld [vmem:[%s8489_s2 + $0x30] sm:$0xff] }
 0x74d   : > { %12715 = vst [vmem:[#allocation99_spill] sm:$0xff] %v11676_v55  ;;  %v6217_v34 = vadd.f32 %v7848_v20, %v6089_v38  ;;  %v7849_v55 = vld [vmem:[%s8489_s2 + $0x10] sm:$0xff]  ;;  %v6222_v38 = vadd.f32 %v7852_v25, %v11472_v2  ;;  %v12726_v20 = vld [vmem:[#allocation110_spill] sm:$0xff]  ;;  %v7853_v24 = vld [vmem:[%s8489_s2 + $0x48] sm:$0xff] }
 0x74e   : > { %12717 = vst [vmem:[#allocation101_spill] sm:$0xff] %v11680_v13  ;;  %v6218_v59 = vadd.f32 %v7849_v55, %v6090_v29  ;;  %v11698_v13 = vmul.f32 %v11450_v60, %v12724_v32  ;;  %v11708_v29 = vmul.f32 %v11443_v10, %v12726_v20  ;;  %v12728_v55 = vld [vmem:[#allocation111_spill] sm:$0xff]  ;;  %v7854_v2 = vld [vmem:[%s8489_s2 + $0x58] sm:$0xff] }
 0x74f   : > { %12719 = vst [vmem:[#allocation40_spill] sm:$0xff] %v11684_v4  ;;  %v11712_v32 = vmul.f32 %v11450_v60, %v12728_v55  ;;  %v6227_v25 = vadd.f32 %v7854_v2, %v11335_v39  ;;  %v7855_v20 = vld [vmem:[%s8489_s2 + $0x78] sm:$0xff]  ;;  %v7856_v55 = vld [vmem:[%s8489_s2 + $0x50] sm:$0xff] }
 0x750   : > { %12721 = vst [vmem:[#allocation28_spill] sm:$0xff] %v11688_v62  ;;  %v7851_v62 = vld [vmem:[%s8489_s2 + $0x28] sm:$0xff]  ;;  %v6346_v39 = vmax.f32 %v6218_v59, 0.0 }
 0x751   : > { %12723 = vst [vmem:[#allocation46_spill] sm:$0xff] %v11692_v41  ;;  %v6221_v4 = vadd.f32 %v7851_v62, %v11468_v61  ;;  %v6225_v61 = vadd.f32 %v7853_v24, %v11476_v22  ;;  %v12732_v62 = vld [vmem:[#allocation113_spill] sm:$0xff]  ;;  %v6345_v24 = vmax.f32 %v6217_v34, 0.0 }
 0x752   : > { %12725 = vst [vmem:[#allocation24_spill] sm:$0xff] %v11698_v13  ;;  %v12730_v13 = vld [vmem:[#allocation112_spill] sm:$0xff]  ;;  %v11722_v41 = vmul.f32 %v11450_v60, %v12732_v62  ;;  %v6347_v62 = vmax.f32 %v11462_v35, 0.0 }
 0x753   : > { %12727 = vst [vmem:[#allocation36_spill] sm:$0xff] %v11708_v29  ;;  %v11716_v45 = vmul.f32 %v11443_v10, %v12730_v13  ;;  %v6231_v29 = vadd.f32 %v7855_v20, %v11338_v14  ;;  %v7857_v10 = vld [vmem:[%s8489_s2 + $0x68] sm:$0xff]  ;;  %v7858_v13 = vld [vmem:[%s8489_s2 + $0x70] sm:$0xff]  ;;  %v6349_v2 = vmax.f32 %v6221_v4, 0.0  ;;  %v6350_v14 = vmax.f32 %v6222_v38, 0.0 }
 0x754   : > { %12729 = vst [vmem:[#allocation25_spill] sm:$0xff] %v11712_v32  ;;  %v6226_v32 = vadd.f32 %v7856_v55, %v11480_v8  ;;  %v6229_v22 = vadd.f32 %v7857_v10, %v11484_v57  ;;  %v6230_v60 = vadd.f32 %v7858_v13, %v11488_v17  ;;  %v6351_v20 = vmax.f32 %v6223_v1, 0.0  ;;  %v7860_v55 = vld [vmem:[%s8489_s2 + $0xb8] sm:$0xff]  ;;  %v7861_v57 = vld [vmem:[%s8489_s2 + $0x88] sm:$0xff]  ;;  %v7862_v34 = vld [vmem:[%s8489_s2 + $0x90] sm:$0xff] }
 0x755   : > { %12731 = vst [vmem:[#allocation30_spill] sm:$0xff] %v11716_v45  ;;  %v11740_v45 = vadd.f32 %v7860_v55, %v11344_v63  ;;  %v6233_v10 = vadd.f32 %v7861_v57, %v11492_v9  ;;  %v6353_v17 = vmax.f32 %v6225_v61, 0.0  ;;  %v6234_v59 = vadd.f32 %v7862_v34, %v11496_v23  ;;  %v7863_v35 = vld [vmem:[%s8489_s2 + $0xa8] sm:$0xff]  ;;  %v12734_v55 = vld [vmem:[#allocation66_spill] sm:$0xff] }
 0x756   : > { %12733 = vst [vmem:[#allocation26_spill] sm:$0xff] %v11722_v41  ;;  %v7859_v41 = vld [vmem:[%s8489_s2 + $0x98] sm:$0xff]  ;;  %v6237_v4 = vadd.f32 %v7863_v35, %v11500_v18  ;;  %v6354_v1 = vmax.f32 %v6226_v32, 0.0  ;;  %v6355_v38 = vmax.f32 %v6227_v25, 0.0  ;;  %v6357_v63 = vmax.f32 %v6229_v22, 0.0  ;;  %v7866_v35 = vld [vmem:[%s8489_s2 + $0xc8] sm:$0xff] }
 0x757   : > { %v6235_v8 = vadd.f32 %v7859_v41, %v11341_v16  ;;  %v7864_v16 = vld [vmem:[%s8489_s2 + $0xb0] sm:$0xff]  ;;  %v6358_v13 = vmax.f32 %v6230_v60, 0.0  ;;  %v12735_v9 = vmax.f32 %v12734_v55, 0.0  ;;  %v6359_v57 = vmax.f32 %v6231_v29, 0.0  ;;  %v7865_v18 = vld [vmem:[%s8489_s2 + $0xd8] sm:$0xff]  ;;  %v12739_v60 = vld [vmem:[#allocation91_spill] sm:$0xff] }
 0x758   : > { %v6238_v41 = vadd.f32 %v7864_v16, %v11504_v28  ;;  %v6473_v36 = vpack.c.bf16 %v6347_v62, %v6346_v39  ;;  %v12737_v23 = vmax.f32 %v12736_v31, 0.0  ;;  %v6475_v56 = vpack.c.bf16 %v6351_v20, %v6350_v14  ;;  %v12738_v32 = vld [vmem:[#allocation29_spill] sm:$0xff]  ;;  %v7869_v14 = vld [vmem:[%s8489_s2 + $0xe8] sm:$0xff] }
 0x759   : > { %v6472_v61 = vpack.c.bf16 %v6345_v24, %v12735_v9  ;;  %v11756_v25 = vadd.f32 %v7865_v18, %v12738_v32  ;;  %v6241_v28 = vadd.f32 %v7866_v35, %v11508_v47  ;;  %v6361_v22 = vmax.f32 %v6233_v10, 0.0  ;;  %v7867_v31 = vld [vmem:[%s8489_s2 + $0xd0] sm:$0xff]  ;;  %v7868_v62 = vld [vmem:[%s8489_s2 + $0xf8] sm:$0xff] }
 0x75a   : > { %v6474_v34 = vpack.c.bf16 %v6349_v2, %v12737_v23  ;;  %v12740_v16 = vmax.f32 %v12739_v60, 0.0  ;;  %v6242_v29 = vadd.f32 %v7867_v31, %v11512_v37  ;;  %v6362_v24 = vmax.f32 %v6234_v59, 0.0  ;;  %6537 = vst [vmem:[%s11764_s22 + $0x8] sm:$0xff] %v6473_v36  ;;  %v7870_v59 = vld [vmem:[%s8489_s2 + $0xf0] sm:$0xff] }
 0x75b   : > { %6536 = vst [vmem:[%s11764_s22] sm:$0xff] %v6472_v61  ;;  %v6363_v39 = vmax.f32 %v6235_v8, 0.0  ;;  %v6477_v47 = vpack.c.bf16 %v6355_v38, %v6354_v1  ;;  %v11772_v2 = vadd.f32 %v7868_v62, %v11350_v27  ;;  %v6245_v20 = vadd.f32 %v7869_v14, %v11516_v6  ;;  %v7871_v38 = vld [vmem:[%s8489_s2 + $0x118] sm:$0xff]  ;;  %v7876_v18 = vld [vmem:[%s8489_s2 + $0x130] sm:$0xff] }
 0x75c   : > { %v6476_v55 = vpack.c.bf16 %v6353_v17, %v12740_v16  ;;  %v6365_v10 = vmax.f32 %v6237_v4, 0.0  ;;  %v12741_v17 = vmax.f32 %v11234_v50, 0.0  ;;  %6538 = vst [vmem:[%s11764_s22 + $0x10] sm:$0xff] %v6474_v34  ;;  %v6246_v8 = vadd.f32 %v7870_v59, %v11520_v58  ;;  %v7872_v4 = vld [vmem:[%s8489_s2 + $0x108] sm:$0xff]  ;;  %v7874_v61 = vld [vmem:[%s8489_s2 + $0x138] sm:$0xff]  ;;  %v7882_v14 = vld [vmem:[%s8489_s2 + $0x170] sm:$0xff] }
 0x75d   : > { %v6366_v1 = vmax.f32 %v6238_v41, 0.0  ;;  %v6367_v36 = vmax.f32 %v11740_v45, 0.0  ;;  %v6479_v27 = vpack.c.bf16 %v6359_v57, %v6358_v13  ;;  %6539 = vst [vmem:[%s11764_s22 + $0x18] sm:$0xff] %v6475_v56  ;;  %v11785_v6 = vadd.f32 %v7871_v38, %v11353_v15  ;;  %v7873_v41 = vld [vmem:[%s8489_s2 + $0x110] sm:$0xff]  ;;  %v7875_v57 = vld [vmem:[%s8489_s2 + $0x128] sm:$0xff] }
 0x75e   : > { %v6478_v37 = vpack.c.bf16 %v6357_v63, %v12741_v17  ;;  %v6249_v50 = vadd.f32 %v7872_v4, %v11524_v44  ;;  %v6369_v63 = vmax.f32 %v6241_v28, 0.0  ;;  %v12742_v9 = vmax.f32 %v11237_v5, 0.0  ;;  %6540 = vst [vmem:[%s11764_s22 + $0x20] sm:$0xff] %v6476_v55  ;;  %v7877_v28 = vld [vmem:[%s8489_s2 + $0x158] sm:$0xff]  ;;  %v7879_v55 = vld [vmem:[%s8489_s2 + $0x150] sm:$0xff]  ;;  %v7884_v59 = vld [vmem:[%s8489_s2 + $0x188] sm:$0xff] }
 0x75f   : > { %v6250_v45 = vadd.f32 %v7873_v41, %v11528_v21  ;;  %v6370_v13 = vmax.f32 %v6242_v29, 0.0  ;;  %v6371_v56 = vmax.f32 %v11756_v25, 0.0  ;;  %v6481_v15 = vpack.c.bf16 %v6363_v39, %v6362_v24  ;;  %6541 = vst [vmem:[%s11764_s22 + $0x28] sm:$0xff] %v6477_v47  ;;  %v7880_v39 = vld [vmem:[%s8489_s2 + $0x178] sm:$0xff]  ;;  %v7881_v47 = vld [vmem:[%s8489_s2 + $0x168] sm:$0xff] }
 0x760   : > { %v6480_v58 = vpack.c.bf16 %v6361_v22, %v12742_v9  ;;  %v11798_v44 = vadd.f32 %v7874_v61, %v11356_v46  ;;  %v6253_v5 = vadd.f32 %v7875_v57, %v11532_v3  ;;  %v6373_v23 = vmax.f32 %v6245_v20, 0.0  ;;  %6542 = vst [vmem:[%s11764_s22 + $0x30] sm:$0xff] %v6478_v37  ;;  %v7878_v22 = vld [vmem:[%s8489_s2 + $0x148] sm:$0xff]  ;;  %v7883_v37 = vld [vmem:[%s8489_s2 + $0x198] sm:$0xff] }
 0x761   : > { %v12743_v34 = vmax.f32 %v11240_v48, 0.0  ;;  %v6254_v32 = vadd.f32 %v7876_v18, %v11536_v40  ;;  %v6374_v25 = vmax.f32 %v6246_v8, 0.0  ;;  %v6375_v35 = vmax.f32 %v11772_v2, 0.0  ;;  %6543 = vst [vmem:[%s11764_s22 + $0x38] sm:$0xff] %v6479_v27  ;;  %v7886_v4 = vld [vmem:[%s8489_s2 + $0x1b8] sm:$0xff]  ;;  %v7891_v18 = vld [vmem:[%s8489_s2 + $0x1d0] sm:$0xff] }
 0x762   : > { %v6483_v46 = vpack.c.bf16 %v6367_v36, %v6366_v1  ;;  %v11811_v3 = vadd.f32 %v7877_v28, %v11359_v26  ;;  %v6257_v48 = vadd.f32 %v7878_v22, %v11540_v53  ;;  %v6377_v60 = vmax.f32 %v6249_v50, 0.0  ;;  %6544 = vst [vmem:[%s11764_s22 + $0x40] sm:$0xff] %v6480_v58  ;;  %v7885_v36 = vld [vmem:[%s8489_s2 + $0x190] sm:$0xff]  ;;  %v7887_v50 = vld [vmem:[%s8489_s2 + $0x1a8] sm:$0xff]  ;;  %v12748_v41 = vld [vmem:[#allocation70_spill] sm:$0xff] }
 0x763   : > { %v6482_v21 = vpack.c.bf16 %v6365_v10, %v12743_v34  ;;  %v12744_v16 = vmax.f32 %v11243_v43, 0.0  ;;  %v6258_v31 = vadd.f32 %v7879_v55, %v11544_v12  ;;  %v6378_v29 = vmax.f32 %v6250_v45, 0.0  ;;  %6545 = vst [vmem:[%s11764_s22 + $0x48] sm:$0xff] %v6481_v15  ;;  %v7888_v58 = vld [vmem:[%s8489_s2 + $0x1b0] sm:$0xff]  ;;  %v7889_v15 = vld [vmem:[%s8489_s2 + $0x1d8] sm:$0xff] }
 0x764   : > { %v6379_v24 = vmax.f32 %v11785_v6, 0.0  ;;  %v6485_v26 = vpack.c.bf16 %v6371_v56, %v6370_v13  ;;  %v11824_v53 = vadd.f32 %v7880_v39, %v11362_v33  ;;  %v6261_v43 = vadd.f32 %v7881_v47, %v11548_v30  ;;  %6547 = vst [vmem:[%s11764_s22 + $0x58] sm:$0xff] %v6483_v46  ;;  %v12754_v22 = vld [vmem:[#allocation102_spill] sm:$0xff]  ;;  %v12758_v39 = vld [vmem:[#allocation72_spill] sm:$0xff] }
 0x765   : > { %v6484_v40 = vpack.c.bf16 %v6369_v63, %v12744_v16  ;;  %v6381_v62 = vmax.f32 %v6253_v5, 0.0  ;;  %v12745_v2 = vmax.f32 %v11246_v7, 0.0  ;;  %6546 = vst [vmem:[%s11764_s22 + $0x50] sm:$0xff] %v6482_v21  ;;  %v6262_v20 = vadd.f32 %v7882_v14, %v11552_v19  ;;  %v12755_v16 = vld [vmem:[#allocation68_spill] sm:$0xff] }
 0x766   : > { %v6382_v10 = vmax.f32 %v6254_v32, 0.0  ;;  %v6383_v17 = vmax.f32 %v11798_v44, 0.0  ;;  %v6487_v33 = vpack.c.bf16 %v6375_v35, %v6374_v25  ;;  %v11837_v30 = vadd.f32 %v7883_v37, %v11365_v49  ;;  %6549 = vst [vmem:[%s11764_s22 + $0x68] sm:$0xff] %v6485_v26  ;;  %v7890_v44 = vld [vmem:[%s8489_s2 + $0x1c8] sm:$0xff]  ;;  %v7894_v26 = vld [vmem:[%s8489_s2 + $0x1f0] sm:$0xff] }
 0x767   : > { %v6486_v12 = vpack.c.bf16 %v6373_v23, %v12745_v2  ;;  %v6265_v7 = vadd.f32 %v7884_v59, %v11556_v42  ;;  %v6385_v8 = vmax.f32 %v6257_v48, 0.0  ;;  %v12746_v1 = vmax.f32 %v11249_v54, 0.0  ;;  %6548 = vst [vmem:[%s11764_s22 + $0x60] sm:$0xff] %v6484_v40  ;;  %v12751_v23 = vld [vmem:[#allocation94_spill] sm:$0xff]  ;;  %v12753_v32 = vld [vmem:[#allocation67_spill] sm:$0xff]  ;;  %v12761_v37 = vld [vmem:[#allocation100_spill] sm:$0xff] }
 0x768   : > { %v6266_v27 = vadd.f32 %v7885_v36, %v11560_v0  ;;  %v6386_v38 = vmax.f32 %v6258_v31, 0.0  ;;  %v6387_v6 = vmax.f32 %v11811_v3, 0.0  ;;  %v6489_v49 = vpack.c.bf16 %v6379_v24, %v6378_v29  ;;  %6551 = vst [vmem:[%s11764_s22 + $0x78] sm:$0xff] %v6487_v33  ;;  %v7892_v3 = vld [vmem:[%s8489_s2 + $0x1f8] sm:$0xff] }
 0x769   : > { %v6488_v19 = vpack.c.bf16 %v6377_v60, %v12746_v1  ;;  %v11850_v42 = vadd.f32 %v7886_v4, %v11368_v11  ;;  %v6269_v54 = vadd.f32 %v7887_v50, %v11564_v51  ;;  %v6389_v63 = vmax.f32 %v6261_v43, 0.0  ;;  %6550 = vst [vmem:[%s11764_s22 + $0x70] sm:$0xff] %v6486_v12  ;;  %v12749_v51 = vld [vmem:[#allocation47_spill] sm:$0xff]  ;;  %v12756_v31 = vld [vmem:[#allocation97_spill] sm:$0xff] }
 0x76a   : > { %v12747_v9 = vmax.f32 %v11252_v52, 0.0  ;;  %v6270_v45 = vadd.f32 %v7888_v58, %v12748_v41  ;;  %v6390_v13 = vmax.f32 %v6262_v20, 0.0  ;;  %v6391_v56 = vmax.f32 %v11824_v53, 0.0  ;;  %v12750_v52 = vld [vmem:[#allocation71_spill] sm:$0xff]  ;;  %6553 = vst [vmem:[%s11764_s22 + $0x88] sm:$0xff] %v6489_v49  ;;  %v7895_v2 = vld [vmem:[%s8489_s2 + $0x218] sm:$0xff] }
 0x76b   : > { %v6491_v11 = vpack.c.bf16 %v6383_v17, %v6382_v10  ;;  %v11863_v61 = vadd.f32 %v7889_v15, %v12749_v51  ;;  %v6273_v57 = vadd.f32 %v7890_v44, %v12750_v52  ;;  %v6393_v5 = vmax.f32 %v6265_v7, 0.0  ;;  %6552 = vst [vmem:[%s11764_s22 + $0x80] sm:$0xff] %v6488_v19  ;;  %v7893_v60 = vld [vmem:[%s8489_s2 + $0x1e8] sm:$0xff]  ;;  %v12760_v10 = vld [vmem:[#allocation73_spill] sm:$0xff]  ;;  %v12769_v51 = vld [vmem:[#allocation34_spill] sm:$0xff] }
 0x76c   : > { %v6490_v0 = vpack.c.bf16 %v6381_v62, %v12747_v9  ;;  %v12752_v34 = vmax.f32 %v12751_v23, 0.0  ;;  %v6274_v25 = vadd.f32 %v7891_v18, %v12753_v32  ;;  %v6394_v35 = vmax.f32 %v6266_v27, 0.0  ;;  %v12759_v12 = vld [vmem:[#allocation35_spill] sm:$0xff]  ;;  %v7897_v7 = vld [vmem:[%s8489_s2 + $0x210] sm:$0xff]  ;;  %v7901_v15 = vld [vmem:[%s8489_s2 + $0x258] sm:$0xff] }
 0x76d   : > { %v6395_v46 = vmax.f32 %v11837_v30, 0.0  ;;  %v6493_v28 = vpack.c.bf16 %v6387_v6, %v6386_v38  ;;  %v11876_v48 = vadd.f32 %v7892_v3, %v12754_v22  ;;  %v6277_v40 = vadd.f32 %v7893_v60, %v12755_v16  ;;  %6555 = vst [vmem:[%s11764_s22 + $0x98] sm:$0xff] %v6491_v11  ;;  %v7896_v20 = vld [vmem:[%s8489_s2 + $0x208] sm:$0xff]  ;;  %v7898_v38 = vld [vmem:[%s8489_s2 + $0x238] sm:$0xff]  ;;  %v7900_v58 = vld [vmem:[%s8489_s2 + $0x230] sm:$0xff] }
 0x76e   : > { %v6492_v21 = vpack.c.bf16 %v6385_v8, %v12752_v34  ;;  %v6397_v55 = vmax.f32 %v6269_v54, 0.0  ;;  %v12757_v29 = vmax.f32 %v12756_v31, 0.0  ;;  %6554 = vst [vmem:[%s11764_s22 + $0x90] sm:$0xff] %v6490_v0  ;;  %v6278_v53 = vadd.f32 %v7894_v26, %v12758_v39  ;;  %v12763_v8 = vld [vmem:[#allocation74_spill] sm:$0xff]  ;;  %v12764_v6 = vld [vmem:[#allocation32_spill] sm:$0xff]  ;;  %v12770_v52 = vld [vmem:[#allocation77_spill] sm:$0xff] }
 0x76f   : > { %v6398_v47 = vmax.f32 %v6270_v45, 0.0  ;;  %v6399_v43 = vmax.f32 %v11850_v42, 0.0  ;;  %v6495_v62 = vpack.c.bf16 %v6391_v56, %v6390_v13  ;;  %v11889_v14 = vadd.f32 %v7895_v2, %v12759_v12  ;;  %6557 = vst [vmem:[%s11764_s22 + $0xa8] sm:$0xff] %v6493_v28  ;;  %v7899_v4 = vld [vmem:[%s8489_s2 + $0x228] sm:$0xff]  ;;  %v7903_v18 = vld [vmem:[%s8489_s2 + $0x250] sm:$0xff]  ;;  %v12773_v32 = vld [vmem:[#allocation78_spill] sm:$0xff] }
 0x770   : > { %v6494_v24 = vpack.c.bf16 %v6389_v63, %v12757_v29  ;;  %v6281_v17 = vadd.f32 %v7896_v20, %v12760_v10  ;;  %v6401_v33 = vmax.f32 %v6273_v57, 0.0  ;;  %v12762_v30 = vmax.f32 %v12761_v37, 0.0  ;;  %6556 = vst [vmem:[%s11764_s22 + $0xa0] sm:$0xff] %v6492_v21  ;;  %v12765_v42 = vld [vmem:[#allocation75_spill] sm:$0xff]  ;;  %v12766_v63 = vld [vmem:[#allocation45_spill] sm:$0xff]  ;;  %v12768_v41 = vld [vmem:[#allocation76_spill] sm:$0xff] }
 0x771   : > { %v6282_v1 = vadd.f32 %v7897_v7, %v12763_v8  ;;  %v6402_v19 = vmax.f32 %v6274_v25, 0.0  ;;  %v6403_v36 = vmax.f32 %v11863_v61, 0.0  ;;  %v6497_v27 = vpack.c.bf16 %v6395_v46, %v6394_v35  ;;  %6559 = vst [vmem:[%s11764_s22 + $0xb8] sm:$0xff] %v6495_v62  ;;  %v7902_v44 = vld [vmem:[%s8489_s2 + $0x248] sm:$0xff]  ;;  %v7904_v3 = vld [vmem:[%s8489_s2 + $0x278] sm:$0xff]  ;;  %v7906_v26 = vld [vmem:[%s8489_s2 + $0x270] sm:$0xff] }
 0x772   : > { %v6496_v59 = vpack.c.bf16 %v6393_v5, %v12762_v30  ;;  %v11902_v49 = vadd.f32 %v7898_v38, %v12764_v6  ;;  %v6285_v50 = vadd.f32 %v7899_v4, %v12765_v42  ;;  %v6405_v54 = vmax.f32 %v6277_v40, 0.0  ;;  %6558 = vst [vmem:[%s11764_s22 + $0xb0] sm:$0xff] %v6494_v24  ;;  %v12771_v23 = vld [vmem:[#allocation48_spill] sm:$0xff]  ;;  %v12774_v22 = vld [vmem:[#allocation51_spill] sm:$0xff]  ;;  %v7907_v2 = vld [vmem:[%s8489_s2 + $0x298] sm:$0xff] }
 0x773   : > { %v12767_v9 = vmax.f32 %v12766_v63, 0.0  ;;  %v6286_v45 = vadd.f32 %v7900_v58, %v12768_v41  ;;  %v6406_v13 = vmax.f32 %v6278_v53, 0.0  ;;  %v6407_v56 = vmax.f32 %v11876_v48, 0.0  ;;  %6561 = vst [vmem:[%s11764_s22 + $0xc8] sm:$0xff] %v6497_v27  ;;  %v7905_v60 = vld [vmem:[%s8489_s2 + $0x268] sm:$0xff]  ;;  %v12780_v10 = vld [vmem:[#allocation81_spill] sm:$0xff] }
 0x774   : > { %v6499_v11 = vpack.c.bf16 %v6399_v43, %v6398_v47  ;;  %v11915_v61 = vadd.f32 %v7901_v15, %v12769_v51  ;;  %v6289_v57 = vadd.f32 %v7902_v44, %v12770_v52  ;;  %v6409_v5 = vmax.f32 %v6281_v17, 0.0  ;;  %6560 = vst [vmem:[%s11764_s22 + $0xc0] sm:$0xff] %v6496_v59  ;;  %v12775_v16 = vld [vmem:[#allocation79_spill] sm:$0xff]  ;;  %v12778_v39 = vld [vmem:[#allocation80_spill] sm:$0xff]  ;;  %v12783_v8 = vld [vmem:[#allocation82_spill] sm:$0xff] }
 0x775   : > { %v6498_v0 = vpack.c.bf16 %v6397_v55, %v12767_v9  ;;  %v12772_v34 = vmax.f32 %v12771_v23, 0.0  ;;  %v6290_v25 = vadd.f32 %v7903_v18, %v12773_v32  ;;  %v6410_v35 = vmax.f32 %v6282_v1, 0.0  ;;  %v12776_v31 = vld [vmem:[#allocation27_spill] sm:$0xff]  ;;  %v7909_v7 = vld [vmem:[%s8489_s2 + $0x290] sm:$0xff]  ;;  %v7910_v38 = vld [vmem:[%s8489_s2 + $0x2b8] sm:$0xff] }
 0x776   : > { %v6411_v46 = vmax.f32 %v11889_v14, 0.0  ;;  %v6501_v28 = vpack.c.bf16 %v6403_v36, %v6402_v19  ;;  %v11928_v48 = vadd.f32 %v7904_v3, %v12774_v22  ;;  %v6293_v40 = vadd.f32 %v7905_v60, %v12775_v16  ;;  %6563 = vst [vmem:[%s11764_s22 + $0xd8] sm:$0xff] %v6499_v11  ;;  %v12779_v12 = vld [vmem:[#allocation55_spill] sm:$0xff]  ;;  %v12784_v6 = vld [vmem:[#allocation60_spill] sm:$0xff]  ;;  %v7913_v15 = vld [vmem:[%s8489_s2 + $0x2d8] sm:$0xff] }
 0x777   : > { %v6500_v21 = vpack.c.bf16 %v6401_v33, %v12772_v34  ;;  %v6413_v55 = vmax.f32 %v6285_v50, 0.0  ;;  %v12777_v29 = vmax.f32 %v12776_v31, 0.0  ;;  %6562 = vst [vmem:[%s11764_s22 + $0xd0] sm:$0xff] %v6498_v0  ;;  %v6294_v53 = vadd.f32 %v7906_v26, %v12778_v39  ;;  %v7908_v20 = vld [vmem:[%s8489_s2 + $0x288] sm:$0xff]  ;;  %v7912_v58 = vld [vmem:[%s8489_s2 + $0x2b0] sm:$0xff]  ;;  %v12789_v51 = vld [vmem:[#allocation38_spill] sm:$0xff] }
 0x778   : > { %v6414_v47 = vmax.f32 %v6286_v45, 0.0  ;;  %v6415_v43 = vmax.f32 %v11902_v49, 0.0  ;;  %v6503_v62 = vpack.c.bf16 %v6407_v56, %v6406_v13  ;;  %v11941_v14 = vadd.f32 %v7907_v2, %v12779_v12  ;;  %v12781_v37 = vld [vmem:[#allocation39_spill] sm:$0xff]  ;;  %6565 = vst [vmem:[%s11764_s22 + $0xe8] sm:$0xff] %v6501_v28  ;;  %v12786_v63 = vld [vmem:[#allocation44_spill] sm:$0xff]  ;;  %v12790_v52 = vld [vmem:[#allocation85_spill] sm:$0xff] }
 0x779   : > { %v6502_v24 = vpack.c.bf16 %v6405_v54, %v12777_v29  ;;  %v6297_v17 = vadd.f32 %v7908_v20, %v12780_v10  ;;  %v6417_v33 = vmax.f32 %v6289_v57, 0.0  ;;  %v12782_v30 = vmax.f32 %v12781_v37, 0.0  ;;  %6564 = vst [vmem:[%s11764_s22 + $0xe0] sm:$0xff] %v6500_v21  ;;  %v7911_v4 = vld [vmem:[%s8489_s2 + $0x2a8] sm:$0xff]  ;;  %v7915_v18 = vld [vmem:[%s8489_s2 + $0x2d0] sm:$0xff]  ;;  %v12793_v32 = vld [vmem:[#allocation86_spill] sm:$0xff] }
 0x77a   : > { %v6298_v1 = vadd.f32 %v7909_v7, %v12783_v8  ;;  %v6418_v19 = vmax.f32 %v6290_v25, 0.0  ;;  %v6419_v36 = vmax.f32 %v11915_v61, 0.0  ;;  %v6505_v27 = vpack.c.bf16 %v6411_v46, %v6410_v35  ;;  %v12785_v42 = vld [vmem:[#allocation83_spill] sm:$0xff]  ;;  %v12788_v41 = vld [vmem:[#allocation84_spill] sm:$0xff]  ;;  %6567 = vst [vmem:[%s11764_s22 + $0xf8] sm:$0xff] %v6503_v62  ;;  %v7916_v3 = vld [vmem:[%s8489_s2 + $0x2f8] sm:$0xff] }
 0x77b   : > { %v6504_v59 = vpack.c.bf16 %v6409_v5, %v12782_v30  ;;  %v11954_v49 = vadd.f32 %v7910_v38, %v12784_v6  ;;  %v6301_v50 = vadd.f32 %v7911_v4, %v12785_v42  ;;  %v6421_v54 = vmax.f32 %v6293_v40, 0.0  ;;  %6566 = vst [vmem:[%s11764_s22 + $0xf0] sm:$0xff] %v6502_v24  ;;  %v7914_v44 = vld [vmem:[%s8489_s2 + $0x2c8] sm:$0xff]  ;;  %v12794_v22 = vld [vmem:[#allocation41_spill] sm:$0xff]  ;;  %v12800_v10 = vld [vmem:[#allocation90_spill] sm:$0xff] }
 0x77c   : > { %v12787_v9 = vmax.f32 %v12786_v63, 0.0  ;;  %v6302_v45 = vadd.f32 %v7912_v58, %v12788_v41  ;;  %v6422_v13 = vmax.f32 %v6294_v53, 0.0  ;;  %v6423_v56 = vmax.f32 %v11928_v48, 0.0  ;;  %v12791_v23 = vld [vmem:[#allocation52_spill] sm:$0xff]  ;;  %6569 = vst [vmem:[%s11764_s22 + $0x108] sm:$0xff] %v6505_v27  ;;  %v12795_v16 = vld [vmem:[#allocation87_spill] sm:$0xff] }
 0x77d   : > { %v6507_v11 = vpack.c.bf16 %v6415_v43, %v6414_v47  ;;  %v11967_v61 = vadd.f32 %v7913_v15, %v12789_v51  ;;  %v6305_v57 = vadd.f32 %v7914_v44, %v12790_v52  ;;  %v6425_v5 = vmax.f32 %v6297_v17, 0.0  ;;  %6568 = vst [vmem:[%s11764_s22 + $0x100] sm:$0xff] %v6504_v59  ;;  %v7917_v60 = vld [vmem:[%s8489_s2 + $0x2e8] sm:$0xff]  ;;  %v7918_v26 = vld [vmem:[%s8489_s2 + $0x2f0] sm:$0xff]  ;;  %v7919_v2 = vld [vmem:[%s8489_s2 + $0x318] sm:$0xff] }
 0x77e   : > { %v6506_v0 = vpack.c.bf16 %v6413_v55, %v12787_v9  ;;  %v12792_v34 = vmax.f32 %v12791_v23, 0.0  ;;  %v6306_v25 = vadd.f32 %v7915_v18, %v12793_v32  ;;  %v6426_v35 = vmax.f32 %v6298_v1, 0.0  ;;  %v12796_v31 = vld [vmem:[#allocation31_spill] sm:$0xff]  ;;  %v12798_v39 = vld [vmem:[#allocation89_spill] sm:$0xff]  ;;  %v12803_v8 = vld [vmem:[#allocation92_spill] sm:$0xff] }
 0x77f   : > { %v6427_v46 = vmax.f32 %v11941_v14, 0.0  ;;  %v6509_v28 = vpack.c.bf16 %v6419_v36, %v6418_v19  ;;  %v11980_v48 = vadd.f32 %v7916_v3, %v12794_v22  ;;  %v6309_v40 = vadd.f32 %v7917_v60, %v12795_v16  ;;  %6571 = vst [vmem:[%s11764_s22 + $0x118] sm:$0xff] %v6507_v11  ;;  %v12799_v12 = vld [vmem:[#allocation103_spill] sm:$0xff]  ;;  %v7921_v7 = vld [vmem:[%s8489_s2 + $0x310] sm:$0xff]  ;;  %v7922_v38 = vld [vmem:[%s8489_s2 + $0x338] sm:$0xff] }
 0x780   : > { %v6508_v21 = vpack.c.bf16 %v6417_v33, %v12792_v34  ;;  %v6429_v55 = vmax.f32 %v6301_v50, 0.0  ;;  %v12797_v29 = vmax.f32 %v12796_v31, 0.0  ;;  %6570 = vst [vmem:[%s11764_s22 + $0x110] sm:$0xff] %v6506_v0  ;;  %v6310_v53 = vadd.f32 %v7918_v26, %v12798_v39  ;;  %v7920_v20 = vld [vmem:[%s8489_s2 + $0x308] sm:$0xff]  ;;  %v12804_v6 = vld [vmem:[#allocation126_spill] sm:$0xff]  ;;  %v12805_v42 = vld [vmem:[#allocation93_spill] sm:$0xff] }
 0x781   : > { %v6430_v47 = vmax.f32 %v6302_v45, 0.0  ;;  %v6431_v43 = vmax.f32 %v11954_v49, 0.0  ;;  %v6511_v62 = vpack.c.bf16 %v6423_v56, %v6422_v13  ;;  %v11993_v14 = vadd.f32 %v7919_v2, %v12799_v12  ;;  %v12801_v37 = vld [vmem:[#allocation115_spill] sm:$0xff]  ;;  %6573 = vst [vmem:[%s11764_s22 + $0x128] sm:$0xff] %v6509_v28  ;;  %v12806_v63 = vld [vmem:[#allocation116_spill] sm:$0xff]  ;;  %v7925_v15 = vld [vmem:[%s8489_s2 + $0x358] sm:$0xff] }
 0x782   : > { %v6510_v24 = vpack.c.bf16 %v6421_v54, %v12797_v29  ;;  %v6313_v17 = vadd.f32 %v7920_v20, %v12800_v10  ;;  %v6433_v33 = vmax.f32 %v6305_v57, 0.0  ;;  %v12802_v30 = vmax.f32 %v12801_v37, 0.0  ;;  %6572 = vst [vmem:[%s11764_s22 + $0x120] sm:$0xff] %v6508_v21  ;;  %v7923_v4 = vld [vmem:[%s8489_s2 + $0x328] sm:$0xff]  ;;  %v7924_v58 = vld [vmem:[%s8489_s2 + $0x330] sm:$0xff]  ;;  %v12813_v32 = vld [vmem:[#allocation98_spill] sm:$0xff] }
 0x783   : > { %v6314_v1 = vadd.f32 %v7921_v7, %v12803_v8  ;;  %v6434_v19 = vmax.f32 %v6306_v25, 0.0  ;;  %v6435_v36 = vmax.f32 %v11967_v61, 0.0  ;;  %v6513_v27 = vpack.c.bf16 %v6427_v46, %v6426_v35  ;;  %v12808_v41 = vld [vmem:[#allocation95_spill] sm:$0xff]  ;;  %6575 = vst [vmem:[%s11764_s22 + $0x138] sm:$0xff] %v6511_v62  ;;  %v12810_v52 = vld [vmem:[#allocation96_spill] sm:$0xff]  ;;  %v12811_v23 = vld [vmem:[#allocation117_spill] sm:$0xff] }
 0x784   : > { %v6512_v59 = vpack.c.bf16 %v6425_v5, %v12802_v30  ;;  %v12006_v49 = vadd.f32 %v7922_v38, %v12804_v6  ;;  %v6317_v50 = vadd.f32 %v7923_v4, %v12805_v42  ;;  %v6437_v54 = vmax.f32 %v6309_v40, 0.0  ;;  %6574 = vst [vmem:[%s11764_s22 + $0x130] sm:$0xff] %v6510_v24  ;;  %v12809_v51 = vld [vmem:[#allocation127_spill] sm:$0xff]  ;;  %v7927_v18 = vld [vmem:[%s8489_s2 + $0x350] sm:$0xff]  ;;  %v7928_v3 = vld [vmem:[%s8489_s2 + $0x378] sm:$0xff] }
 0x785   : > { %v12807_v9 = vmax.f32 %v12806_v63, 0.0  ;;  %v6318_v45 = vadd.f32 %v7924_v58, %v12808_v41  ;;  %v6438_v13 = vmax.f32 %v6310_v53, 0.0  ;;  %v6439_v56 = vmax.f32 %v11980_v48, 0.0  ;;  %v7926_v44 = vld [vmem:[%s8489_s2 + $0x348] sm:$0xff]  ;;  %6577 = vst [vmem:[%s11764_s22 + $0x148] sm:$0xff] %v6513_v27  ;;  %v12816_v31 = vld [vmem:[#allocation118_spill] sm:$0xff] }
 0x786   : > { %v6515_v11 = vpack.c.bf16 %v6431_v43, %v6430_v47  ;;  %v12019_v61 = vadd.f32 %v7925_v15, %v12809_v51  ;;  %v6321_v57 = vadd.f32 %v7926_v44, %v12810_v52  ;;  %v6441_v5 = vmax.f32 %v6313_v17, 0.0  ;;  %6576 = vst [vmem:[%s11764_s22 + $0x140] sm:$0xff] %v6512_v59  ;;  %v12814_v22 = vld [vmem:[#allocation128_spill] sm:$0xff]  ;;  %v12815_v16 = vld [vmem:[#allocation99_spill] sm:$0xff]  ;;  %v12818_v39 = vld [vmem:[#allocation101_spill] sm:$0xff] }
 0x787   : > { %v6514_v0 = vpack.c.bf16 %v6429_v55, %v12807_v9  ;;  %v12812_v34 = vmax.f32 %v12811_v23, 0.0  ;;  %v6322_v25 = vadd.f32 %v7927_v18, %v12813_v32  ;;  %v6442_v35 = vmax.f32 %v6314_v1, 0.0  ;;  %v7929_v60 = vld [vmem:[%s8489_s2 + $0x368] sm:$0xff]  ;;  %v7930_v26 = vld [vmem:[%s8489_s2 + $0x370] sm:$0xff]  ;;  %v7931_v2 = vld [vmem:[%s8489_s2 + $0x398] sm:$0xff] }
 0x788   : > { %v6443_v46 = vmax.f32 %v11993_v14, 0.0  ;;  %v6517_v28 = vpack.c.bf16 %v6435_v36, %v6434_v19  ;;  %v12032_v48 = vadd.f32 %v7928_v3, %v12814_v22  ;;  %v6325_v40 = vadd.f32 %v7929_v60, %v12815_v16  ;;  %6579 = vst [vmem:[%s11764_s22 + $0x158] sm:$0xff] %v6515_v11  ;;  %v12819_v12 = vld [vmem:[#allocation129_spill] sm:$0xff]  ;;  %v7932_v20 = vld [vmem:[%s8489_s2 + $0x388] sm:$0xff]  ;;  %v12824_v6 = vld [vmem:[#allocation130_spill] sm:$0xff] }
 0x789   : > { %v6516_v21 = vpack.c.bf16 %v6433_v33, %v12812_v34  ;;  %v6445_v55 = vmax.f32 %v6317_v50, 0.0  ;;  %v12817_v29 = vmax.f32 %v12816_v31, 0.0  ;;  %6578 = vst [vmem:[%s11764_s22 + $0x150] sm:$0xff] %v6514_v0  ;;  %v6326_v53 = vadd.f32 %v7930_v26, %v12818_v39  ;;  %v12820_v10 = vld [vmem:[#allocation40_spill] sm:$0xff]  ;;  %v12821_v37 = vld [vmem:[#allocation119_spill] sm:$0xff]  ;;  %v7934_v38 = vld [vmem:[%s8489_s2 + $0x3b8] sm:$0xff] }
 0x78a   : > { %v6446_v47 = vmax.f32 %v6318_v45, 0.0  ;;  %v6447_v43 = vmax.f32 %v12006_v49, 0.0  ;;  %v6519_v62 = vpack.c.bf16 %v6439_v56, %v6438_v13  ;;  %v6331_v14 = vadd.f32 %v7931_v2, %v12819_v12  ;;  %v7933_v7 = vld [vmem:[%s8489_s2 + $0x390] sm:$0xff]  ;;  %6581 = vst [vmem:[%s11764_s22 + $0x168] sm:$0xff] %v6517_v28  ;;  %v7935_v4 = vld [vmem:[%s8489_s2 + $0x3a8] sm:$0xff]  ;;  %v12825_v42 = vld [vmem:[#allocation46_spill] sm:$0xff] }
 0x78b   : > { %v6518_v24 = vpack.c.bf16 %v6437_v54, %v12817_v29  ;;  %v6329_v17 = vadd.f32 %v7932_v20, %v12820_v10  ;;  %v6449_v33 = vmax.f32 %v6321_v57, 0.0  ;;  %v12822_v30 = vmax.f32 %v12821_v37, 0.0  ;;  %6580 = vst [vmem:[%s11764_s22 + $0x160] sm:$0xff] %v6516_v21  ;;  %v12823_v8 = vld [vmem:[#allocation28_spill] sm:$0xff]  ;;  %v7937_v15 = vld [vmem:[%s8489_s2 + $0x3d8] sm:$0xff]  ;;  %v12829_v51 = vld [vmem:[#allocation131_spill] sm:$0xff] }
 0x78c   : > { %v6330_v1 = vadd.f32 %v7933_v7, %v12823_v8  ;;  %v6450_v19 = vmax.f32 %v6322_v25, 0.0  ;;  %v6451_v36 = vmax.f32 %v12019_v61, 0.0  ;;  %v6521_v27 = vpack.c.bf16 %v6443_v46, %v6442_v35  ;;  %v12826_v63 = vld [vmem:[#allocation120_spill] sm:$0xff]  ;;  %6583 = vst [vmem:[%s11764_s22 + $0x178] sm:$0xff] %v6519_v62  ;;  %v12831_v23 = vld [vmem:[#allocation121_spill] sm:$0xff]  ;;  %v12834_v22 = vld [vmem:[#allocation114_spill] sm:$0xff] }
 0x78d   : > { %v6520_v59 = vpack.c.bf16 %v6441_v5, %v12822_v30  ;;  %v6335_v49 = vadd.f32 %v7934_v38, %v12824_v6  ;;  %v6333_v50 = vadd.f32 %v7935_v4, %v12825_v42  ;;  %v6453_v54 = vmax.f32 %v6325_v40, 0.0  ;;  %6582 = vst [vmem:[%s11764_s22 + $0x170] sm:$0xff] %v6518_v24  ;;  %v7936_v58 = vld [vmem:[%s8489_s2 + $0x3b0] sm:$0xff]  ;;  %v7938_v44 = vld [vmem:[%s8489_s2 + $0x3c8] sm:$0xff]  ;;  %v7940_v3 = vld [vmem:[%s8489_s2 + $0x3f8] sm:$0xff] }
 0x78e   : > { %v12827_v9 = vmax.f32 %v12826_v63, 0.0  ;;  %v12828_v41 = vld [vmem:[#allocation24_spill] sm:$0xff]  ;;  %v6454_v13 = vmax.f32 %v6326_v53, 0.0  ;;  %v6455_v56 = vmax.f32 %v12032_v48, 0.0  ;;  %v6523_v11 = vpack.c.bf16 %v6447_v43, %v6446_v47  ;;  %v12833_v32 = vld [vmem:[#allocation25_spill] sm:$0xff]  ;;  %6585 = vst [vmem:[%s11764_s22 + $0x188] sm:$0xff] %v6521_v27 }
 0x78f   : > { %v6334_v45 = vadd.f32 %v7936_v58, %v12828_v41  ;;  %v6339_v61 = vadd.f32 %v7937_v15, %v12829_v51  ;;  %v12830_v52 = vld [vmem:[#allocation36_spill] sm:$0xff]  ;;  %v6457_v5 = vmax.f32 %v6329_v17, 0.0  ;;  %v12832_v34 = vmax.f32 %v12831_v23, 0.0  ;;  %6584 = vst [vmem:[%s11764_s22 + $0x180] sm:$0xff] %v6520_v59  ;;  %v12835_v16 = vld [vmem:[#allocation30_spill] sm:$0xff]  ;;  %v12839_v12 = vld [vmem:[#allocation69_spill] sm:$0xff] }
 0x790   : > { %v6522_v0 = vpack.c.bf16 %v6445_v55, %v12827_v9  ;;  %v6337_v57 = vadd.f32 %v7938_v44, %v12830_v52  ;;  %v7939_v18 = vld [vmem:[%s8489_s2 + $0x3d0] sm:$0xff]  ;;  %v6458_v35 = vmax.f32 %v6330_v1, 0.0  ;;  %v6459_v46 = vmax.f32 %v6331_v14, 0.0  ;;  %v7941_v60 = vld [vmem:[%s8489_s2 + $0x3e8] sm:$0xff]  ;;  %v12836_v31 = vld [vmem:[#allocation122_spill] sm:$0xff]  ;;  %6587 = vst [vmem:[%s11764_s22 + $0x198] sm:$0xff] %v6523_v11 }
 0x791   : > { %v6524_v21 = vpack.c.bf16 %v6449_v33, %v12832_v34  ;;  %v6338_v25 = vadd.f32 %v7939_v18, %v12833_v32  ;;  %v6525_v28 = vpack.c.bf16 %v6451_v36, %v6450_v19  ;;  %v6343_v48 = vadd.f32 %v7940_v3, %v12834_v22  ;;  %v7942_v26 = vld [vmem:[%s8489_s2 + $0x3f0] sm:$0xff]  ;;  %v12838_v39 = vld [vmem:[#allocation26_spill] sm:$0xff]  ;;  %v12841_v33 = vld [vmem:[#allocation123_spill] sm:$0xff] }
 0x792   : > { %v6341_v40 = vadd.f32 %v7941_v60, %v12835_v16  ;;  %v6461_v55 = vmax.f32 %v6333_v50, 0.0  ;;  %v12837_v29 = vmax.f32 %v12836_v31, 0.0  ;;  %6586 = vst [vmem:[%s11764_s22 + $0x190] sm:$0xff] %v6522_v0  ;;  %v6342_v53 = vadd.f32 %v7942_v26, %v12838_v39  ;;  %v7943_v2 = vld [vmem:[%s8489_s2 + $0x3e0] sm:$0xff]  ;;  %v12840_v20 = vld [vmem:[#allocation124_spill] sm:$0xff]  ;;  %v12843_v1 = vld [vmem:[#allocation125_spill] sm:$0xff]  ;;  %s6612_s2 = scalar_lea.hbm %s12144_s7, %s7461_s20 }
 0x793   : > { %v6462_v47 = vmax.f32 %v6334_v45, 0.0  ;;  %v6463_v43 = vmax.f32 %v6335_v49, 0.0  ;;  %v6527_v62 = vpack.c.bf16 %v6455_v56, %v6454_v13  ;;  %v6340_v14 = vadd.f32 %v7943_v2, %v12839_v12  ;;  %6588 = vst [vmem:[%s11764_s22 + $0x1a0] sm:$0xff] %v6524_v21  ;;  %s6615_s15 = sshll.u32 %s6612_s2, 4  ;;  %s6616_s15 = int_to_ptr.hbm [resolvable:$true] %s6615_s15 }
 0x794   : > { %v6526_v24 = vpack.c.bf16 %v6453_v54, %v12837_v29  ;;  %v6460_v10 = vmax.f32 %v12840_v20, 0.0  ;;  %v6465_v17 = vmax.f32 %v6337_v57, 0.0  ;;  %v12842_v37 = vmax.f32 %v12841_v33, 0.0  ;;  %6589 = vst [vmem:[%s11764_s22 + $0x1a8] sm:$0xff] %v6525_v28  ;;  %s8204_s12 = sshra.s32 %s6616_s15, 4  ;;  %s8205_s12 = int_to_ptr.hbm [resolvable:$true] %s8204_s12 }
 0x795   : > { %v6466_v59 = vmax.f32 %v6338_v25, 0.0  ;;  %v6467_v7 = vmax.f32 %v6339_v61, 0.0  ;;  %v6529_v8 = vpack.c.bf16 %v6459_v46, %v6458_v35  ;;  %v6464_v19 = vmax.f32 %v12843_v1, 0.0  ;;  %6591 = vst [vmem:[%s11764_s22 + $0x1b8] sm:$0xff] %v6527_v62  ;;  %s8206_s29 = scalar_lea.hbm %s8205_s12, 512  ;;  %p8211_p12 = scmp.lt.s32.totalorder %s8205_s12, %s12144_s7 }
 0x796   : > { %v6528_v30 = vpack.c.bf16 %v6457_v5, %v12842_v37  ;;  %v6469_v36 = vmax.f32 %v6341_v40, 0.0  ;;  %v6530_v27 = vpack.c.bf16 %v6461_v55, %v6460_v10  ;;  %6590 = vst [vmem:[%s11764_s22 + $0x1b0] sm:$0xff] %v6526_v24  ;;  %v6470_v38 = vmax.f32 %v6342_v53, 0.0  ;;  %p8207_p1 = scmp.ne.s32.totalorder %s8205_s12, %s8206_s29  ;;  %p8212_p7 = scmp.lt.s32.totalorder %s8210_s18, %s8206_s29 }
 0x797   : > { %v6471_v6 = vmax.f32 %v6343_v48, 0.0  ;;  %v6531_v49 = vpack.c.bf16 %v6463_v43, %v6462_v47  ;;  %v6468_v4 = vmax.f32 %v6340_v14, 0.0  ;;  %v6532_v42 = vpack.c.bf16 %v6465_v17, %v6464_v19  ;;  %6593 = vst [vmem:[%s11764_s22 + $0x1c8] sm:$0xff] %v6529_v8 }
 0x798   : > { %6592 = vst [vmem:[%s11764_s22 + $0x1c0] sm:$0xff] %v6528_v30  ;;  %v6533_v50 = vpack.c.bf16 %v6467_v7, %v6466_v59  ;;  %p8208_p3 = pnand %p8207_p1, %p8454_p4  ;;  %p8213_p8 = por %p8212_p7, %p8211_p12 }
 0x799   : > { %v6534_v54 = vpack.c.bf16 %v6469_v36, %v6468_v4  ;;  %6594 = vst [vmem:[%s11764_s22 + $0x1d0] sm:$0xff] %v6530_v27  ;;  %v6535_v63 = vpack.c.bf16 %v6471_v6, %v6470_v38 }
 0x79a   : > { %6595 = vst [vmem:[%s11764_s22 + $0x1d8] sm:$0xff] %v6531_v49  ;;  %p8209_p5 = pneg %p8208_p3 }
 0x79b   : > { %6596 = vst [vmem:[%s11764_s22 + $0x1e0] sm:$0xff] %v6532_v42 }
 0x79c   : > { %6597 = vst [vmem:[%s11764_s22 + $0x1e8] sm:$0xff] %v6533_v50  ;;  %p8214_p9 = pnand %p8213_p8, %p8209_p5 }
 0x79d   : > { %6598 = vst [vmem:[%s11764_s22 + $0x1f0] sm:$0xff] %v6534_v54 }
 0x79e   : > { %6599 = vst [vmem:[%s11764_s22 + $0x1f8] sm:$0xff] %v6535_v63 }
 0x79f   : > { %8217 = shalt.err (!%p8214_p9)
}
 0x7a0   : > { %s8315_s23 = smov 256   ;;  %s8316_s11 = smov 16  }
 0x7a1   : > { %7702 = dma.vmem_to_hbm [thread:$0]  (%p8454_p4), %s6614_s9, 8192, %s6616_s15, %s6601_s28, %s8315_s23, %s8315_s23, %s8316_s11  }
 0x7a2 PF: > { %s6630_s22 = sand.u32 1, %s8281_s24   ;;  %p12844_p10 = scmp.ge.s32.totalorder %s8293_s27, 2 }
 0x7a3   : > { %s6631_s20 = scalar_lea.sflag [#allocation6], %s6630_s22 }
 0x7a4   : > { %p7728_p13 = pnand %p12844_p10, %p8458_p6 }
 0x7a6   : > { %p7729_p11 = pneg %p7728_p13 }
 0x7a8   : > { %8255 = dma.done.wait (%p7729_p11), %s6631_s20, 8192  }
 0x7a9   : > { %8257 = vsyncadd (%p7729_p11), %s6631_s20, 4294959104  ;;  %p24_p0 = scmp.ge.s32.totalorder %s8428_s10, 4   ;;  %s12845_s24 = smov %s8285_s25 }
 0x7aa   : > { %s12846_s25 = smov %s8289_s26  ;;  %s12847_s26 = smov %s8439_s16 }
 0x7ab   : > { %s12848_s27 = smov %s8428_s10  ;;  %26 = sbr.rel (!%p24_p0) target bundleno = 12 (0xc), region = 124 }
 0x7b0   :  { %6637 = vsyncpa [#allocation5], 1 }
 0x7b1   :  { %6639 = vsyncpa [#allocation5 + $0x1], 1 }
 0x7b2   :  { %6640 = vsyncpa [#allocation9], 1 }
 0x7b3   :  { %6641 = vsyncpa [#allocation12], 1 }
 0x7b4   :  { %6642 = vsyncpa [#allocation15], 1 }
 0x7b5   :  { %6643 = vsyncpa [#allocation6], 1 }
 0x7b6   :  { %6645 = vsyncpa [#allocation6 + $0x1], 1 }
 0x7b7   :  { %6646 = vsyncpa [#allocation7], 1 }
 0x7b8   :  { %6648 = vsyncpa [#allocation7 + $0x1], 1 }

</bundles_post_ra>
